<compile_context>
chip_gen: v6e
topology: v6e:2x2x1
jax: 0.10.0
libtpu: 0.0.40
codegen_flags: <defaults>
</compile_context>

<pallas_src>
import functools

import numpy as np

import jax
import jax.numpy as jnp
from jax.experimental import pallas as pl
from jax.experimental.pallas import tpu as pltpu

LATENT_DIM = 20
DEC_FEATS = 7 * 7 * 64


# ----------------------------- Pallas kernels -----------------------------

def _mm_bias_act_kernel(x_ref, w_ref, b_ref, o_ref, *, act):
    # bf16 operands on the MXU, f32 accumulation, f32 epilogue on VPU/EUP.
    x = x_ref[...].astype(jnp.bfloat16)
    y = jnp.dot(x, w_ref[...], preferred_element_type=jnp.float32)
    y = y + b_ref[...]                       # bias is (1, N) f32, broadcasts
    if act == "relu":
        y = jnp.maximum(y, 0.0)
    elif act == "sigmoid":
        y = jax.nn.sigmoid(y)
    o_ref[...] = y.astype(o_ref.dtype)


def matmul_bias_act(x, w_bf16, b_row, act="none", *, tile_m=512):
    """y = act(x @ W + b).  W is pre-cast bf16, b is pre-shaped (1, N) f32.

    Single row-parallel grid; at small M the tile collapses to the full array
    (one block), at large M rows shard over the grid (megacore on v7x).
    """
    M, K = x.shape
    K2, N = w_bf16.shape
    assert K == K2, (K, K2)
    if M % tile_m != 0 or M < 2 * tile_m:
        tile_m = M                       # full-array block (toy sizes)
    kernel = functools.partial(_mm_bias_act_kernel, act=act)
    return pl.pallas_call(
        kernel,
        out_shape=jax.ShapeDtypeStruct((M, N), jnp.float32),
        grid=(M // tile_m,),
        in_specs=[
            pl.BlockSpec((tile_m, K), lambda i: (i, 0)),
            pl.BlockSpec((K, N), lambda i: (0, 0)),
            pl.BlockSpec((1, N), lambda i: (0, 0)),
        ],
        out_specs=pl.BlockSpec((tile_m, N), lambda i: (i, 0)),
        compiler_params=pltpu.CompilerParams(
            dimension_semantics=("parallel",)),
    )(x, w_bf16, b_row)


def _fc_core_kernel(x_ref, eps_ref,
                    w1_ref, b1_ref, wmu_ref, bmu_ref, wlv_ref, blv_ref,
                    wd1_ref, bd1_ref, wd2_ref, bd2_ref,
                    d_ref, mu_ref, lv_ref):
    """Fused: e_fc1 -> (mu, logvar) -> reparameterize -> d_fc1 -> d_fc2.

    Everything stays in VMEM; three HBM outputs: decoder features (lane-dense
    N=3136), z_mean, z_logvar.
    """
    x = x_ref[...].astype(jnp.bfloat16)
    h = jnp.dot(x, w1_ref[...], preferred_element_type=jnp.float32) + b1_ref[...]
    h = jnp.maximum(h, 0.0)
    hb = h.astype(jnp.bfloat16)

    mu = jnp.dot(hb, wmu_ref[...], preferred_element_type=jnp.float32) + bmu_ref[...]
    lv = jnp.dot(hb, wlv_ref[...], preferred_element_type=jnp.float32) + blv_ref[...]
    mu_ref[...] = mu
    lv_ref[...] = lv

    # Reparameterization trick: z = mu + eps * exp(0.5 * logvar)   (EUP exp)
    z = mu + eps_ref[...] * jnp.exp(0.5 * lv)

    d = jnp.dot(z.astype(jnp.bfloat16), wd1_ref[...],
                preferred_element_type=jnp.float32) + bd1_ref[...]
    d = jnp.maximum(d, 0.0)
    d = jnp.dot(d.astype(jnp.bfloat16), wd2_ref[...],
                preferred_element_type=jnp.float32) + bd2_ref[...]
    d_ref[...] = jnp.maximum(d, 0.0)


def fc_core(x_flat, eps, p, *, tile_b=256):
    """Fused FC core; batch-tiled over a parallel grid (weights stay at block
    (0,0) so they are fetched once and remain VMEM-resident)."""
    B, K = x_flat.shape
    if B % tile_b != 0 or B < 2 * tile_b:
        tile_b = B                        # single full-array block at toy B
    weight_names = ("e_fc1_w", "e_fc1_b", "e_mu_w", "e_mu_b",
                    "e_lv_w", "e_lv_b", "d_fc1_w", "d_fc1_b",
                    "d_fc2_w", "d_fc2_b")
    w_specs = [pl.BlockSpec(p[n].shape, lambda i: (0, 0)) for n in weight_names]
    return pl.pallas_call(
        _fc_core_kernel,
        out_shape=(
            jax.ShapeDtypeStruct((B, DEC_FEATS), jnp.float32),
            jax.ShapeDtypeStruct((B, LATENT_DIM), jnp.float32),
            jax.ShapeDtypeStruct((B, LATENT_DIM), jnp.float32),
        ),
        grid=(B // tile_b,),
        in_specs=[pl.BlockSpec((tile_b, K), lambda i: (i, 0)),
                  pl.BlockSpec((tile_b, LATENT_DIM), lambda i: (i, 0))]
                 + w_specs,
        out_specs=(pl.BlockSpec((tile_b, DEC_FEATS), lambda i: (i, 0)),
                   pl.BlockSpec((tile_b, LATENT_DIM), lambda i: (i, 0)),
                   pl.BlockSpec((tile_b, LATENT_DIM), lambda i: (i, 0))),
        compiler_params=pltpu.CompilerParams(
            dimension_semantics=("parallel",),
            vmem_limit_bytes=32 * 1024 * 1024),   # explicit, v7x-safe
    )(x_flat, eps,
      p["e_fc1_w"], p["e_fc1_b"], p["e_mu_w"], p["e_mu_b"],
      p["e_lv_w"], p["e_lv_b"], p["d_fc1_w"], p["d_fc1_b"],
      p["d_fc2_w"], p["d_fc2_b"])


# ------------------------------- JAX glue ----------------------------------
# Tiny layout plumbing (im2col, pixel-shuffle) stays in XLA; all matmul work
# runs in the Pallas kernels above.

def _im2col_s2(x_nhwc, pad):
    """3x3 / stride-2 patches -> ([B*OH*OW, 9*C], OH, OW); (kh,kw,c) ordering."""
    x = jnp.pad(x_nhwc, ((0, 0), (pad, pad), (pad, pad), (0, 0)))
    B, H, W, C = x.shape
    oh = (H - 3) // 2 + 1
    ow = (W - 3) // 2 + 1
    patches = [x[:, i:i + 2 * oh:2, j:j + 2 * ow:2, :]
               for i in range(3) for j in range(3)]
    p = jnp.stack(patches, axis=3)               # (B, oh, ow, 9, C)
    return p.reshape(B * oh * ow, 9 * C), oh, ow


def conv2d_s2(x_nhwc, w_mat, b_row, act):
    """PyTorch Conv2d(k=3, s=2, p=1) via im2col + one Pallas matmul."""
    # TODO(synk): conv1's K=9 contraction under-utilizes the MXU; at this size
    # the cost is negligible, a VPU shifted-MAC path would only matter fused.
    B = x_nhwc.shape[0]
    cols, oh, ow = _im2col_s2(x_nhwc, pad=1)
    y = matmul_bias_act(cols, w_mat, b_row, act=act)
    return y.reshape(B, oh, ow, -1)


def conv_transpose2d_s2(x_nhwc, w_cat, b_cat, act):
    """PyTorch ConvTranspose2d(k=3, s=2, p=1, output_padding=1) in sub-pixel
    form: one matmul producing all 4 output sub-positions, then pixel-shuffle.
    """
    B, H, W, C = x_nhwc.shape
    xp = jnp.pad(x_nhwc, ((0, 0), (0, 1), (0, 1), (0, 0)))
    x_cat = jnp.concatenate(
        [xp[:, :H, :W, :],   # I[y,   x  ]
         xp[:, :H, 1:, :],   # I[y,   x+1]
         xp[:, 1:, :W, :],   # I[y+1, x  ]
         xp[:, 1:, 1:, :]],  # I[y+1, x+1]
        axis=-1).reshape(B * H * W, 4 * C)
    y = matmul_bias_act(x_cat, w_cat, b_cat, act=act)       # (B*H*W, 4*Cout)
    co = y.shape[-1] // 4
    y = y.reshape(B, H, W, 2, 2, co)                         # [b,y,x,ry,rx,c]
    y = jnp.transpose(y, (0, 1, 3, 2, 4, 5)).reshape(B, 2 * H, 2 * W, co)
    return y


def _subpixel_tconv_weight(w_iohw):
    """ConvTranspose2d(k=3,s=2,p=1,op=1) weight (Cin,Cout,3,3) -> (4*Cin,4*Cout).

    Row block s=2*sy+sx <-> shifted input I[y+sy, x+sx]; column block
    r=2*ry+rx <-> output sub-position (2y+ry, 2x+rx).
    """
    w_np = np.asarray(w_iohw, dtype=np.float32)
    cin, cout = w_np.shape[:2]

    def k_idx(r_par, s_par):
        if s_par == 0:
            return 1 if r_par == 0 else 2
        return 0 if r_par == 1 else None

    w = np.zeros((4 * cin, 4 * cout), dtype=np.float32)
    for sy in (0, 1):
        for sx in (0, 1):
            for ry in (0, 1):
                for rx in (0, 1):
                    ki, kj = k_idx(ry, sy), k_idx(rx, sx)
                    if ki is None or kj is None:
                        continue
                    s, r = 2 * sy + sx, 2 * ry + rx
                    w[s * cin:(s + 1) * cin, r * cout:(r + 1) * cout] = \
                        w_np[:, :, ki, kj]
    return jnp.asarray(w)


# ------------------------------- Parameters --------------------------------

def init_raw_params(key):
    """PyTorch-shaped parameters with PyTorch-style uniform init."""
    def dense(key, shape, fan_in):
        bound = 1.0 / jnp.sqrt(fan_in)
        return jax.random.uniform(key, shape, jnp.float32, -bound, bound)

    keys = jax.random.split(key, 20)
    p = {}
    # Encoder
    p["e_conv1_w"] = dense(keys[0], (32, 1, 3, 3), 1 * 9)
    p["e_conv1_b"] = dense(keys[1], (32,), 1 * 9)
    p["e_conv2_w"] = dense(keys[2], (64, 32, 3, 3), 32 * 9)
    p["e_conv2_b"] = dense(keys[3], (64,), 32 * 9)
    p["e_fc1_w"] = dense(keys[4], (256, DEC_FEATS), DEC_FEATS)
    p["e_fc1_b"] = dense(keys[5], (256,), DEC_FEATS)
    p["e_mu_w"] = dense(keys[6], (LATENT_DIM, 256), 256)
    p["e_mu_b"] = dense(keys[7], (LATENT_DIM,), 256)
    p["e_lv_w"] = dense(keys[8], (LATENT_DIM, 256), 256)
    p["e_lv_b"] = dense(keys[9], (LATENT_DIM,), 256)
    # Decoder
    p["d_fc1_w"] = dense(keys[10], (256, LATENT_DIM), LATENT_DIM)
    p["d_fc1_b"] = dense(keys[11], (256,), LATENT_DIM)
    p["d_fc2_w"] = dense(keys[12], (DEC_FEATS, 256), 256)
    p["d_fc2_b"] = dense(keys[13], (DEC_FEATS,), 256)
    p["d_tconv1_w"] = dense(keys[14], (64, 32, 3, 3), 64 * 9)   # (in,out,kh,kw)
    p["d_tconv1_b"] = dense(keys[15], (32,), 64 * 9)
    p["d_tconv2_w"] = dense(keys[16], (32, 1, 3, 3), 32 * 9)
    p["d_tconv2_b"] = dense(keys[17], (1,), 32 * 9)
    return p


def prepare_params(raw):
    """One-time layout / dtype prep: all matmul weights bf16 in final layout,
    biases f32 (1, N).  No per-call reshape/transpose/cast remains at runtime.
    """
    bf16 = jnp.bfloat16

    def wmat(x):
        return x.astype(bf16)

    def brow(x):
        return x.reshape(1, -1).astype(jnp.float32)

    p = {}
    # Encoder convs: im2col column ordering is (kh, kw, cin).
    p["e_conv1_w"] = wmat(jnp.transpose(raw["e_conv1_w"], (2, 3, 1, 0)).reshape(9 * 1, 32))
    p["e_conv1_b"] = brow(raw["e_conv1_b"])
    p["e_conv2_w"] = wmat(jnp.transpose(raw["e_conv2_w"], (2, 3, 1, 0)).reshape(9 * 32, 64))
    p["e_conv2_b"] = brow(raw["e_conv2_b"])

    # e_fc1: fold PyTorch's NCHW channel-major flatten into the weight columns
    # so the kernel consumes the NHWC-flattened conv2 output directly.
    w = raw["e_fc1_w"].reshape(256, 64, 7, 7)                      # (n,c,h,w)
    p["e_fc1_w"] = wmat(jnp.transpose(w, (2, 3, 1, 0)).reshape(DEC_FEATS, 256))
    p["e_fc1_b"] = brow(raw["e_fc1_b"])

    p["e_mu_w"] = wmat(raw["e_mu_w"].T)                            # (256, 20)
    p["e_mu_b"] = brow(raw["e_mu_b"])
    p["e_lv_w"] = wmat(raw["e_lv_w"].T)
    p["e_lv_b"] = brow(raw["e_lv_b"])

    p["d_fc1_w"] = wmat(raw["d_fc1_w"].T)                          # (20, 256)
    p["d_fc1_b"] = brow(raw["d_fc1_b"])

    # d_fc2: fold the decoder's view(B, 64, 7, 7) (NCHW) into the output
    # columns so the kernel emits the NHWC (h, w, c) feature map directly.
    w = raw["d_fc2_w"].reshape(64, 7, 7, 256)                      # (c,h,w,k)
    p["d_fc2_w"] = wmat(jnp.transpose(w, (3, 1, 2, 0)).reshape(256, DEC_FEATS))
    p["d_fc2_b"] = brow(jnp.transpose(raw["d_fc2_b"].reshape(64, 7, 7),
                                      (1, 2, 0)).reshape(-1))

    # ConvTranspose layers in sub-pixel (pixel-shuffle) form.
    p["d_tconv1_w"] = wmat(_subpixel_tconv_weight(raw["d_tconv1_w"]))  # (256,128)
    p["d_tconv1_b"] = brow(jnp.tile(raw["d_tconv1_b"], 4))
    p["d_tconv2_w"] = wmat(_subpixel_tconv_weight(raw["d_tconv2_w"]))  # (128,4)
    p["d_tconv2_b"] = brow(jnp.tile(raw["d_tconv2_b"], 4))
    return p


# ------------------------------- VAE forward -------------------------------

def vae_forward(params, x_nchw, eps):
    B = x_nchw.shape[0]

    # ---- Encoder convs (Pallas matmuls over im2col patches) ----
    x = jnp.transpose(x_nchw, (0, 2, 3, 1))                          # NHWC (C=1)
    x = conv2d_s2(x, params["e_conv1_w"], params["e_conv1_b"], "relu")  # (B,14,14,32)
    x = conv2d_s2(x, params["e_conv2_w"], params["e_conv2_b"], "relu")  # (B,7,7,64)
    x_flat = x.reshape(B, DEC_FEATS)             # NHWC flatten (folded into e_fc1_w)

    # ---- Fused FC core: e_fc1 -> mu/logvar -> reparam -> d_fc1 -> d_fc2 ----
    d_flat, z_mean, z_logvar = fc_core(x_flat, eps, params)

    # ---- Decoder convs (sub-pixel ConvTranspose, Pallas matmuls) ----
    d = d_flat.reshape(B, 7, 7, 64)              # NHWC (folded into d_fc2_w)
    d = conv_transpose2d_s2(d, params["d_tconv1_w"], params["d_tconv1_b"],
                            "relu")                                  # (B,14,14,32)
    d = conv_transpose2d_s2(d, params["d_tconv2_w"], params["d_tconv2_b"],
                            "sigmoid")                               # (B,28,28,1)
    x_recon = jnp.transpose(d, (0, 3, 1, 2))                         # (B,1,28,28)
    return x_recon, z_mean, z_logvar


# ---------------------------------- Main ------------------------------------

if __name__ == "__main__":
    key = jax.random.PRNGKey(0)
    k_param, k_x, k_eps = jax.random.split(key, 3)

    B = 2
    x = jax.random.uniform(k_x, (B, 1, 28, 28), jnp.float32)   # MNIST-like input
    raw_params = init_raw_params(k_param)
    params = prepare_params(raw_params)                        # one-time layout/cast
    eps = jax.random.normal(k_eps, (B, LATENT_DIM), jnp.float32)

    fwd = jax.jit(vae_forward)
    x_recon, z_mean, z_logvar = fwd(params, x, eps)
    jax.block_until_ready((x_recon, z_mean, z_logvar))

    assert x_recon.shape == (B, 1, 28, 28)
    assert z_mean.shape == (B, LATENT_DIM)
    assert z_logvar.shape == (B, LATENT_DIM)
    assert bool(jnp.all(jnp.isfinite(x_recon)))
    assert bool(jnp.all((x_recon >= 0.0) & (x_recon <= 1.0)))
    assert bool(jnp.all(jnp.isfinite(z_mean))) and bool(jnp.all(jnp.isfinite(z_logvar)))

    print("KERNEL_OK")
</pallas_src>

<mosaic_0001>
module attributes {stable_mosaic.version = 11 : i64} {
  func.func @_mm_bias_act_kernel(%arg0: i32, %arg1: memref<392x9xf32, #tpu.memory_space<vmem>>, %arg2: memref<9x32xbf16, #tpu.memory_space<vmem>>, %arg3: memref<1x32xf32, #tpu.memory_space<vmem>>, %arg4: memref<392x32xf32, #tpu.memory_space<vmem>>) attributes {dimension_semantics = [#tpu.dimension_semantics<parallel>], iteration_bounds = array<i64: 1>, scalar_prefetch = 0 : i64, scratch_operands = 0 : i64, tpu.core_type = #tpu.core_type<tc>, window_params = [{transform_indices = @transform_0, window_bounds = array<i64: 392, 9>}, {pipeline_mode = #tpu.pipeline_mode<synchronous>, transform_indices = @transform_1, window_bounds = array<i64: 9, 32>}, {pipeline_mode = #tpu.pipeline_mode<synchronous>, transform_indices = @transform_2, window_bounds = array<i64: 1, 32>}, {transform_indices = @transform_3, window_bounds = array<i64: 392, 32>}]} {
    %c0 = arith.constant 0 : index
    %c0_0 = arith.constant 0 : index
    %0 = vector.load %arg1[%c0, %c0_0] : memref<392x9xf32, #tpu.memory_space<vmem>>, vector<392x9xf32>
    %1 = arith.truncf %0 : vector<392x9xf32> to vector<392x9xbf16>
    %c0_1 = arith.constant 0 : index
    %c0_2 = arith.constant 0 : index
    %2 = vector.load %arg2[%c0_1, %c0_2] : memref<9x32xbf16, #tpu.memory_space<vmem>>, vector<9x32xbf16>
    %cst = arith.constant dense<0.000000e+00> : vector<392x32xf32>
    %3 = tpu.matmul %1, %2, %cst {dimension_numbers = #tpu.dot_dimension_numbers<[1], [0], [0], [1], [0, 0, 1, 1], [], []>} : vector<392x9xbf16>, vector<9x32xbf16>, vector<392x32xf32> -> vector<392x32xf32>
    %c0_3 = arith.constant 0 : index
    %c0_4 = arith.constant 0 : index
    %4 = vector.load %arg3[%c0_3, %c0_4] : memref<1x32xf32, #tpu.memory_space<vmem>>, vector<1x32xf32>
    %5 = vector.broadcast %4 : vector<1x32xf32> to vector<392x32xf32>
    %6 = arith.addf %3, %5 : vector<392x32xf32>
    %cst_5 = arith.constant 0.000000e+00 : f32
    %7 = vector.broadcast %cst_5 : f32 to vector<392x32xf32>
    %8 = arith.maximumf %6, %7 : vector<392x32xf32>
    %c0_6 = arith.constant 0 : index
    %c0_7 = arith.constant 0 : index
    %9 = vector.load %arg4[%c0_6, %c0_7] : memref<392x32xf32, #tpu.memory_space<vmem>>, vector<392x32xf32>
    tpu.vector_store %arg4[%c0_6, %c0_7], %8 {strides = array<i32>} : memref<392x32xf32, #tpu.memory_space<vmem>>, vector<392x32xf32>,
    return
  }
  func.func @transform_0(%arg0: i32) -> (i32, i32) {
    %c0_i32 = arith.constant 0 : i32
    %c0_i32_0 = arith.constant 0 : i32
    return %arg0, %c0_i32 : i32, i32
  }
  func.func @transform_1(%arg0: i32) -> (i32, i32) {
    %c0_i32 = arith.constant 0 : i32
    %c0_i32_0 = arith.constant 0 : i32
    %c0_i32_1 = arith.constant 0 : i32
    return %c0_i32, %c0_i32_0 : i32, i32
  }
  func.func @transform_2(%arg0: i32) -> (i32, i32) {
    %c0_i32 = arith.constant 0 : i32
    %c0_i32_0 = arith.constant 0 : i32
    %c0_i32_1 = arith.constant 0 : i32
    return %c0_i32, %c0_i32_0 : i32, i32
  }
  func.func @transform_3(%arg0: i32) -> (i32, i32) {
    %c0_i32 = arith.constant 0 : i32
    %c0_i32_0 = arith.constant 0 : i32
    return %arg0, %c0_i32 : i32, i32
  }
}

module attributes {stable_mosaic.version = 11 : i64} {
  func.func @_mm_bias_act_kernel(%arg0: i32, %arg1: memref<98x288xf32, #tpu.memory_space<vmem>>, %arg2: memref<288x64xbf16, #tpu.memory_space<vmem>>, %arg3: memref<1x64xf32, #tpu.memory_space<vmem>>, %arg4: memref<98x64xf32, #tpu.memory_space<vmem>>) attributes {dimension_semantics = [#tpu.dimension_semantics<parallel>], iteration_bounds = array<i64: 1>, scalar_prefetch = 0 : i64, scratch_operands = 0 : i64, tpu.core_type = #tpu.core_type<tc>, window_params = [{transform_indices = @transform_0, window_bounds = array<i64: 98, 288>}, {pipeline_mode = #tpu.pipeline_mode<synchronous>, transform_indices = @transform_1, window_bounds = array<i64: 288, 64>}, {pipeline_mode = #tpu.pipeline_mode<synchronous>, transform_indices = @transform_2, window_bounds = array<i64: 1, 64>}, {transform_indices = @transform_3, window_bounds = array<i64: 98, 64>}]} {
    %c0 = arith.constant 0 : index
    %c0_0 = arith.constant 0 : index
    %0 = vector.load %arg1[%c0, %c0_0] : memref<98x288xf32, #tpu.memory_space<vmem>>, vector<98x288xf32>
    %1 = arith.truncf %0 : vector<98x288xf32> to vector<98x288xbf16>
    %c0_1 = arith.constant 0 : index
    %c0_2 = arith.constant 0 : index
    %2 = vector.load %arg2[%c0_1, %c0_2] : memref<288x64xbf16, #tpu.memory_space<vmem>>, vector<288x64xbf16>
    %cst = arith.constant dense<0.000000e+00> : vector<98x64xf32>
    %3 = tpu.matmul %1, %2, %cst {dimension_numbers = #tpu.dot_dimension_numbers<[1], [0], [0], [1], [0, 0, 1, 1], [], []>} : vector<98x288xbf16>, vector<288x64xbf16>, vector<98x64xf32> -> vector<98x64xf32>
    %c0_3 = arith.constant 0 : index
    %c0_4 = arith.constant 0 : index
    %4 = vector.load %arg3[%c0_3, %c0_4] : memref<1x64xf32, #tpu.memory_space<vmem>>, vector<1x64xf32>
    %5 = vector.broadcast %4 : vector<1x64xf32> to vector<98x64xf32>
    %6 = arith.addf %3, %5 : vector<98x64xf32>
    %cst_5 = arith.constant 0.000000e+00 : f32
    %7 = vector.broadcast %cst_5 : f32 to vector<98x64xf32>
    %8 = arith.maximumf %6, %7 : vector<98x64xf32>
    %c0_6 = arith.constant 0 : index
    %c0_7 = arith.constant 0 : index
    %9 = vector.load %arg4[%c0_6, %c0_7] : memref<98x64xf32, #tpu.memory_space<vmem>>, vector<98x64xf32>
    tpu.vector_store %arg4[%c0_6, %c0_7], %8 {strides = array<i32>} : memref<98x64xf32, #tpu.memory_space<vmem>>, vector<98x64xf32>,
    return
  }
  func.func @transform_0(%arg0: i32) -> (i32, i32) {
    %c0_i32 = arith.constant 0 : i32
    %c0_i32_0 = arith.constant 0 : i32
    return %arg0, %c0_i32 : i32, i32
  }
  func.func @transform_1(%arg0: i32) -> (i32, i32) {
    %c0_i32 = arith.constant 0 : i32
    %c0_i32_0 = arith.constant 0 : i32
    %c0_i32_1 = arith.constant 0 : i32
    return %c0_i32, %c0_i32_0 : i32, i32
  }
  func.func @transform_2(%arg0: i32) -> (i32, i32) {
    %c0_i32 = arith.constant 0 : i32
    %c0_i32_0 = arith.constant 0 : i32
    %c0_i32_1 = arith.constant 0 : i32
    return %c0_i32, %c0_i32_0 : i32, i32
  }
  func.func @transform_3(%arg0: i32) -> (i32, i32) {
    %c0_i32 = arith.constant 0 : i32
    %c0_i32_0 = arith.constant 0 : i32
    return %arg0, %c0_i32 : i32, i32
  }
}

module attributes {stable_mosaic.version = 11 : i64} {
  func.func @_fc_core_kernel(%arg0: i32, %arg1: memref<2x3136xf32, #tpu.memory_space<vmem>>, %arg2: memref<2x20xf32, #tpu.memory_space<vmem>>, %arg3: memref<3136x256xbf16, #tpu.memory_space<vmem>>, %arg4: memref<1x256xf32, #tpu.memory_space<vmem>>, %arg5: memref<256x20xbf16, #tpu.memory_space<vmem>>, %arg6: memref<1x20xf32, #tpu.memory_space<vmem>>, %arg7: memref<256x20xbf16, #tpu.memory_space<vmem>>, %arg8: memref<1x20xf32, #tpu.memory_space<vmem>>, %arg9: memref<20x256xbf16, #tpu.memory_space<vmem>>, %arg10: memref<1x256xf32, #tpu.memory_space<vmem>>, %arg11: memref<256x3136xbf16, #tpu.memory_space<vmem>>, %arg12: memref<1x3136xf32, #tpu.memory_space<vmem>>, %arg13: memref<2x3136xf32, #tpu.memory_space<vmem>>, %arg14: memref<2x20xf32, #tpu.memory_space<vmem>>, %arg15: memref<2x20xf32, #tpu.memory_space<vmem>>) attributes {dimension_semantics = [#tpu.dimension_semantics<parallel>], iteration_bounds = array<i64: 1>, scalar_prefetch = 0 : i64, scratch_operands = 0 : i64, tpu.core_type = #tpu.core_type<tc>, window_params = [{transform_indices = @transform_0, window_bounds = array<i64: 2, 3136>}, {transform_indices = @transform_1, window_bounds = array<i64: 2, 20>}, {pipeline_mode = #tpu.pipeline_mode<synchronous>, transform_indices = @transform_2, window_bounds = array<i64: 3136, 256>}, {pipeline_mode = #tpu.pipeline_mode<synchronous>, transform_indices = @transform_3, window_bounds = array<i64: 1, 256>}, {pipeline_mode = #tpu.pipeline_mode<synchronous>, transform_indices = @transform_4, window_bounds = array<i64: 256, 20>}, {pipeline_mode = #tpu.pipeline_mode<synchronous>, transform_indices = @transform_5, window_bounds = array<i64: 1, 20>}, {pipeline_mode = #tpu.pipeline_mode<synchronous>, transform_indices = @transform_6, window_bounds = array<i64: 256, 20>}, {pipeline_mode = #tpu.pipeline_mode<synchronous>, transform_indices = @transform_7, window_bounds = array<i64: 1, 20>}, {pipeline_mode = #tpu.pipeline_mode<synchronous>, transform_indices = @transform_8, window_bounds = array<i64: 20, 256>}, {pipeline_mode = #tpu.pipeline_mode<synchronous>, transform_indices = @transform_9, window_bounds = array<i64: 1, 256>}, {pipeline_mode = #tpu.pipeline_mode<synchronous>, transform_indices = @transform_10, window_bounds = array<i64: 256, 3136>}, {pipeline_mode = #tpu.pipeline_mode<synchronous>, transform_indices = @transform_11, window_bounds = array<i64: 1, 3136>}, {transform_indices = @transform_12, window_bounds = array<i64: 2, 3136>}, {transform_indices = @transform_13, window_bounds = array<i64: 2, 20>}, {transform_indices = @transform_14, window_bounds = array<i64: 2, 20>}]} {
    %c0 = arith.constant 0 : index
    %c0_0 = arith.constant 0 : index
    %0 = vector.load %arg1[%c0, %c0_0] : memref<2x3136xf32, #tpu.memory_space<vmem>>, vector<2x3136xf32>
    %1 = arith.truncf %0 : vector<2x3136xf32> to vector<2x3136xbf16>
    %c0_1 = arith.constant 0 : index
    %c0_2 = arith.constant 0 : index
    %2 = vector.load %arg3[%c0_1, %c0_2] : memref<3136x256xbf16, #tpu.memory_space<vmem>>, vector<3136x256xbf16>
    %cst = arith.constant dense<0.000000e+00> : vector<2x256xf32>
    %3 = tpu.matmul %1, %2, %cst {dimension_numbers = #tpu.dot_dimension_numbers<[1], [0], [0], [1], [0, 0, 1, 1], [], []>} : vector<2x3136xbf16>, vector<3136x256xbf16>, vector<2x256xf32> -> vector<2x256xf32>
    %c0_3 = arith.constant 0 : index
    %c0_4 = arith.constant 0 : index
    %4 = vector.load %arg4[%c0_3, %c0_4] : memref<1x256xf32, #tpu.memory_space<vmem>>, vector<1x256xf32>
    %5 = vector.broadcast %4 : vector<1x256xf32> to vector<2x256xf32>
    %6 = arith.addf %3, %5 : vector<2x256xf32>
    %cst_5 = arith.constant 0.000000e+00 : f32
    %7 = vector.broadcast %cst_5 : f32 to vector<2x256xf32>
    %8 = arith.maximumf %6, %7 : vector<2x256xf32>
    %9 = arith.truncf %8 : vector<2x256xf32> to vector<2x256xbf16>
    %c0_6 = arith.constant 0 : index
    %c0_7 = arith.constant 0 : index
    %10 = vector.load %arg5[%c0_6, %c0_7] : memref<256x20xbf16, #tpu.memory_space<vmem>>, vector<256x20xbf16>
    %cst_8 = arith.constant dense<0.000000e+00> : vector<2x20xf32>
    %11 = tpu.matmul %9, %10, %cst_8 {dimension_numbers = #tpu.dot_dimension_numbers<[1], [0], [0], [1], [0, 0, 1, 1], [], []>} : vector<2x256xbf16>, vector<256x20xbf16>, vector<2x20xf32> -> vector<2x20xf32>
    %c0_9 = arith.constant 0 : index
    %c0_10 = arith.constant 0 : index
    %12 = vector.load %arg6[%c0_9, %c0_10] : memref<1x20xf32, #tpu.memory_space<vmem>>, vector<1x20xf32>
    %13 = vector.broadcast %12 : vector<1x20xf32> to vector<2x20xf32>
    %14 = arith.addf %11, %13 : vector<2x20xf32>
    %c0_11 = arith.constant 0 : index
    %c0_12 = arith.constant 0 : index
    %15 = vector.load %arg7[%c0_11, %c0_12] : memref<256x20xbf16, #tpu.memory_space<vmem>>, vector<256x20xbf16>
    %cst_13 = arith.constant dense<0.000000e+00> : vector<2x20xf32>
    %16 = tpu.matmul %9, %15, %cst_13 {dimension_numbers = #tpu.dot_dimension_numbers<[1], [0], [0], [1], [0, 0, 1, 1], [], []>} : vector<2x256xbf16>, vector<256x20xbf16>, vector<2x20xf32> -> vector<2x20xf32>
    %c0_14 = arith.constant 0 : index
    %c0_15 = arith.constant 0 : index
    %17 = vector.load %arg8[%c0_14, %c0_15] : memref<1x20xf32, #tpu.memory_space<vmem>>, vector<1x20xf32>
    %18 = vector.broadcast %17 : vector<1x20xf32> to vector<2x20xf32>
    %19 = arith.addf %16, %18 : vector<2x20xf32>
    %c0_16 = arith.constant 0 : index
    %c0_17 = arith.constant 0 : index
    %20 = vector.load %arg14[%c0_16, %c0_17] : memref<2x20xf32, #tpu.memory_space<vmem>>, vector<2x20xf32>
    tpu.vector_store %arg14[%c0_16, %c0_17], %14 {strides = array<i32>} : memref<2x20xf32, #tpu.memory_space<vmem>>, vector<2x20xf32>,
    %c0_18 = arith.constant 0 : index
    %c0_19 = arith.constant 0 : index
    %21 = vector.load %arg15[%c0_18, %c0_19] : memref<2x20xf32, #tpu.memory_space<vmem>>, vector<2x20xf32>
    tpu.vector_store %arg15[%c0_18, %c0_19], %19 {strides = array<i32>} : memref<2x20xf32, #tpu.memory_space<vmem>>, vector<2x20xf32>,
    %c0_20 = arith.constant 0 : index
    %c0_21 = arith.constant 0 : index
    %22 = vector.load %arg2[%c0_20, %c0_21] : memref<2x20xf32, #tpu.memory_space<vmem>>, vector<2x20xf32>
    %cst_22 = arith.constant 5.000000e-01 : f32
    %23 = vector.broadcast %cst_22 : f32 to vector<2x20xf32>
    %24 = arith.mulf %23, %19 : vector<2x20xf32>
    %25 = math.exp %24 : vector<2x20xf32>
    %26 = arith.mulf %22, %25 : vector<2x20xf32>
    %27 = arith.addf %14, %26 : vector<2x20xf32>
    %28 = arith.truncf %27 : vector<2x20xf32> to vector<2x20xbf16>
    %c0_23 = arith.constant 0 : index
    %c0_24 = arith.constant 0 : index
    %29 = vector.load %arg9[%c0_23, %c0_24] : memref<20x256xbf16, #tpu.memory_space<vmem>>, vector<20x256xbf16>
    %cst_25 = arith.constant dense<0.000000e+00> : vector<2x256xf32>
    %30 = tpu.matmul %28, %29, %cst_25 {dimension_numbers = #tpu.dot_dimension_numbers<[1], [0], [0], [1], [0, 0, 1, 1], [], []>} : vector<2x20xbf16>, vector<20x256xbf16>, vector<2x256xf32> -> vector<2x256xf32>
    %c0_26 = arith.constant 0 : index
    %c0_27 = arith.constant 0 : index
    %31 = vector.load %arg10[%c0_26, %c0_27] : memref<1x256xf32, #tpu.memory_space<vmem>>, vector<1x256xf32>
    %32 = vector.broadcast %31 : vector<1x256xf32> to vector<2x256xf32>
    %33 = arith.addf %30, %32 : vector<2x256xf32>
    %cst_28 = arith.constant 0.000000e+00 : f32
    %34 = vector.broadcast %cst_28 : f32 to vector<2x256xf32>
    %35 = arith.maximumf %33, %34 : vector<2x256xf32>
    %36 = arith.truncf %35 : vector<2x256xf32> to vector<2x256xbf16>
    %c0_29 = arith.constant 0 : index
    %c0_30 = arith.constant 0 : index
    %37 = vector.load %arg11[%c0_29, %c0_30] : memref<256x3136xbf16, #tpu.memory_space<vmem>>, vector<256x3136xbf16>
    %cst_31 = arith.constant dense<0.000000e+00> : vector<2x3136xf32>
    %38 = tpu.matmul %36, %37, %cst_31 {dimension_numbers = #tpu.dot_dimension_numbers<[1], [0], [0], [1], [0, 0, 1, 1], [], []>} : vector<2x256xbf16>, vector<256x3136xbf16>, vector<2x3136xf32> -> vector<2x3136xf32>
    %c0_32 = arith.constant 0 : index
    %c0_33 = arith.constant 0 : index
    %39 = vector.load %arg12[%c0_32, %c0_33] : memref<1x3136xf32, #tpu.memory_space<vmem>>, vector<1x3136xf32>
    %40 = vector.broadcast %39 : vector<1x3136xf32> to vector<2x3136xf32>
    %41 = arith.addf %38, %40 : vector<2x3136xf32>
    %cst_34 = arith.constant 0.000000e+00 : f32
    %42 = vector.broadcast %cst_34 : f32 to vector<2x3136xf32>
    %43 = arith.maximumf %41, %42 : vector<2x3136xf32>
    %c0_35 = arith.constant 0 : index
    %c0_36 = arith.constant 0 : index
    %44 = vector.load %arg13[%c0_35, %c0_36] : memref<2x3136xf32, #tpu.memory_space<vmem>>, vector<2x3136xf32>
    tpu.vector_store %arg13[%c0_35, %c0_36], %43 {strides = array<i32>} : memref<2x3136xf32, #tpu.memory_space<vmem>>, vector<2x3136xf32>,
    return
  }
  func.func @transform_0(%arg0: i32) -> (i32, i32) {
    %c0_i32 = arith.constant 0 : i32
    %c0_i32_0 = arith.constant 0 : i32
    return %arg0, %c0_i32 : i32, i32
  }
  func.func @transform_1(%arg0: i32) -> (i32, i32) {
    %c0_i32 = arith.constant 0 : i32
    %c0_i32_0 = arith.constant 0 : i32
    return %arg0, %c0_i32 : i32, i32
  }
  func.func @transform_2(%arg0: i32) -> (i32, i32) {
    %c0_i32 = arith.constant 0 : i32
    %c0_i32_0 = arith.constant 0 : i32
    %c0_i32_1 = arith.constant 0 : i32
    return %c0_i32, %c0_i32_0 : i32, i32
  }
  func.func @transform_3(%arg0: i32) -> (i32, i32) {
    %c0_i32 = arith.constant 0 : i32
    %c0_i32_0 = arith.constant 0 : i32
    %c0_i32_1 = arith.constant 0 : i32
    return %c0_i32, %c0_i32_0 : i32, i32
  }
  func.func @transform_4(%arg0: i32) -> (i32, i32) {
    %c0_i32 = arith.constant 0 : i32
    %c0_i32_0 = arith.constant 0 : i32
    %c0_i32_1 = arith.constant 0 : i32
    return %c0_i32, %c0_i32_0 : i32, i32
  }
  func.func @transform_5(%arg0: i32) -> (i32, i32) {
    %c0_i32 = arith.constant 0 : i32
    %c0_i32_0 = arith.constant 0 : i32
    %c0_i32_1 = arith.constant 0 : i32
    return %c0_i32, %c0_i32_0 : i32, i32
  }
  func.func @transform_6(%arg0: i32) -> (i32, i32) {
    %c0_i32 = arith.constant 0 : i32
    %c0_i32_0 = arith.constant 0 : i32
    %c0_i32_1 = arith.constant 0 : i32
    return %c0_i32, %c0_i32_0 : i32, i32
  }
  func.func @transform_7(%arg0: i32) -> (i32, i32) {
    %c0_i32 = arith.constant 0 : i32
    %c0_i32_0 = arith.constant 0 : i32
    %c0_i32_1 = arith.constant 0 : i32
    return %c0_i32, %c0_i32_0 : i32, i32
  }
  func.func @transform_8(%arg0: i32) -> (i32, i32) {
    %c0_i32 = arith.constant 0 : i32
    %c0_i32_0 = arith.constant 0 : i32
    %c0_i32_1 = arith.constant 0 : i32
    return %c0_i32, %c0_i32_0 : i32, i32
  }
  func.func @transform_9(%arg0: i32) -> (i32, i32) {
    %c0_i32 = arith.constant 0 : i32
    %c0_i32_0 = arith.constant 0 : i32
    %c0_i32_1 = arith.constant 0 : i32
    return %c0_i32, %c0_i32_0 : i32, i32
  }
  func.func @transform_10(%arg0: i32) -> (i32, i32) {
    %c0_i32 = arith.constant 0 : i32
    %c0_i32_0 = arith.constant 0 : i32
    %c0_i32_1 = arith.constant 0 : i32
    return %c0_i32, %c0_i32_0 : i32, i32
  }
  func.func @transform_11(%arg0: i32) -> (i32, i32) {
    %c0_i32 = arith.constant 0 : i32
    %c0_i32_0 = arith.constant 0 : i32
    %c0_i32_1 = arith.constant 0 : i32
    return %c0_i32, %c0_i32_0 : i32, i32
  }
  func.func @transform_12(%arg0: i32) -> (i32, i32) {
    %c0_i32 = arith.constant 0 : i32
    %c0_i32_0 = arith.constant 0 : i32
    return %arg0, %c0_i32 : i32, i32
  }
  func.func @transform_13(%arg0: i32) -> (i32, i32) {
    %c0_i32 = arith.constant 0 : i32
    %c0_i32_0 = arith.constant 0 : i32
    return %arg0, %c0_i32 : i32, i32
  }
  func.func @transform_14(%arg0: i32) -> (i32, i32) {
    %c0_i32 = arith.constant 0 : i32
    %c0_i32_0 = arith.constant 0 : i32
    return %arg0, %c0_i32 : i32, i32
  }
}

module attributes {stable_mosaic.version = 11 : i64} {
  func.func @_mm_bias_act_kernel(%arg0: i32, %arg1: memref<98x256xf32, #tpu.memory_space<vmem>>, %arg2: memref<256x128xbf16, #tpu.memory_space<vmem>>, %arg3: memref<1x128xf32, #tpu.memory_space<vmem>>, %arg4: memref<98x128xf32, #tpu.memory_space<vmem>>) attributes {dimension_semantics = [#tpu.dimension_semantics<parallel>], iteration_bounds = array<i64: 1>, scalar_prefetch = 0 : i64, scratch_operands = 0 : i64, tpu.core_type = #tpu.core_type<tc>, window_params = [{transform_indices = @transform_0, window_bounds = array<i64: 98, 256>}, {pipeline_mode = #tpu.pipeline_mode<synchronous>, transform_indices = @transform_1, window_bounds = array<i64: 256, 128>}, {pipeline_mode = #tpu.pipeline_mode<synchronous>, transform_indices = @transform_2, window_bounds = array<i64: 1, 128>}, {transform_indices = @transform_3, window_bounds = array<i64: 98, 128>}]} {
    %c0 = arith.constant 0 : index
    %c0_0 = arith.constant 0 : index
    %0 = vector.load %arg1[%c0, %c0_0] : memref<98x256xf32, #tpu.memory_space<vmem>>, vector<98x256xf32>
    %1 = arith.truncf %0 : vector<98x256xf32> to vector<98x256xbf16>
    %c0_1 = arith.constant 0 : index
    %c0_2 = arith.constant 0 : index
    %2 = vector.load %arg2[%c0_1, %c0_2] : memref<256x128xbf16, #tpu.memory_space<vmem>>, vector<256x128xbf16>
    %cst = arith.constant dense<0.000000e+00> : vector<98x128xf32>
    %3 = tpu.matmul %1, %2, %cst {dimension_numbers = #tpu.dot_dimension_numbers<[1], [0], [0], [1], [0, 0, 1, 1], [], []>} : vector<98x256xbf16>, vector<256x128xbf16>, vector<98x128xf32> -> vector<98x128xf32>
    %c0_3 = arith.constant 0 : index
    %c0_4 = arith.constant 0 : index
    %4 = vector.load %arg3[%c0_3, %c0_4] : memref<1x128xf32, #tpu.memory_space<vmem>>, vector<1x128xf32>
    %5 = vector.broadcast %4 : vector<1x128xf32> to vector<98x128xf32>
    %6 = arith.addf %3, %5 : vector<98x128xf32>
    %cst_5 = arith.constant 0.000000e+00 : f32
    %7 = vector.broadcast %cst_5 : f32 to vector<98x128xf32>
    %8 = arith.maximumf %6, %7 : vector<98x128xf32>
    %c0_6 = arith.constant 0 : index
    %c0_7 = arith.constant 0 : index
    %9 = vector.load %arg4[%c0_6, %c0_7] : memref<98x128xf32, #tpu.memory_space<vmem>>, vector<98x128xf32>
    tpu.vector_store %arg4[%c0_6, %c0_7], %8 {strides = array<i32>} : memref<98x128xf32, #tpu.memory_space<vmem>>, vector<98x128xf32>,
    return
  }
  func.func @transform_0(%arg0: i32) -> (i32, i32) {
    %c0_i32 = arith.constant 0 : i32
    %c0_i32_0 = arith.constant 0 : i32
    return %arg0, %c0_i32 : i32, i32
  }
  func.func @transform_1(%arg0: i32) -> (i32, i32) {
    %c0_i32 = arith.constant 0 : i32
    %c0_i32_0 = arith.constant 0 : i32
    %c0_i32_1 = arith.constant 0 : i32
    return %c0_i32, %c0_i32_0 : i32, i32
  }
  func.func @transform_2(%arg0: i32) -> (i32, i32) {
    %c0_i32 = arith.constant 0 : i32
    %c0_i32_0 = arith.constant 0 : i32
    %c0_i32_1 = arith.constant 0 : i32
    return %c0_i32, %c0_i32_0 : i32, i32
  }
  func.func @transform_3(%arg0: i32) -> (i32, i32) {
    %c0_i32 = arith.constant 0 : i32
    %c0_i32_0 = arith.constant 0 : i32
    return %arg0, %c0_i32 : i32, i32
  }
}

module attributes {stable_mosaic.version = 11 : i64} {
  func.func @_mm_bias_act_kernel(%arg0: i32, %arg1: memref<392x128xf32, #tpu.memory_space<vmem>>, %arg2: memref<128x4xbf16, #tpu.memory_space<vmem>>, %arg3: memref<1x4xf32, #tpu.memory_space<vmem>>, %arg4: memref<392x4xf32, #tpu.memory_space<vmem>>) attributes {dimension_semantics = [#tpu.dimension_semantics<parallel>], iteration_bounds = array<i64: 1>, scalar_prefetch = 0 : i64, scratch_operands = 0 : i64, tpu.core_type = #tpu.core_type<tc>, window_params = [{transform_indices = @transform_0, window_bounds = array<i64: 392, 128>}, {pipeline_mode = #tpu.pipeline_mode<synchronous>, transform_indices = @transform_1, window_bounds = array<i64: 128, 4>}, {pipeline_mode = #tpu.pipeline_mode<synchronous>, transform_indices = @transform_2, window_bounds = array<i64: 1, 4>}, {transform_indices = @transform_3, window_bounds = array<i64: 392, 4>}]} {
    %c0 = arith.constant 0 : index
    %c0_0 = arith.constant 0 : index
    %0 = vector.load %arg1[%c0, %c0_0] : memref<392x128xf32, #tpu.memory_space<vmem>>, vector<392x128xf32>
    %1 = arith.truncf %0 : vector<392x128xf32> to vector<392x128xbf16>
    %c0_1 = arith.constant 0 : index
    %c0_2 = arith.constant 0 : index
    %2 = vector.load %arg2[%c0_1, %c0_2] : memref<128x4xbf16, #tpu.memory_space<vmem>>, vector<128x4xbf16>
    %cst = arith.constant dense<0.000000e+00> : vector<392x4xf32>
    %3 = tpu.matmul %1, %2, %cst {dimension_numbers = #tpu.dot_dimension_numbers<[1], [0], [0], [1], [0, 0, 1, 1], [], []>} : vector<392x128xbf16>, vector<128x4xbf16>, vector<392x4xf32> -> vector<392x4xf32>
    %c0_3 = arith.constant 0 : index
    %c0_4 = arith.constant 0 : index
    %4 = vector.load %arg3[%c0_3, %c0_4] : memref<1x4xf32, #tpu.memory_space<vmem>>, vector<1x4xf32>
    %5 = vector.broadcast %4 : vector<1x4xf32> to vector<392x4xf32>
    %6 = arith.addf %3, %5 : vector<392x4xf32>
    %7 = arith.negf %6 : vector<392x4xf32>
    %8 = math.exp %7 : vector<392x4xf32>
    %cst_5 = arith.constant 1.000000e+00 : f32
    %9 = vector.broadcast %cst_5 : f32 to vector<392x4xf32>
    %10 = arith.addf %9, %8 : vector<392x4xf32>
    %11 = arith.divf %9, %10 : vector<392x4xf32>
    %c0_6 = arith.constant 0 : index
    %c0_7 = arith.constant 0 : index
    %12 = vector.load %arg4[%c0_6, %c0_7] : memref<392x4xf32, #tpu.memory_space<vmem>>, vector<392x4xf32>
    tpu.vector_store %arg4[%c0_6, %c0_7], %11 {strides = array<i32>} : memref<392x4xf32, #tpu.memory_space<vmem>>, vector<392x4xf32>,
    return
  }
  func.func @transform_0(%arg0: i32) -> (i32, i32) {
    %c0_i32 = arith.constant 0 : i32
    %c0_i32_0 = arith.constant 0 : i32
    return %arg0, %c0_i32 : i32, i32
  }
  func.func @transform_1(%arg0: i32) -> (i32, i32) {
    %c0_i32 = arith.constant 0 : i32
    %c0_i32_0 = arith.constant 0 : i32
    %c0_i32_1 = arith.constant 0 : i32
    return %c0_i32, %c0_i32_0 : i32, i32
  }
  func.func @transform_2(%arg0: i32) -> (i32, i32) {
    %c0_i32 = arith.constant 0 : i32
    %c0_i32_0 = arith.constant 0 : i32
    %c0_i32_1 = arith.constant 0 : i32
    return %c0_i32, %c0_i32_0 : i32, i32
  }
  func.func @transform_3(%arg0: i32) -> (i32, i32) {
    %c0_i32 = arith.constant 0 : i32
    %c0_i32_0 = arith.constant 0 : i32
    return %arg0, %c0_i32 : i32, i32
  }
}

</mosaic_0001>

<bundles_post_ra>
// kernel: vae_forward.5
= control target key start
LH: loop header
LB: loop body
LE: loop exit
PB: predicated region body
PF: predicated region fallthrough
CT: control target
= control target key end

     0   :  { %8 = vsyncpa [#allocation3], 0  ;;  %s1262_s0 = inlined_call_operand.vmem [shape: f32[392,9], index: 0, kind: input, shape index: {}]   ;;  %s1263_s1 = inlined_call_operand.hbm [shape: bf16[9,32], index: 1, kind: input, shape index: {}]   ;;  %s1264_s2 = inlined_call_operand.hbm [shape: f32[1,32], index: 2, kind: input, shape index: {}]   ;;  %s1265_s3 = inlined_call_operand.vmem [shape: f32[392,32], index: 3, kind: output, shape index: {}]  }
   0x1   :  { %9 = vsyncpa [#allocation5], 0  ;;  %s758_s12 = smov [#allocation2]  }
   0x2   :  { %s17_s13 = sshll.u32 %s758_s12, 4  ;;  %s18_s13 = int_to_ptr.vmem [resolvable:$true] %s17_s13 }
   0x3   :  { %s722_s14 = scalar_lea.vmem %s18_s13, 128  ;;  %p727_p1 = scmp.lt.s32.totalorder %s18_s13, %s18_s13 }
   0x4   :  { %p723_p0 = scmp.ne.s32.totalorder %s18_s13, %s722_s14  ;;  %p728_p2 = scmp.lt.s32.totalorder %s722_s14, %s722_s14 }
   0x6   :  { %p729_p3 = por %p728_p2, %p727_p1 }
   0x8   :  { %p730_p4 = pnand %p729_p3, %p723_p0 }
   0xa   :  { %733 = shalt.err (!%p730_p4)
}
   0xb   :  { %s759_s15 = smov 64   ;;  %s760_s16 = smov 4  }
   0xc   :  { %23 = dma.hbm_to_vmem [thread:$0]  %s1263_s1, 128, %s18_s13, [#allocation3], %s759_s15, %s759_s15, %s760_s16  }
   0xd   :  { %s761_s19 = smov [#allocation4]  }
   0xe   :  { %s30_s20 = sshll.u32 %s761_s19, 4  ;;  %s31_s20 = int_to_ptr.vmem [resolvable:$true] %s30_s20 }
   0xf   :  { %s742_s21 = scalar_lea.vmem %s31_s20, 16  ;;  %s746_s22 = scalar_lea.vmem %s31_s20, 32 }
  0x10   :  { %p743_p5 = scmp.ne.s32.totalorder %s31_s20, %s742_s21  ;;  %p747_p6 = scmp.lt.s32.totalorder %s31_s20, %s31_s20 }
  0x11   :  { %p748_p7 = scmp.lt.s32.totalorder %s746_s22, %s742_s21 }
  0x13   :  { %p749_p8 = por %p748_p7, %p747_p6 }
  0x15   :  { %p750_p9 = pnand %p749_p8, %p743_p5 }
  0x17   :  { %753 = shalt.err (!%p750_p9)
}
  0x18   :  { %33 = dma.hbm_to_vmem [thread:$0]  %s1264_s2, 16, %s31_s20, [#allocation5]  }
  0x19   :  { %754 = dma.done.wait [#allocation3], 128  }
  0x1a   :  { %755 = vsyncadd [#allocation3], 4294967168 }
  0x1b   :  { %756 = dma.done.wait [#allocation5], 16  }
  0x1c   :  { %757 = vsyncadd [#allocation5], 4294967280  ;;  %vm205_vm0 = vcmask 1043456   ;;  %v762_v0 = vmov 0.0   ;;  %vm763_vm1 = vmmov 0   ;;  %vm206_vm2 = vcmask 1044480  }
  0x1d   :  { %602 = vmatprep.subr.bf16.mxu0 %v762_v0  ;;  %704 = vmatprep.subr.bf16.mxu1 %v762_v0  ;;  %v764_v1 = vmov 65535   ;;  %v713_v4 = vld [vmem:[#allocation2] sm:$0x1f]   ;;  %v42_v6 = vld [vmem:[%s1262_s0 + $0x8] sm:$0xff]  ;;  %v67_v7 = vld [vmem:[%s1262_s0 + $0xd0] sm:$0xff]  ;;  %vm129_vm3 = vcmask 72704  }
  0x1e   :  { %604 = vmatprep.mubr.msk.bf16.mxu0 %vm763_vm1, %v762_v0  ;;  %656 = vmatprep.mubr.msk.bf16.mxu1 %vm763_vm1, %v762_v0  ;;  %v207_v2 = vsel %vm205_vm0, 4294967295, %v764_v1  ;;  %v41_v5 = vld [vmem:[%s1262_s0] sm:$0xff]  ;;  %v68_v9 = vld [vmem:[%s1262_s0 + $0xd8] sm:$0xff]  ;;  %v43_v12 = vld [vmem:[%s1262_s0 + $0x10] sm:$0xff]  ;;  %vm493_vm4 = vcmask 261120  }
  0x1f   :  { %v208_v3 = vsel %vm206_vm2, %v207_v2, 0  ;;  %v90_v10 = vpack.c.bf16 %v42_v6, %v41_v5  ;;  %v103_v11 = vpack.c.bf16 %v68_v9, %v67_v7  ;;  %v44_v13 = vld [vmem:[%s1262_s0 + $0x18] sm:$0xff]  ;;  %v69_v14 = vld [vmem:[%s1262_s0 + $0xe0] sm:$0xff]  ;;  %v70_v15 = vld [vmem:[%s1262_s0 + $0xe8] sm:$0xff] }
  0x20   :  { %v210_v8 = vand.u32 %v713_v4, %v208_v3  ;;  %v91_v16 = vpack.c.bf16 %v44_v13, %v43_v12  ;;  %v104_v17 = vpack.c.bf16 %v70_v15, %v69_v14  ;;  %v45_v18 = vld [vmem:[%s1262_s0 + $0x20] sm:$0xff]  ;;  %v46_v19 = vld [vmem:[%s1262_s0 + $0x28] sm:$0xff]  ;;  %v71_v20 = vld [vmem:[%s1262_s0 + $0xf0] sm:$0xff] }
  0x21   :  { %v72_v21 = vld [vmem:[%s1262_s0 + $0xf8] sm:$0xff]  ;;  %v92_v22 = vpack.c.bf16 %v46_v19, %v45_v18  ;;  %v47_v24 = vld [vmem:[%s1262_s0 + $0x30] sm:$0xff]  ;;  %v73_v26 = vld [vmem:[%s1262_s0 + $0x100] sm:$0xff] }
  0x22   :  { %603 = vmatpush3.bf16.msra.mxu0 %v210_v8  ;;  %705 = vmatpush3.bf16.msra.mxu1 %v210_v8  ;;  %v105_v23 = vpack.c.bf16 %v72_v21, %v71_v20  ;;  %v48_v25 = vld [vmem:[%s1262_s0 + $0x38] sm:$0xff]  ;;  %v74_v27 = vld [vmem:[%s1262_s0 + $0x108] sm:$0xff]  ;;  %v49_v30 = vld [vmem:[%s1262_s0 + $0x40] sm:$0xff] }
  0x23   :  { %v93_v28 = vpack.c.bf16 %v48_v25, %v47_v24  ;;  %v106_v29 = vpack.c.bf16 %v74_v27, %v73_v26  ;;  %v50_v31 = vld [vmem:[%s1262_s0 + $0x48] sm:$0xff]  ;;  %v75_v32 = vld [vmem:[%s1262_s0 + $0x110] sm:$0xff]  ;;  %v76_v33 = vld [vmem:[%s1262_s0 + $0x118] sm:$0xff] }
  0x24   :  { %v94_v34 = vpack.c.bf16 %v50_v31, %v49_v30  ;;  %v107_v35 = vpack.c.bf16 %v76_v33, %v75_v32  ;;  %v51_v36 = vld [vmem:[%s1262_s0 + $0x50] sm:$0xff]  ;;  %v52_v37 = vld [vmem:[%s1262_s0 + $0x58] sm:$0xff]  ;;  %v77_v38 = vld [vmem:[%s1262_s0 + $0x120] sm:$0xff] }
  0x25   :  { %605 = vmatmul.mubr.msk.bf16.vlgmr.msra.gmra.mxu0 %vm129_vm3, %v90_v10  ;;  %657 = vmatmul.mubr.msk.bf16.vlgmr.msra.gmra.mxu1 %vm129_vm3, %v103_v11  ;;  %v78_v39 = vld [vmem:[%s1262_s0 + $0x128] sm:$0xff]  ;;  %v95_v40 = vpack.c.bf16 %v52_v37, %v51_v36  ;;  %v53_v42 = vld [vmem:[%s1262_s0 + $0x60] sm:$0xff]  ;;  %v79_v44 = vld [vmem:[%s1262_s0 + $0x130] sm:$0xff] }
  0x26   :  { %608 = vmatprep.mubr.msk.bf16.mxu0 %vm763_vm1, %v762_v0  ;;  %660 = vmatprep.mubr.msk.bf16.mxu1 %vm763_vm1, %v762_v0  ;;  %v108_v41 = vpack.c.bf16 %v78_v39, %v77_v38  ;;  %v54_v43 = vld [vmem:[%s1262_s0 + $0x68] sm:$0xff]  ;;  %v80_v45 = vld [vmem:[%s1262_s0 + $0x138] sm:$0xff]  ;;  %v55_v48 = vld [vmem:[%s1262_s0 + $0x70] sm:$0xff] }
  0x27   :  { %v96_v46 = vpack.c.bf16 %v54_v43, %v53_v42  ;;  %v109_v47 = vpack.c.bf16 %v80_v45, %v79_v44  ;;  %v56_v49 = vld [vmem:[%s1262_s0 + $0x78] sm:$0xff]  ;;  %v81_v50 = vld [vmem:[%s1262_s0 + $0x140] sm:$0xff]  ;;  %v82_v51 = vld [vmem:[%s1262_s0 + $0x148] sm:$0xff] }
  0x28   :  { %v97_v52 = vpack.c.bf16 %v56_v49, %v55_v48  ;;  %v110_v53 = vpack.c.bf16 %v82_v51, %v81_v50  ;;  %v57_v54 = vld [vmem:[%s1262_s0 + $0x80] sm:$0xff]  ;;  %v58_v55 = vld [vmem:[%s1262_s0 + $0x88] sm:$0xff]  ;;  %v83_v56 = vld [vmem:[%s1262_s0 + $0x150] sm:$0xff] }
  0x29   :  { %v84_v57 = vld [vmem:[%s1262_s0 + $0x158] sm:$0xff]  ;;  %v98_v58 = vpack.c.bf16 %v58_v55, %v57_v54  ;;  %v59_v60 = vld [vmem:[%s1262_s0 + $0x90] sm:$0xff]  ;;  %v85_v62 = vld [vmem:[%s1262_s0 + $0x160] sm:$0xff] }
  0x2a   :  { %v111_v59 = vpack.c.bf16 %v84_v57, %v83_v56  ;;  %v60_v61 = vld [vmem:[%s1262_s0 + $0x98] sm:$0xff]  ;;  %v86_v63 = vld [vmem:[%s1262_s0 + $0x168] sm:$0xff]  ;;  %v61_v3 = vld [vmem:[%s1262_s0 + $0xa0] sm:$0xff] }
  0x2b   :  { %v99_v1 = vpack.c.bf16 %v60_v61, %v59_v60  ;;  %v112_v2 = vpack.c.bf16 %v86_v63, %v85_v62  ;;  %v62_v4 = vld [vmem:[%s1262_s0 + $0xa8] sm:$0xff]  ;;  %v87_v5 = vld [vmem:[%s1262_s0 + $0x170] sm:$0xff]  ;;  %v88_v6 = vld [vmem:[%s1262_s0 + $0x178] sm:$0xff] }
  0x2c   :  { %v100_v7 = vpack.c.bf16 %v62_v4, %v61_v3  ;;  %v113_v8 = vpack.c.bf16 %v88_v6, %v87_v5  ;;  %v63_v9 = vld [vmem:[%s1262_s0 + $0xb0] sm:$0xff]  ;;  %v64_v10 = vld [vmem:[%s1262_s0 + $0xb8] sm:$0xff]  ;;  %v89_v11 = vld [vmem:[%s1262_s0 + $0x180] sm:$0xff] }
  0x2d   :  { %609 = vmatmul.mubr.msk.bf16.gmra.mxu0 %vm129_vm3, %v91_v16  ;;  %661 = vmatmul.mubr.msk.bf16.gmra.mxu1 %vm129_vm3, %v104_v17  ;;  %v101_v12 = vpack.c.bf16 %v64_v10, %v63_v9  ;;  %v114_v13 = vpack.c.bf16 %v89_v11, %v89_v11  ;;  %v65_v14 = vld [vmem:[%s1262_s0 + $0xc0] sm:$0xff]  ;;  %v66_v15 = vld [vmem:[%s1262_s0 + $0xc8] sm:$0xff] }
  0x2e   :  { %612 = vmatprep.mubr.msk.bf16.mxu0 %vm763_vm1, %v762_v0  ;;  %664 = vmatprep.mubr.msk.bf16.mxu1 %vm763_vm1, %v762_v0  ;;  %v102_v16 = vpack.c.bf16 %v66_v15, %v65_v14  ;;  %v1015_v17 = vld [vmem:[#allocation4] ss:$0 sm:$0xff] }
  0x35   :  { %613 = vmatmul.mubr.msk.bf16.gmra.mxu0 %vm129_vm3, %v92_v22  ;;  %665 = vmatmul.mubr.msk.bf16.gmra.mxu1 %vm129_vm3, %v105_v23 }
  0x36   :  { %616 = vmatprep.mubr.msk.bf16.mxu0 %vm763_vm1, %v762_v0  ;;  %668 = vmatprep.mubr.msk.bf16.mxu1 %vm763_vm1, %v762_v0 }
  0x3d   :  { %617 = vmatmul.mubr.msk.bf16.gmra.mxu0 %vm129_vm3, %v93_v28  ;;  %669 = vmatmul.mubr.msk.bf16.gmra.mxu1 %vm129_vm3, %v106_v29 }
  0x3e   :  { %620 = vmatprep.mubr.msk.bf16.mxu0 %vm763_vm1, %v762_v0  ;;  %672 = vmatprep.mubr.msk.bf16.mxu1 %vm763_vm1, %v762_v0 }
  0x45   :  { %621 = vmatmul.mubr.msk.bf16.gmra.mxu0 %vm129_vm3, %v94_v34  ;;  %673 = vmatmul.mubr.msk.bf16.gmra.mxu1 %vm129_vm3, %v107_v35 }
  0x46   :  { %624 = vmatprep.mubr.msk.bf16.mxu0 %vm763_vm1, %v762_v0  ;;  %676 = vmatprep.mubr.msk.bf16.mxu1 %vm763_vm1, %v762_v0 }
  0x4d   :  { %625 = vmatmul.mubr.msk.bf16.gmra.mxu0 %vm129_vm3, %v95_v40  ;;  %677 = vmatmul.mubr.msk.bf16.gmra.mxu1 %vm129_vm3, %v108_v41 }
  0x4e   :  { %628 = vmatprep.mubr.msk.bf16.mxu0 %vm763_vm1, %v762_v0  ;;  %680 = vmatprep.mubr.msk.bf16.mxu1 %vm763_vm1, %v762_v0 }
  0x55   :  { %629 = vmatmul.mubr.msk.bf16.gmra.mxu0 %vm129_vm3, %v96_v46  ;;  %681 = vmatmul.mubr.msk.bf16.gmra.mxu1 %vm129_vm3, %v109_v47 }
  0x56   :  { %632 = vmatprep.mubr.msk.bf16.mxu0 %vm763_vm1, %v762_v0  ;;  %684 = vmatprep.mubr.msk.bf16.mxu1 %vm763_vm1, %v762_v0 }
  0x5d   :  { %633 = vmatmul.mubr.msk.bf16.gmra.mxu0 %vm129_vm3, %v97_v52  ;;  %685 = vmatmul.mubr.msk.bf16.gmra.mxu1 %vm129_vm3, %v110_v53 }
  0x5e   :  { %636 = vmatprep.mubr.msk.bf16.mxu0 %vm763_vm1, %v762_v0  ;;  %688 = vmatprep.mubr.msk.bf16.mxu1 %vm763_vm1, %v762_v0 }
  0x65   :  { %637 = vmatmul.mubr.msk.bf16.gmra.mxu0 %vm129_vm3, %v98_v58  ;;  %689 = vmatmul.mubr.msk.bf16.gmra.mxu1 %vm129_vm3, %v111_v59 }
  0x66   :  { %640 = vmatprep.mubr.msk.bf16.mxu0 %vm763_vm1, %v762_v0  ;;  %692 = vmatprep.mubr.msk.bf16.mxu1 %vm763_vm1, %v762_v0 }
  0x6d   :  { %641 = vmatmul.mubr.msk.bf16.gmra.mxu0 %vm129_vm3, %v99_v1  ;;  %693 = vmatmul.mubr.msk.bf16.gmra.mxu1 %vm129_vm3, %v112_v2 }
  0x6e   :  { %644 = vmatprep.mubr.msk.bf16.mxu0 %vm763_vm1, %v762_v0  ;;  %696 = vmatprep.mubr.msk.bf16.mxu1 %vm763_vm1, %v762_v0 }
  0x75   :  { %645 = vmatmul.mubr.msk.bf16.gmra.mxu0 %vm129_vm3, %v100_v7  ;;  %697 = vmatmul.mubr.msk.bf16.gmra.mxu1 %vm129_vm3, %v113_v8 }
  0x76   :  { %648 = vmatprep.mubr.msk.bf16.mxu0 %vm763_vm1, %v762_v0  ;;  %700 = vmatprep.mubr.msk.bf16.mxu1 %vm763_vm1, %v762_v0 }
  0x7d   :  { %649 = vmatmul.mubr.msk.bf16.gmra.mxu0 %vm129_vm3, %v101_v12  ;;  %701 = vmatmul.mubr.msk.bf16.gmra.mxu1 %vm129_vm3, %v114_v13 }
  0x7e   :  { %652 = vmatprep.mubr.msk.bf16.mxu0 %vm763_vm1, %v762_v0 }
  0x85   :  { %653 = vmatmul.mubr.msk.bf16.gmra.mxu0 %vm129_vm3, %v102_v16 }
  0xe5   :  { %v246_v18 = vpop.f32.mrf.mxu0  ;;  %v350_v19 = vpop.f32.mrf.mxu1 }
  0xe6   :  { %v247_v20 = vadd.f32 %v1015_v17, %v246_v18  ;;  %v351_v21 = vadd.f32 %v1015_v17, %v350_v19 }
  0xe7   :  { %v606_v0 = vpop.f32.mrf.mxu0  ;;  %v658_v22 = vpop.f32.mrf.mxu1 }
  0xe8   :  { %v444_v23 = vmax.f32 %v247_v20, 0.0  ;;  %v470_v24 = vmax.f32 %v351_v21, 0.0 }
  0xe9   :  { %v249_v25 = vpop.f32.mrf.mxu0  ;;  %v353_v26 = vpop.f32.mrf.mxu1 }
  0xea   :  { %494 = vst.msk [vmem:[%s1265_s3] sm:$0xff] %vm493_vm4, %v444_v23  ;;  %v250_v27 = vadd.f32 %v1015_v17, %v249_v25  ;;  %520 = vst.msk [vmem:[%s1265_s3 + $0xd0] sm:$0xff] %vm493_vm4, %v470_v24  ;;  %v354_v28 = vadd.f32 %v1015_v17, %v353_v26 }
  0xeb   :  { %v607_v29 = vpop.f32.mrf.mxu0  ;;  %v659_v30 = vpop.f32.mrf.mxu1 }
  0xec   :  { %v445_v31 = vmax.f32 %v250_v27, 0.0  ;;  %v471_v32 = vmax.f32 %v354_v28, 0.0 }
  0xed   :  { %v254_v33 = vpop.f32.mrf.mxu0  ;;  %v358_v34 = vpop.f32.mrf.mxu1 }
  0xee   :  { %495 = vst.msk [vmem:[%s1265_s3 + $0x8] sm:$0xff] %vm493_vm4, %v445_v31  ;;  %v255_v35 = vadd.f32 %v1015_v17, %v254_v33  ;;  %521 = vst.msk [vmem:[%s1265_s3 + $0xd8] sm:$0xff] %vm493_vm4, %v471_v32  ;;  %v359_v36 = vadd.f32 %v1015_v17, %v358_v34 }
  0xef   :  { %v610_v37 = vpop.f32.mrf.mxu0  ;;  %v662_v38 = vpop.f32.mrf.mxu1 }
  0xf0   :  { %v446_v39 = vmax.f32 %v255_v35, 0.0  ;;  %v472_v40 = vmax.f32 %v359_v36, 0.0 }
  0xf1   :  { %v257_v41 = vpop.f32.mrf.mxu0  ;;  %v361_v42 = vpop.f32.mrf.mxu1 }
  0xf2   :  { %496 = vst.msk [vmem:[%s1265_s3 + $0x10] sm:$0xff] %vm493_vm4, %v446_v39  ;;  %v258_v43 = vadd.f32 %v1015_v17, %v257_v41  ;;  %522 = vst.msk [vmem:[%s1265_s3 + $0xe0] sm:$0xff] %vm493_vm4, %v472_v40  ;;  %v362_v44 = vadd.f32 %v1015_v17, %v361_v42 }
  0xf3   :  { %v611_v45 = vpop.f32.mrf.mxu0  ;;  %v663_v46 = vpop.f32.mrf.mxu1 }
  0xf4   :  { %v447_v47 = vmax.f32 %v258_v43, 0.0  ;;  %v473_v48 = vmax.f32 %v362_v44, 0.0 }
  0xf5   :  { %v262_v49 = vpop.f32.mrf.mxu0  ;;  %v366_v50 = vpop.f32.mrf.mxu1 }
  0xf6   :  { %497 = vst.msk [vmem:[%s1265_s3 + $0x18] sm:$0xff] %vm493_vm4, %v447_v47  ;;  %v263_v51 = vadd.f32 %v1015_v17, %v262_v49  ;;  %523 = vst.msk [vmem:[%s1265_s3 + $0xe8] sm:$0xff] %vm493_vm4, %v473_v48  ;;  %v367_v52 = vadd.f32 %v1015_v17, %v366_v50 }
  0xf7   :  { %v614_v53 = vpop.f32.mrf.mxu0  ;;  %v666_v54 = vpop.f32.mrf.mxu1 }
  0xf8   :  { %v448_v55 = vmax.f32 %v263_v51, 0.0  ;;  %v474_v56 = vmax.f32 %v367_v52, 0.0 }
  0xf9   :  { %v265_v57 = vpop.f32.mrf.mxu0  ;;  %v369_v58 = vpop.f32.mrf.mxu1 }
  0xfa   :  { %498 = vst.msk [vmem:[%s1265_s3 + $0x20] sm:$0xff] %vm493_vm4, %v448_v55  ;;  %v266_v59 = vadd.f32 %v1015_v17, %v265_v57  ;;  %524 = vst.msk [vmem:[%s1265_s3 + $0xf0] sm:$0xff] %vm493_vm4, %v474_v56  ;;  %v370_v60 = vadd.f32 %v1015_v17, %v369_v58 }
  0xfb   :  { %v615_v61 = vpop.f32.mrf.mxu0  ;;  %v667_v62 = vpop.f32.mrf.mxu1 }
  0xfc   :  { %v449_v63 = vmax.f32 %v266_v59, 0.0  ;;  %v475_v1 = vmax.f32 %v370_v60, 0.0 }
  0xfd   :  { %v270_v2 = vpop.f32.mrf.mxu0  ;;  %v374_v3 = vpop.f32.mrf.mxu1 }
  0xfe   :  { %499 = vst.msk [vmem:[%s1265_s3 + $0x28] sm:$0xff] %vm493_vm4, %v449_v63  ;;  %v271_v4 = vadd.f32 %v1015_v17, %v270_v2  ;;  %525 = vst.msk [vmem:[%s1265_s3 + $0xf8] sm:$0xff] %vm493_vm4, %v475_v1  ;;  %v375_v5 = vadd.f32 %v1015_v17, %v374_v3 }
  0xff   :  { %v618_v6 = vpop.f32.mrf.mxu0  ;;  %v670_v7 = vpop.f32.mrf.mxu1 }
 0x100   :  { %v450_v8 = vmax.f32 %v271_v4, 0.0  ;;  %v476_v9 = vmax.f32 %v375_v5, 0.0 }
 0x101   :  { %v273_v10 = vpop.f32.mrf.mxu0  ;;  %v377_v11 = vpop.f32.mrf.mxu1 }
 0x102   :  { %500 = vst.msk [vmem:[%s1265_s3 + $0x30] sm:$0xff] %vm493_vm4, %v450_v8  ;;  %v274_v12 = vadd.f32 %v1015_v17, %v273_v10  ;;  %526 = vst.msk [vmem:[%s1265_s3 + $0x100] sm:$0xff] %vm493_vm4, %v476_v9  ;;  %v378_v13 = vadd.f32 %v1015_v17, %v377_v11 }
 0x103   :  { %v619_v14 = vpop.f32.mrf.mxu0  ;;  %v671_v15 = vpop.f32.mrf.mxu1 }
 0x104   :  { %v451_v16 = vmax.f32 %v274_v12, 0.0  ;;  %v477_v18 = vmax.f32 %v378_v13, 0.0 }
 0x105   :  { %v278_v19 = vpop.f32.mrf.mxu0  ;;  %v382_v20 = vpop.f32.mrf.mxu1 }
 0x106   :  { %501 = vst.msk [vmem:[%s1265_s3 + $0x38] sm:$0xff] %vm493_vm4, %v451_v16  ;;  %v279_v21 = vadd.f32 %v1015_v17, %v278_v19  ;;  %527 = vst.msk [vmem:[%s1265_s3 + $0x108] sm:$0xff] %vm493_vm4, %v477_v18  ;;  %v383_v0 = vadd.f32 %v1015_v17, %v382_v20 }
 0x107   :  { %v622_v22 = vpop.f32.mrf.mxu0  ;;  %v674_v23 = vpop.f32.mrf.mxu1 }
 0x108   :  { %v452_v24 = vmax.f32 %v279_v21, 0.0  ;;  %v478_v25 = vmax.f32 %v383_v0, 0.0 }
 0x109   :  { %v281_v26 = vpop.f32.mrf.mxu0  ;;  %v385_v27 = vpop.f32.mrf.mxu1 }
 0x10a   :  { %502 = vst.msk [vmem:[%s1265_s3 + $0x40] sm:$0xff] %vm493_vm4, %v452_v24  ;;  %v282_v28 = vadd.f32 %v1015_v17, %v281_v26  ;;  %528 = vst.msk [vmem:[%s1265_s3 + $0x110] sm:$0xff] %vm493_vm4, %v478_v25  ;;  %v386_v29 = vadd.f32 %v1015_v17, %v385_v27 }
 0x10b   :  { %v623_v30 = vpop.f32.mrf.mxu0  ;;  %v675_v31 = vpop.f32.mrf.mxu1 }
 0x10c   :  { %v453_v32 = vmax.f32 %v282_v28, 0.0  ;;  %v479_v33 = vmax.f32 %v386_v29, 0.0 }
 0x10d   :  { %v286_v34 = vpop.f32.mrf.mxu0  ;;  %v390_v35 = vpop.f32.mrf.mxu1 }
 0x10e   :  { %503 = vst.msk [vmem:[%s1265_s3 + $0x48] sm:$0xff] %vm493_vm4, %v453_v32  ;;  %v287_v36 = vadd.f32 %v1015_v17, %v286_v34  ;;  %529 = vst.msk [vmem:[%s1265_s3 + $0x118] sm:$0xff] %vm493_vm4, %v479_v33  ;;  %v391_v37 = vadd.f32 %v1015_v17, %v390_v35 }
 0x10f   :  { %v626_v38 = vpop.f32.mrf.mxu0  ;;  %v678_v39 = vpop.f32.mrf.mxu1 }
 0x110   :  { %v454_v40 = vmax.f32 %v287_v36, 0.0  ;;  %v480_v41 = vmax.f32 %v391_v37, 0.0 }
 0x111   :  { %v289_v42 = vpop.f32.mrf.mxu0  ;;  %v393_v43 = vpop.f32.mrf.mxu1 }
 0x112   :  { %504 = vst.msk [vmem:[%s1265_s3 + $0x50] sm:$0xff] %vm493_vm4, %v454_v40  ;;  %v290_v44 = vadd.f32 %v1015_v17, %v289_v42  ;;  %530 = vst.msk [vmem:[%s1265_s3 + $0x120] sm:$0xff] %vm493_vm4, %v480_v41  ;;  %v394_v45 = vadd.f32 %v1015_v17, %v393_v43 }
 0x113   :  { %v627_v46 = vpop.f32.mrf.mxu0  ;;  %v679_v47 = vpop.f32.mrf.mxu1 }
 0x114   :  { %v455_v48 = vmax.f32 %v290_v44, 0.0  ;;  %v481_v49 = vmax.f32 %v394_v45, 0.0 }
 0x115   :  { %v294_v50 = vpop.f32.mrf.mxu0  ;;  %v398_v51 = vpop.f32.mrf.mxu1 }
 0x116   :  { %505 = vst.msk [vmem:[%s1265_s3 + $0x58] sm:$0xff] %vm493_vm4, %v455_v48  ;;  %v295_v52 = vadd.f32 %v1015_v17, %v294_v50  ;;  %531 = vst.msk [vmem:[%s1265_s3 + $0x128] sm:$0xff] %vm493_vm4, %v481_v49  ;;  %v399_v53 = vadd.f32 %v1015_v17, %v398_v51 }
 0x117   :  { %v630_v54 = vpop.f32.mrf.mxu0  ;;  %v682_v55 = vpop.f32.mrf.mxu1 }
 0x118   :  { %v456_v56 = vmax.f32 %v295_v52, 0.0  ;;  %v482_v57 = vmax.f32 %v399_v53, 0.0 }
 0x119   :  { %v297_v58 = vpop.f32.mrf.mxu0  ;;  %v401_v59 = vpop.f32.mrf.mxu1 }
 0x11a   :  { %506 = vst.msk [vmem:[%s1265_s3 + $0x60] sm:$0xff] %vm493_vm4, %v456_v56  ;;  %v298_v60 = vadd.f32 %v1015_v17, %v297_v58  ;;  %532 = vst.msk [vmem:[%s1265_s3 + $0x130] sm:$0xff] %vm493_vm4, %v482_v57  ;;  %v402_v61 = vadd.f32 %v1015_v17, %v401_v59 }
 0x11b   :  { %v631_v62 = vpop.f32.mrf.mxu0  ;;  %v683_v63 = vpop.f32.mrf.mxu1 }
 0x11c   :  { %v457_v1 = vmax.f32 %v298_v60, 0.0  ;;  %v483_v2 = vmax.f32 %v402_v61, 0.0 }
 0x11d   :  { %v302_v3 = vpop.f32.mrf.mxu0  ;;  %v406_v4 = vpop.f32.mrf.mxu1 }
 0x11e   :  { %507 = vst.msk [vmem:[%s1265_s3 + $0x68] sm:$0xff] %vm493_vm4, %v457_v1  ;;  %v303_v5 = vadd.f32 %v1015_v17, %v302_v3  ;;  %533 = vst.msk [vmem:[%s1265_s3 + $0x138] sm:$0xff] %vm493_vm4, %v483_v2  ;;  %v407_v6 = vadd.f32 %v1015_v17, %v406_v4 }
 0x11f   :  { %v634_v7 = vpop.f32.mrf.mxu0  ;;  %v686_v8 = vpop.f32.mrf.mxu1 }
 0x120   :  { %v458_v9 = vmax.f32 %v303_v5, 0.0  ;;  %v484_v10 = vmax.f32 %v407_v6, 0.0 }
 0x121   :  { %v305_v11 = vpop.f32.mrf.mxu0  ;;  %v409_v12 = vpop.f32.mrf.mxu1 }
 0x122   :  { %508 = vst.msk [vmem:[%s1265_s3 + $0x70] sm:$0xff] %vm493_vm4, %v458_v9  ;;  %v306_v13 = vadd.f32 %v1015_v17, %v305_v11  ;;  %534 = vst.msk [vmem:[%s1265_s3 + $0x140] sm:$0xff] %vm493_vm4, %v484_v10  ;;  %v410_v14 = vadd.f32 %v1015_v17, %v409_v12 }
 0x123   :  { %v635_v15 = vpop.f32.mrf.mxu0  ;;  %v687_v16 = vpop.f32.mrf.mxu1 }
 0x124   :  { %v459_v18 = vmax.f32 %v306_v13, 0.0  ;;  %v485_v19 = vmax.f32 %v410_v14, 0.0 }
 0x125   :  { %v310_v20 = vpop.f32.mrf.mxu0  ;;  %v414_v21 = vpop.f32.mrf.mxu1 }
 0x126   :  { %509 = vst.msk [vmem:[%s1265_s3 + $0x78] sm:$0xff] %vm493_vm4, %v459_v18  ;;  %v311_v0 = vadd.f32 %v1015_v17, %v310_v20  ;;  %535 = vst.msk [vmem:[%s1265_s3 + $0x148] sm:$0xff] %vm493_vm4, %v485_v19  ;;  %v415_v22 = vadd.f32 %v1015_v17, %v414_v21 }
 0x127   :  { %v638_v23 = vpop.f32.mrf.mxu0  ;;  %v690_v24 = vpop.f32.mrf.mxu1 }
 0x128   :  { %v460_v25 = vmax.f32 %v311_v0, 0.0  ;;  %v486_v26 = vmax.f32 %v415_v22, 0.0 }
 0x129   :  { %v313_v27 = vpop.f32.mrf.mxu0  ;;  %v417_v28 = vpop.f32.mrf.mxu1 }
 0x12a   :  { %510 = vst.msk [vmem:[%s1265_s3 + $0x80] sm:$0xff] %vm493_vm4, %v460_v25  ;;  %v314_v29 = vadd.f32 %v1015_v17, %v313_v27  ;;  %536 = vst.msk [vmem:[%s1265_s3 + $0x150] sm:$0xff] %vm493_vm4, %v486_v26  ;;  %v418_v30 = vadd.f32 %v1015_v17, %v417_v28 }
 0x12b   :  { %v639_v31 = vpop.f32.mrf.mxu0  ;;  %v691_v32 = vpop.f32.mrf.mxu1 }
 0x12c   :  { %v461_v33 = vmax.f32 %v314_v29, 0.0  ;;  %v487_v34 = vmax.f32 %v418_v30, 0.0 }
 0x12d   :  { %v318_v35 = vpop.f32.mrf.mxu0  ;;  %v422_v36 = vpop.f32.mrf.mxu1 }
 0x12e   :  { %511 = vst.msk [vmem:[%s1265_s3 + $0x88] sm:$0xff] %vm493_vm4, %v461_v33  ;;  %v319_v37 = vadd.f32 %v1015_v17, %v318_v35  ;;  %537 = vst.msk [vmem:[%s1265_s3 + $0x158] sm:$0xff] %vm493_vm4, %v487_v34  ;;  %v423_v38 = vadd.f32 %v1015_v17, %v422_v36 }
 0x12f   :  { %v642_v39 = vpop.f32.mrf.mxu0  ;;  %v694_v40 = vpop.f32.mrf.mxu1 }
 0x130   :  { %v462_v41 = vmax.f32 %v319_v37, 0.0  ;;  %v488_v42 = vmax.f32 %v423_v38, 0.0 }
 0x131   :  { %v321_v43 = vpop.f32.mrf.mxu0  ;;  %v425_v44 = vpop.f32.mrf.mxu1 }
 0x132   :  { %512 = vst.msk [vmem:[%s1265_s3 + $0x90] sm:$0xff] %vm493_vm4, %v462_v41  ;;  %v322_v45 = vadd.f32 %v1015_v17, %v321_v43  ;;  %538 = vst.msk [vmem:[%s1265_s3 + $0x160] sm:$0xff] %vm493_vm4, %v488_v42  ;;  %v426_v46 = vadd.f32 %v1015_v17, %v425_v44 }
 0x133   :  { %v643_v47 = vpop.f32.mrf.mxu0  ;;  %v695_v48 = vpop.f32.mrf.mxu1 }
 0x134   :  { %v463_v49 = vmax.f32 %v322_v45, 0.0  ;;  %v489_v50 = vmax.f32 %v426_v46, 0.0 }
 0x135   :  { %v326_v51 = vpop.f32.mrf.mxu0  ;;  %v430_v52 = vpop.f32.mrf.mxu1 }
 0x136   :  { %513 = vst.msk [vmem:[%s1265_s3 + $0x98] sm:$0xff] %vm493_vm4, %v463_v49  ;;  %v327_v53 = vadd.f32 %v1015_v17, %v326_v51  ;;  %539 = vst.msk [vmem:[%s1265_s3 + $0x168] sm:$0xff] %vm493_vm4, %v489_v50  ;;  %v431_v54 = vadd.f32 %v1015_v17, %v430_v52 }
 0x137   :  { %v646_v55 = vpop.f32.mrf.mxu0  ;;  %v698_v56 = vpop.f32.mrf.mxu1 }
 0x138   :  { %v464_v57 = vmax.f32 %v327_v53, 0.0  ;;  %v490_v58 = vmax.f32 %v431_v54, 0.0 }
 0x139   :  { %v329_v59 = vpop.f32.mrf.mxu0  ;;  %v433_v60 = vpop.f32.mrf.mxu1 }
 0x13a   :  { %514 = vst.msk [vmem:[%s1265_s3 + $0xa0] sm:$0xff] %vm493_vm4, %v464_v57  ;;  %v330_v61 = vadd.f32 %v1015_v17, %v329_v59  ;;  %540 = vst.msk [vmem:[%s1265_s3 + $0x170] sm:$0xff] %vm493_vm4, %v490_v58  ;;  %v434_v62 = vadd.f32 %v1015_v17, %v433_v60 }
 0x13b   :  { %v647_v63 = vpop.f32.mrf.mxu0  ;;  %v699_v1 = vpop.f32.mrf.mxu1 }
 0x13c   :  { %v465_v2 = vmax.f32 %v330_v61, 0.0  ;;  %v491_v3 = vmax.f32 %v434_v62, 0.0 }
 0x13d   :  { %v334_v4 = vpop.f32.mrf.mxu0  ;;  %v438_v5 = vpop.f32.mrf.mxu1 }
 0x13e   :  { %515 = vst.msk [vmem:[%s1265_s3 + $0xa8] sm:$0xff] %vm493_vm4, %v465_v2  ;;  %v335_v6 = vadd.f32 %v1015_v17, %v334_v4  ;;  %541 = vst.msk [vmem:[%s1265_s3 + $0x178] sm:$0xff] %vm493_vm4, %v491_v3  ;;  %v439_v7 = vadd.f32 %v1015_v17, %v438_v5 }
 0x13f   :  { %v650_v8 = vpop.f32.mrf.mxu0  ;;  %v702_v9 = vpop.f32.mrf.mxu1 }
 0x140   :  { %v466_v10 = vmax.f32 %v335_v6, 0.0  ;;  %v492_v11 = vmax.f32 %v439_v7, 0.0 }
 0x141   :  { %v337_v12 = vpop.f32.mrf.mxu0  ;;  %v441_v13 = vpop.f32.mrf.mxu1 }
 0x142   :  { %516 = vst.msk [vmem:[%s1265_s3 + $0xb0] sm:$0xff] %vm493_vm4, %v466_v10  ;;  %v338_v14 = vadd.f32 %v1015_v17, %v337_v12  ;;  %542 = vst.msk [vmem:[%s1265_s3 + $0x180] sm:$0xff] %vm493_vm4, %v492_v11 }
 0x143   :  { %v651_v15 = vpop.f32.mrf.mxu0  ;;  %v703_v16 = vpop.f32.mrf.mxu1 }
 0x144   :  { %v467_v18 = vmax.f32 %v338_v14, 0.0 }
 0x145   :  { %v342_v19 = vpop.f32.mrf.mxu0 }
 0x146   :  { %517 = vst.msk [vmem:[%s1265_s3 + $0xb8] sm:$0xff] %vm493_vm4, %v467_v18  ;;  %v343_v20 = vadd.f32 %v1015_v17, %v342_v19 }
 0x147   :  { %v654_v21 = vpop.f32.mrf.mxu0 }
 0x148   :  { %v468_v0 = vmax.f32 %v343_v20, 0.0 }
 0x149   :  { %v345_v22 = vpop.f32.mrf.mxu0 }
 0x14a   :  { %518 = vst.msk [vmem:[%s1265_s3 + $0xc0] sm:$0xff] %vm493_vm4, %v468_v0  ;;  %v346_v23 = vadd.f32 %v1015_v17, %v345_v22 }
 0x14b   :  { %v655_v24 = vpop.f32.mrf.mxu0 }
 0x14c   :  { %v469_v25 = vmax.f32 %v346_v23, 0.0 }
 0x14e   :  { %519 = vst.msk [vmem:[%s1265_s3 + $0xc8] sm:$0xff] %vm493_vm4, %v469_v25 }
 0x14f   :  { %547 = vsyncpa [#allocation3], 1 }
 0x150   :  { %548 = vsyncpa [#allocation5], 1 }

// kernel: vae_forward.6
= control target key start
LH: loop header
LB: loop body
LE: loop exit
PB: predicated region body
PF: predicated region fallthrough
CT: control target
= control target key end

     0   :  { %v601_v1 = vmov 0.0   ;;  %vm602_vm0 = vmmov 0   ;;  %vm226_vm1 = vcmask 261120   ;;  %vm437_vm2 = vcmask 523264   ;;  %s886_s1 = inlined_call_operand.vmem [shape: bf16[288,64], index: 1, kind: input, shape index: {}]   ;;  %s887_s0 = inlined_call_operand.vmem [shape: f32[98,288], index: 0, kind: input, shape index: {}]   ;;  %s888_s2 = inlined_call_operand.vmem [shape: f32[1,64], index: 2, kind: input, shape index: {}]   ;;  %s889_s3 = inlined_call_operand.vmem [shape: f32[98,64], index: 3, kind: output, shape index: {}]  }
   0x1   :  { %v583_v0 = vld [vmem:[%s886_s1 + $0x78] sm:$0xff]   ;;  %549 = vmatprep.subr.bf16.mxu1 %v601_v1  ;;  %553 = vmatprep.mubr.msk.bf16.mxu1 %vm602_vm0, %v601_v1  ;;  %v585_v3 = vld [vmem:[%s886_s1 + $0x70] sm:$0xff]   ;;  %v587_v5 = vld [vmem:[%s886_s1 + $0x68] sm:$0xff]   ;;  %vm450_vm3 = vcmask 517120  }
   0x2   :  { %v584_v2 = vld [vmem:[%s886_s1 + $0x38] sm:$0xff]   ;;  %482 = vmatprep.subr.bf16.mxu0 %v583_v0  ;;  %v586_v4 = vld [vmem:[%s886_s1 + $0x30] sm:$0xff]   ;;  %v588_v6 = vld [vmem:[%s886_s1 + $0x28] sm:$0xff]  }
   0x3   :  { %483 = vmatpush3.bf16.msra.mxu0 %v584_v2  ;;  %v589_v7 = vld [vmem:[%s886_s1 + $0x60] sm:$0xff]   ;;  %v591_v9 = vld [vmem:[%s886_s1 + $0x58] sm:$0xff]   ;;  %v596_v10 = vld [vmem:[%s886_s1 + $0x88] sm:$0xff]  }
   0x4   :  { %484 = vmatprep.subr.bf16.mxu0 %v585_v3  ;;  %v590_v8 = vld [vmem:[%s886_s1 + $0x20] sm:$0xff]   ;;  %v592_v11 = vld [vmem:[%s886_s1 + $0x18] sm:$0xff]   ;;  %v593_v12 = vld [vmem:[%s886_s1 + $0x50] sm:$0xff]   ;;  %550 = vmatpush3.bf16.msra.mxu1 %v596_v10 }
   0x5   :  { %551 = vmatprep.subr.bf16.mxu1 %v601_v1  ;;  %v599_v13 = vld [vmem:[%s886_s1 + $0x80] sm:$0xff]   ;;  %v16_v14 = vld [vmem:[%s887_s0 + $0x8] sm:$0xff]  ;;  %v17_v16 = vld [vmem:[%s887_s0 + $0x10] sm:$0xff] }
   0x6   :  { %v19_v15 = vld [vmem:[%s887_s0 + $0x20] sm:$0xff]  ;;  %v594_v17 = vld [vmem:[%s886_s1 + $0x10] sm:$0xff]   ;;  %v20_v19 = vld [vmem:[%s887_s0 + $0x28] sm:$0xff] }
   0x7   :  { %485 = vmatpush3.bf16.msra.mxu0 %v586_v4  ;;  %v55_v18 = vpack.c.bf16 %v19_v15, %v16_v14  ;;  %v595_v20 = vld [vmem:[%s886_s1 + $0x48] sm:$0xff]   ;;  %v56_v21 = vpack.c.bf16 %v20_v19, %v17_v16  ;;  %v23_v23 = vld [vmem:[%s887_s0 + $0x40] sm:$0xff]  ;;  %v26_v24 = vld [vmem:[%s887_s0 + $0x58] sm:$0xff] }
   0x8   :  { %486 = vmatprep.subr.bf16.mxu0 %v587_v5  ;;  %552 = vmatpush3.bf16.msra.mxu1 %v599_v13  ;;  %v597_v22 = vld [vmem:[%s886_s1 + $0x8] sm:$0xff]   ;;  %v598_v25 = vld [vmem:[%s886_s1 + $0x40] sm:$0xff]   ;;  %v59_v26 = vpack.c.bf16 %v26_v24, %v23_v23  ;;  %v18_v29 = vld [vmem:[%s887_s0 + $0x18] sm:$0xff] }
   0x9   :  { %280 = vmatprep.mubr.bf16.mxu0 %v55_v18  ;;  %v600_v27 = vld [vmem:[%s886_s1] sm:$0xff]   ;;  %v22_v30 = vld [vmem:[%s887_s0 + $0x38] sm:$0xff]  ;;  %v25_v31 = vld [vmem:[%s887_s0 + $0x50] sm:$0xff] }
   0xa   :  { %v15_v28 = vld [vmem:[%s887_s0] sm:$0xff]  ;;  %v58_v33 = vpack.c.bf16 %v25_v31, %v22_v30  ;;  %v29_v34 = vld [vmem:[%s887_s0 + $0x70] sm:$0xff]  ;;  %v32_v35 = vld [vmem:[%s887_s0 + $0x88] sm:$0xff] }
   0xb   :  { %487 = vmatpush3.bf16.msra.mxu0 %v588_v6  ;;  %554 = vmatmul.mubr.msk.bf16.vlgmr.msra.gmra.mxu1 %vm226_vm1, %v56_v21  ;;  %v54_v32 = vpack.c.bf16 %v18_v29, %v15_v28  ;;  %v62_v36 = vpack.c.bf16 %v32_v35, %v29_v34  ;;  %v21_v37 = vld [vmem:[%s887_s0 + $0x30] sm:$0xff]  ;;  %v24_v38 = vld [vmem:[%s887_s0 + $0x48] sm:$0xff]  ;;  %v31_v40 = vld [vmem:[%s887_s0 + $0x80] sm:$0xff] }
   0xc   :  { %488 = vmatprep.subr.bf16.mxu0 %v589_v7  ;;  %557 = vmatprep.mubr.msk.bf16.mxu1 %vm602_vm0, %v601_v1  ;;  %v28_v39 = vld [vmem:[%s887_s0 + $0x68] sm:$0xff]  ;;  %v57_v41 = vpack.c.bf16 %v24_v38, %v21_v37  ;;  %v35_v43 = vld [vmem:[%s887_s0 + $0xa0] sm:$0xff]  ;;  %v38_v44 = vld [vmem:[%s887_s0 + $0xb8] sm:$0xff] }
   0xd   :  { %v61_v42 = vpack.c.bf16 %v31_v40, %v28_v39  ;;  %v65_v45 = vpack.c.bf16 %v38_v44, %v35_v43  ;;  %v27_v46 = vld [vmem:[%s887_s0 + $0x60] sm:$0xff]  ;;  %v30_v47 = vld [vmem:[%s887_s0 + $0x78] sm:$0xff]  ;;  %v37_v49 = vld [vmem:[%s887_s0 + $0xb0] sm:$0xff] }
   0xe   :  { %v34_v48 = vld [vmem:[%s887_s0 + $0x98] sm:$0xff]  ;;  %v60_v50 = vpack.c.bf16 %v30_v47, %v27_v46  ;;  %v41_v52 = vld [vmem:[%s887_s0 + $0xd0] sm:$0xff]  ;;  %v44_v53 = vld [vmem:[%s887_s0 + $0xe8] sm:$0xff] }
   0xf   :  { %489 = vmatpush3.bf16.msra.mxu0 %v590_v8  ;;  %v64_v51 = vpack.c.bf16 %v37_v49, %v34_v48  ;;  %v68_v54 = vpack.c.bf16 %v44_v53, %v41_v52  ;;  %v33_v55 = vld [vmem:[%s887_s0 + $0x90] sm:$0xff]  ;;  %v36_v56 = vld [vmem:[%s887_s0 + $0xa8] sm:$0xff]  ;;  %v43_v58 = vld [vmem:[%s887_s0 + $0xe0] sm:$0xff] }
  0x10   :  { %490 = vmatprep.subr.bf16.mxu0 %v591_v9  ;;  %v40_v57 = vld [vmem:[%s887_s0 + $0xc8] sm:$0xff]  ;;  %v63_v59 = vpack.c.bf16 %v36_v56, %v33_v55  ;;  %v47_v61 = vld [vmem:[%s887_s0 + $0x100] sm:$0xff]  ;;  %v50_v62 = vld [vmem:[%s887_s0 + $0x118] sm:$0xff] }
  0x11   :  { %v67_v60 = vpack.c.bf16 %v43_v58, %v40_v57  ;;  %v71_v63 = vpack.c.bf16 %v50_v62, %v47_v61  ;;  %v39_v0 = vld [vmem:[%s887_s0 + $0xc0] sm:$0xff]  ;;  %v42_v2 = vld [vmem:[%s887_s0 + $0xd8] sm:$0xff]  ;;  %v49_v4 = vld [vmem:[%s887_s0 + $0x110] sm:$0xff] }
  0x12   :  { %v46_v3 = vld [vmem:[%s887_s0 + $0xf8] sm:$0xff]  ;;  %v66_v5 = vpack.c.bf16 %v42_v2, %v39_v0  ;;  %v53_v7 = vld [vmem:[%s887_s0 + $0x130] sm:$0x3]  ;;  %v48_v10 = vld [vmem:[%s887_s0 + $0x108] sm:$0xff] }
  0x13   :  { %491 = vmatpush3.bf16.msra.mxu0 %v592_v11  ;;  %558 = vmatmul.mubr.msk.bf16.gmra.mxu1 %vm226_vm1, %v59_v26  ;;  %v70_v6 = vpack.c.bf16 %v49_v4, %v46_v3  ;;  %v74_v8 = vpack.c.bf16 %v53_v7, %v53_v7  ;;  %v45_v9 = vld [vmem:[%s887_s0 + $0xf0] sm:$0xff]  ;;  %v52_v11 = vld [vmem:[%s887_s0 + $0x128] sm:$0x3]  ;;  %v51_v13 = vld [vmem:[%s887_s0 + $0x120] sm:$0x3] }
  0x14   :  { %492 = vmatprep.subr.bf16.mxu0 %v593_v12  ;;  %561 = vmatprep.mubr.msk.bf16.mxu1 %vm602_vm0, %v601_v1  ;;  %v73_v12 = vpack.c.bf16 %v52_v11, %v52_v11  ;;  %v72_v14 = vpack.c.bf16 %v51_v13, %v51_v13  ;;  %v820_v23 = vld [vmem:[%s888_s2] ss:$0 sm:$0xff] }
  0x17   :  { %493 = vmatpush3.bf16.msra.mxu0 %v594_v17 }
  0x18   :  { %494 = vmatprep.subr.bf16.mxu0 %v595_v20 }
  0x1b   :  { %495 = vmatpush3.bf16.msra.mxu0 %v597_v22  ;;  %562 = vmatmul.mubr.msk.bf16.gmra.mxu1 %vm226_vm1, %v62_v36 }
  0x1c   :  { %496 = vmatprep.subr.bf16.mxu0 %v598_v25  ;;  %565 = vmatprep.mubr.msk.bf16.mxu1 %vm602_vm0, %v601_v1 }
  0x1f   :  { %497 = vmatpush3.bf16.msra.mxu0 %v600_v27 }
  0x22   :  { %281 = vmatmul.mubr.bf16.vlgmr.msra.gmra.mxu0 %v54_v32 }
  0x23   :  { %288 = vmatprep.mubr.bf16.mxu0 %v58_v33  ;;  %566 = vmatmul.mubr.msk.bf16.gmra.mxu1 %vm226_vm1, %v65_v45 }
  0x24   :  { %569 = vmatprep.mubr.msk.bf16.mxu1 %vm602_vm0, %v601_v1 }
  0x2a   :  { %289 = vmatmul.mubr.bf16.gmra.mxu0 %v57_v41 }
  0x2b   :  { %296 = vmatprep.mubr.bf16.mxu0 %v61_v42  ;;  %570 = vmatmul.mubr.msk.bf16.gmra.mxu1 %vm226_vm1, %v68_v54 }
  0x2c   :  { %573 = vmatprep.mubr.msk.bf16.mxu1 %vm602_vm0, %v601_v1 }
  0x32   :  { %297 = vmatmul.mubr.bf16.gmra.mxu0 %v60_v50 }
  0x33   :  { %304 = vmatprep.mubr.bf16.mxu0 %v64_v51  ;;  %574 = vmatmul.mubr.msk.bf16.gmra.mxu1 %vm226_vm1, %v71_v63 }
  0x34   :  { %577 = vmatprep.mubr.msk.bf16.mxu1 %vm602_vm0, %v601_v1  ;;  %v69_v1 = vpack.c.bf16 %v48_v10, %v45_v9 }
  0x3a   :  { %305 = vmatmul.mubr.bf16.gmra.mxu0 %v63_v59 }
  0x3b   :  { %312 = vmatprep.mubr.bf16.mxu0 %v67_v60  ;;  %578 = vmatmul.mubr.msk.bf16.gmra.mxu1 %vm226_vm1, %v74_v8 }
  0x42   :  { %313 = vmatmul.mubr.bf16.gmra.mxu0 %v66_v5 }
  0x43   :  { %320 = vmatprep.mubr.bf16.mxu0 %v70_v6 }
  0x4a   :  { %321 = vmatmul.mubr.bf16.gmra.mxu0 %v69_v1 }
  0x4b   :  { %328 = vmatprep.mubr.bf16.mxu0 %v73_v12 }
  0x52   :  { %329 = vmatmul.mubr.bf16.gmra.mxu0 %v72_v14 }
  0xcb   :  { %v370_v15 = vpop.f32.mrf.mxu1 }
  0xcd   :  { %v555_v16 = vpop.f32.mrf.mxu1 }
  0xcf   :  { %v373_v17 = vpop.f32.mrf.mxu1 }
  0xd1   :  { %v556_v18 = vpop.f32.mrf.mxu1 }
  0xd3   :  { %v378_v19 = vpop.f32.mrf.mxu1 }
  0xd5   :  { %v559_v20 = vpop.f32.mrf.mxu1 }
  0xd7   :  { %v381_v22 = vpop.f32.mrf.mxu1 }
  0xd9   :  { %v560_v25 = vpop.f32.mrf.mxu1 }
  0xdb   :  { %v386_v28 = vpop.f32.mrf.mxu1 }
  0xdd   :  { %v563_v31 = vpop.f32.mrf.mxu1 }
  0xdf   :  { %v389_v35 = vpop.f32.mrf.mxu1 }
  0xe1   :  { %v564_v39 = vpop.f32.mrf.mxu1 }
  0xe2   :  { %v498_v21 = vpop.f32.mrf.mxu0 }
  0xe3   :  { %v394_v43 = vpop.f32.mrf.mxu1 }
  0xe4   :  { %v499_v24 = vpop.f32.mrf.mxu0 }
  0xe5   :  { %v500_v26 = vadd.f32 %v499_v24, %v498_v21  ;;  %v567_v47 = vpop.f32.mrf.mxu1 }
  0xe6   :  { %v501_v27 = vpop.f32.mrf.mxu0 }
  0xe7   :  { %v283_v29 = vadd.f32 %v500_v26, %v820_v23  ;;  %v397_v51 = vpop.f32.mrf.mxu1 }
  0xe8   :  { %v502_v30 = vpop.f32.mrf.mxu0 }
  0xe9   :  { %v371_v32 = vadd.f32 %v370_v15, %v283_v29  ;;  %v503_v33 = vadd.f32 %v502_v30, %v501_v27  ;;  %v568_v55 = vpop.f32.mrf.mxu1 }
  0xea   :  { %v504_v34 = vpop.f32.mrf.mxu0 }
  0xeb   :  { %v424_v36 = vmax.f32 %v371_v32, 0.0  ;;  %v286_v37 = vadd.f32 %v503_v33, %v820_v23  ;;  %v402_v59 = vpop.f32.mrf.mxu1 }
  0xec   :  { %v505_v38 = vpop.f32.mrf.mxu0 }
  0xed   :  { %438 = vst.msk [vmem:[%s889_s3] sm:$0xff] %vm437_vm2, %v424_v36  ;;  %v374_v40 = vadd.f32 %v373_v17, %v286_v37  ;;  %v506_v41 = vadd.f32 %v505_v38, %v504_v34  ;;  %v571_v63 = vpop.f32.mrf.mxu1 }
  0xee   :  { %v507_v42 = vpop.f32.mrf.mxu0 }
  0xef   :  { %v425_v44 = vmax.f32 %v374_v40, 0.0  ;;  %v291_v45 = vadd.f32 %v506_v41, %v820_v23  ;;  %v405_v4 = vpop.f32.mrf.mxu1 }
  0xf0   :  { %v508_v46 = vpop.f32.mrf.mxu0 }
  0xf1   :  { %439 = vst.msk [vmem:[%s889_s3 + $0x8] sm:$0xff] %vm437_vm2, %v425_v44  ;;  %v379_v48 = vadd.f32 %v378_v19, %v291_v45  ;;  %v509_v49 = vadd.f32 %v508_v46, %v507_v42  ;;  %v572_v8 = vpop.f32.mrf.mxu1 }
  0xf2   :  { %v510_v50 = vpop.f32.mrf.mxu0 }
  0xf3   :  { %v426_v52 = vmax.f32 %v379_v48, 0.0  ;;  %v294_v53 = vadd.f32 %v509_v49, %v820_v23  ;;  %v410_v1 = vpop.f32.mrf.mxu1 }
  0xf4   :  { %v511_v54 = vpop.f32.mrf.mxu0 }
  0xf5   :  { %440 = vst.msk [vmem:[%s889_s3 + $0x10] sm:$0xff] %vm437_vm2, %v426_v52  ;;  %v382_v56 = vadd.f32 %v381_v22, %v294_v53  ;;  %v512_v57 = vadd.f32 %v511_v54, %v510_v50  ;;  %v575_v15 = vpop.f32.mrf.mxu1 }
  0xf6   :  { %v513_v58 = vpop.f32.mrf.mxu0 }
  0xf7   :  { %v427_v60 = vmax.f32 %v382_v56, 0.0  ;;  %v299_v61 = vadd.f32 %v512_v57, %v820_v23  ;;  %v413_v19 = vpop.f32.mrf.mxu1 }
  0xf8   :  { %v514_v62 = vpop.f32.mrf.mxu0 }
  0xf9   :  { %441 = vst.msk [vmem:[%s889_s3 + $0x18] sm:$0xff] %vm437_vm2, %v427_v60  ;;  %v387_v0 = vadd.f32 %v386_v28, %v299_v61  ;;  %v515_v2 = vadd.f32 %v514_v62, %v513_v58  ;;  %v576_v24 = vpop.f32.mrf.mxu1 }
  0xfa   :  { %v516_v3 = vpop.f32.mrf.mxu0 }
  0xfb   :  { %v428_v5 = vmax.f32 %v387_v0, 0.0  ;;  %v302_v6 = vadd.f32 %v515_v2, %v820_v23  ;;  %v418_v28 = vpop.f32.mrf.mxu1 }
  0xfc   :  { %v517_v7 = vpop.f32.mrf.mxu0 }
  0xfd   :  { %442 = vst.msk [vmem:[%s889_s3 + $0x20] sm:$0xff] %vm437_vm2, %v428_v5  ;;  %v390_v9 = vadd.f32 %v389_v35, %v302_v6  ;;  %v518_v10 = vadd.f32 %v517_v7, %v516_v3  ;;  %v579_v32 = vpop.f32.mrf.mxu1 }
  0xfe   :  { %v519_v11 = vpop.f32.mrf.mxu0 }
  0xff   :  { %v429_v12 = vmax.f32 %v390_v9, 0.0  ;;  %v307_v13 = vadd.f32 %v518_v10, %v820_v23  ;;  %v421_v36 = vpop.f32.mrf.mxu1 }
 0x100   :  { %v520_v14 = vpop.f32.mrf.mxu0 }
 0x101   :  { %443 = vst.msk [vmem:[%s889_s3 + $0x28] sm:$0xff] %vm437_vm2, %v429_v12  ;;  %v395_v16 = vadd.f32 %v394_v43, %v307_v13  ;;  %v521_v17 = vadd.f32 %v520_v14, %v519_v11  ;;  %v580_v40 = vpop.f32.mrf.mxu1 }
 0x102   :  { %v522_v18 = vpop.f32.mrf.mxu0 }
 0x103   :  { %v430_v20 = vmax.f32 %v395_v16, 0.0  ;;  %v310_v21 = vadd.f32 %v521_v17, %v820_v23 }
 0x104   :  { %v523_v22 = vpop.f32.mrf.mxu0 }
 0x105   :  { %444 = vst.msk [vmem:[%s889_s3 + $0x30] sm:$0xff] %vm437_vm2, %v430_v20  ;;  %v398_v25 = vadd.f32 %v397_v51, %v310_v21  ;;  %v524_v26 = vadd.f32 %v523_v22, %v522_v18 }
 0x106   :  { %v525_v27 = vpop.f32.mrf.mxu0 }
 0x107   :  { %v431_v29 = vmax.f32 %v398_v25, 0.0  ;;  %v315_v30 = vadd.f32 %v524_v26, %v820_v23 }
 0x108   :  { %v526_v31 = vpop.f32.mrf.mxu0 }
 0x109   :  { %445 = vst.msk [vmem:[%s889_s3 + $0x38] sm:$0xff] %vm437_vm2, %v431_v29  ;;  %v403_v33 = vadd.f32 %v402_v59, %v315_v30  ;;  %v527_v34 = vadd.f32 %v526_v31, %v525_v27 }
 0x10a   :  { %v528_v35 = vpop.f32.mrf.mxu0 }
 0x10b   :  { %v432_v37 = vmax.f32 %v403_v33, 0.0  ;;  %v318_v38 = vadd.f32 %v527_v34, %v820_v23 }
 0x10c   :  { %v529_v39 = vpop.f32.mrf.mxu0 }
 0x10d   :  { %446 = vst.msk [vmem:[%s889_s3 + $0x40] sm:$0xff] %vm437_vm2, %v432_v37  ;;  %v406_v41 = vadd.f32 %v405_v4, %v318_v38  ;;  %v530_v42 = vadd.f32 %v529_v39, %v528_v35 }
 0x10e   :  { %v531_v43 = vpop.f32.mrf.mxu0 }
 0x10f   :  { %v433_v44 = vmax.f32 %v406_v41, 0.0  ;;  %v323_v45 = vadd.f32 %v530_v42, %v820_v23 }
 0x110   :  { %v532_v46 = vpop.f32.mrf.mxu0 }
 0x111   :  { %447 = vst.msk [vmem:[%s889_s3 + $0x48] sm:$0xff] %vm437_vm2, %v433_v44  ;;  %v411_v47 = vadd.f32 %v410_v1, %v323_v45  ;;  %v533_v48 = vadd.f32 %v532_v46, %v531_v43 }
 0x112   :  { %v534_v49 = vpop.f32.mrf.mxu0 }
 0x113   :  { %v434_v50 = vmax.f32 %v411_v47, 0.0  ;;  %v326_v51 = vadd.f32 %v533_v48, %v820_v23 }
 0x114   :  { %v535_v52 = vpop.f32.mrf.mxu0 }
 0x115   :  { %448 = vst.msk [vmem:[%s889_s3 + $0x50] sm:$0xff] %vm437_vm2, %v434_v50  ;;  %v414_v53 = vadd.f32 %v413_v19, %v326_v51  ;;  %v536_v54 = vadd.f32 %v535_v52, %v534_v49 }
 0x116   :  { %v537_v55 = vpop.f32.mrf.mxu0 }
 0x117   :  { %v435_v56 = vmax.f32 %v414_v53, 0.0  ;;  %v331_v57 = vadd.f32 %v536_v54, %v820_v23 }
 0x118   :  { %v538_v58 = vpop.f32.mrf.mxu0 }
 0x119   :  { %449 = vst.msk [vmem:[%s889_s3 + $0x58] sm:$0xff] %vm437_vm2, %v435_v56  ;;  %v419_v59 = vadd.f32 %v418_v28, %v331_v57 }
 0x11b   :  { %v436_v60 = vmax.f32 %v419_v59, 0.0 }
 0x11d   :  { %451 = vst.msk [vmem:[%s889_s3 + $0x60] sm:$0x3] %vm450_vm3, %v436_v60 }

// kernel: vae_forward.8
= control target key start
LH: loop header
LB: loop body
LE: loop exit
PB: predicated region body
PF: predicated region fallthrough
CT: control target
= control target key end

     0   :  { %s618_s1 = inlined_call_operand.vmem [shape: bf16[256,128], index: 1, kind: input, shape index: {}]   ;;  %s619_s0 = inlined_call_operand.vmem [shape: f32[98,256], index: 0, kind: input, shape index: {}]   ;;  %s620_s2 = inlined_call_operand.vmem [shape: f32[1,128], index: 2, kind: input, shape index: {}]   ;;  %s621_s3 = inlined_call_operand.vmem [shape: f32[98,128], index: 3, kind: output, shape index: {}]  }
   0x1   :  { %v399_v0 = vld [vmem:[%s618_s1 + $0x78] sm:$0xff]   ;;  %v401_v2 = vld [vmem:[%s618_s1 + $0x70] sm:$0xff]   ;;  %v403_v4 = vld [vmem:[%s618_s1 + $0x68] sm:$0xff]  }
   0x2   :  { %v400_v1 = vld [vmem:[%s618_s1 + $0x38] sm:$0xff]   ;;  %325 = vmatprep.subr.bf16.mxu0 %v399_v0  ;;  %383 = vmatprep.subr.bf16.mxu1 %v399_v0  ;;  %v402_v3 = vld [vmem:[%s618_s1 + $0x30] sm:$0xff]   ;;  %v404_v5 = vld [vmem:[%s618_s1 + $0x28] sm:$0xff]  }
   0x3   :  { %326 = vmatpush3.bf16.msra.mxu0 %v400_v1  ;;  %391 = vmatpush3.bf16.msra.mxu1 %v400_v1  ;;  %v405_v6 = vld [vmem:[%s618_s1 + $0x60] sm:$0xff]   ;;  %v407_v8 = vld [vmem:[%s618_s1 + $0x58] sm:$0xff]   ;;  %v409_v10 = vld [vmem:[%s618_s1 + $0x50] sm:$0xff]  }
   0x4   :  { %327 = vmatprep.subr.bf16.mxu0 %v401_v2  ;;  %384 = vmatprep.subr.bf16.mxu1 %v401_v2  ;;  %v406_v7 = vld [vmem:[%s618_s1 + $0x20] sm:$0xff]   ;;  %v408_v9 = vld [vmem:[%s618_s1 + $0x18] sm:$0xff]   ;;  %v16_v11 = vld [vmem:[%s619_s0 + $0x8] sm:$0xff] }
   0x5   :  { %v18_v12 = vld [vmem:[%s619_s0 + $0x18] sm:$0xff]  ;;  %v32_v14 = vld [vmem:[%s619_s0 + $0x88] sm:$0xff]  ;;  %v410_v17 = vld [vmem:[%s618_s1 + $0x10] sm:$0xff]  }
   0x6   :  { %v42_v13 = vpack.c.bf16 %v18_v12, %v16_v11  ;;  %v34_v15 = vld [vmem:[%s619_s0 + $0x98] sm:$0xff]  ;;  %v411_v18 = vld [vmem:[%s618_s1 + $0x48] sm:$0xff]   ;;  %v413_v20 = vld [vmem:[%s618_s1 + $0x40] sm:$0xff]  }
   0x7   :  { %328 = vmatpush3.bf16.msra.mxu0 %v402_v3  ;;  %392 = vmatpush3.bf16.msra.mxu1 %v402_v3  ;;  %v50_v16 = vpack.c.bf16 %v34_v15, %v32_v14  ;;  %v412_v19 = vld [vmem:[%s618_s1 + $0x8] sm:$0xff]   ;;  %v414_v21 = vld [vmem:[%s618_s1] sm:$0xff]   ;;  %v17_v23 = vld [vmem:[%s619_s0 + $0x10] sm:$0xff] }
   0x8   :  { %329 = vmatprep.subr.bf16.mxu0 %v403_v4  ;;  %385 = vmatprep.subr.bf16.mxu1 %v403_v4  ;;  %v15_v22 = vld [vmem:[%s619_s0] sm:$0xff]  ;;  %v33_v25 = vld [vmem:[%s619_s0 + $0x90] sm:$0xff]  ;;  %v20_v26 = vld [vmem:[%s619_s0 + $0x28] sm:$0xff] }
   0x9   :  { %222 = vmatprep.mubr.bf16.mxu0 %v42_v13  ;;  %254 = vmatprep.mubr.bf16.mxu1 %v50_v16  ;;  %v31_v24 = vld [vmem:[%s619_s0 + $0x80] sm:$0xff]  ;;  %v22_v27 = vld [vmem:[%s619_s0 + $0x38] sm:$0xff]  ;;  %v36_v28 = vld [vmem:[%s619_s0 + $0xa8] sm:$0xff]  ;;  %v41_v30 = vpack.c.bf16 %v17_v23, %v15_v22 }
   0xa   :  { %v38_v29 = vld [vmem:[%s619_s0 + $0xb8] sm:$0xff]  ;;  %v49_v31 = vpack.c.bf16 %v33_v25, %v31_v24  ;;  %v44_v32 = vpack.c.bf16 %v22_v27, %v20_v26  ;;  %v19_v34 = vld [vmem:[%s619_s0 + $0x20] sm:$0xff]  ;;  %v21_v35 = vld [vmem:[%s619_s0 + $0x30] sm:$0xff] }
   0xb   :  { %330 = vmatpush3.bf16.msra.mxu0 %v404_v5  ;;  %393 = vmatpush3.bf16.msra.mxu1 %v404_v5  ;;  %v52_v33 = vpack.c.bf16 %v38_v29, %v36_v28  ;;  %v35_v36 = vld [vmem:[%s619_s0 + $0xa0] sm:$0xff]  ;;  %v37_v37 = vld [vmem:[%s619_s0 + $0xb0] sm:$0xff]  ;;  %v24_v38 = vld [vmem:[%s619_s0 + $0x48] sm:$0xff]  ;;  %v43_v41 = vpack.c.bf16 %v21_v35, %v19_v34 }
   0xc   :  { %331 = vmatprep.subr.bf16.mxu0 %v405_v6  ;;  %386 = vmatprep.subr.bf16.mxu1 %v405_v6  ;;  %v26_v39 = vld [vmem:[%s619_s0 + $0x58] sm:$0xff]  ;;  %v40_v40 = vld [vmem:[%s619_s0 + $0xc8] sm:$0x3]  ;;  %v51_v42 = vpack.c.bf16 %v37_v37, %v35_v36  ;;  %v23_v45 = vld [vmem:[%s619_s0 + $0x40] sm:$0xff] }
   0xd   :  { %v46_v43 = vpack.c.bf16 %v26_v39, %v24_v38  ;;  %v54_v44 = vpack.c.bf16 %v40_v40, %v40_v40  ;;  %v25_v46 = vld [vmem:[%s619_s0 + $0x50] sm:$0xff]  ;;  %v39_v47 = vld [vmem:[%s619_s0 + $0xc0] sm:$0x3]  ;;  %v28_v48 = vld [vmem:[%s619_s0 + $0x68] sm:$0xff] }
   0xe   :  { %v30_v49 = vld [vmem:[%s619_s0 + $0x78] sm:$0xff]  ;;  %v45_v50 = vpack.c.bf16 %v25_v46, %v23_v45  ;;  %v53_v51 = vpack.c.bf16 %v39_v47, %v39_v47  ;;  %v27_v53 = vld [vmem:[%s619_s0 + $0x60] sm:$0xff]  ;;  %v29_v54 = vld [vmem:[%s619_s0 + $0x70] sm:$0xff] }
   0xf   :  { %332 = vmatpush3.bf16.msra.mxu0 %v406_v7  ;;  %394 = vmatpush3.bf16.msra.mxu1 %v406_v7  ;;  %v48_v52 = vpack.c.bf16 %v30_v49, %v28_v48  ;;  %v47_v55 = vpack.c.bf16 %v29_v54, %v27_v53  ;;  %v564_v58 = vld [vmem:[%s620_s2] ss:$0 sm:$0xff] }
  0x10   :  { %333 = vmatprep.subr.bf16.mxu0 %v407_v8  ;;  %387 = vmatprep.subr.bf16.mxu1 %v407_v8 }
  0x13   :  { %334 = vmatpush3.bf16.msra.mxu0 %v408_v9  ;;  %395 = vmatpush3.bf16.msra.mxu1 %v408_v9 }
  0x14   :  { %335 = vmatprep.subr.bf16.mxu0 %v409_v10  ;;  %388 = vmatprep.subr.bf16.mxu1 %v409_v10 }
  0x17   :  { %336 = vmatpush3.bf16.msra.mxu0 %v410_v17  ;;  %396 = vmatpush3.bf16.msra.mxu1 %v410_v17 }
  0x18   :  { %337 = vmatprep.subr.bf16.mxu0 %v411_v18  ;;  %389 = vmatprep.subr.bf16.mxu1 %v411_v18 }
  0x1b   :  { %338 = vmatpush3.bf16.msra.mxu0 %v412_v19  ;;  %397 = vmatpush3.bf16.msra.mxu1 %v412_v19 }
  0x1c   :  { %339 = vmatprep.subr.bf16.mxu0 %v413_v20  ;;  %390 = vmatprep.subr.bf16.mxu1 %v413_v20 }
  0x1f   :  { %340 = vmatpush3.bf16.msra.mxu0 %v414_v21  ;;  %398 = vmatpush3.bf16.msra.mxu1 %v414_v21 }
  0x22   :  { %223 = vmatmul.mubr.bf16.vlgmr.msra.gmra.mxu0 %v41_v30  ;;  %255 = vmatmul.mubr.bf16.vlgmr.msra.gmra.mxu1 %v49_v31 }
  0x23   :  { %230 = vmatprep.mubr.bf16.mxu0 %v44_v32  ;;  %262 = vmatprep.mubr.bf16.mxu1 %v52_v33 }
  0x2a   :  { %231 = vmatmul.mubr.bf16.gmra.mxu0 %v43_v41  ;;  %263 = vmatmul.mubr.bf16.gmra.mxu1 %v51_v42 }
  0x2b   :  { %238 = vmatprep.mubr.bf16.mxu0 %v46_v43  ;;  %270 = vmatprep.mubr.bf16.mxu1 %v54_v44 }
  0x32   :  { %239 = vmatmul.mubr.bf16.gmra.mxu0 %v45_v50  ;;  %271 = vmatmul.mubr.bf16.gmra.mxu1 %v53_v51 }
  0x33   :  { %246 = vmatprep.mubr.bf16.mxu0 %v48_v52 }
  0x3a   :  { %247 = vmatmul.mubr.bf16.gmra.mxu0 %v47_v55 }
  0xe2   :  { %v341_v56 = vpop.f32.mrf.mxu0  ;;  %v365_v57 = vpop.f32.mrf.mxu1 }
  0xe4   :  { %v342_v59 = vpop.f32.mrf.mxu0  ;;  %v366_v60 = vpop.f32.mrf.mxu1 }
  0xe5   :  { %v343_v61 = vadd.f32 %v342_v59, %v341_v56  ;;  %v367_v62 = vadd.f32 %v366_v60, %v365_v57 }
  0xe6   :  { %v344_v63 = vpop.f32.mrf.mxu0  ;;  %v368_v0 = vpop.f32.mrf.mxu1 }
  0xe7   :  { %v225_v1 = vadd.f32 %v343_v61, %v564_v58  ;;  %v257_v2 = vadd.f32 %v367_v62, %v564_v58 }
  0xe8   :  { %v345_v3 = vpop.f32.mrf.mxu0  ;;  %v369_v4 = vpop.f32.mrf.mxu1 }
  0xe9   :  { %v278_v5 = vmax.f32 %v225_v1, 0.0  ;;  %v346_v6 = vadd.f32 %v345_v3, %v344_v63  ;;  %v286_v7 = vmax.f32 %v257_v2, 0.0  ;;  %v370_v8 = vadd.f32 %v369_v4, %v368_v0 }
  0xea   :  { %v347_v9 = vpop.f32.mrf.mxu0  ;;  %v371_v10 = vpop.f32.mrf.mxu1 }
  0xeb   :  { %291 = vst [vmem:[%s621_s3] sm:$0xff] %v278_v5  ;;  %v228_v11 = vadd.f32 %v346_v6, %v564_v58  ;;  %299 = vst [vmem:[%s621_s3 + $0x40] sm:$0xff] %v286_v7  ;;  %v260_v12 = vadd.f32 %v370_v8, %v564_v58 }
  0xec   :  { %v348_v13 = vpop.f32.mrf.mxu0  ;;  %v372_v14 = vpop.f32.mrf.mxu1 }
  0xed   :  { %v279_v15 = vmax.f32 %v228_v11, 0.0  ;;  %v349_v16 = vadd.f32 %v348_v13, %v347_v9  ;;  %v287_v17 = vmax.f32 %v260_v12, 0.0  ;;  %v373_v18 = vadd.f32 %v372_v14, %v371_v10 }
  0xee   :  { %v350_v19 = vpop.f32.mrf.mxu0  ;;  %v374_v20 = vpop.f32.mrf.mxu1 }
  0xef   :  { %292 = vst [vmem:[%s621_s3 + $0x8] sm:$0xff] %v279_v15  ;;  %v233_v21 = vadd.f32 %v349_v16, %v564_v58  ;;  %300 = vst [vmem:[%s621_s3 + $0x48] sm:$0xff] %v287_v17  ;;  %v265_v22 = vadd.f32 %v373_v18, %v564_v58 }
  0xf0   :  { %v351_v23 = vpop.f32.mrf.mxu0  ;;  %v375_v24 = vpop.f32.mrf.mxu1 }
  0xf1   :  { %v280_v25 = vmax.f32 %v233_v21, 0.0  ;;  %v352_v26 = vadd.f32 %v351_v23, %v350_v19  ;;  %v288_v27 = vmax.f32 %v265_v22, 0.0  ;;  %v376_v28 = vadd.f32 %v375_v24, %v374_v20 }
  0xf2   :  { %v353_v29 = vpop.f32.mrf.mxu0  ;;  %v377_v30 = vpop.f32.mrf.mxu1 }
  0xf3   :  { %293 = vst [vmem:[%s621_s3 + $0x10] sm:$0xff] %v280_v25  ;;  %v236_v31 = vadd.f32 %v352_v26, %v564_v58  ;;  %301 = vst [vmem:[%s621_s3 + $0x50] sm:$0xff] %v288_v27  ;;  %v268_v32 = vadd.f32 %v376_v28, %v564_v58 }
  0xf4   :  { %v354_v33 = vpop.f32.mrf.mxu0  ;;  %v378_v34 = vpop.f32.mrf.mxu1 }
  0xf5   :  { %v281_v35 = vmax.f32 %v236_v31, 0.0  ;;  %v355_v36 = vadd.f32 %v354_v33, %v353_v29  ;;  %v289_v37 = vmax.f32 %v268_v32, 0.0  ;;  %v379_v38 = vadd.f32 %v378_v34, %v377_v30 }
  0xf6   :  { %v356_v39 = vpop.f32.mrf.mxu0  ;;  %v380_v40 = vpop.f32.mrf.mxu1 }
  0xf7   :  { %294 = vst [vmem:[%s621_s3 + $0x18] sm:$0xff] %v281_v35  ;;  %v241_v41 = vadd.f32 %v355_v36, %v564_v58  ;;  %302 = vst [vmem:[%s621_s3 + $0x58] sm:$0xff] %v289_v37  ;;  %v273_v42 = vadd.f32 %v379_v38, %v564_v58 }
  0xf8   :  { %v357_v43 = vpop.f32.mrf.mxu0  ;;  %v381_v44 = vpop.f32.mrf.mxu1 }
  0xf9   :  { %v282_v45 = vmax.f32 %v241_v41, 0.0  ;;  %v358_v46 = vadd.f32 %v357_v43, %v356_v39  ;;  %v290_v47 = vmax.f32 %v273_v42, 0.0 }
  0xfa   :  { %v359_v48 = vpop.f32.mrf.mxu0 }
  0xfb   :  { %295 = vst [vmem:[%s621_s3 + $0x20] sm:$0xff] %v282_v45  ;;  %v244_v49 = vadd.f32 %v358_v46, %v564_v58  ;;  %303 = vst [vmem:[%s621_s3 + $0x60] sm:$0x3] %v290_v47 }
  0xfc   :  { %v360_v50 = vpop.f32.mrf.mxu0 }
  0xfd   :  { %v283_v51 = vmax.f32 %v244_v49, 0.0  ;;  %v361_v52 = vadd.f32 %v360_v50, %v359_v48 }
  0xfe   :  { %v362_v53 = vpop.f32.mrf.mxu0 }
  0xff   :  { %296 = vst [vmem:[%s621_s3 + $0x28] sm:$0xff] %v283_v51  ;;  %v249_v54 = vadd.f32 %v361_v52, %v564_v58 }
 0x100   :  { %v363_v55 = vpop.f32.mrf.mxu0 }
 0x101   :  { %v284_v56 = vmax.f32 %v249_v54, 0.0  ;;  %v364_v57 = vadd.f32 %v363_v55, %v362_v53 }
 0x103   :  { %297 = vst [vmem:[%s621_s3 + $0x30] sm:$0xff] %v284_v56  ;;  %v252_v59 = vadd.f32 %v364_v57, %v564_v58 }
 0x105   :  { %v285_v60 = vmax.f32 %v252_v59, 0.0 }
 0x107   :  { %298 = vst [vmem:[%s621_s3 + $0x38] sm:$0xff] %v285_v60 }

// kernel: vae_forward.9
= control target key start
LH: loop header
LB: loop body
LE: loop exit
PB: predicated region body
PF: predicated region fallthrough
CT: control target
= control target key end

     0   :  { %v1169_v0 = vmov 0.0   ;;  %vm1170_vm0 = vmmov 0   ;;  %vm686_vm1 = vcmask 31744   ;;  %s1678_s1 = inlined_call_operand.vmem [shape: bf16[128,4], index: 1, kind: input, shape index: {}]   ;;  %s1679_s0 = inlined_call_operand.vmem [shape: f32[392,128], index: 0, kind: input, shape index: {}]   ;;  %s1680_s2 = inlined_call_operand.vmem [shape: f32[1,4], index: 2, kind: input, shape index: {}]   ;;  %s1681_s3 = inlined_call_operand.vmem [shape: f32[392,4], index: 3, kind: output, shape index: {}]  }
   0x1   :  { %831 = vmatprep.subr.bf16.mxu0 %v1169_v0  ;;  %v965_v1 = vld [vmem:[%s1678_s1 + $0x38] sm:$0xff]   ;;  %947 = vmatprep.subr.bf16.mxu1 %v1169_v0  ;;  %v966_v2 = vld [vmem:[%s1678_s1 + $0x30] sm:$0xff]   ;;  %v967_v3 = vld [vmem:[%s1678_s1 + $0x28] sm:$0xff]  }
   0x2   :  { %847 = vmatprep.mubr.msk.bf16.mxu0 %vm1170_vm0, %v1169_v0  ;;  %899 = vmatprep.mubr.msk.bf16.mxu1 %vm1170_vm0, %v1169_v0  ;;  %v968_v4 = vld [vmem:[%s1678_s1 + $0x20] sm:$0xff]   ;;  %v969_v5 = vld [vmem:[%s1678_s1 + $0x18] sm:$0xff]   ;;  %v970_v6 = vld [vmem:[%s1678_s1 + $0x10] sm:$0xff]  }
   0x3   :  { %832 = vmatpush3.bf16.msra.mxu0 %v965_v1  ;;  %955 = vmatpush3.bf16.msra.mxu1 %v965_v1  ;;  %v971_v7 = vld [vmem:[%s1678_s1 + $0x8] sm:$0xff]   ;;  %v972_v8 = vld [vmem:[%s1678_s1] sm:$0xff]   ;;  %v41_v11 = vld [vmem:[%s1679_s0 + $0xd0] sm:$0xff] }
   0x4   :  { %833 = vmatprep.subr.bf16.mxu0 %v1169_v0  ;;  %948 = vmatprep.subr.bf16.mxu1 %v1169_v0  ;;  %v15_v9 = vld [vmem:[%s1679_s0] sm:$0xff]  ;;  %v16_v10 = vld [vmem:[%s1679_s0 + $0x8] sm:$0xff]  ;;  %v42_v12 = vld [vmem:[%s1679_s0 + $0xd8] sm:$0xff] }
   0x5   :  { %v64_v13 = vpack.c.bf16 %v16_v10, %v15_v9  ;;  %v77_v14 = vpack.c.bf16 %v42_v12, %v41_v11  ;;  %v17_v15 = vld [vmem:[%s1679_s0 + $0x10] sm:$0xff]  ;;  %v18_v16 = vld [vmem:[%s1679_s0 + $0x18] sm:$0xff]  ;;  %v43_v17 = vld [vmem:[%s1679_s0 + $0xe0] sm:$0xff] }
   0x6   :  { %v44_v18 = vld [vmem:[%s1679_s0 + $0xe8] sm:$0xff]  ;;  %v65_v19 = vpack.c.bf16 %v18_v16, %v17_v15  ;;  %v19_v21 = vld [vmem:[%s1679_s0 + $0x20] sm:$0xff]  ;;  %v45_v23 = vld [vmem:[%s1679_s0 + $0xf0] sm:$0xff] }
   0x7   :  { %834 = vmatpush3.bf16.msra.mxu0 %v966_v2  ;;  %956 = vmatpush3.bf16.msra.mxu1 %v966_v2  ;;  %v78_v20 = vpack.c.bf16 %v44_v18, %v43_v17  ;;  %v20_v22 = vld [vmem:[%s1679_s0 + $0x28] sm:$0xff]  ;;  %v46_v24 = vld [vmem:[%s1679_s0 + $0xf8] sm:$0xff]  ;;  %v21_v27 = vld [vmem:[%s1679_s0 + $0x30] sm:$0xff] }
   0x8   :  { %835 = vmatprep.subr.bf16.mxu0 %v1169_v0  ;;  %949 = vmatprep.subr.bf16.mxu1 %v1169_v0  ;;  %v66_v25 = vpack.c.bf16 %v20_v22, %v19_v21  ;;  %v79_v26 = vpack.c.bf16 %v46_v24, %v45_v23  ;;  %v22_v28 = vld [vmem:[%s1679_s0 + $0x38] sm:$0xff]  ;;  %v47_v29 = vld [vmem:[%s1679_s0 + $0x100] sm:$0xff]  ;;  %v48_v30 = vld [vmem:[%s1679_s0 + $0x108] sm:$0xff] }
   0x9   :  { %v67_v31 = vpack.c.bf16 %v22_v28, %v21_v27  ;;  %v80_v32 = vpack.c.bf16 %v48_v30, %v47_v29  ;;  %v23_v33 = vld [vmem:[%s1679_s0 + $0x40] sm:$0xff]  ;;  %v24_v34 = vld [vmem:[%s1679_s0 + $0x48] sm:$0xff]  ;;  %v49_v35 = vld [vmem:[%s1679_s0 + $0x110] sm:$0xff] }
   0xa   :  { %v50_v36 = vld [vmem:[%s1679_s0 + $0x118] sm:$0xff]  ;;  %v68_v37 = vpack.c.bf16 %v24_v34, %v23_v33  ;;  %v25_v39 = vld [vmem:[%s1679_s0 + $0x50] sm:$0xff]  ;;  %v51_v41 = vld [vmem:[%s1679_s0 + $0x120] sm:$0xff] }
   0xb   :  { %836 = vmatpush3.bf16.msra.mxu0 %v967_v3  ;;  %957 = vmatpush3.bf16.msra.mxu1 %v967_v3  ;;  %v81_v38 = vpack.c.bf16 %v50_v36, %v49_v35  ;;  %v26_v40 = vld [vmem:[%s1679_s0 + $0x58] sm:$0xff]  ;;  %v52_v42 = vld [vmem:[%s1679_s0 + $0x128] sm:$0xff]  ;;  %v27_v45 = vld [vmem:[%s1679_s0 + $0x60] sm:$0xff] }
   0xc   :  { %837 = vmatprep.subr.bf16.mxu0 %v1169_v0  ;;  %950 = vmatprep.subr.bf16.mxu1 %v1169_v0  ;;  %v69_v43 = vpack.c.bf16 %v26_v40, %v25_v39  ;;  %v82_v44 = vpack.c.bf16 %v52_v42, %v51_v41  ;;  %v28_v46 = vld [vmem:[%s1679_s0 + $0x68] sm:$0xff]  ;;  %v53_v47 = vld [vmem:[%s1679_s0 + $0x130] sm:$0xff]  ;;  %v54_v48 = vld [vmem:[%s1679_s0 + $0x138] sm:$0xff] }
   0xd   :  { %v70_v49 = vpack.c.bf16 %v28_v46, %v27_v45  ;;  %v83_v50 = vpack.c.bf16 %v54_v48, %v53_v47  ;;  %v29_v51 = vld [vmem:[%s1679_s0 + $0x70] sm:$0xff]  ;;  %v30_v52 = vld [vmem:[%s1679_s0 + $0x78] sm:$0xff]  ;;  %v55_v53 = vld [vmem:[%s1679_s0 + $0x140] sm:$0xff] }
   0xe   :  { %v56_v54 = vld [vmem:[%s1679_s0 + $0x148] sm:$0xff]  ;;  %v71_v55 = vpack.c.bf16 %v30_v52, %v29_v51  ;;  %v31_v57 = vld [vmem:[%s1679_s0 + $0x80] sm:$0xff]  ;;  %v57_v59 = vld [vmem:[%s1679_s0 + $0x150] sm:$0xff] }
   0xf   :  { %838 = vmatpush3.bf16.msra.mxu0 %v968_v4  ;;  %958 = vmatpush3.bf16.msra.mxu1 %v968_v4  ;;  %v84_v56 = vpack.c.bf16 %v56_v54, %v55_v53  ;;  %v32_v58 = vld [vmem:[%s1679_s0 + $0x88] sm:$0xff]  ;;  %v58_v60 = vld [vmem:[%s1679_s0 + $0x158] sm:$0xff]  ;;  %v33_v63 = vld [vmem:[%s1679_s0 + $0x90] sm:$0xff] }
  0x10   :  { %839 = vmatprep.subr.bf16.mxu0 %v1169_v0  ;;  %951 = vmatprep.subr.bf16.mxu1 %v1169_v0  ;;  %v72_v61 = vpack.c.bf16 %v32_v58, %v31_v57  ;;  %v85_v62 = vpack.c.bf16 %v58_v60, %v57_v59  ;;  %v34_v1 = vld [vmem:[%s1679_s0 + $0x98] sm:$0xff]  ;;  %v59_v2 = vld [vmem:[%s1679_s0 + $0x160] sm:$0xff]  ;;  %v60_v3 = vld [vmem:[%s1679_s0 + $0x168] sm:$0xff] }
  0x11   :  { %v73_v4 = vpack.c.bf16 %v34_v1, %v33_v63  ;;  %v62_v9 = vld [vmem:[%s1679_s0 + $0x178] sm:$0xff]  ;;  %v37_v12 = vld [vmem:[%s1679_s0 + $0xb0] sm:$0xff]  ;;  %v39_v17 = vld [vmem:[%s1679_s0 + $0xc0] sm:$0xff] }
  0x12   :  { %v40_v18 = vld [vmem:[%s1679_s0 + $0xc8] sm:$0xff] }
  0x13   :  { %840 = vmatpush3.bf16.msra.mxu0 %v969_v5  ;;  %959 = vmatpush3.bf16.msra.mxu1 %v969_v5  ;;  %v86_v5 = vpack.c.bf16 %v60_v3, %v59_v2 }
  0x14   :  { %841 = vmatprep.subr.bf16.mxu0 %v1169_v0  ;;  %952 = vmatprep.subr.bf16.mxu1 %v1169_v0 }
  0x17   :  { %842 = vmatpush3.bf16.msra.mxu0 %v970_v6  ;;  %960 = vmatpush3.bf16.msra.mxu1 %v970_v6  ;;  %v35_v6 = vld [vmem:[%s1679_s0 + $0xa0] sm:$0xff] }
  0x18   :  { %843 = vmatprep.subr.bf16.mxu0 %v1169_v0  ;;  %953 = vmatprep.subr.bf16.mxu1 %v1169_v0 }
  0x1b   :  { %844 = vmatpush3.bf16.msra.mxu0 %v971_v7  ;;  %961 = vmatpush3.bf16.msra.mxu1 %v971_v7  ;;  %v36_v7 = vld [vmem:[%s1679_s0 + $0xa8] sm:$0xff] }
  0x1c   :  { %845 = vmatprep.subr.bf16.mxu0 %v1169_v0  ;;  %954 = vmatprep.subr.bf16.mxu1 %v1169_v0  ;;  %v74_v10 = vpack.c.bf16 %v36_v7, %v35_v6 }
  0x1f   :  { %846 = vmatpush3.bf16.msra.mxu0 %v972_v8  ;;  %962 = vmatpush3.bf16.msra.mxu1 %v972_v8  ;;  %v61_v8 = vld [vmem:[%s1679_s0 + $0x170] sm:$0xff] }
  0x20   :  { %v87_v11 = vpack.c.bf16 %v62_v9, %v61_v8 }
  0x22   :  { %848 = vmatmul.mubr.bf16.vlgmr.msra.gmra.mxu0 %v64_v13  ;;  %900 = vmatmul.mubr.bf16.vlgmr.msra.gmra.mxu1 %v77_v14  ;;  %v38_v13 = vld [vmem:[%s1679_s0 + $0xb8] sm:$0xff]  ;;  %v63_v14 = vld [vmem:[%s1679_s0 + $0x180] sm:$0xff] }
  0x23   :  { %851 = vmatprep.mubr.msk.bf16.mxu0 %vm1170_vm0, %v1169_v0  ;;  %903 = vmatprep.mubr.msk.bf16.mxu1 %vm1170_vm0, %v1169_v0  ;;  %v75_v15 = vpack.c.bf16 %v38_v13, %v37_v12  ;;  %v88_v16 = vpack.c.bf16 %v63_v14, %v63_v14 }
  0x2a   :  { %852 = vmatmul.mubr.bf16.gmra.mxu0 %v65_v19  ;;  %904 = vmatmul.mubr.bf16.gmra.mxu1 %v78_v20  ;;  %v76_v19 = vpack.c.bf16 %v40_v18, %v39_v17  ;;  %v1431_v20 = vld [vmem:[%s1680_s2] ss:$0 sm:$0xff] }
  0x2b   :  { %855 = vmatprep.mubr.msk.bf16.mxu0 %vm1170_vm0, %v1169_v0  ;;  %907 = vmatprep.mubr.msk.bf16.mxu1 %vm1170_vm0, %v1169_v0 }
  0x32   :  { %856 = vmatmul.mubr.bf16.gmra.mxu0 %v66_v25  ;;  %908 = vmatmul.mubr.bf16.gmra.mxu1 %v79_v26 }
  0x33   :  { %859 = vmatprep.mubr.msk.bf16.mxu0 %vm1170_vm0, %v1169_v0  ;;  %911 = vmatprep.mubr.msk.bf16.mxu1 %vm1170_vm0, %v1169_v0 }
  0x3a   :  { %860 = vmatmul.mubr.bf16.gmra.mxu0 %v67_v31  ;;  %912 = vmatmul.mubr.bf16.gmra.mxu1 %v80_v32 }
  0x3b   :  { %863 = vmatprep.mubr.msk.bf16.mxu0 %vm1170_vm0, %v1169_v0  ;;  %915 = vmatprep.mubr.msk.bf16.mxu1 %vm1170_vm0, %v1169_v0 }
  0x42   :  { %864 = vmatmul.mubr.bf16.gmra.mxu0 %v68_v37  ;;  %916 = vmatmul.mubr.bf16.gmra.mxu1 %v81_v38 }
  0x43   :  { %867 = vmatprep.mubr.msk.bf16.mxu0 %vm1170_vm0, %v1169_v0  ;;  %919 = vmatprep.mubr.msk.bf16.mxu1 %vm1170_vm0, %v1169_v0 }
  0x4a   :  { %868 = vmatmul.mubr.bf16.gmra.mxu0 %v69_v43  ;;  %920 = vmatmul.mubr.bf16.gmra.mxu1 %v82_v44 }
  0x4b   :  { %871 = vmatprep.mubr.msk.bf16.mxu0 %vm1170_vm0, %v1169_v0  ;;  %923 = vmatprep.mubr.msk.bf16.mxu1 %vm1170_vm0, %v1169_v0 }
  0x52   :  { %872 = vmatmul.mubr.bf16.gmra.mxu0 %v70_v49  ;;  %924 = vmatmul.mubr.bf16.gmra.mxu1 %v83_v50 }
  0x53   :  { %875 = vmatprep.mubr.msk.bf16.mxu0 %vm1170_vm0, %v1169_v0  ;;  %927 = vmatprep.mubr.msk.bf16.mxu1 %vm1170_vm0, %v1169_v0 }
  0x5a   :  { %876 = vmatmul.mubr.bf16.gmra.mxu0 %v71_v55  ;;  %928 = vmatmul.mubr.bf16.gmra.mxu1 %v84_v56 }
  0x5b   :  { %879 = vmatprep.mubr.msk.bf16.mxu0 %vm1170_vm0, %v1169_v0  ;;  %931 = vmatprep.mubr.msk.bf16.mxu1 %vm1170_vm0, %v1169_v0 }
  0x62   :  { %880 = vmatmul.mubr.bf16.gmra.mxu0 %v72_v61  ;;  %932 = vmatmul.mubr.bf16.gmra.mxu1 %v85_v62 }
  0x63   :  { %883 = vmatprep.mubr.msk.bf16.mxu0 %vm1170_vm0, %v1169_v0  ;;  %935 = vmatprep.mubr.msk.bf16.mxu1 %vm1170_vm0, %v1169_v0 }
  0x6a   :  { %884 = vmatmul.mubr.bf16.gmra.mxu0 %v73_v4  ;;  %936 = vmatmul.mubr.bf16.gmra.mxu1 %v86_v5 }
  0x6b   :  { %887 = vmatprep.mubr.msk.bf16.mxu0 %vm1170_vm0, %v1169_v0  ;;  %939 = vmatprep.mubr.msk.bf16.mxu1 %vm1170_vm0, %v1169_v0 }
  0x72   :  { %888 = vmatmul.mubr.bf16.gmra.mxu0 %v74_v10  ;;  %940 = vmatmul.mubr.bf16.gmra.mxu1 %v87_v11 }
  0x73   :  { %891 = vmatprep.mubr.msk.bf16.mxu0 %vm1170_vm0, %v1169_v0  ;;  %943 = vmatprep.mubr.msk.bf16.mxu1 %vm1170_vm0, %v1169_v0 }
  0x7a   :  { %892 = vmatmul.mubr.bf16.gmra.mxu0 %v75_v15  ;;  %944 = vmatmul.mubr.bf16.gmra.mxu1 %v88_v16 }
  0x7b   :  { %895 = vmatprep.mubr.msk.bf16.mxu0 %vm1170_vm0, %v1169_v0 }
  0x82   :  { %896 = vmatmul.mubr.bf16.gmra.mxu0 %v76_v19 }
  0xe2   :  { %v194_v21 = vpop.f32.mrf.mxu0  ;;  %v298_v22 = vpop.f32.mrf.mxu1 }
  0xe3   :  { %v195_v23 = vadd.f32 %v1431_v20, %v194_v21  ;;  %v299_v0 = vadd.f32 %v1431_v20, %v298_v22 }
  0xe4   :  { %v849_v24 = vpop.f32.mrf.mxu0  ;;  %v901_v25 = vpop.f32.mrf.mxu1 }
  0xe5   :  { %v749_v26 = vmul.f32 -1.442695, %v195_v23  ;;  %v775_v27 = vmul.f32 -1.442695, %v299_v0 }
  0xe6   :  { %v197_v28 = vpop.f32.mrf.mxu0  ;;  %v301_v29 = vpop.f32.mrf.mxu1 }
  0xe7   :  { %973 = vpow2.f32 %v749_v26  ;;  %v198_v30 = vadd.f32 %v1431_v20, %v197_v28  ;;  %v302_v31 = vadd.f32 %v1431_v20, %v301_v29 }
  0xe8   :  { %v850_v32 = vpop.f32.mrf.mxu0  ;;  %975 = vpow2.f32 %v775_v27  ;;  %v902_v33 = vpop.f32.mrf.mxu1 }
  0xe9   :  { %v750_v34 = vmul.f32 -1.442695, %v198_v30  ;;  %v776_v35 = vmul.f32 -1.442695, %v302_v31 }
  0xea   :  { %v202_v36 = vpop.f32.mrf.mxu0  ;;  %v306_v37 = vpop.f32.mrf.mxu1 }
  0xeb   :  { %977 = vpow2.f32 %v750_v34  ;;  %v203_v38 = vadd.f32 %v1431_v20, %v202_v36  ;;  %v307_v39 = vadd.f32 %v1431_v20, %v306_v37 }
  0xec   :  { %v853_v40 = vpop.f32.mrf.mxu0  ;;  %979 = vpow2.f32 %v776_v35  ;;  %v905_v41 = vpop.f32.mrf.mxu1 }
  0xed   :  { %v751_v42 = vmul.f32 -1.442695, %v203_v38  ;;  %v777_v43 = vmul.f32 -1.442695, %v307_v39 }
  0xee   :  { %v205_v44 = vpop.f32.mrf.mxu0  ;;  %v309_v45 = vpop.f32.mrf.mxu1 }
  0xef   :  { %981 = vpow2.f32 %v751_v42  ;;  %v206_v46 = vadd.f32 %v1431_v20, %v205_v44  ;;  %v310_v47 = vadd.f32 %v1431_v20, %v309_v45 }
  0xf0   :  { %v854_v48 = vpop.f32.mrf.mxu0  ;;  %983 = vpow2.f32 %v777_v43  ;;  %v906_v49 = vpop.f32.mrf.mxu1 }
  0xf1   :  { %v752_v50 = vmul.f32 -1.442695, %v206_v46  ;;  %v778_v51 = vmul.f32 -1.442695, %v310_v47 }
  0xf2   :  { %v210_v52 = vpop.f32.mrf.mxu0  ;;  %v314_v53 = vpop.f32.mrf.mxu1 }
  0xf3   :  { %985 = vpow2.f32 %v752_v50  ;;  %v211_v54 = vadd.f32 %v1431_v20, %v210_v52  ;;  %v315_v55 = vadd.f32 %v1431_v20, %v314_v53 }
  0xf4   :  { %v974_v56 = vpop.eup %973  ;;  %v857_v57 = vpop.f32.mrf.mxu0  ;;  %987 = vpow2.f32 %v778_v51 }
  0xf5   :  { %v909_v58 = vpop.f32.mrf.mxu1  ;;  %v976_v59 = vpop.eup %975  ;;  %v539_v60 = vadd.f32 1.0, %v974_v56  ;;  %v753_v61 = vmul.f32 -1.442695, %v211_v54  ;;  %v779_v1 = vmul.f32 -1.442695, %v315_v55 }
  0xf6   :  { %v565_v62 = vadd.f32 1.0, %v976_v59  ;;  %v213_v63 = vpop.f32.mrf.mxu0 }
  0xf7   :  { %v317_v2 = vpop.f32.mrf.mxu1  ;;  %989 = vrcp.f32 %v539_v60  ;;  %v214_v3 = vadd.f32 %v1431_v20, %v213_v63 }
  0xf8   :  { %v318_v4 = vadd.f32 %v1431_v20, %v317_v2  ;;  %v978_v5 = vpop.eup %977  ;;  %991 = vrcp.f32 %v565_v62  ;;  %v858_v6 = vpop.f32.mrf.mxu0 }
  0xf9   :  { %v910_v7 = vpop.f32.mrf.mxu1  ;;  %v980_v8 = vpop.eup %979  ;;  %v540_v9 = vadd.f32 1.0, %v978_v5  ;;  %993 = vpow2.f32 %v753_v61  ;;  %v754_v10 = vmul.f32 -1.442695, %v214_v3 }
  0xfa   :  { %v566_v11 = vadd.f32 1.0, %v980_v8  ;;  %995 = vpow2.f32 %v779_v1  ;;  %v218_v12 = vpop.f32.mrf.mxu0  ;;  %v780_v13 = vmul.f32 -1.442695, %v318_v4 }
  0xfb   :  { %v322_v14 = vpop.f32.mrf.mxu1  ;;  %997 = vrcp.f32 %v540_v9  ;;  %v219_v15 = vadd.f32 %v1431_v20, %v218_v12 }
  0xfc   :  { %v323_v16 = vadd.f32 %v1431_v20, %v322_v14  ;;  %v982_v17 = vpop.eup %981  ;;  %999 = vrcp.f32 %v566_v11  ;;  %v861_v18 = vpop.f32.mrf.mxu0 }
  0xfd   :  { %v913_v19 = vpop.f32.mrf.mxu1  ;;  %v984_v21 = vpop.eup %983  ;;  %v541_v22 = vadd.f32 1.0, %v982_v17  ;;  %1001 = vpow2.f32 %v754_v10  ;;  %v755_v23 = vmul.f32 -1.442695, %v219_v15 }
  0xfe   :  { %v567_v0 = vadd.f32 1.0, %v984_v21  ;;  %1003 = vpow2.f32 %v780_v13  ;;  %v221_v24 = vpop.f32.mrf.mxu0  ;;  %v781_v25 = vmul.f32 -1.442695, %v323_v16 }
  0xff   :  { %v325_v26 = vpop.f32.mrf.mxu1  ;;  %1005 = vrcp.f32 %v541_v22  ;;  %v222_v27 = vadd.f32 %v1431_v20, %v221_v24 }
 0x100   :  { %v326_v28 = vadd.f32 %v1431_v20, %v325_v26  ;;  %v986_v29 = vpop.eup %985  ;;  %1007 = vrcp.f32 %v567_v0  ;;  %v862_v30 = vpop.f32.mrf.mxu0 }
 0x101   :  { %v914_v31 = vpop.f32.mrf.mxu1  ;;  %v988_v32 = vpop.eup %987  ;;  %v542_v33 = vadd.f32 1.0, %v986_v29  ;;  %1009 = vpow2.f32 %v755_v23  ;;  %v756_v34 = vmul.f32 -1.442695, %v222_v27 }
 0x102   :  { %v568_v35 = vadd.f32 1.0, %v988_v32  ;;  %1011 = vpow2.f32 %v781_v25  ;;  %v226_v36 = vpop.f32.mrf.mxu0  ;;  %v782_v37 = vmul.f32 -1.442695, %v326_v28 }
 0x103   :  { %v330_v38 = vpop.f32.mrf.mxu1  ;;  %1013 = vrcp.f32 %v542_v33  ;;  %v227_v39 = vadd.f32 %v1431_v20, %v226_v36 }
 0x104   :  { %v331_v40 = vadd.f32 %v1431_v20, %v330_v38  ;;  %v990_v41 = vpop.eup %989  ;;  %1015 = vrcp.f32 %v568_v35  ;;  %v865_v42 = vpop.f32.mrf.mxu0 }
 0x105   :  { %v917_v43 = vpop.f32.mrf.mxu1  ;;  %v992_v44 = vpop.eup %991  ;;  %687 = vst.msk [vmem:[%s1681_s3] sm:$0xff] %vm686_vm1, %v990_v41  ;;  %1017 = vpow2.f32 %v756_v34  ;;  %v757_v45 = vmul.f32 -1.442695, %v227_v39 }
 0x106   :  { %v783_v46 = vmul.f32 -1.442695, %v331_v40  ;;  %v994_v47 = vpop.eup %993  ;;  %713 = vst.msk [vmem:[%s1681_s3 + $0xd0] sm:$0xff] %vm686_vm1, %v992_v44  ;;  %1019 = vpow2.f32 %v782_v37  ;;  %v229_v48 = vpop.f32.mrf.mxu0 }
 0x107   :  { %v333_v49 = vpop.f32.mrf.mxu1  ;;  %v996_v50 = vpop.eup %995  ;;  %v543_v51 = vadd.f32 1.0, %v994_v47  ;;  %1021 = vpow2.f32 %v757_v45  ;;  %v230_v52 = vadd.f32 %v1431_v20, %v229_v48 }
 0x108   :  { %v334_v53 = vadd.f32 %v1431_v20, %v333_v49  ;;  %v998_v54 = vpop.eup %997  ;;  %v569_v55 = vadd.f32 1.0, %v996_v50  ;;  %v866_v56 = vpop.f32.mrf.mxu0  ;;  %1023 = vpow2.f32 %v783_v46 }
 0x109   :  { %v918_v57 = vpop.f32.mrf.mxu1  ;;  %v1000_v58 = vpop.eup %999  ;;  %688 = vst.msk [vmem:[%s1681_s3 + $0x8] sm:$0xff] %vm686_vm1, %v998_v54  ;;  %1025 = vrcp.f32 %v543_v51  ;;  %v758_v59 = vmul.f32 -1.442695, %v230_v52 }
 0x10a   :  { %v784_v60 = vmul.f32 -1.442695, %v334_v53  ;;  %v1002_v61 = vpop.eup %1001  ;;  %714 = vst.msk [vmem:[%s1681_s3 + $0xd8] sm:$0xff] %vm686_vm1, %v1000_v58  ;;  %1027 = vrcp.f32 %v569_v55  ;;  %v234_v62 = vpop.f32.mrf.mxu0 }
 0x10b   :  { %v338_v63 = vpop.f32.mrf.mxu1  ;;  %v1004_v1 = vpop.eup %1003  ;;  %v544_v2 = vadd.f32 1.0, %v1002_v61  ;;  %1029 = vpow2.f32 %v758_v59  ;;  %v235_v3 = vadd.f32 %v1431_v20, %v234_v62 }
 0x10c   :  { %v339_v4 = vadd.f32 %v1431_v20, %v338_v63  ;;  %v1006_v5 = vpop.eup %1005  ;;  %v570_v6 = vadd.f32 1.0, %v1004_v1  ;;  %v869_v7 = vpop.f32.mrf.mxu0  ;;  %1031 = vpow2.f32 %v784_v60 }
 0x10d   :  { %v921_v8 = vpop.f32.mrf.mxu1  ;;  %v1008_v9 = vpop.eup %1007  ;;  %689 = vst.msk [vmem:[%s1681_s3 + $0x10] sm:$0xff] %vm686_vm1, %v1006_v5  ;;  %1033 = vrcp.f32 %v544_v2  ;;  %v759_v10 = vmul.f32 -1.442695, %v235_v3 }
 0x10e   :  { %v785_v11 = vmul.f32 -1.442695, %v339_v4  ;;  %v1010_v12 = vpop.eup %1009  ;;  %715 = vst.msk [vmem:[%s1681_s3 + $0xe0] sm:$0xff] %vm686_vm1, %v1008_v9  ;;  %1035 = vrcp.f32 %v570_v6  ;;  %v237_v13 = vpop.f32.mrf.mxu0 }
 0x10f   :  { %v341_v14 = vpop.f32.mrf.mxu1  ;;  %v1012_v15 = vpop.eup %1011  ;;  %v545_v16 = vadd.f32 1.0, %v1010_v12  ;;  %1037 = vpow2.f32 %v759_v10  ;;  %v238_v17 = vadd.f32 %v1431_v20, %v237_v13 }
 0x110   :  { %v342_v18 = vadd.f32 %v1431_v20, %v341_v14  ;;  %v1014_v19 = vpop.eup %1013  ;;  %v571_v21 = vadd.f32 1.0, %v1012_v15  ;;  %v870_v22 = vpop.f32.mrf.mxu0  ;;  %1039 = vpow2.f32 %v785_v11 }
 0x111   :  { %v922_v23 = vpop.f32.mrf.mxu1  ;;  %v1016_v0 = vpop.eup %1015  ;;  %690 = vst.msk [vmem:[%s1681_s3 + $0x18] sm:$0xff] %vm686_vm1, %v1014_v19  ;;  %1041 = vrcp.f32 %v545_v16  ;;  %v760_v24 = vmul.f32 -1.442695, %v238_v17 }
 0x112   :  { %v786_v25 = vmul.f32 -1.442695, %v342_v18  ;;  %v1018_v26 = vpop.eup %1017  ;;  %716 = vst.msk [vmem:[%s1681_s3 + $0xe8] sm:$0xff] %vm686_vm1, %v1016_v0  ;;  %1043 = vrcp.f32 %v571_v21  ;;  %v242_v27 = vpop.f32.mrf.mxu0 }
 0x113   :  { %v346_v28 = vpop.f32.mrf.mxu1  ;;  %v1020_v29 = vpop.eup %1019  ;;  %v546_v30 = vadd.f32 1.0, %v1018_v26  ;;  %1045 = vpow2.f32 %v760_v24  ;;  %v243_v31 = vadd.f32 %v1431_v20, %v242_v27 }
 0x114   :  { %v347_v32 = vadd.f32 %v1431_v20, %v346_v28  ;;  %v1022_v33 = vpop.eup %1021  ;;  %v572_v34 = vadd.f32 1.0, %v1020_v29  ;;  %v873_v35 = vpop.f32.mrf.mxu0  ;;  %1047 = vpow2.f32 %v786_v25 }
 0x115   :  { %v925_v36 = vpop.f32.mrf.mxu1  ;;  %v1024_v37 = vpop.eup %1023  ;;  %1049 = vrcp.f32 %v546_v30  ;;  %v547_v38 = vadd.f32 1.0, %v1022_v33  ;;  %v761_v39 = vmul.f32 -1.442695, %v243_v31 }
 0x116   :  { %v1026_v40 = vpop.eup %1025  ;;  %1051 = vrcp.f32 %v572_v34  ;;  %v573_v41 = vadd.f32 1.0, %v1024_v37  ;;  %v245_v42 = vpop.f32.mrf.mxu0  ;;  %v787_v43 = vmul.f32 -1.442695, %v347_v32 }
 0x117   :  { %v349_v44 = vpop.f32.mrf.mxu1  ;;  %v1028_v45 = vpop.eup %1027  ;;  %691 = vst.msk [vmem:[%s1681_s3 + $0x20] sm:$0xff] %vm686_vm1, %v1026_v40  ;;  %1053 = vrcp.f32 %v547_v38  ;;  %v246_v46 = vadd.f32 %v1431_v20, %v245_v42 }
 0x118   :  { %v350_v47 = vadd.f32 %v1431_v20, %v349_v44  ;;  %v1030_v48 = vpop.eup %1029  ;;  %717 = vst.msk [vmem:[%s1681_s3 + $0xf0] sm:$0xff] %vm686_vm1, %v1028_v45  ;;  %1055 = vrcp.f32 %v573_v41  ;;  %v874_v49 = vpop.f32.mrf.mxu0 }
 0x119   :  { %v926_v50 = vpop.f32.mrf.mxu1  ;;  %v1032_v51 = vpop.eup %1031  ;;  %v548_v52 = vadd.f32 1.0, %v1030_v48  ;;  %1057 = vpow2.f32 %v761_v39  ;;  %v762_v53 = vmul.f32 -1.442695, %v246_v46 }
 0x11a   :  { %v1034_v54 = vpop.eup %1033  ;;  %v574_v55 = vadd.f32 1.0, %v1032_v51  ;;  %1059 = vpow2.f32 %v787_v43  ;;  %v250_v56 = vpop.f32.mrf.mxu0  ;;  %v788_v57 = vmul.f32 -1.442695, %v350_v47 }
 0x11b   :  { %v354_v58 = vpop.f32.mrf.mxu1  ;;  %v1036_v59 = vpop.eup %1035  ;;  %692 = vst.msk [vmem:[%s1681_s3 + $0x28] sm:$0xff] %vm686_vm1, %v1034_v54  ;;  %1061 = vrcp.f32 %v548_v52  ;;  %v251_v60 = vadd.f32 %v1431_v20, %v250_v56 }
 0x11c   :  { %v355_v61 = vadd.f32 %v1431_v20, %v354_v58  ;;  %v1038_v62 = vpop.eup %1037  ;;  %718 = vst.msk [vmem:[%s1681_s3 + $0xf8] sm:$0xff] %vm686_vm1, %v1036_v59  ;;  %1063 = vrcp.f32 %v574_v55  ;;  %v877_v63 = vpop.f32.mrf.mxu0 }
 0x11d   :  { %v929_v1 = vpop.f32.mrf.mxu1  ;;  %v1040_v2 = vpop.eup %1039  ;;  %v549_v3 = vadd.f32 1.0, %v1038_v62  ;;  %1065 = vpow2.f32 %v762_v53  ;;  %v763_v4 = vmul.f32 -1.442695, %v251_v60 }
 0x11e   :  { %v1042_v5 = vpop.eup %1041  ;;  %v575_v6 = vadd.f32 1.0, %v1040_v2  ;;  %1067 = vpow2.f32 %v788_v57  ;;  %v253_v7 = vpop.f32.mrf.mxu0  ;;  %v789_v8 = vmul.f32 -1.442695, %v355_v61 }
 0x11f   :  { %v357_v9 = vpop.f32.mrf.mxu1  ;;  %v1044_v10 = vpop.eup %1043  ;;  %693 = vst.msk [vmem:[%s1681_s3 + $0x30] sm:$0xff] %vm686_vm1, %v1042_v5  ;;  %1069 = vrcp.f32 %v549_v3  ;;  %v254_v11 = vadd.f32 %v1431_v20, %v253_v7 }
 0x120   :  { %v358_v12 = vadd.f32 %v1431_v20, %v357_v9  ;;  %v1046_v13 = vpop.eup %1045  ;;  %719 = vst.msk [vmem:[%s1681_s3 + $0x100] sm:$0xff] %vm686_vm1, %v1044_v10  ;;  %1071 = vrcp.f32 %v575_v6  ;;  %v878_v14 = vpop.f32.mrf.mxu0 }
 0x121   :  { %v930_v15 = vpop.f32.mrf.mxu1  ;;  %v1048_v16 = vpop.eup %1047  ;;  %v550_v17 = vadd.f32 1.0, %v1046_v13  ;;  %1073 = vpow2.f32 %v763_v4  ;;  %v764_v18 = vmul.f32 -1.442695, %v254_v11 }
 0x122   :  { %v1050_v19 = vpop.eup %1049  ;;  %v576_v21 = vadd.f32 1.0, %v1048_v16  ;;  %1075 = vpow2.f32 %v789_v8  ;;  %v258_v22 = vpop.f32.mrf.mxu0  ;;  %v790_v23 = vmul.f32 -1.442695, %v358_v12 }
 0x123   :  { %v362_v0 = vpop.f32.mrf.mxu1  ;;  %v1052_v24 = vpop.eup %1051  ;;  %694 = vst.msk [vmem:[%s1681_s3 + $0x38] sm:$0xff] %vm686_vm1, %v1050_v19  ;;  %1077 = vrcp.f32 %v550_v17  ;;  %v259_v25 = vadd.f32 %v1431_v20, %v258_v22 }
 0x124   :  { %v363_v26 = vadd.f32 %v1431_v20, %v362_v0  ;;  %v1054_v27 = vpop.eup %1053  ;;  %720 = vst.msk [vmem:[%s1681_s3 + $0x108] sm:$0xff] %vm686_vm1, %v1052_v24  ;;  %1079 = vrcp.f32 %v576_v21  ;;  %v881_v28 = vpop.f32.mrf.mxu0 }
 0x125   :  { %v933_v29 = vpop.f32.mrf.mxu1  ;;  %v1056_v30 = vpop.eup %1055  ;;  %695 = vst.msk [vmem:[%s1681_s3 + $0x40] sm:$0xff] %vm686_vm1, %v1054_v27  ;;  %1081 = vpow2.f32 %v764_v18  ;;  %v765_v31 = vmul.f32 -1.442695, %v259_v25 }
 0x126   :  { %v791_v32 = vmul.f32 -1.442695, %v363_v26  ;;  %v1058_v33 = vpop.eup %1057  ;;  %721 = vst.msk [vmem:[%s1681_s3 + $0x110] sm:$0xff] %vm686_vm1, %v1056_v30  ;;  %1083 = vpow2.f32 %v790_v23  ;;  %v261_v34 = vpop.f32.mrf.mxu0 }
 0x127   :  { %v365_v35 = vpop.f32.mrf.mxu1  ;;  %v1060_v36 = vpop.eup %1059  ;;  %v551_v37 = vadd.f32 1.0, %v1058_v33  ;;  %1085 = vpow2.f32 %v765_v31  ;;  %v262_v38 = vadd.f32 %v1431_v20, %v261_v34 }
 0x128   :  { %v366_v39 = vadd.f32 %v1431_v20, %v365_v35  ;;  %v1062_v40 = vpop.eup %1061  ;;  %v577_v41 = vadd.f32 1.0, %v1060_v36  ;;  %v882_v42 = vpop.f32.mrf.mxu0  ;;  %1087 = vpow2.f32 %v791_v32 }
 0x129   :  { %v934_v43 = vpop.f32.mrf.mxu1  ;;  %v1064_v44 = vpop.eup %1063  ;;  %696 = vst.msk [vmem:[%s1681_s3 + $0x48] sm:$0xff] %vm686_vm1, %v1062_v40  ;;  %1089 = vrcp.f32 %v551_v37  ;;  %v766_v45 = vmul.f32 -1.442695, %v262_v38 }
 0x12a   :  { %v792_v46 = vmul.f32 -1.442695, %v366_v39  ;;  %v1066_v47 = vpop.eup %1065  ;;  %722 = vst.msk [vmem:[%s1681_s3 + $0x118] sm:$0xff] %vm686_vm1, %v1064_v44  ;;  %1091 = vrcp.f32 %v577_v41  ;;  %v266_v48 = vpop.f32.mrf.mxu0 }
 0x12b   :  { %v370_v49 = vpop.f32.mrf.mxu1  ;;  %v1068_v50 = vpop.eup %1067  ;;  %v552_v51 = vadd.f32 1.0, %v1066_v47  ;;  %1093 = vpow2.f32 %v766_v45  ;;  %v267_v52 = vadd.f32 %v1431_v20, %v266_v48 }
 0x12c   :  { %v371_v53 = vadd.f32 %v1431_v20, %v370_v49  ;;  %v1070_v54 = vpop.eup %1069  ;;  %v578_v55 = vadd.f32 1.0, %v1068_v50  ;;  %v885_v56 = vpop.f32.mrf.mxu0  ;;  %1095 = vpow2.f32 %v792_v46 }
 0x12d   :  { %v937_v57 = vpop.f32.mrf.mxu1  ;;  %v1072_v58 = vpop.eup %1071  ;;  %697 = vst.msk [vmem:[%s1681_s3 + $0x50] sm:$0xff] %vm686_vm1, %v1070_v54  ;;  %1097 = vrcp.f32 %v552_v51  ;;  %v767_v59 = vmul.f32 -1.442695, %v267_v52 }
 0x12e   :  { %v793_v60 = vmul.f32 -1.442695, %v371_v53  ;;  %v1074_v61 = vpop.eup %1073  ;;  %723 = vst.msk [vmem:[%s1681_s3 + $0x120] sm:$0xff] %vm686_vm1, %v1072_v58  ;;  %1099 = vrcp.f32 %v578_v55  ;;  %v269_v62 = vpop.f32.mrf.mxu0 }
 0x12f   :  { %v373_v63 = vpop.f32.mrf.mxu1  ;;  %v1076_v1 = vpop.eup %1075  ;;  %v553_v2 = vadd.f32 1.0, %v1074_v61  ;;  %1101 = vpow2.f32 %v767_v59  ;;  %v270_v3 = vadd.f32 %v1431_v20, %v269_v62 }
 0x130   :  { %v374_v4 = vadd.f32 %v1431_v20, %v373_v63  ;;  %v1078_v5 = vpop.eup %1077  ;;  %v579_v6 = vadd.f32 1.0, %v1076_v1  ;;  %v886_v7 = vpop.f32.mrf.mxu0  ;;  %1103 = vpow2.f32 %v793_v60 }
 0x131   :  { %v938_v8 = vpop.f32.mrf.mxu1  ;;  %v1080_v9 = vpop.eup %1079  ;;  %698 = vst.msk [vmem:[%s1681_s3 + $0x58] sm:$0xff] %vm686_vm1, %v1078_v5  ;;  %1105 = vrcp.f32 %v553_v2  ;;  %v768_v10 = vmul.f32 -1.442695, %v270_v3 }
 0x132   :  { %v794_v11 = vmul.f32 -1.442695, %v374_v4  ;;  %v1082_v12 = vpop.eup %1081  ;;  %724 = vst.msk [vmem:[%s1681_s3 + $0x128] sm:$0xff] %vm686_vm1, %v1080_v9  ;;  %1107 = vrcp.f32 %v579_v6  ;;  %v274_v13 = vpop.f32.mrf.mxu0 }
 0x133   :  { %v378_v14 = vpop.f32.mrf.mxu1  ;;  %v1084_v15 = vpop.eup %1083  ;;  %v554_v16 = vadd.f32 1.0, %v1082_v12  ;;  %1109 = vpow2.f32 %v768_v10  ;;  %v275_v17 = vadd.f32 %v1431_v20, %v274_v13 }
 0x134   :  { %v379_v18 = vadd.f32 %v1431_v20, %v378_v14  ;;  %v1086_v19 = vpop.eup %1085  ;;  %v580_v21 = vadd.f32 1.0, %v1084_v15  ;;  %v889_v22 = vpop.f32.mrf.mxu0  ;;  %1111 = vpow2.f32 %v794_v11 }
 0x135   :  { %v941_v23 = vpop.f32.mrf.mxu1  ;;  %v1088_v0 = vpop.eup %1087  ;;  %1113 = vrcp.f32 %v554_v16  ;;  %v555_v24 = vadd.f32 1.0, %v1086_v19  ;;  %v769_v25 = vmul.f32 -1.442695, %v275_v17 }
 0x136   :  { %v1090_v26 = vpop.eup %1089  ;;  %1115 = vrcp.f32 %v580_v21  ;;  %v581_v27 = vadd.f32 1.0, %v1088_v0  ;;  %v277_v28 = vpop.f32.mrf.mxu0  ;;  %v795_v29 = vmul.f32 -1.442695, %v379_v18 }
 0x137   :  { %v381_v30 = vpop.f32.mrf.mxu1  ;;  %v1092_v31 = vpop.eup %1091  ;;  %699 = vst.msk [vmem:[%s1681_s3 + $0x60] sm:$0xff] %vm686_vm1, %v1090_v26  ;;  %1117 = vrcp.f32 %v555_v24  ;;  %v278_v32 = vadd.f32 %v1431_v20, %v277_v28 }
 0x138   :  { %v382_v33 = vadd.f32 %v1431_v20, %v381_v30  ;;  %v1094_v34 = vpop.eup %1093  ;;  %725 = vst.msk [vmem:[%s1681_s3 + $0x130] sm:$0xff] %vm686_vm1, %v1092_v31  ;;  %1119 = vrcp.f32 %v581_v27  ;;  %v890_v35 = vpop.f32.mrf.mxu0 }
 0x139   :  { %v942_v36 = vpop.f32.mrf.mxu1  ;;  %v1096_v37 = vpop.eup %1095  ;;  %v556_v38 = vadd.f32 1.0, %v1094_v34  ;;  %1121 = vpow2.f32 %v769_v25  ;;  %v770_v39 = vmul.f32 -1.442695, %v278_v32 }
 0x13a   :  { %v1098_v40 = vpop.eup %1097  ;;  %v582_v41 = vadd.f32 1.0, %v1096_v37  ;;  %1123 = vpow2.f32 %v795_v29  ;;  %v282_v42 = vpop.f32.mrf.mxu0  ;;  %v796_v43 = vmul.f32 -1.442695, %v382_v33 }
 0x13b   :  { %v386_v44 = vpop.f32.mrf.mxu1  ;;  %v1100_v45 = vpop.eup %1099  ;;  %700 = vst.msk [vmem:[%s1681_s3 + $0x68] sm:$0xff] %vm686_vm1, %v1098_v40  ;;  %1125 = vrcp.f32 %v556_v38  ;;  %v283_v46 = vadd.f32 %v1431_v20, %v282_v42 }
 0x13c   :  { %v387_v47 = vadd.f32 %v1431_v20, %v386_v44  ;;  %v1102_v48 = vpop.eup %1101  ;;  %726 = vst.msk [vmem:[%s1681_s3 + $0x138] sm:$0xff] %vm686_vm1, %v1100_v45  ;;  %1127 = vrcp.f32 %v582_v41  ;;  %v893_v49 = vpop.f32.mrf.mxu0 }
 0x13d   :  { %v945_v50 = vpop.f32.mrf.mxu1  ;;  %v1104_v51 = vpop.eup %1103  ;;  %v557_v52 = vadd.f32 1.0, %v1102_v48  ;;  %1129 = vpow2.f32 %v770_v39  ;;  %v771_v53 = vmul.f32 -1.442695, %v283_v46 }
 0x13e   :  { %v1106_v54 = vpop.eup %1105  ;;  %v583_v55 = vadd.f32 1.0, %v1104_v51  ;;  %1131 = vpow2.f32 %v796_v43  ;;  %v285_v56 = vpop.f32.mrf.mxu0  ;;  %v797_v57 = vmul.f32 -1.442695, %v387_v47 }
 0x13f   :  { %v389_v58 = vpop.f32.mrf.mxu1  ;;  %v1108_v59 = vpop.eup %1107  ;;  %701 = vst.msk [vmem:[%s1681_s3 + $0x70] sm:$0xff] %vm686_vm1, %v1106_v54  ;;  %1133 = vrcp.f32 %v557_v52  ;;  %v286_v60 = vadd.f32 %v1431_v20, %v285_v56 }
 0x140   :  { %v1110_v61 = vpop.eup %1109  ;;  %727 = vst.msk [vmem:[%s1681_s3 + $0x140] sm:$0xff] %vm686_vm1, %v1108_v59  ;;  %1135 = vrcp.f32 %v583_v55  ;;  %v894_v62 = vpop.f32.mrf.mxu0 }
 0x141   :  { %v946_v63 = vpop.f32.mrf.mxu1  ;;  %v1112_v1 = vpop.eup %1111  ;;  %v558_v2 = vadd.f32 1.0, %v1110_v61  ;;  %1137 = vpow2.f32 %v771_v53  ;;  %v772_v3 = vmul.f32 -1.442695, %v286_v60 }
 0x142   :  { %v1114_v4 = vpop.eup %1113  ;;  %v584_v5 = vadd.f32 1.0, %v1112_v1  ;;  %1139 = vpow2.f32 %v797_v57  ;;  %v290_v6 = vpop.f32.mrf.mxu0 }
 0x143   :  { %v1116_v7 = vpop.eup %1115  ;;  %702 = vst.msk [vmem:[%s1681_s3 + $0x78] sm:$0xff] %vm686_vm1, %v1114_v4  ;;  %1141 = vrcp.f32 %v558_v2  ;;  %v291_v8 = vadd.f32 %v1431_v20, %v290_v6 }
 0x144   :  { %v1118_v9 = vpop.eup %1117  ;;  %728 = vst.msk [vmem:[%s1681_s3 + $0x148] sm:$0xff] %vm686_vm1, %v1116_v7  ;;  %1143 = vrcp.f32 %v584_v5  ;;  %v897_v10 = vpop.f32.mrf.mxu0 }
 0x145   :  { %v1120_v11 = vpop.eup %1119  ;;  %703 = vst.msk [vmem:[%s1681_s3 + $0x80] sm:$0xff] %vm686_vm1, %v1118_v9  ;;  %1145 = vpow2.f32 %v772_v3  ;;  %v773_v12 = vmul.f32 -1.442695, %v291_v8 }
 0x146   :  { %v1122_v13 = vpop.eup %1121  ;;  %729 = vst.msk [vmem:[%s1681_s3 + $0x150] sm:$0xff] %vm686_vm1, %v1120_v11  ;;  %v293_v14 = vpop.f32.mrf.mxu0 }
 0x147   :  { %v1124_v15 = vpop.eup %1123  ;;  %v559_v16 = vadd.f32 1.0, %v1122_v13  ;;  %1147 = vpow2.f32 %v773_v12  ;;  %v294_v17 = vadd.f32 %v1431_v20, %v293_v14 }
 0x148   :  { %v1126_v18 = vpop.eup %1125  ;;  %v585_v19 = vadd.f32 1.0, %v1124_v15  ;;  %v898_v21 = vpop.f32.mrf.mxu0 }
 0x149   :  { %v1128_v22 = vpop.eup %1127  ;;  %704 = vst.msk [vmem:[%s1681_s3 + $0x88] sm:$0xff] %vm686_vm1, %v1126_v18  ;;  %1149 = vrcp.f32 %v559_v16  ;;  %v774_v23 = vmul.f32 -1.442695, %v294_v17 }
 0x14a   :  { %v1130_v0 = vpop.eup %1129  ;;  %730 = vst.msk [vmem:[%s1681_s3 + $0x158] sm:$0xff] %vm686_vm1, %v1128_v22  ;;  %1151 = vrcp.f32 %v585_v19 }
 0x14b   :  { %v1132_v24 = vpop.eup %1131  ;;  %v560_v20 = vadd.f32 1.0, %v1130_v0  ;;  %1153 = vpow2.f32 %v774_v23 }
 0x14c   :  { %v1134_v25 = vpop.eup %1133  ;;  %v586_v26 = vadd.f32 1.0, %v1132_v24 }
 0x14d   :  { %v1136_v27 = vpop.eup %1135  ;;  %705 = vst.msk [vmem:[%s1681_s3 + $0x90] sm:$0xff] %vm686_vm1, %v1134_v25  ;;  %1155 = vrcp.f32 %v560_v20 }
 0x14e   :  { %v1138_v28 = vpop.eup %1137  ;;  %731 = vst.msk [vmem:[%s1681_s3 + $0x160] sm:$0xff] %vm686_vm1, %v1136_v27  ;;  %1157 = vrcp.f32 %v586_v26 }
 0x14f   :  { %v1140_v29 = vpop.eup %1139  ;;  %v561_v30 = vadd.f32 1.0, %v1138_v28 }
 0x150   :  { %v1142_v31 = vpop.eup %1141  ;;  %v587_v32 = vadd.f32 1.0, %v1140_v29 }
 0x151   :  { %v1144_v33 = vpop.eup %1143  ;;  %706 = vst.msk [vmem:[%s1681_s3 + $0x98] sm:$0xff] %vm686_vm1, %v1142_v31  ;;  %1159 = vrcp.f32 %v561_v30 }
 0x152   :  { %v1146_v34 = vpop.eup %1145  ;;  %732 = vst.msk [vmem:[%s1681_s3 + $0x168] sm:$0xff] %vm686_vm1, %v1144_v33  ;;  %1161 = vrcp.f32 %v587_v32 }
 0x153   :  { %v562_v35 = vadd.f32 1.0, %v1146_v34 }
 0x154   :  { %v1148_v36 = vpop.eup %1147 }
 0x155   :  { %1163 = vrcp.f32 %v562_v35  ;;  %v563_v37 = vadd.f32 1.0, %v1148_v36 }
 0x156   :  { %v1150_v38 = vpop.eup %1149 }
 0x157   :  { %v1152_v39 = vpop.eup %1151  ;;  %707 = vst.msk [vmem:[%s1681_s3 + $0xa0] sm:$0xff] %vm686_vm1, %v1150_v38  ;;  %1165 = vrcp.f32 %v563_v37 }
 0x158   :  { %v1154_v40 = vpop.eup %1153  ;;  %733 = vst.msk [vmem:[%s1681_s3 + $0x170] sm:$0xff] %vm686_vm1, %v1152_v39 }
 0x159   :  { %v564_v41 = vadd.f32 1.0, %v1154_v40 }
 0x15a   :  { %v1156_v42 = vpop.eup %1155 }
 0x15b   :  { %v1158_v43 = vpop.eup %1157  ;;  %708 = vst.msk [vmem:[%s1681_s3 + $0xa8] sm:$0xff] %vm686_vm1, %v1156_v42  ;;  %1167 = vrcp.f32 %v564_v41 }
 0x15c   :  { %734 = vst.msk [vmem:[%s1681_s3 + $0x178] sm:$0xff] %vm686_vm1, %v1158_v43 }
 0x15e   :  { %v1160_v44 = vpop.eup %1159 }
 0x15f   :  { %v1162_v45 = vpop.eup %1161  ;;  %709 = vst.msk [vmem:[%s1681_s3 + $0xb0] sm:$0xff] %vm686_vm1, %v1160_v44 }
 0x160   :  { %735 = vst.msk [vmem:[%s1681_s3 + $0x180] sm:$0xff] %vm686_vm1, %v1162_v45 }
 0x162   :  { %v1164_v46 = vpop.eup %1163 }
 0x163   :  { %710 = vst.msk [vmem:[%s1681_s3 + $0xb8] sm:$0xff] %vm686_vm1, %v1164_v46 }
 0x164   :  { %v1166_v47 = vpop.eup %1165 }
 0x165   :  { %711 = vst.msk [vmem:[%s1681_s3 + $0xc0] sm:$0xff] %vm686_vm1, %v1166_v47 }
 0x168   :  { %v1168_v48 = vpop.eup %1167 }
 0x169   :  { %712 = vst.msk [vmem:[%s1681_s3 + $0xc8] sm:$0xff] %vm686_vm1, %v1168_v48 }

// kernel: vae_forward.7
= control target key start
LH: loop header
LB: loop body
LE: loop exit
PB: predicated region body
PF: predicated region fallthrough
CT: control target
= control target key end

     0   :  { %20 = vsyncpa [#allocation3], 0  ;;  %v9048_v35 = vmov 1983009808   ;;  %v65_v37 = vlaneseq  ;;  %vm2584_vm0 = vcmask 523264   ;;  %s11889_s0 = inlined_call_operand.vmem [shape: f32[2,3136], index: 0, kind: input, shape index: {}]   ;;  %s11890_s1 = inlined_call_operand.vmem [shape: f32[2,20], index: 1, kind: input, shape index: {}]   ;;  %s11891_s2 = inlined_call_operand.vmem [shape: bf16[3136,256], index: 2, kind: input, shape index: {}]   ;;  %s11892_s3 = inlined_call_operand.vmem [shape: f32[1,256], index: 3, kind: input, shape index: {}]   ;;  %s11893_s4 = inlined_call_operand.vmem [shape: bf16[256,20], index: 4, kind: input, shape index: {}]   ;;  %s11894_s5 = inlined_call_operand.vmem [shape: f32[1,20], index: 5, kind: input, shape index: {}]   ;;  %s11895_s6 = inlined_call_operand.vmem [shape: bf16[256,20], index: 6, kind: input, shape index: {}]   ;;  %s11896_s7 = inlined_call_operand.vmem [shape: f32[1,20], index: 7, kind: input, shape index: {}]   ;;  %s11897_s8 = inlined_call_operand.vmem [shape: bf16[20,256], index: 8, kind: input, shape index: {}]   ;;  %s11898_s9 = inlined_call_operand.vmem [shape: f32[1,256], index: 9, kind: input, shape index: {}]   ;;  %s11899_s10 = inlined_call_operand.vmem [shape: bf16[256,3136], index: 10, kind: input, shape index: {}]   ;;  %s11900_s11 = inlined_call_operand.vmem [shape: f32[1,3136], index: 11, kind: input, shape index: {}]   ;;  %s11901_s12 = inlined_call_operand.vmem [shape: f32[2,3136], index: 12, kind: output, shape index: {0}]   ;;  %s11902_s13 = inlined_call_operand.hbm [shape: f32[2,20], index: 13, kind: output, shape index: {1}]   ;;  %s11903_s14 = inlined_call_operand.hbm [shape: f32[2,20], index: 14, kind: output, shape index: {2}]  }
   0x1   :  { %v7779_v0 = vld [vmem:[%s11891_s2 + $0x74] ss:$8 sps:$4 sm:$0xff]   ;;  %v7781_v1 = vld [vmem:[%s11891_s2 + $0x70] ss:$8 sps:$4 sm:$0xff]   ;;  %v7785_v4 = vld [vmem:[%s11891_s2 + $0x64] ss:$8 sps:$4 sm:$0xff]   ;;  %v63_v36 = vunpack.c.l.s4 %v9048_v35 }
   0x2   :  { %2588 = vmatprep.subr.bf16.mxu0 %v7779_v0  ;;  %v7782_v2 = vld [vmem:[%s11891_s2 + $0x174] ss:$8 sps:$4 sm:$0xff]   ;;  %v7784_v3 = vld [vmem:[%s11891_s2 + $0x170] ss:$8 sps:$4 sm:$0xff]   ;;  %v7787_v5 = vld [vmem:[%s11891_s2 + $0x60] ss:$8 sps:$4 sm:$0xff]  }
   0x3   :  { %2589 = vmatpush1.bf16.msra.mxu0 %v7781_v1  ;;  %2629 = vmatprep.subr.bf16.mxu1 %v7782_v2  ;;  %v7788_v6 = vld [vmem:[%s11891_s2 + $0x164] ss:$8 sps:$4 sm:$0xff]   ;;  %v7790_v7 = vld [vmem:[%s11891_s2 + $0x160] ss:$8 sps:$4 sm:$0xff]   ;;  %v7791_v8 = vld [vmem:[%s11891_s2 + $0x54] ss:$8 sps:$4 sm:$0xff]   ;;  %v64_v42 = vunpack.c.0.s8 %v63_v36 }
   0x4   :  { %2630 = vmatpush1.bf16.msra.mxu1 %v7784_v3  ;;  %2590 = vmatprep.subr.bf16.mxu0 %v7785_v4  ;;  %v7793_v9 = vld [vmem:[%s11891_s2 + $0x50] ss:$8 sps:$4 sm:$0xff]   ;;  %v7794_v10 = vld [vmem:[%s11891_s2 + $0x154] ss:$8 sps:$4 sm:$0xff]   ;;  %v7797_v11 = vld [vmem:[%s11891_s2 + $0x44] ss:$8 sps:$4 sm:$0xff]  }
   0x5   :  { %2631 = vmatprep.subr.bf16.mxu1 %v7788_v6  ;;  %v7796_v12 = vld [vmem:[%s11891_s2 + $0x150] ss:$8 sps:$4 sm:$0xff]   ;;  %v7800_v13 = vld [vmem:[%s11891_s2 + $0x144] ss:$8 sps:$4 sm:$0xff]   ;;  %v7799_v14 = vld [vmem:[%s11891_s2 + $0x40] ss:$8 sps:$4 sm:$0xff]  }
   0x6   :  { %v7803_v15 = vld [vmem:[%s11891_s2 + $0x34] ss:$8 sps:$4 sm:$0xff]   ;;  %v7802_v16 = vld [vmem:[%s11891_s2 + $0x140] ss:$8 sps:$4 sm:$0xff]   ;;  %v7805_v18 = vld [vmem:[%s11891_s2 + $0x30] ss:$8 sps:$4 sm:$0xff]  }
   0x7   :  { %2591 = vmatpush1.bf16.msra.mxu0 %v7787_v5  ;;  %v7806_v17 = vld [vmem:[%s11891_s2 + $0x134] ss:$8 sps:$4 sm:$0xff]   ;;  %v7809_v19 = vld [vmem:[%s11891_s2 + $0x24] ss:$8 sps:$4 sm:$0xff]   ;;  %v7808_v20 = vld [vmem:[%s11891_s2 + $0x130] ss:$8 sps:$4 sm:$0xff]  }
   0x8   :  { %2592 = vmatprep.subr.bf16.mxu0 %v7791_v8  ;;  %2632 = vmatpush1.bf16.msra.mxu1 %v7790_v7  ;;  %v7812_v21 = vld [vmem:[%s11891_s2 + $0x124] ss:$8 sps:$4 sm:$0xff]   ;;  %v7811_v22 = vld [vmem:[%s11891_s2 + $0x20] ss:$8 sps:$4 sm:$0xff]   ;;  %v7815_v23 = vld [vmem:[%s11891_s2 + $0x14] ss:$8 sps:$4 sm:$0xff]  }
   0x9   :  { %2633 = vmatprep.subr.bf16.mxu1 %v7794_v10  ;;  %v7814_v24 = vld [vmem:[%s11891_s2 + $0x120] ss:$8 sps:$4 sm:$0xff]   ;;  %v7818_v25 = vld [vmem:[%s11891_s2 + $0x114] ss:$8 sps:$4 sm:$0xff]   ;;  %v7817_v26 = vld [vmem:[%s11891_s2 + $0x10] ss:$8 sps:$4 sm:$0xff]  }
   0xa   :  { %v7821_v27 = vld [vmem:[%s11891_s2 + $0x4] ss:$8 sps:$4 sm:$0xff]   ;;  %v7820_v28 = vld [vmem:[%s11891_s2 + $0x110] ss:$8 sps:$4 sm:$0xff]   ;;  %v7823_v30 = vld [vmem:[%s11891_s2] ss:$8 sps:$4 sm:$0xff]  }
   0xb   :  { %2593 = vmatpush1.bf16.msra.mxu0 %v7793_v9  ;;  %v7824_v29 = vld [vmem:[%s11891_s2 + $0x104] ss:$8 sps:$4 sm:$0xff]   ;;  %v7827_v31 = vld [vmem:[%s11891_s2 + $0xf4] ss:$8 sps:$4 sm:$0xff]   ;;  %v7826_v32 = vld [vmem:[%s11891_s2 + $0x100] ss:$8 sps:$4 sm:$0xff]  }
   0xc   :  { %2594 = vmatprep.subr.bf16.mxu0 %v7797_v11  ;;  %2634 = vmatpush1.bf16.msra.mxu1 %v7796_v12  ;;  %v7830_v33 = vld [vmem:[%s11891_s2 + $0x1f4] ss:$8 sps:$4 sm:$0xff]   ;;  %v7829_v34 = vld [vmem:[%s11891_s2 + $0xf0] ss:$8 sps:$4 sm:$0xff]   ;;  %v7833_v38 = vld [vmem:[%s11891_s2 + $0xe4] ss:$8 sps:$4 sm:$0xff]  }
   0xd   :  { %2635 = vmatprep.subr.bf16.mxu1 %v7800_v13  ;;  %v7832_v39 = vld [vmem:[%s11891_s2 + $0x1f0] ss:$8 sps:$4 sm:$0xff]   ;;  %v7836_v40 = vld [vmem:[%s11891_s2 + $0x1e4] ss:$8 sps:$4 sm:$0xff]   ;;  %v7835_v41 = vld [vmem:[%s11891_s2 + $0xe0] ss:$8 sps:$4 sm:$0xff]  }
   0xe   :  { %v9244_v43 = vshrl.u32 %v65_v37, 7  ;;  %v7839_v44 = vld [vmem:[%s11891_s2 + $0xd4] ss:$8 sps:$4 sm:$0xff]   ;;  %v7838_v45 = vld [vmem:[%s11891_s2 + $0x1e0] ss:$8 sps:$4 sm:$0xff]  }
   0xf   :  { %2595 = vmatpush1.bf16.msra.mxu0 %v7799_v14  ;;  %v7842_v46 = vld [vmem:[%s11891_s2 + $0x1d4] ss:$8 sps:$4 sm:$0xff]   ;;  %v7841_v47 = vld [vmem:[%s11891_s2 + $0xd0] ss:$8 sps:$4 sm:$0xff]   ;;  %v7845_v49 = vld [vmem:[%s11891_s2 + $0xc4] ss:$8 sps:$4 sm:$0xff]  }
  0x10   :  { %2596 = vmatprep.subr.bf16.mxu0 %v7803_v15  ;;  %2636 = vmatpush1.bf16.msra.mxu1 %v7802_v16  ;;  %v9259_v48 = vsub.s32 %v64_v42, %v9244_v43  ;;  %v7844_v50 = vld [vmem:[%s11891_s2 + $0x1d0] ss:$8 sps:$4 sm:$0xff]   ;;  %v7848_v51 = vld [vmem:[%s11891_s2 + $0x1c4] ss:$8 sps:$4 sm:$0xff]   ;;  %v7847_v53 = vld [vmem:[%s11891_s2 + $0xc0] ss:$8 sps:$4 sm:$0xff]  }
  0x11   :  { %2637 = vmatprep.subr.bf16.mxu1 %v7806_v17  ;;  %v47_v52 = vld [vmem:[%s11889_s0] sm:$0xff]  ;;  %v7851_v56 = vld [vmem:[%s11891_s2 + $0xb4] ss:$8 sps:$4 sm:$0xff]   ;;  %v7853_v61 = vld [vmem:[%s11891_s2 + $0xb0] ss:$8 sps:$4 sm:$0xff]  }
  0x12   :  { %v68_v54 = vrot.slane %v47_v52, %v9259_v48  ;;  %v61_v55 = vcombine.high %v47_v52, %v47_v52  ;;  %v7850_v57 = vld [vmem:[%s11891_s2 + $0x1c0] ss:$8 sps:$4 sm:$0xff]   ;;  %v7854_v60 = vld [vmem:[%s11891_s2 + $0x1b4] ss:$8 sps:$4 sm:$0xff]   ;;  %v7857_v0 = vld [vmem:[%s11891_s2 + $0xa4] ss:$8 sps:$4 sm:$0xff]  }
  0x13   :  { %2597 = vmatpush1.bf16.msra.mxu0 %v7805_v18  ;;  %v7856_v1 = vld [vmem:[%s11891_s2 + $0x1b0] ss:$8 sps:$4 sm:$0xff]   ;;  %v7860_v3 = vld [vmem:[%s11891_s2 + $0x1a4] ss:$8 sps:$4 sm:$0xff]   ;;  %v7859_v4 = vld [vmem:[%s11891_s2 + $0xa0] ss:$8 sps:$4 sm:$0xff]  }
  0x14   :  { %2598 = vmatprep.subr.bf16.mxu0 %v7809_v19  ;;  %2638 = vmatpush1.bf16.msra.mxu1 %v7808_v20  ;;  %v76_v58 = vcombine.high %v68_v54, %v68_v54  ;;  %v75_v59 = vrot.slane %v61_v55, %v9259_v48  ;;  %v7863_v5 = vld [vmem:[%s11891_s2 + $0x94] ss:$8 sps:$4 sm:$0xff]   ;;  %v7862_v6 = vld [vmem:[%s11891_s2 + $0x1a0] ss:$8 sps:$4 sm:$0xff]   ;;  %v7865_v8 = vld [vmem:[%s11891_s2 + $0x90] ss:$8 sps:$4 sm:$0xff]   ;;  %v195_v15 = vpack.c.bf16 %v68_v54, %v68_v54 }
  0x15   :  { %2639 = vmatprep.subr.bf16.mxu1 %v7812_v21  ;;  %v7866_v7 = vld [vmem:[%s11891_s2 + $0x194] ss:$8 sps:$4 sm:$0xff]   ;;  %v7869_v9 = vld [vmem:[%s11891_s2 + $0x84] ss:$8 sps:$4 sm:$0xff]   ;;  %v7868_v10 = vld [vmem:[%s11891_s2 + $0x190] ss:$8 sps:$4 sm:$0xff]  }
  0x16   :  { %v196_v62 = vpack.c.bf16 %v76_v58, %v76_v58  ;;  %v77_v63 = vcombine.high %v75_v59, %v75_v59  ;;  %v7872_v11 = vld [vmem:[%s11891_s2 + $0x184] ss:$8 sps:$4 sm:$0xff]   ;;  %v7871_v12 = vld [vmem:[%s11891_s2 + $0x80] ss:$8 sps:$4 sm:$0xff]   ;;  %v7877_v13 = vld [vmem:[%s11891_s2 + $0x274] ss:$8 sps:$4 sm:$0xff]   ;;  %v197_v18 = vpack.c.bf16 %v75_v59, %v75_v59 }
  0x17   :  { %2599 = vmatpush1.bf16.msra.mxu0 %v7811_v22  ;;  %v7874_v14 = vld [vmem:[%s11891_s2 + $0x180] ss:$8 sps:$4 sm:$0xff]   ;;  %v7881_v16 = vld [vmem:[%s11891_s2 + $0x374] ss:$8 sps:$4 sm:$0xff]   ;;  %v7875_v17 = vld [vmem:[%s11891_s2 + $0x270] ss:$8 sps:$4 sm:$0xff]  }
  0x18   :  { %2600 = vmatprep.subr.bf16.mxu0 %v7815_v23  ;;  %2640 = vmatpush1.bf16.msra.mxu1 %v7814_v24  ;;  %v198_v2 = vpack.c.bf16 %v77_v63, %v77_v63  ;;  %v7884_v19 = vld [vmem:[%s11891_s2 + $0x264] ss:$8 sps:$4 sm:$0xff]   ;;  %v7879_v20 = vld [vmem:[%s11891_s2 + $0x370] ss:$8 sps:$4 sm:$0xff]   ;;  %v7882_v22 = vld [vmem:[%s11891_s2 + $0x260] ss:$8 sps:$4 sm:$0xff]  }
  0x19   :  { %2641 = vmatprep.subr.bf16.mxu1 %v7818_v25  ;;  %2620 = vmatprep.mubr.bf16.mxu0 %v196_v62  ;;  %v7887_v21 = vld [vmem:[%s11891_s2 + $0x364] ss:$8 sps:$4 sm:$0xff]   ;;  %v7890_v23 = vld [vmem:[%s11891_s2 + $0x254] ss:$8 sps:$4 sm:$0xff]   ;;  %v7885_v24 = vld [vmem:[%s11891_s2 + $0x360] ss:$8 sps:$4 sm:$0xff]  }
  0x1a   :  { %2661 = vmatprep.mubr.bf16.mxu1 %v198_v2  ;;  %v7893_v25 = vld [vmem:[%s11891_s2 + $0x354] ss:$8 sps:$4 sm:$0xff]   ;;  %v7908_v35 = vld [vmem:[%s11891_s2 + $0x224] ss:$8 sps:$4 sm:$0xff]   ;;  %v7903_v36 = vld [vmem:[%s11891_s2 + $0x330] ss:$8 sps:$4 sm:$0xff]  }
  0x1b   :  { %2601 = vmatpush1.bf16.msra.mxu0 %v7817_v26  ;;  %v7888_v26 = vld [vmem:[%s11891_s2 + $0x250] ss:$8 sps:$4 sm:$0xff]   ;;  %v7911_v37 = vld [vmem:[%s11891_s2 + $0x324] ss:$8 sps:$4 sm:$0xff]   ;;  %v7917_v42 = vld [vmem:[%s11891_s2 + $0x314] ss:$8 sps:$4 sm:$0xff]  }
  0x1c   :  { %2602 = vmatprep.subr.bf16.mxu0 %v7821_v27  ;;  %2642 = vmatpush1.bf16.msra.mxu1 %v7820_v28  ;;  %v7896_v27 = vld [vmem:[%s11891_s2 + $0x244] ss:$8 sps:$4 sm:$0xff]   ;;  %v7891_v28 = vld [vmem:[%s11891_s2 + $0x350] ss:$8 sps:$4 sm:$0xff]   ;;  %v7918_v55 = vld [vmem:[%s11891_s2 + $0x200] ss:$8 sps:$4 sm:$0xff]  }
  0x1d   :  { %2643 = vmatprep.subr.bf16.mxu1 %v7824_v29  ;;  %v7899_v29 = vld [vmem:[%s11891_s2 + $0x344] ss:$8 sps:$4 sm:$0xff]   ;;  %v7921_v58 = vld [vmem:[%s11891_s2 + $0x300] ss:$8 sps:$4 sm:$0xff]   ;;  %v7929_v59 = vld [vmem:[%s11891_s2 + $0x3f4] ss:$8 sps:$4 sm:$0xff]  }
  0x1e   :  { %v7923_v52 = vld [vmem:[%s11891_s2 + $0x304] ss:$8 sps:$4 sm:$0xff]   ;;  %v7927_v62 = vld [vmem:[%s11891_s2 + $0x3f0] ss:$8 sps:$4 sm:$0xff]   ;;  %v7933_v2 = vld [vmem:[%s11891_s2 + $0x3e0] ss:$8 sps:$4 sm:$0xff]  }
  0x1f   :  { %2603 = vmatpush1.bf16.msra.mxu0 %v7823_v30  ;;  %v7894_v30 = vld [vmem:[%s11891_s2 + $0x240] ss:$8 sps:$4 sm:$0xff]   ;;  %v7935_v63 = vld [vmem:[%s11891_s2 + $0x3e4] ss:$8 sps:$4 sm:$0xff]  }
  0x20   :  { %2604 = vmatprep.subr.bf16.mxu0 %v7827_v31  ;;  %2644 = vmatpush1.bf16.msra.mxu1 %v7826_v32  ;;  %v7902_v31 = vld [vmem:[%s11891_s2 + $0x234] ss:$8 sps:$4 sm:$0xff]   ;;  %v7897_v32 = vld [vmem:[%s11891_s2 + $0x340] ss:$8 sps:$4 sm:$0xff]  }
  0x21   :  { %2645 = vmatprep.subr.bf16.mxu1 %v7830_v33  ;;  %v7905_v33 = vld [vmem:[%s11891_s2 + $0x334] ss:$8 sps:$4 sm:$0xff]  }
  0x23   :  { %2605 = vmatpush2.bf16.msra.mxu0 %v7829_v34  ;;  %v7900_v34 = vld [vmem:[%s11891_s2 + $0x230] ss:$8 sps:$4 sm:$0xff]  }
  0x24   :  { %2606 = vmatprep.subr.bf16.mxu0 %v7833_v38  ;;  %2646 = vmatpush2.bf16.msra.mxu1 %v7832_v39  ;;  %v7906_v38 = vld [vmem:[%s11891_s2 + $0x220] ss:$8 sps:$4 sm:$0xff]   ;;  %v7914_v39 = vld [vmem:[%s11891_s2 + $0x214] ss:$8 sps:$4 sm:$0xff]  }
  0x25   :  { %2647 = vmatprep.subr.bf16.mxu1 %v7836_v40  ;;  %v7909_v40 = vld [vmem:[%s11891_s2 + $0x320] ss:$8 sps:$4 sm:$0xff]  }
  0x27   :  { %2607 = vmatpush2.bf16.msra.mxu0 %v7835_v41  ;;  %v48_v41 = vld [vmem:[%s11889_s0 + $0x8] sm:$0xff] }
  0x28   :  { %2608 = vmatprep.subr.bf16.mxu0 %v7839_v44  ;;  %2648 = vmatpush2.bf16.msra.mxu1 %v7838_v45  ;;  %v9411_v44 = vrot.slane %v48_v41, %v9259_v48  ;;  %v78_v45 = vcombine.high %v48_v41, %v48_v41  ;;  %v7982_v41 = vld [vmem:[%s11891_s2 + $0x560] ss:$8 sps:$4 sm:$0xff]  }
  0x29   :  { %2649 = vmatprep.subr.bf16.mxu1 %v7842_v46  ;;  %v7912_v46 = vld [vmem:[%s11891_s2 + $0x210] ss:$8 sps:$4 sm:$0xff]  }
  0x2b   :  { %2609 = vmatpush2.bf16.msra.mxu0 %v7841_v47  ;;  %v7920_v47 = vld [vmem:[%s11891_s2 + $0x204] ss:$8 sps:$4 sm:$0xff]  }
  0x2c   :  { %2610 = vmatprep.subr.bf16.mxu0 %v7845_v49  ;;  %2650 = vmatpush2.bf16.msra.mxu1 %v7844_v50  ;;  %v93_v49 = vcombine.high %v9411_v44, %v9411_v44  ;;  %v9422_v50 = vrot.slane %v78_v45, %v9259_v48  ;;  %v7990_v45 = vld [vmem:[%s11891_s2 + $0x554] ss:$8 sps:$4 sm:$0xff]  }
  0x2d   :  { %2651 = vmatprep.subr.bf16.mxu1 %v7848_v51  ;;  %v7915_v51 = vld [vmem:[%s11891_s2 + $0x310] ss:$8 sps:$4 sm:$0xff]  }
  0x2e   :  { %v94_v54 = vcombine.high %v9422_v50, %v9422_v50 }
  0x2f   :  { %2611 = vmatpush2.bf16.msra.mxu0 %v7847_v53  ;;  %v200_v53 = vpack.c.bf16 %v93_v49, %v93_v49  ;;  %v7993_v49 = vld [vmem:[%s11891_s2 + $0x444] ss:$8 sps:$4 sm:$0xff]  }
  0x30   :  { %2612 = vmatprep.subr.bf16.mxu0 %v7851_v56  ;;  %2652 = vmatpush2.bf16.msra.mxu1 %v7850_v57  ;;  %v7926_v56 = vld [vmem:[%s11891_s2 + $0x2f4] ss:$8 sps:$4 sm:$0xff]   ;;  %v202_v57 = vpack.c.bf16 %v94_v54, %v94_v54  ;;  %v7994_v54 = vld [vmem:[%s11891_s2 + $0x540] ss:$8 sps:$4 sm:$0xff]  }
  0x31   :  { %2653 = vmatprep.subr.bf16.mxu1 %v7854_v60  ;;  %v7924_v60 = vld [vmem:[%s11891_s2 + $0x2f0] ss:$8 sps:$4 sm:$0xff]  }
  0x33   :  { %2613 = vmatpush2.bf16.msra.mxu0 %v7853_v61  ;;  %v7932_v61 = vld [vmem:[%s11891_s2 + $0x2e4] ss:$8 sps:$4 sm:$0xff]  }
  0x34   :  { %2614 = vmatprep.subr.bf16.mxu0 %v7857_v0  ;;  %2654 = vmatpush2.bf16.msra.mxu1 %v7856_v1  ;;  %v7930_v0 = vld [vmem:[%s11891_s2 + $0x2e0] ss:$8 sps:$4 sm:$0xff]   ;;  %v7938_v1 = vld [vmem:[%s11891_s2 + $0x2d4] ss:$8 sps:$4 sm:$0xff]  }
  0x35   :  { %2655 = vmatprep.subr.bf16.mxu1 %v7860_v3  ;;  %v7941_v3 = vld [vmem:[%s11891_s2 + $0x3d4] ss:$8 sps:$4 sm:$0xff]  }
  0x37   :  { %2615 = vmatpush2.bf16.msra.mxu0 %v7859_v4  ;;  %v7936_v4 = vld [vmem:[%s11891_s2 + $0x2d0] ss:$8 sps:$4 sm:$0xff]  }
  0x38   :  { %2616 = vmatprep.subr.bf16.mxu0 %v7863_v5  ;;  %2656 = vmatpush2.bf16.msra.mxu1 %v7862_v6  ;;  %v7944_v5 = vld [vmem:[%s11891_s2 + $0x2c4] ss:$8 sps:$4 sm:$0xff]   ;;  %v7939_v6 = vld [vmem:[%s11891_s2 + $0x3d0] ss:$8 sps:$4 sm:$0xff]  }
  0x39   :  { %2657 = vmatprep.subr.bf16.mxu1 %v7866_v7  ;;  %v7947_v7 = vld [vmem:[%s11891_s2 + $0x3c4] ss:$8 sps:$4 sm:$0xff]  }
  0x3b   :  { %2617 = vmatpush2.bf16.msra.mxu0 %v7865_v8  ;;  %v7942_v8 = vld [vmem:[%s11891_s2 + $0x2c0] ss:$8 sps:$4 sm:$0xff]  }
  0x3c   :  { %2618 = vmatprep.subr.bf16.mxu0 %v7869_v9  ;;  %2658 = vmatpush2.bf16.msra.mxu1 %v7868_v10  ;;  %v7950_v9 = vld [vmem:[%s11891_s2 + $0x2b4] ss:$8 sps:$4 sm:$0xff]   ;;  %v7945_v10 = vld [vmem:[%s11891_s2 + $0x3c0] ss:$8 sps:$4 sm:$0xff]  }
  0x3d   :  { %2659 = vmatprep.subr.bf16.mxu1 %v7872_v11  ;;  %v7953_v11 = vld [vmem:[%s11891_s2 + $0x3b4] ss:$8 sps:$4 sm:$0xff]  }
  0x3f   :  { %2619 = vmatpush2.bf16.msra.mxu0 %v7871_v12  ;;  %v7948_v12 = vld [vmem:[%s11891_s2 + $0x2b0] ss:$8 sps:$4 sm:$0xff]  }
  0x40   :  { %2670 = vmatprep.subr.bf16.mxu0 %v7877_v13  ;;  %2660 = vmatpush2.bf16.msra.mxu1 %v7874_v14  ;;  %v7956_v13 = vld [vmem:[%s11891_s2 + $0x2a4] ss:$8 sps:$4 sm:$0xff]   ;;  %v7951_v14 = vld [vmem:[%s11891_s2 + $0x3b0] ss:$8 sps:$4 sm:$0xff]  }
  0x41   :  { %2711 = vmatprep.subr.bf16.mxu1 %v7881_v16  ;;  %v7954_v16 = vld [vmem:[%s11891_s2 + $0x2a0] ss:$8 sps:$4 sm:$0xff]  }
  0x42   :  { %2621 = vmatmul.mubr.bf16.vlgmr.msra.gmra.mxu0 %v195_v15  ;;  %v7959_v15 = vld [vmem:[%s11891_s2 + $0x3a4] ss:$8 sps:$4 sm:$0xff]  }
  0x43   :  { %2671 = vmatpush1.bf16.msra.mxu0 %v7875_v17  ;;  %2662 = vmatmul.mubr.bf16.vlgmr.msra.gmra.mxu1 %v197_v18  ;;  %v7962_v17 = vld [vmem:[%s11891_s2 + $0x294] ss:$8 sps:$4 sm:$0xff]   ;;  %v7957_v18 = vld [vmem:[%s11891_s2 + $0x3a0] ss:$8 sps:$4 sm:$0xff]  }
  0x44   :  { %2672 = vmatprep.subr.bf16.mxu0 %v7884_v19  ;;  %2712 = vmatpush1.bf16.msra.mxu1 %v7879_v20  ;;  %v7965_v19 = vld [vmem:[%s11891_s2 + $0x394] ss:$8 sps:$4 sm:$0xff]   ;;  %v7960_v20 = vld [vmem:[%s11891_s2 + $0x290] ss:$8 sps:$4 sm:$0xff]  }
  0x45   :  { %2713 = vmatprep.subr.bf16.mxu1 %v7887_v21  ;;  %2702 = vmatprep.mubr.bf16.mxu0 %v200_v53  ;;  %v7968_v21 = vld [vmem:[%s11891_s2 + $0x284] ss:$8 sps:$4 sm:$0xff]   ;;  %v7999_v53 = vld [vmem:[%s11891_s2 + $0x434] ss:$8 sps:$4 sm:$0xff]  }
  0x46   :  { %2743 = vmatprep.mubr.bf16.mxu1 %v202_v57  ;;  %v8005_v57 = vld [vmem:[%s11891_s2 + $0x424] ss:$8 sps:$4 sm:$0xff]  }
  0x47   :  { %2673 = vmatpush1.bf16.msra.mxu0 %v7882_v22  ;;  %v7963_v22 = vld [vmem:[%s11891_s2 + $0x390] ss:$8 sps:$4 sm:$0xff]  }
  0x48   :  { %2674 = vmatprep.subr.bf16.mxu0 %v7890_v23  ;;  %2714 = vmatpush1.bf16.msra.mxu1 %v7885_v24  ;;  %v7971_v23 = vld [vmem:[%s11891_s2 + $0x384] ss:$8 sps:$4 sm:$0xff]   ;;  %v7966_v24 = vld [vmem:[%s11891_s2 + $0x280] ss:$8 sps:$4 sm:$0xff]  }
  0x49   :  { %2715 = vmatprep.subr.bf16.mxu1 %v7893_v25  ;;  %v7974_v25 = vld [vmem:[%s11891_s2 + $0x474] ss:$8 sps:$4 sm:$0xff]  }
  0x4b   :  { %2675 = vmatpush1.bf16.msra.mxu0 %v7888_v26  ;;  %v7969_v26 = vld [vmem:[%s11891_s2 + $0x380] ss:$8 sps:$4 sm:$0xff]  }
  0x4c   :  { %2676 = vmatprep.subr.bf16.mxu0 %v7896_v27  ;;  %2716 = vmatpush1.bf16.msra.mxu1 %v7891_v28  ;;  %v199_v27 = vpack.c.bf16 %v9411_v44, %v9411_v44  ;;  %v7978_v28 = vld [vmem:[%s11891_s2 + $0x574] ss:$8 sps:$4 sm:$0xff]  }
  0x4d   :  { %2717 = vmatprep.subr.bf16.mxu1 %v7899_v29  ;;  %v7972_v29 = vld [vmem:[%s11891_s2 + $0x470] ss:$8 sps:$4 sm:$0xff]  }
  0x4f   :  { %2677 = vmatpush1.bf16.msra.mxu0 %v7894_v30  ;;  %v201_v30 = vpack.c.bf16 %v9422_v50, %v9422_v50  ;;  %v7988_v50 = vld [vmem:[%s11891_s2 + $0x550] ss:$8 sps:$4 sm:$0xff]  }
  0x50   :  { %2678 = vmatprep.subr.bf16.mxu0 %v7902_v31  ;;  %2718 = vmatpush1.bf16.msra.mxu1 %v7897_v32  ;;  %v7981_v31 = vld [vmem:[%s11891_s2 + $0x464] ss:$8 sps:$4 sm:$0xff]   ;;  %v49_v32 = vld [vmem:[%s11889_s0 + $0x10] sm:$0xff] }
  0x51   :  { %2719 = vmatprep.subr.bf16.mxu1 %v7905_v33  ;;  %v7976_v33 = vld [vmem:[%s11891_s2 + $0x570] ss:$8 sps:$4 sm:$0xff]  }
  0x53   :  { %2679 = vmatpush1.bf16.msra.mxu0 %v7900_v34  ;;  %v9557_v34 = vrot.slane %v49_v32, %v9259_v48 }
  0x54   :  { %2680 = vmatprep.subr.bf16.mxu0 %v7908_v35  ;;  %2720 = vmatpush1.bf16.msra.mxu1 %v7903_v36  ;;  %v95_v35 = vcombine.high %v49_v32, %v49_v32  ;;  %v7984_v36 = vld [vmem:[%s11891_s2 + $0x564] ss:$8 sps:$4 sm:$0xff]  }
  0x55   :  { %2721 = vmatprep.subr.bf16.mxu1 %v7911_v37  ;;  %v7979_v37 = vld [vmem:[%s11891_s2 + $0x460] ss:$8 sps:$4 sm:$0xff]  }
  0x57   :  { %2681 = vmatpush1.bf16.msra.mxu0 %v7906_v38  ;;  %v110_v38 = vcombine.high %v9557_v34, %v9557_v34 }
  0x58   :  { %2682 = vmatprep.subr.bf16.mxu0 %v7914_v39  ;;  %2722 = vmatpush1.bf16.msra.mxu1 %v7909_v40  ;;  %v9568_v39 = vrot.slane %v95_v35, %v9259_v48  ;;  %v7987_v40 = vld [vmem:[%s11891_s2 + $0x454] ss:$8 sps:$4 sm:$0xff]   ;;  %v8057_v35 = vld [vmem:[%s11891_s2 + $0x490] ss:$8 sps:$4 sm:$0xff]  }
  0x59   :  { %2723 = vmatprep.subr.bf16.mxu1 %v7917_v42  ;;  %v204_v42 = vpack.c.bf16 %v110_v38, %v110_v38  ;;  %v8060_v38 = vld [vmem:[%s11891_s2 + $0x590] ss:$8 sps:$4 sm:$0xff]  }
  0x5a   :  { %v111_v44 = vcombine.high %v9568_v39, %v9568_v39 }
  0x5b   :  { %2683 = vmatpush1.bf16.msra.mxu0 %v7912_v46  ;;  %v7985_v46 = vld [vmem:[%s11891_s2 + $0x450] ss:$8 sps:$4 sm:$0xff]  }
  0x5c   :  { %2684 = vmatprep.subr.bf16.mxu0 %v7920_v47  ;;  %2724 = vmatpush1.bf16.msra.mxu1 %v7915_v51  ;;  %v206_v47 = vpack.c.bf16 %v111_v44, %v111_v44  ;;  %v7996_v51 = vld [vmem:[%s11891_s2 + $0x544] ss:$8 sps:$4 sm:$0xff]  }
  0x5d   :  { %2725 = vmatprep.subr.bf16.mxu1 %v7923_v52  ;;  %v7991_v52 = vld [vmem:[%s11891_s2 + $0x440] ss:$8 sps:$4 sm:$0xff]  }
  0x5f   :  { %2685 = vmatpush1.bf16.msra.mxu0 %v7918_v55  ;;  %v8002_v55 = vld [vmem:[%s11891_s2 + $0x534] ss:$8 sps:$4 sm:$0xff]  }
  0x60   :  { %2686 = vmatprep.subr.bf16.mxu0 %v7926_v56  ;;  %2726 = vmatpush1.bf16.msra.mxu1 %v7921_v58  ;;  %v7997_v56 = vld [vmem:[%s11891_s2 + $0x430] ss:$8 sps:$4 sm:$0xff]  }
  0x61   :  { %2727 = vmatprep.subr.bf16.mxu1 %v7929_v59  ;;  %v8000_v58 = vld [vmem:[%s11891_s2 + $0x530] ss:$8 sps:$4 sm:$0xff]   ;;  %v8008_v59 = vld [vmem:[%s11891_s2 + $0x524] ss:$8 sps:$4 sm:$0xff]  }
  0x63   :  { %2687 = vmatpush2.bf16.msra.mxu0 %v7924_v60  ;;  %v8003_v60 = vld [vmem:[%s11891_s2 + $0x420] ss:$8 sps:$4 sm:$0xff]  }
  0x64   :  { %2688 = vmatprep.subr.bf16.mxu0 %v7932_v61  ;;  %2728 = vmatpush2.bf16.msra.mxu1 %v7927_v62  ;;  %v8011_v61 = vld [vmem:[%s11891_s2 + $0x414] ss:$8 sps:$4 sm:$0xff]   ;;  %v8006_v62 = vld [vmem:[%s11891_s2 + $0x520] ss:$8 sps:$4 sm:$0xff]  }
  0x65   :  { %2729 = vmatprep.subr.bf16.mxu1 %v7935_v63  ;;  %v8014_v63 = vld [vmem:[%s11891_s2 + $0x514] ss:$8 sps:$4 sm:$0xff]  }
  0x67   :  { %2689 = vmatpush2.bf16.msra.mxu0 %v7930_v0  ;;  %v8009_v0 = vld [vmem:[%s11891_s2 + $0x410] ss:$8 sps:$4 sm:$0xff]  }
  0x68   :  { %2690 = vmatprep.subr.bf16.mxu0 %v7938_v1  ;;  %2730 = vmatpush2.bf16.msra.mxu1 %v7933_v2  ;;  %v8017_v1 = vld [vmem:[%s11891_s2 + $0x404] ss:$8 sps:$4 sm:$0xff]   ;;  %v8012_v2 = vld [vmem:[%s11891_s2 + $0x510] ss:$8 sps:$4 sm:$0xff]  }
  0x69   :  { %2731 = vmatprep.subr.bf16.mxu1 %v7941_v3  ;;  %v8020_v3 = vld [vmem:[%s11891_s2 + $0x504] ss:$8 sps:$4 sm:$0xff]  }
  0x6b   :  { %2691 = vmatpush2.bf16.msra.mxu0 %v7936_v4  ;;  %v8015_v4 = vld [vmem:[%s11891_s2 + $0x400] ss:$8 sps:$4 sm:$0xff]  }
  0x6c   :  { %2692 = vmatprep.subr.bf16.mxu0 %v7944_v5  ;;  %2732 = vmatpush2.bf16.msra.mxu1 %v7939_v6  ;;  %v8023_v5 = vld [vmem:[%s11891_s2 + $0x4f4] ss:$8 sps:$4 sm:$0xff]   ;;  %v8018_v6 = vld [vmem:[%s11891_s2 + $0x500] ss:$8 sps:$4 sm:$0xff]  }
  0x6d   :  { %2733 = vmatprep.subr.bf16.mxu1 %v7947_v7  ;;  %v8026_v7 = vld [vmem:[%s11891_s2 + $0x5f4] ss:$8 sps:$4 sm:$0xff]  }
  0x6f   :  { %2693 = vmatpush2.bf16.msra.mxu0 %v7942_v8  ;;  %v8021_v8 = vld [vmem:[%s11891_s2 + $0x4f0] ss:$8 sps:$4 sm:$0xff]  }
  0x70   :  { %2694 = vmatprep.subr.bf16.mxu0 %v7950_v9  ;;  %2734 = vmatpush2.bf16.msra.mxu1 %v7945_v10  ;;  %v8029_v9 = vld [vmem:[%s11891_s2 + $0x4e4] ss:$8 sps:$4 sm:$0xff]   ;;  %v8024_v10 = vld [vmem:[%s11891_s2 + $0x5f0] ss:$8 sps:$4 sm:$0xff]  }
  0x71   :  { %2735 = vmatprep.subr.bf16.mxu1 %v7953_v11  ;;  %v8032_v11 = vld [vmem:[%s11891_s2 + $0x5e4] ss:$8 sps:$4 sm:$0xff]  }
  0x73   :  { %2695 = vmatpush2.bf16.msra.mxu0 %v7948_v12  ;;  %v8027_v12 = vld [vmem:[%s11891_s2 + $0x4e0] ss:$8 sps:$4 sm:$0xff]  }
  0x74   :  { %2696 = vmatprep.subr.bf16.mxu0 %v7956_v13  ;;  %2736 = vmatpush2.bf16.msra.mxu1 %v7951_v14  ;;  %v8035_v13 = vld [vmem:[%s11891_s2 + $0x4d4] ss:$8 sps:$4 sm:$0xff]   ;;  %v8030_v14 = vld [vmem:[%s11891_s2 + $0x5e0] ss:$8 sps:$4 sm:$0xff]  }
  0x75   :  { %2737 = vmatprep.subr.bf16.mxu1 %v7959_v15  ;;  %v8038_v15 = vld [vmem:[%s11891_s2 + $0x5d4] ss:$8 sps:$4 sm:$0xff]  }
  0x77   :  { %2697 = vmatpush2.bf16.msra.mxu0 %v7954_v16  ;;  %v8033_v16 = vld [vmem:[%s11891_s2 + $0x4d0] ss:$8 sps:$4 sm:$0xff]  }
  0x78   :  { %2698 = vmatprep.subr.bf16.mxu0 %v7962_v17  ;;  %2738 = vmatpush2.bf16.msra.mxu1 %v7957_v18  ;;  %v8041_v17 = vld [vmem:[%s11891_s2 + $0x4c4] ss:$8 sps:$4 sm:$0xff]   ;;  %v8036_v18 = vld [vmem:[%s11891_s2 + $0x5d0] ss:$8 sps:$4 sm:$0xff]  }
  0x79   :  { %2739 = vmatprep.subr.bf16.mxu1 %v7965_v19  ;;  %v8044_v19 = vld [vmem:[%s11891_s2 + $0x5c4] ss:$8 sps:$4 sm:$0xff]  }
  0x7b   :  { %2699 = vmatpush2.bf16.msra.mxu0 %v7960_v20  ;;  %v8039_v20 = vld [vmem:[%s11891_s2 + $0x4c0] ss:$8 sps:$4 sm:$0xff]  }
  0x7c   :  { %2700 = vmatprep.subr.bf16.mxu0 %v7968_v21  ;;  %2740 = vmatpush2.bf16.msra.mxu1 %v7963_v22  ;;  %v8047_v21 = vld [vmem:[%s11891_s2 + $0x4b4] ss:$8 sps:$4 sm:$0xff]   ;;  %v8042_v22 = vld [vmem:[%s11891_s2 + $0x5c0] ss:$8 sps:$4 sm:$0xff]  }
  0x7d   :  { %2741 = vmatprep.subr.bf16.mxu1 %v7971_v23  ;;  %v8050_v23 = vld [vmem:[%s11891_s2 + $0x5b4] ss:$8 sps:$4 sm:$0xff]  }
  0x7f   :  { %2701 = vmatpush2.bf16.msra.mxu0 %v7966_v24  ;;  %v8045_v24 = vld [vmem:[%s11891_s2 + $0x4b0] ss:$8 sps:$4 sm:$0xff]  }
  0x80   :  { %2752 = vmatprep.subr.bf16.mxu0 %v7974_v25  ;;  %2742 = vmatpush2.bf16.msra.mxu1 %v7969_v26  ;;  %v8053_v25 = vld [vmem:[%s11891_s2 + $0x4a4] ss:$8 sps:$4 sm:$0xff]   ;;  %v8048_v26 = vld [vmem:[%s11891_s2 + $0x5b0] ss:$8 sps:$4 sm:$0xff]  }
  0x81   :  { %2793 = vmatprep.subr.bf16.mxu1 %v7978_v28  ;;  %v50_v28 = vld [vmem:[%s11889_s0 + $0x18] sm:$0xff] }
  0x82   :  { %2703 = vmatmul.mubr.bf16.vlgmr.msra.gmra.mxu0 %v199_v27  ;;  %v8056_v27 = vld [vmem:[%s11891_s2 + $0x5a4] ss:$8 sps:$4 sm:$0xff]   ;;  %v112_v32 = vcombine.high %v50_v28, %v50_v28 }
  0x83   :  { %2753 = vmatpush1.bf16.msra.mxu0 %v7972_v29  ;;  %2744 = vmatmul.mubr.bf16.vlgmr.msra.gmra.mxu1 %v201_v30  ;;  %v8051_v29 = vld [vmem:[%s11891_s2 + $0x4a0] ss:$8 sps:$4 sm:$0xff]   ;;  %v8059_v30 = vld [vmem:[%s11891_s2 + $0x494] ss:$8 sps:$4 sm:$0xff]  }
  0x84   :  { %2754 = vmatprep.subr.bf16.mxu0 %v7981_v31  ;;  %2794 = vmatpush1.bf16.msra.mxu1 %v7976_v33  ;;  %v8054_v31 = vld [vmem:[%s11891_s2 + $0x5a0] ss:$8 sps:$4 sm:$0xff]   ;;  %v8062_v33 = vld [vmem:[%s11891_s2 + $0x594] ss:$8 sps:$4 sm:$0xff]  }
  0x85   :  { %2795 = vmatprep.subr.bf16.mxu1 %v7984_v36  ;;  %2784 = vmatprep.mubr.bf16.mxu0 %v204_v42  ;;  %v9732_v36 = vrot.slane %v50_v28, %v9259_v48  ;;  %v8063_v42 = vld [vmem:[%s11891_s2 + $0x480] ss:$8 sps:$4 sm:$0xff]   ;;  %v8130_v28 = vld [vmem:[%s11891_s2 + $0x6d0] ss:$8 sps:$4 sm:$0xff]  }
  0x86   :  { %2825 = vmatprep.mubr.bf16.mxu1 %v206_v47 }
  0x87   :  { %2755 = vmatpush1.bf16.msra.mxu0 %v7979_v37  ;;  %v8065_v37 = vld [vmem:[%s11891_s2 + $0x484] ss:$8 sps:$4 sm:$0xff]   ;;  %v127_v44 = vcombine.high %v9732_v36, %v9732_v36 }
  0x88   :  { %2756 = vmatprep.subr.bf16.mxu0 %v7987_v40  ;;  %2796 = vmatpush1.bf16.msra.mxu1 %v7982_v41  ;;  %v9741_v40 = vrot.slane %v112_v32, %v9259_v48  ;;  %v8068_v41 = vld [vmem:[%s11891_s2 + $0x584] ss:$8 sps:$4 sm:$0xff]   ;;  %v8136_v32 = vld [vmem:[%s11891_s2 + $0x6c0] ss:$8 sps:$4 sm:$0xff]  }
  0x89   :  { %2797 = vmatprep.subr.bf16.mxu1 %v7990_v45  ;;  %v8071_v45 = vld [vmem:[%s11891_s2 + $0x674] ss:$8 sps:$4 sm:$0xff]  }
  0x8a   :  { %v128_v47 = vcombine.high %v9741_v40, %v9741_v40 }
  0x8b   :  { %2757 = vmatpush1.bf16.msra.mxu0 %v7985_v46  ;;  %v8066_v46 = vld [vmem:[%s11891_s2 + $0x580] ss:$8 sps:$4 sm:$0xff]  }
  0x8c   :  { %2758 = vmatprep.subr.bf16.mxu0 %v7993_v49  ;;  %2798 = vmatpush1.bf16.msra.mxu1 %v7988_v50  ;;  %v203_v49 = vpack.c.bf16 %v9557_v34, %v9557_v34  ;;  %v8075_v50 = vld [vmem:[%s11891_s2 + $0x774] ss:$8 sps:$4 sm:$0xff]   ;;  %v8073_v34 = vld [vmem:[%s11891_s2 + $0x770] ss:$8 sps:$4 sm:$0xff]  }
  0x8d   :  { %2799 = vmatprep.subr.bf16.mxu1 %v7996_v51  ;;  %v8069_v51 = vld [vmem:[%s11891_s2 + $0x670] ss:$8 sps:$4 sm:$0xff]  }
  0x8f   :  { %2759 = vmatpush1.bf16.msra.mxu0 %v7991_v52  ;;  %v208_v52 = vpack.c.bf16 %v127_v44, %v127_v44  ;;  %v8153_v44 = vld [vmem:[%s11891_s2 + $0x7a4] ss:$8 sps:$4 sm:$0xff]  }
  0x90   :  { %2760 = vmatprep.subr.bf16.mxu0 %v7999_v53  ;;  %2800 = vmatpush1.bf16.msra.mxu1 %v7994_v54  ;;  %v205_v53 = vpack.c.bf16 %v9568_v39, %v9568_v39  ;;  %v8078_v54 = vld [vmem:[%s11891_s2 + $0x664] ss:$8 sps:$4 sm:$0xff]   ;;  %v8076_v39 = vld [vmem:[%s11891_s2 + $0x660] ss:$8 sps:$4 sm:$0xff]  }
  0x91   :  { %2801 = vmatprep.subr.bf16.mxu1 %v8002_v55  ;;  %v210_v55 = vpack.c.bf16 %v128_v47, %v128_v47  ;;  %v8156_v47 = vld [vmem:[%s11891_s2 + $0x694] ss:$8 sps:$4 sm:$0xff]  }
  0x93   :  { %2761 = vmatpush1.bf16.msra.mxu0 %v7997_v56  ;;  %v8081_v56 = vld [vmem:[%s11891_s2 + $0x764] ss:$8 sps:$4 sm:$0xff]  }
  0x94   :  { %2762 = vmatprep.subr.bf16.mxu0 %v8005_v57  ;;  %2802 = vmatpush1.bf16.msra.mxu1 %v8000_v58  ;;  %v8084_v57 = vld [vmem:[%s11891_s2 + $0x654] ss:$8 sps:$4 sm:$0xff]   ;;  %v8079_v58 = vld [vmem:[%s11891_s2 + $0x760] ss:$8 sps:$4 sm:$0xff]  }
  0x95   :  { %2803 = vmatprep.subr.bf16.mxu1 %v8008_v59  ;;  %v8087_v59 = vld [vmem:[%s11891_s2 + $0x754] ss:$8 sps:$4 sm:$0xff]  }
  0x97   :  { %2763 = vmatpush1.bf16.msra.mxu0 %v8003_v60  ;;  %v8082_v60 = vld [vmem:[%s11891_s2 + $0x650] ss:$8 sps:$4 sm:$0xff]  }
  0x98   :  { %2764 = vmatprep.subr.bf16.mxu0 %v8011_v61  ;;  %2804 = vmatpush1.bf16.msra.mxu1 %v8006_v62  ;;  %v8090_v61 = vld [vmem:[%s11891_s2 + $0x644] ss:$8 sps:$4 sm:$0xff]   ;;  %v8085_v62 = vld [vmem:[%s11891_s2 + $0x750] ss:$8 sps:$4 sm:$0xff]  }
  0x99   :  { %2805 = vmatprep.subr.bf16.mxu1 %v8014_v63  ;;  %v8093_v63 = vld [vmem:[%s11891_s2 + $0x744] ss:$8 sps:$4 sm:$0xff]  }
  0x9b   :  { %2765 = vmatpush1.bf16.msra.mxu0 %v8009_v0  ;;  %v8088_v0 = vld [vmem:[%s11891_s2 + $0x640] ss:$8 sps:$4 sm:$0xff]  }
  0x9c   :  { %2766 = vmatprep.subr.bf16.mxu0 %v8017_v1  ;;  %2806 = vmatpush1.bf16.msra.mxu1 %v8012_v2  ;;  %v8096_v1 = vld [vmem:[%s11891_s2 + $0x634] ss:$8 sps:$4 sm:$0xff]   ;;  %v8091_v2 = vld [vmem:[%s11891_s2 + $0x740] ss:$8 sps:$4 sm:$0xff]  }
  0x9d   :  { %2807 = vmatprep.subr.bf16.mxu1 %v8020_v3  ;;  %v8099_v3 = vld [vmem:[%s11891_s2 + $0x734] ss:$8 sps:$4 sm:$0xff]  }
  0x9f   :  { %2767 = vmatpush1.bf16.msra.mxu0 %v8015_v4  ;;  %v8094_v4 = vld [vmem:[%s11891_s2 + $0x630] ss:$8 sps:$4 sm:$0xff]  }
  0xa0   :  { %2768 = vmatprep.subr.bf16.mxu0 %v8023_v5  ;;  %2808 = vmatpush1.bf16.msra.mxu1 %v8018_v6  ;;  %v8102_v5 = vld [vmem:[%s11891_s2 + $0x624] ss:$8 sps:$4 sm:$0xff]   ;;  %v8097_v6 = vld [vmem:[%s11891_s2 + $0x730] ss:$8 sps:$4 sm:$0xff]  }
  0xa1   :  { %2809 = vmatprep.subr.bf16.mxu1 %v8026_v7  ;;  %v8105_v7 = vld [vmem:[%s11891_s2 + $0x724] ss:$8 sps:$4 sm:$0xff]  }
  0xa3   :  { %2769 = vmatpush2.bf16.msra.mxu0 %v8021_v8  ;;  %v8100_v8 = vld [vmem:[%s11891_s2 + $0x620] ss:$8 sps:$4 sm:$0xff]  }
  0xa4   :  { %2770 = vmatprep.subr.bf16.mxu0 %v8029_v9  ;;  %2810 = vmatpush2.bf16.msra.mxu1 %v8024_v10  ;;  %v8108_v9 = vld [vmem:[%s11891_s2 + $0x614] ss:$8 sps:$4 sm:$0xff]   ;;  %v8103_v10 = vld [vmem:[%s11891_s2 + $0x720] ss:$8 sps:$4 sm:$0xff]  }
  0xa5   :  { %2811 = vmatprep.subr.bf16.mxu1 %v8032_v11  ;;  %v8111_v11 = vld [vmem:[%s11891_s2 + $0x714] ss:$8 sps:$4 sm:$0xff]  }
  0xa7   :  { %2771 = vmatpush2.bf16.msra.mxu0 %v8027_v12  ;;  %v8106_v12 = vld [vmem:[%s11891_s2 + $0x610] ss:$8 sps:$4 sm:$0xff]  }
  0xa8   :  { %2772 = vmatprep.subr.bf16.mxu0 %v8035_v13  ;;  %2812 = vmatpush2.bf16.msra.mxu1 %v8030_v14  ;;  %v8114_v13 = vld [vmem:[%s11891_s2 + $0x604] ss:$8 sps:$4 sm:$0xff]   ;;  %v8109_v14 = vld [vmem:[%s11891_s2 + $0x710] ss:$8 sps:$4 sm:$0xff]  }
  0xa9   :  { %2813 = vmatprep.subr.bf16.mxu1 %v8038_v15  ;;  %v8117_v15 = vld [vmem:[%s11891_s2 + $0x704] ss:$8 sps:$4 sm:$0xff]  }
  0xab   :  { %2773 = vmatpush2.bf16.msra.mxu0 %v8033_v16  ;;  %v8112_v16 = vld [vmem:[%s11891_s2 + $0x600] ss:$8 sps:$4 sm:$0xff]  }
  0xac   :  { %2774 = vmatprep.subr.bf16.mxu0 %v8041_v17  ;;  %2814 = vmatpush2.bf16.msra.mxu1 %v8036_v18  ;;  %v8120_v17 = vld [vmem:[%s11891_s2 + $0x6f4] ss:$8 sps:$4 sm:$0xff]   ;;  %v8115_v18 = vld [vmem:[%s11891_s2 + $0x700] ss:$8 sps:$4 sm:$0xff]  }
  0xad   :  { %2815 = vmatprep.subr.bf16.mxu1 %v8044_v19  ;;  %v8123_v19 = vld [vmem:[%s11891_s2 + $0x7f4] ss:$8 sps:$4 sm:$0xff]  }
  0xaf   :  { %2775 = vmatpush2.bf16.msra.mxu0 %v8039_v20  ;;  %v8118_v20 = vld [vmem:[%s11891_s2 + $0x6f0] ss:$8 sps:$4 sm:$0xff]  }
  0xb0   :  { %2776 = vmatprep.subr.bf16.mxu0 %v8047_v21  ;;  %2816 = vmatpush2.bf16.msra.mxu1 %v8042_v22  ;;  %v8126_v21 = vld [vmem:[%s11891_s2 + $0x6e4] ss:$8 sps:$4 sm:$0xff]   ;;  %v8121_v22 = vld [vmem:[%s11891_s2 + $0x7f0] ss:$8 sps:$4 sm:$0xff]  }
  0xb1   :  { %2817 = vmatprep.subr.bf16.mxu1 %v8050_v23  ;;  %v8129_v23 = vld [vmem:[%s11891_s2 + $0x7e4] ss:$8 sps:$4 sm:$0xff]  }
  0xb3   :  { %2777 = vmatpush2.bf16.msra.mxu0 %v8045_v24  ;;  %v8124_v24 = vld [vmem:[%s11891_s2 + $0x6e0] ss:$8 sps:$4 sm:$0xff]  }
  0xb4   :  { %2778 = vmatprep.subr.bf16.mxu0 %v8053_v25  ;;  %2818 = vmatpush2.bf16.msra.mxu1 %v8048_v26  ;;  %v8132_v25 = vld [vmem:[%s11891_s2 + $0x6d4] ss:$8 sps:$4 sm:$0xff]   ;;  %v8127_v26 = vld [vmem:[%s11891_s2 + $0x7e0] ss:$8 sps:$4 sm:$0xff]  }
  0xb5   :  { %2819 = vmatprep.subr.bf16.mxu1 %v8056_v27  ;;  %v8135_v27 = vld [vmem:[%s11891_s2 + $0x7d4] ss:$8 sps:$4 sm:$0xff]  }
  0xb7   :  { %2779 = vmatpush2.bf16.msra.mxu0 %v8051_v29  ;;  %v8138_v29 = vld [vmem:[%s11891_s2 + $0x6c4] ss:$8 sps:$4 sm:$0xff]  }
  0xb8   :  { %2780 = vmatprep.subr.bf16.mxu0 %v8059_v30  ;;  %2820 = vmatpush2.bf16.msra.mxu1 %v8054_v31  ;;  %v8133_v30 = vld [vmem:[%s11891_s2 + $0x7d0] ss:$8 sps:$4 sm:$0xff]   ;;  %v8141_v31 = vld [vmem:[%s11891_s2 + $0x7c4] ss:$8 sps:$4 sm:$0xff]  }
  0xb9   :  { %2821 = vmatprep.subr.bf16.mxu1 %v8062_v33  ;;  %v8144_v33 = vld [vmem:[%s11891_s2 + $0x6b4] ss:$8 sps:$4 sm:$0xff]  }
  0xbb   :  { %2781 = vmatpush2.bf16.msra.mxu0 %v8057_v35  ;;  %v8139_v35 = vld [vmem:[%s11891_s2 + $0x7c0] ss:$8 sps:$4 sm:$0xff]  }
  0xbc   :  { %2782 = vmatprep.subr.bf16.mxu0 %v8065_v37  ;;  %2822 = vmatpush2.bf16.msra.mxu1 %v8060_v38  ;;  %v8147_v37 = vld [vmem:[%s11891_s2 + $0x7b4] ss:$8 sps:$4 sm:$0xff]   ;;  %v8142_v38 = vld [vmem:[%s11891_s2 + $0x6b0] ss:$8 sps:$4 sm:$0xff]  }
  0xbd   :  { %2823 = vmatprep.subr.bf16.mxu1 %v8068_v41  ;;  %v8150_v41 = vld [vmem:[%s11891_s2 + $0x6a4] ss:$8 sps:$4 sm:$0xff]  }
  0xbf   :  { %2783 = vmatpush2.bf16.msra.mxu0 %v8063_v42  ;;  %v8145_v42 = vld [vmem:[%s11891_s2 + $0x7b0] ss:$8 sps:$4 sm:$0xff]  }
  0xc0   :  { %2834 = vmatprep.subr.bf16.mxu0 %v8071_v45  ;;  %2824 = vmatpush2.bf16.msra.mxu1 %v8066_v46  ;;  %v51_v45 = vld [vmem:[%s11889_s0 + $0x20] sm:$0xff] }
  0xc1   :  { %2875 = vmatprep.subr.bf16.mxu1 %v8075_v50  ;;  %v8148_v46 = vld [vmem:[%s11891_s2 + $0x6a0] ss:$8 sps:$4 sm:$0xff]   ;;  %v129_v50 = vcombine.high %v51_v45, %v51_v45 }
  0xc2   :  { %2785 = vmatmul.mubr.bf16.vlgmr.msra.gmra.mxu0 %v203_v49  ;;  %v8151_v49 = vld [vmem:[%s11891_s2 + $0x7a0] ss:$8 sps:$4 sm:$0xff]  }
  0xc3   :  { %2835 = vmatpush1.bf16.msra.mxu0 %v8069_v51  ;;  %2866 = vmatprep.mubr.bf16.mxu0 %v208_v52  ;;  %v8159_v51 = vld [vmem:[%s11891_s2 + $0x794] ss:$8 sps:$4 sm:$0xff]   ;;  %v8154_v52 = vld [vmem:[%s11891_s2 + $0x690] ss:$8 sps:$4 sm:$0xff]  }
  0xc4   :  { %2826 = vmatmul.mubr.bf16.vlgmr.msra.gmra.mxu1 %v205_v53  ;;  %2836 = vmatprep.subr.bf16.mxu0 %v8078_v54  ;;  %v9941_v53 = vrot.slane %v51_v45, %v9259_v48  ;;  %v8162_v54 = vld [vmem:[%s11891_s2 + $0x684] ss:$8 sps:$4 sm:$0xff]   ;;  %v8208_v45 = vld [vmem:[%s11891_s2 + $0x914] ss:$8 sps:$4 sm:$0xff]  }
  0xc5   :  { %2876 = vmatpush1.bf16.msra.mxu1 %v8073_v34  ;;  %2907 = vmatprep.mubr.bf16.mxu1 %v210_v55  ;;  %v8157_v34 = vld [vmem:[%s11891_s2 + $0x790] ss:$8 sps:$4 sm:$0xff]   ;;  %v9950_v55 = vrot.slane %v129_v50, %v9259_v48  ;;  %v8214_v50 = vld [vmem:[%s11891_s2 + $0x904] ss:$8 sps:$4 sm:$0xff]  }
  0xc6   :  { %2877 = vmatprep.subr.bf16.mxu1 %v8081_v56  ;;  %v8165_v56 = vld [vmem:[%s11891_s2 + $0x784] ss:$8 sps:$4 sm:$0xff]  }
  0xc7   :  { %2837 = vmatpush1.bf16.msra.mxu0 %v8076_v39  ;;  %v8160_v39 = vld [vmem:[%s11891_s2 + $0x680] ss:$8 sps:$4 sm:$0xff]  }
  0xc8   :  { %2838 = vmatprep.subr.bf16.mxu0 %v8084_v57  ;;  %v9959_v57 = vsub.s32 0, %v9244_v43 }
  0xc9   :  { %2878 = vmatpush1.bf16.msra.mxu1 %v8079_v58  ;;  %v144_v58 = vcombine.high %v9941_v53, %v9941_v53 }
  0xca   :  { %2879 = vmatprep.subr.bf16.mxu1 %v8087_v59  ;;  %v612_v59 = vld [vmem:[%s11892_s3] sm:$0x3] }
  0xcb   :  { %2839 = vmatpush1.bf16.msra.mxu0 %v8082_v60  ;;  %v8168_v60 = vld [vmem:[%s11891_s2 + $0x874] ss:$8 sps:$4 sm:$0xff]  }
  0xcc   :  { %2840 = vmatprep.subr.bf16.mxu0 %v8090_v61  ;;  %v8163_v61 = vld [vmem:[%s11891_s2 + $0x780] ss:$8 sps:$4 sm:$0xff]  }
  0xcd   :  { %2880 = vmatpush1.bf16.msra.mxu1 %v8085_v62  ;;  %v9973_v62 = vsub.s32 1, %v9244_v43 }
  0xce   :  { %2881 = vmatprep.subr.bf16.mxu1 %v8093_v63  ;;  %v145_v63 = vcombine.high %v9950_v55, %v9950_v55 }
  0xcf   :  { %2841 = vmatpush1.bf16.msra.mxu0 %v8088_v0  ;;  %v207_v0 = vpack.c.bf16 %v9732_v36, %v9732_v36  ;;  %v8175_v36 = vld [vmem:[%s11891_s2 + $0x864] ss:$8 sps:$4 sm:$0xff]  }
  0xd0   :  { %2842 = vmatprep.subr.bf16.mxu0 %v8096_v1  ;;  %v8172_v1 = vld [vmem:[%s11891_s2 + $0x974] ss:$8 sps:$4 sm:$0xff]  }
  0xd1   :  { %2882 = vmatpush1.bf16.msra.mxu1 %v8091_v2  ;;  %v617_v2 = vrot.slane %v612_v59, %v9959_v57 }
  0xd2   :  { %2883 = vmatprep.subr.bf16.mxu1 %v8099_v3  ;;  %v8166_v3 = vld [vmem:[%s11891_s2 + $0x870] ss:$8 sps:$4 sm:$0xff]  }
  0xd3   :  { %2843 = vmatpush1.bf16.msra.mxu0 %v8094_v4  ;;  %v212_v4 = vpack.c.bf16 %v144_v58, %v144_v58  ;;  %v8218_v58 = vld [vmem:[%s11891_s2 + $0x9f0] ss:$8 sps:$4 sm:$0xff]  }
  0xd4   :  { %2844 = vmatprep.subr.bf16.mxu0 %v8102_v5  ;;  %v209_v5 = vpack.c.bf16 %v9741_v40, %v9741_v40 }
  0xd5   :  { %2884 = vmatpush1.bf16.msra.mxu1 %v8097_v6  ;;  %v621_v6 = vrot.slane %v612_v59, %v9973_v62  ;;  %v8226_v59 = vld [vmem:[%s11891_s2 + $0x9e4] ss:$8 sps:$4 sm:$0xff]  }
  0xd6   :  { %2885 = vmatprep.subr.bf16.mxu1 %v8105_v7  ;;  %v8170_v7 = vld [vmem:[%s11891_s2 + $0x970] ss:$8 sps:$4 sm:$0xff]  }
  0xd7   :  { %2845 = vmatpush1.bf16.msra.mxu0 %v8100_v8  ;;  %v214_v8 = vpack.c.bf16 %v145_v63, %v145_v63  ;;  %v8224_v63 = vld [vmem:[%s11891_s2 + $0x9e0] ss:$8 sps:$4 sm:$0xff]  }
  0xd8   :  { %2846 = vmatprep.subr.bf16.mxu0 %v8108_v9 }
  0xd9   :  { %2886 = vmatpush1.bf16.msra.mxu1 %v8103_v10  ;;  %v8178_v10 = vld [vmem:[%s11891_s2 + $0x964] ss:$8 sps:$4 sm:$0xff]  }
  0xda   :  { %2887 = vmatprep.subr.bf16.mxu1 %v8111_v11  ;;  %v8173_v11 = vld [vmem:[%s11891_s2 + $0x860] ss:$8 sps:$4 sm:$0xff]  }
  0xdb   :  { %2847 = vmatpush1.bf16.msra.mxu0 %v8106_v12  ;;  %v8176_v12 = vld [vmem:[%s11891_s2 + $0x960] ss:$8 sps:$4 sm:$0xff]  }
  0xdc   :  { %2848 = vmatprep.subr.bf16.mxu0 %v8114_v13 }
  0xdd   :  { %2888 = vmatpush1.bf16.msra.mxu1 %v8109_v14 }
  0xde   :  { %2889 = vmatprep.subr.bf16.mxu1 %v8117_v15  ;;  %v8181_v15 = vld [vmem:[%s11891_s2 + $0x854] ss:$8 sps:$4 sm:$0xff]  }
  0xdf   :  { %2849 = vmatpush1.bf16.msra.mxu0 %v8112_v16 }
  0xe0   :  { %2850 = vmatprep.subr.bf16.mxu0 %v8120_v17 }
  0xe1   :  { %2890 = vmatpush1.bf16.msra.mxu1 %v8115_v18  ;;  %v8179_v18 = vld [vmem:[%s11891_s2 + $0x850] ss:$8 sps:$4 sm:$0xff]  }
  0xe2   :  { %2891 = vmatprep.subr.bf16.mxu1 %v8123_v19  ;;  %v8184_v19 = vld [vmem:[%s11891_s2 + $0x954] ss:$8 sps:$4 sm:$0xff]  }
  0xe3   :  { %2851 = vmatpush2.bf16.msra.mxu0 %v8118_v20 }
  0xe4   :  { %2852 = vmatprep.subr.bf16.mxu0 %v8126_v21 }
  0xe5   :  { %2892 = vmatpush2.bf16.msra.mxu1 %v8121_v22 }
  0xe6   :  { %2893 = vmatprep.subr.bf16.mxu1 %v8129_v23  ;;  %v8182_v23 = vld [vmem:[%s11891_s2 + $0x950] ss:$8 sps:$4 sm:$0xff]  }
  0xe7   :  { %2853 = vmatpush2.bf16.msra.mxu0 %v8124_v24 }
  0xe8   :  { %2854 = vmatprep.subr.bf16.mxu0 %v8132_v25  ;;  %v8187_v25 = vld [vmem:[%s11891_s2 + $0x844] ss:$8 sps:$4 sm:$0xff]  }
  0xe9   :  { %2894 = vmatpush2.bf16.msra.mxu1 %v8127_v26 }
  0xea   :  { %2895 = vmatprep.subr.bf16.mxu1 %v8135_v27  ;;  %v8190_v27 = vld [vmem:[%s11891_s2 + $0x944] ss:$8 sps:$4 sm:$0xff]  }
  0xeb   :  { %2855 = vmatpush2.bf16.msra.mxu0 %v8130_v28  ;;  %v8185_v28 = vld [vmem:[%s11891_s2 + $0x840] ss:$8 sps:$4 sm:$0xff]  }
  0xec   :  { %2856 = vmatprep.subr.bf16.mxu0 %v8138_v29 }
  0xed   :  { %2896 = vmatpush2.bf16.msra.mxu1 %v8133_v30  ;;  %v8188_v30 = vld [vmem:[%s11891_s2 + $0x940] ss:$8 sps:$4 sm:$0xff]  }
  0xee   :  { %2897 = vmatprep.subr.bf16.mxu1 %v8141_v31  ;;  %v8193_v31 = vld [vmem:[%s11891_s2 + $0x834] ss:$8 sps:$4 sm:$0xff]  }
  0xef   :  { %2857 = vmatpush2.bf16.msra.mxu0 %v8136_v32  ;;  %v8196_v32 = vld [vmem:[%s11891_s2 + $0x934] ss:$8 sps:$4 sm:$0xff]  }
  0xf0   :  { %2858 = vmatprep.subr.bf16.mxu0 %v8144_v33  ;;  %v8191_v33 = vld [vmem:[%s11891_s2 + $0x830] ss:$8 sps:$4 sm:$0xff]  }
  0xf1   :  { %2898 = vmatpush2.bf16.msra.mxu1 %v8139_v35  ;;  %v8194_v35 = vld [vmem:[%s11891_s2 + $0x930] ss:$8 sps:$4 sm:$0xff]  }
  0xf2   :  { %2899 = vmatprep.subr.bf16.mxu1 %v8147_v37  ;;  %v8199_v37 = vld [vmem:[%s11891_s2 + $0x824] ss:$8 sps:$4 sm:$0xff]  }
  0xf3   :  { %2859 = vmatpush2.bf16.msra.mxu0 %v8142_v38  ;;  %v8202_v38 = vld [vmem:[%s11891_s2 + $0x924] ss:$8 sps:$4 sm:$0xff]  }
  0xf4   :  { %2860 = vmatprep.subr.bf16.mxu0 %v8150_v41  ;;  %v8197_v41 = vld [vmem:[%s11891_s2 + $0x820] ss:$8 sps:$4 sm:$0xff]  }
  0xf5   :  { %2900 = vmatpush2.bf16.msra.mxu1 %v8145_v42  ;;  %v8205_v42 = vld [vmem:[%s11891_s2 + $0x814] ss:$8 sps:$4 sm:$0xff]  }
  0xf6   :  { %2901 = vmatprep.subr.bf16.mxu1 %v8153_v44  ;;  %v8200_v44 = vld [vmem:[%s11891_s2 + $0x920] ss:$8 sps:$4 sm:$0xff]  }
  0xf7   :  { %2861 = vmatpush2.bf16.msra.mxu0 %v8148_v46  ;;  %v8203_v46 = vld [vmem:[%s11891_s2 + $0x810] ss:$8 sps:$4 sm:$0xff]  }
  0xf8   :  { %2862 = vmatprep.subr.bf16.mxu0 %v8156_v47  ;;  %v8211_v47 = vld [vmem:[%s11891_s2 + $0x804] ss:$8 sps:$4 sm:$0xff]  }
  0xf9   :  { %2902 = vmatpush2.bf16.msra.mxu1 %v8151_v49  ;;  %v8206_v49 = vld [vmem:[%s11891_s2 + $0x910] ss:$8 sps:$4 sm:$0xff]  }
  0xfa   :  { %2903 = vmatprep.subr.bf16.mxu1 %v8159_v51  ;;  %v8209_v51 = vld [vmem:[%s11891_s2 + $0x800] ss:$8 sps:$4 sm:$0xff]  }
  0xfb   :  { %2863 = vmatpush2.bf16.msra.mxu0 %v8154_v52  ;;  %v8217_v52 = vld [vmem:[%s11891_s2 + $0x8f4] ss:$8 sps:$4 sm:$0xff]  }
  0xfc   :  { %2864 = vmatprep.subr.bf16.mxu0 %v8162_v54  ;;  %v8212_v54 = vld [vmem:[%s11891_s2 + $0x900] ss:$8 sps:$4 sm:$0xff]  }
  0xfd   :  { %2904 = vmatpush2.bf16.msra.mxu1 %v8157_v34  ;;  %v8220_v34 = vld [vmem:[%s11891_s2 + $0x9f4] ss:$8 sps:$4 sm:$0xff]  }
  0xfe   :  { %2905 = vmatprep.subr.bf16.mxu1 %v8165_v56  ;;  %v8215_v56 = vld [vmem:[%s11891_s2 + $0x8f0] ss:$8 sps:$4 sm:$0xff]  }
  0xff   :  { %2865 = vmatpush2.bf16.msra.mxu0 %v8160_v39  ;;  %v8223_v39 = vld [vmem:[%s11891_s2 + $0x8e4] ss:$8 sps:$4 sm:$0xff]  }
 0x100   :  { %2916 = vmatprep.subr.bf16.mxu0 %v8168_v60  ;;  %v8221_v60 = vld [vmem:[%s11891_s2 + $0x8e0] ss:$8 sps:$4 sm:$0xff]  }
 0x101   :  { %2906 = vmatpush2.bf16.msra.mxu1 %v8163_v61  ;;  %v8229_v61 = vld [vmem:[%s11891_s2 + $0x8d4] ss:$8 sps:$4 sm:$0xff]  }
 0x102   :  { %v2622_v9 = vpop.f32.mrf.mxu0  ;;  %2867 = vmatmul.mubr.bf16.vlgmr.msra.gmra.mxu0 %v207_v0  ;;  %2957 = vmatprep.subr.bf16.mxu1 %v8172_v1  ;;  %v8232_v0 = vld [vmem:[%s11891_s2 + $0x9d4] ss:$8 sps:$4 sm:$0xff]   ;;  %v8227_v1 = vld [vmem:[%s11891_s2 + $0x8d0] ss:$8 sps:$4 sm:$0xff]  }
 0x103   :  { %v2623_v40 = vadd.f32 %v2622_v9, %v617_v2  ;;  %2917 = vmatpush1.bf16.msra.mxu0 %v8166_v3  ;;  %2948 = vmatprep.mubr.bf16.mxu0 %v212_v4  ;;  %v2663_v14 = vpop.f32.mrf.mxu1  ;;  %v8235_v2 = vld [vmem:[%s11891_s2 + $0x8c4] ss:$8 sps:$4 sm:$0xff]   ;;  %v8230_v3 = vld [vmem:[%s11891_s2 + $0x9d0] ss:$8 sps:$4 sm:$0xff]  }
 0x104   :  { %v2624_v13 = vpop.f32.mrf.mxu0  ;;  %2908 = vmatmul.mubr.bf16.vlgmr.msra.gmra.mxu1 %v209_v5  ;;  %2918 = vmatprep.subr.bf16.mxu0 %v8175_v36  ;;  %v8238_v4 = vld [vmem:[%s11891_s2 + $0x9c4] ss:$8 sps:$4 sm:$0xff]   ;;  %v8233_v5 = vld [vmem:[%s11891_s2 + $0x8c0] ss:$8 sps:$4 sm:$0xff]   ;;  %v8241_v36 = vld [vmem:[%s11891_s2 + $0x8b4] ss:$8 sps:$4 sm:$0xff]  }
 0x105   :  { %v2625_v16 = vadd.f32 %v2624_v13, %v621_v6  ;;  %v10007_v17 = vadd.f32 %v2663_v14, %v2623_v40  ;;  %2958 = vmatpush1.bf16.msra.mxu1 %v8170_v7  ;;  %2989 = vmatprep.mubr.bf16.mxu1 %v214_v8  ;;  %v2665_v21 = vpop.f32.mrf.mxu1  ;;  %v8236_v6 = vld [vmem:[%s11891_s2 + $0x9c0] ss:$8 sps:$4 sm:$0xff]   ;;  %v8244_v7 = vld [vmem:[%s11891_s2 + $0x9b4] ss:$8 sps:$4 sm:$0xff]   ;;  %v8239_v8 = vld [vmem:[%s11891_s2 + $0x8b0] ss:$8 sps:$4 sm:$0xff]  }
 0x106   :  { %v2626_v20 = vpop.f32.mrf.mxu0  ;;  %2959 = vmatprep.subr.bf16.mxu1 %v8178_v10  ;;  %v8247_v9 = vld [vmem:[%s11891_s2 + $0x8a4] ss:$8 sps:$4 sm:$0xff]   ;;  %v8242_v10 = vld [vmem:[%s11891_s2 + $0x9b0] ss:$8 sps:$4 sm:$0xff]   ;;  %v8253_v13 = vld [vmem:[%s11891_s2 + $0x894] ss:$8 sps:$4 sm:$0xff]  }
 0x107   :  { %v10015_v22 = vadd.f32 %v2665_v21, %v2625_v16  ;;  %2919 = vmatpush1.bf16.msra.mxu0 %v8173_v11  ;;  %v2667_v26 = vpop.f32.mrf.mxu1  ;;  %v8250_v40 = vld [vmem:[%s11891_s2 + $0x9a4] ss:$8 sps:$4 sm:$0xff]   ;;  %v8248_v14 = vld [vmem:[%s11891_s2 + $0x9a0] ss:$8 sps:$4 sm:$0xff]   ;;  %v8251_v16 = vld [vmem:[%s11891_s2 + $0x890] ss:$8 sps:$4 sm:$0xff]  }
 0x108   :  { %v2627_v24 = vpop.f32.mrf.mxu0  ;;  %2920 = vmatprep.subr.bf16.mxu0 %v8181_v15  ;;  %v52_v11 = vld [vmem:[%s11889_s0 + $0x28] sm:$0xff]  ;;  %v8256_v15 = vld [vmem:[%s11891_s2 + $0x994] ss:$8 sps:$4 sm:$0xff]   ;;  %v8254_v20 = vld [vmem:[%s11891_s2 + $0x990] ss:$8 sps:$4 sm:$0xff]  }
 0x109   :  { %2960 = vmatpush1.bf16.msra.mxu1 %v8176_v12  ;;  %v2668_v29 = vpop.f32.mrf.mxu1  ;;  %v8245_v12 = vld [vmem:[%s11891_s2 + $0x8a0] ss:$8 sps:$4 sm:$0xff]   ;;  %v10171_v21 = vrot.slane %v52_v11, %v9259_v48  ;;  %v8265_v26 = vld [vmem:[%s11891_s2 + $0xa74] ss:$8 sps:$4 sm:$0xff]  }
 0x10a   :  { %2961 = vmatprep.subr.bf16.mxu1 %v8184_v19  ;;  %v8259_v19 = vld [vmem:[%s11891_s2 + $0x884] ss:$8 sps:$4 sm:$0xff]   ;;  %v8257_v24 = vld [vmem:[%s11891_s2 + $0x880] ss:$8 sps:$4 sm:$0xff]   ;;  %v8269_v29 = vld [vmem:[%s11891_s2 + $0xb74] ss:$8 sps:$4 sm:$0xff]  }
 0x10b   :  { %2921 = vmatpush1.bf16.msra.mxu0 %v8179_v18  ;;  %v146_v18 = vcombine.high %v52_v11, %v52_v11  ;;  %v8303_v11 = vld [vmem:[%s11891_s2 + $0xb10] ss:$8 sps:$4 sm:$0xff]  }
 0x10c   :  { %2922 = vmatprep.subr.bf16.mxu0 %v8187_v25 }
 0x10d   :  { %2962 = vmatpush1.bf16.msra.mxu1 %v8182_v23  ;;  %v8262_v23 = vld [vmem:[%s11891_s2 + $0x984] ss:$8 sps:$4 sm:$0xff]   ;;  %v10180_v25 = vrot.slane %v146_v18, %v9259_v48  ;;  %v8312_v18 = vld [vmem:[%s11891_s2 + $0xaf0] ss:$8 sps:$4 sm:$0xff]  }
 0x10e   :  { %2963 = vmatprep.subr.bf16.mxu1 %v8190_v27  ;;  %v8260_v27 = vld [vmem:[%s11891_s2 + $0x980] ss:$8 sps:$4 sm:$0xff]  }
 0x10f   :  { %2923 = vmatpush1.bf16.msra.mxu0 %v8185_v28  ;;  %v161_v28 = vcombine.high %v10171_v21, %v10171_v21 }
 0x110   :  { %2924 = vmatprep.subr.bf16.mxu0 %v8193_v31  ;;  %v162_v31 = vcombine.high %v10180_v25, %v10180_v25 }
 0x111   :  { %2964 = vmatpush1.bf16.msra.mxu1 %v8188_v30  ;;  %v8263_v30 = vld [vmem:[%s11891_s2 + $0xa70] ss:$8 sps:$4 sm:$0xff]  }
 0x112   :  { %2965 = vmatprep.subr.bf16.mxu1 %v8196_v32  ;;  %v211_v32 = vpack.c.bf16 %v9941_v53, %v9941_v53  ;;  %v8270_v53 = vld [vmem:[%s11891_s2 + $0xa60] ss:$8 sps:$4 sm:$0xff]  }
 0x113   :  { %2925 = vmatpush1.bf16.msra.mxu0 %v8191_v33  ;;  %v8272_v33 = vld [vmem:[%s11891_s2 + $0xa64] ss:$8 sps:$4 sm:$0xff]  }
 0x114   :  { %2926 = vmatprep.subr.bf16.mxu0 %v8199_v37  ;;  %v216_v37 = vpack.c.bf16 %v161_v28, %v161_v28  ;;  %v8329_v28 = vld [vmem:[%s11891_s2 + $0xbd4] ss:$8 sps:$4 sm:$0xff]  }
 0x115   :  { %2966 = vmatpush1.bf16.msra.mxu1 %v8194_v35  ;;  %v8267_v35 = vld [vmem:[%s11891_s2 + $0xb70] ss:$8 sps:$4 sm:$0xff]  }
 0x116   :  { %2967 = vmatprep.subr.bf16.mxu1 %v8202_v38  ;;  %v213_v38 = vpack.c.bf16 %v9950_v55, %v9950_v55  ;;  %v8273_v55 = vld [vmem:[%s11891_s2 + $0xb60] ss:$8 sps:$4 sm:$0xff]  }
 0x117   :  { %2927 = vmatpush1.bf16.msra.mxu0 %v8197_v41  ;;  %v8275_v41 = vld [vmem:[%s11891_s2 + $0xb64] ss:$8 sps:$4 sm:$0xff]  }
 0x118   :  { %2928 = vmatprep.subr.bf16.mxu0 %v8205_v42  ;;  %v218_v42 = vpack.c.bf16 %v162_v31, %v162_v31  ;;  %v8327_v31 = vld [vmem:[%s11891_s2 + $0xbd0] ss:$8 sps:$4 sm:$0xff]  }
 0x119   :  { %2968 = vmatpush1.bf16.msra.mxu1 %v8200_v44 }
 0x11a   :  { %2969 = vmatprep.subr.bf16.mxu1 %v8208_v45  ;;  %v8278_v45 = vld [vmem:[%s11891_s2 + $0xa54] ss:$8 sps:$4 sm:$0xff]  }
 0x11b   :  { %2929 = vmatpush1.bf16.msra.mxu0 %v8203_v46 }
 0x11c   :  { %2930 = vmatprep.subr.bf16.mxu0 %v8211_v47 }
 0x11d   :  { %2970 = vmatpush1.bf16.msra.mxu1 %v8206_v49 }
 0x11e   :  { %2971 = vmatprep.subr.bf16.mxu1 %v8214_v50  ;;  %v8281_v50 = vld [vmem:[%s11891_s2 + $0xb54] ss:$8 sps:$4 sm:$0xff]  }
 0x11f   :  { %2931 = vmatpush1.bf16.msra.mxu0 %v8209_v51 }
 0x120   :  { %2932 = vmatprep.subr.bf16.mxu0 %v8217_v52 }
 0x121   :  { %2972 = vmatpush1.bf16.msra.mxu1 %v8212_v54 }
 0x122   :  { %2973 = vmatprep.subr.bf16.mxu1 %v8220_v34 }
 0x123   :  { %2933 = vmatpush2.bf16.msra.mxu0 %v8215_v56  ;;  %v8284_v56 = vld [vmem:[%s11891_s2 + $0xa44] ss:$8 sps:$4 sm:$0xff]  }
 0x124   :  { %2934 = vmatprep.subr.bf16.mxu0 %v8223_v39 }
 0x125   :  { %2974 = vmatpush2.bf16.msra.mxu1 %v8218_v58 }
 0x126   :  { %2975 = vmatprep.subr.bf16.mxu1 %v8226_v59 }
 0x127   :  { %2935 = vmatpush2.bf16.msra.mxu0 %v8221_v60  ;;  %v8287_v60 = vld [vmem:[%s11891_s2 + $0xb44] ss:$8 sps:$4 sm:$0xff]  }
 0x128   :  { %2936 = vmatprep.subr.bf16.mxu0 %v8229_v61  ;;  %v8282_v61 = vld [vmem:[%s11891_s2 + $0xa40] ss:$8 sps:$4 sm:$0xff]  }
 0x129   :  { %2976 = vmatpush2.bf16.msra.mxu1 %v8224_v63 }
 0x12a   :  { %2977 = vmatprep.subr.bf16.mxu1 %v8232_v0  ;;  %v8290_v0 = vld [vmem:[%s11891_s2 + $0xa34] ss:$8 sps:$4 sm:$0xff]  }
 0x12b   :  { %2937 = vmatpush2.bf16.msra.mxu0 %v8227_v1  ;;  %v8285_v1 = vld [vmem:[%s11891_s2 + $0xb40] ss:$8 sps:$4 sm:$0xff]  }
 0x12c   :  { %2938 = vmatprep.subr.bf16.mxu0 %v8235_v2  ;;  %v8293_v2 = vld [vmem:[%s11891_s2 + $0xb34] ss:$8 sps:$4 sm:$0xff]  }
 0x12d   :  { %2978 = vmatpush2.bf16.msra.mxu1 %v8230_v3  ;;  %v8288_v3 = vld [vmem:[%s11891_s2 + $0xa30] ss:$8 sps:$4 sm:$0xff]  }
 0x12e   :  { %2979 = vmatprep.subr.bf16.mxu1 %v8238_v4  ;;  %v8296_v4 = vld [vmem:[%s11891_s2 + $0xa24] ss:$8 sps:$4 sm:$0xff]  }
 0x12f   :  { %2939 = vmatpush2.bf16.msra.mxu0 %v8233_v5  ;;  %v8291_v5 = vld [vmem:[%s11891_s2 + $0xb30] ss:$8 sps:$4 sm:$0xff]  }
 0x130   :  { %2940 = vmatprep.subr.bf16.mxu0 %v8241_v36  ;;  %v8299_v36 = vld [vmem:[%s11891_s2 + $0xb24] ss:$8 sps:$4 sm:$0xff]  }
 0x131   :  { %2980 = vmatpush2.bf16.msra.mxu1 %v8236_v6  ;;  %v8294_v6 = vld [vmem:[%s11891_s2 + $0xa20] ss:$8 sps:$4 sm:$0xff]  }
 0x132   :  { %2981 = vmatprep.subr.bf16.mxu1 %v8244_v7  ;;  %v8302_v7 = vld [vmem:[%s11891_s2 + $0xa14] ss:$8 sps:$4 sm:$0xff]  }
 0x133   :  { %2941 = vmatpush2.bf16.msra.mxu0 %v8239_v8  ;;  %v8297_v8 = vld [vmem:[%s11891_s2 + $0xb20] ss:$8 sps:$4 sm:$0xff]  }
 0x134   :  { %2942 = vmatprep.subr.bf16.mxu0 %v8247_v9  ;;  %v8305_v9 = vld [vmem:[%s11891_s2 + $0xb14] ss:$8 sps:$4 sm:$0xff]  }
 0x135   :  { %2982 = vmatpush2.bf16.msra.mxu1 %v8242_v10  ;;  %v8300_v10 = vld [vmem:[%s11891_s2 + $0xa10] ss:$8 sps:$4 sm:$0xff]  }
 0x136   :  { %2983 = vmatprep.subr.bf16.mxu1 %v8250_v40  ;;  %v8308_v40 = vld [vmem:[%s11891_s2 + $0xa04] ss:$8 sps:$4 sm:$0xff]  }
 0x137   :  { %2943 = vmatpush2.bf16.msra.mxu0 %v8245_v12  ;;  %v8311_v12 = vld [vmem:[%s11891_s2 + $0xb04] ss:$8 sps:$4 sm:$0xff]  }
 0x138   :  { %2944 = vmatprep.subr.bf16.mxu0 %v8253_v13  ;;  %v8306_v13 = vld [vmem:[%s11891_s2 + $0xa00] ss:$8 sps:$4 sm:$0xff]  }
 0x139   :  { %2984 = vmatpush2.bf16.msra.mxu1 %v8248_v14  ;;  %v8314_v14 = vld [vmem:[%s11891_s2 + $0xaf4] ss:$8 sps:$4 sm:$0xff]  }
 0x13a   :  { %2985 = vmatprep.subr.bf16.mxu1 %v8256_v15  ;;  %v8309_v15 = vld [vmem:[%s11891_s2 + $0xb00] ss:$8 sps:$4 sm:$0xff]  }
 0x13b   :  { %2945 = vmatpush2.bf16.msra.mxu0 %v8251_v16  ;;  %v8317_v16 = vld [vmem:[%s11891_s2 + $0xbf4] ss:$8 sps:$4 sm:$0xff]  }
 0x13c   :  { %2946 = vmatprep.subr.bf16.mxu0 %v8259_v19  ;;  %v8320_v19 = vld [vmem:[%s11891_s2 + $0xae4] ss:$8 sps:$4 sm:$0xff]  }
 0x13d   :  { %2986 = vmatpush2.bf16.msra.mxu1 %v8254_v20  ;;  %v8315_v20 = vld [vmem:[%s11891_s2 + $0xbf0] ss:$8 sps:$4 sm:$0xff]  }
 0x13e   :  { %2987 = vmatprep.subr.bf16.mxu1 %v8262_v23  ;;  %v8323_v23 = vld [vmem:[%s11891_s2 + $0xbe4] ss:$8 sps:$4 sm:$0xff]  }
 0x13f   :  { %2947 = vmatpush2.bf16.msra.mxu0 %v8257_v24  ;;  %v8318_v24 = vld [vmem:[%s11891_s2 + $0xae0] ss:$8 sps:$4 sm:$0xff]  }
 0x140   :  { %2998 = vmatprep.subr.bf16.mxu0 %v8265_v26  ;;  %v8326_v26 = vld [vmem:[%s11891_s2 + $0xad4] ss:$8 sps:$4 sm:$0xff]  }
 0x141   :  { %2988 = vmatpush2.bf16.msra.mxu1 %v8260_v27  ;;  %v8321_v27 = vld [vmem:[%s11891_s2 + $0xbe0] ss:$8 sps:$4 sm:$0xff]  }
 0x142   :  { %v2704_v44 = vpop.f32.mrf.mxu0  ;;  %2949 = vmatmul.mubr.bf16.vlgmr.msra.gmra.mxu0 %v211_v32  ;;  %3039 = vmatprep.subr.bf16.mxu1 %v8269_v29  ;;  %v8324_v29 = vld [vmem:[%s11891_s2 + $0xad0] ss:$8 sps:$4 sm:$0xff]   ;;  %v8335_v32 = vld [vmem:[%s11891_s2 + $0xbc4] ss:$8 sps:$4 sm:$0xff]  }
 0x143   :  { %v2705_v46 = vadd.f32 %v2704_v44, %v10007_v17  ;;  %2999 = vmatpush1.bf16.msra.mxu0 %v8263_v30  ;;  %3030 = vmatprep.mubr.bf16.mxu0 %v216_v37  ;;  %v2745_v49 = vpop.f32.mrf.mxu1  ;;  %v8276_v17 = vld [vmem:[%s11891_s2 + $0xa50] ss:$8 sps:$4 sm:$0xff]   ;;  %v8332_v30 = vld [vmem:[%s11891_s2 + $0xac4] ss:$8 sps:$4 sm:$0xff]   ;;  %v8333_v37 = vld [vmem:[%s11891_s2 + $0xbc0] ss:$8 sps:$4 sm:$0xff]  }
 0x144   :  { %v2706_v47 = vpop.f32.mrf.mxu0  ;;  %2990 = vmatmul.mubr.bf16.vlgmr.msra.gmra.mxu1 %v213_v38  ;;  %3000 = vmatprep.subr.bf16.mxu0 %v8272_v33  ;;  %v8330_v33 = vld [vmem:[%s11891_s2 + $0xac0] ss:$8 sps:$4 sm:$0xff]   ;;  %v8341_v38 = vld [vmem:[%s11891_s2 + $0xbb4] ss:$8 sps:$4 sm:$0xff]   ;;  %v8347_v44 = vld [vmem:[%s11891_s2 + $0xba4] ss:$8 sps:$4 sm:$0xff]  }
 0x145   :  { %v2707_v51 = vadd.f32 %v2706_v47, %v10015_v22  ;;  %v10225_v52 = vadd.f32 %v2745_v49, %v2705_v46  ;;  %3040 = vmatpush1.bf16.msra.mxu1 %v8267_v35  ;;  %3071 = vmatprep.mubr.bf16.mxu1 %v218_v42  ;;  %v2747_v34 = vpop.f32.mrf.mxu1  ;;  %v8279_v22 = vld [vmem:[%s11891_s2 + $0xb50] ss:$8 sps:$4 sm:$0xff]   ;;  %v8338_v35 = vld [vmem:[%s11891_s2 + $0xab4] ss:$8 sps:$4 sm:$0xff]  }
 0x146   :  { %v2708_v54 = vpop.f32.mrf.mxu0  ;;  %3041 = vmatprep.subr.bf16.mxu1 %v8275_v41  ;;  %v8336_v41 = vld [vmem:[%s11891_s2 + $0xab0] ss:$8 sps:$4 sm:$0xff]   ;;  %v8350_v46 = vld [vmem:[%s11891_s2 + $0xa94] ss:$8 sps:$4 sm:$0xff]  }
 0x147   :  { %v10233_v39 = vadd.f32 %v2747_v34, %v2707_v51  ;;  %3001 = vmatpush1.bf16.msra.mxu0 %v8270_v53  ;;  %v2749_v59 = vpop.f32.mrf.mxu1  ;;  %v8344_v53 = vld [vmem:[%s11891_s2 + $0xaa4] ss:$8 sps:$4 sm:$0xff]   ;;  %v8339_v42 = vld [vmem:[%s11891_s2 + $0xbb0] ss:$8 sps:$4 sm:$0xff]   ;;  %v8353_v47 = vld [vmem:[%s11891_s2 + $0xb94] ss:$8 sps:$4 sm:$0xff]  }
 0x148   :  { %v2709_v58 = vpop.f32.mrf.mxu0  ;;  %3002 = vmatprep.subr.bf16.mxu0 %v8278_v45  ;;  %v8342_v45 = vld [vmem:[%s11891_s2 + $0xaa0] ss:$8 sps:$4 sm:$0xff]   ;;  %v8348_v49 = vld [vmem:[%s11891_s2 + $0xa90] ss:$8 sps:$4 sm:$0xff]   ;;  %v8362_v34 = vld [vmem:[%s11891_s2 + $0xc34] ss:$8 sps:$4 sm:$0xff]  }
 0x149   :  { %3042 = vmatpush1.bf16.msra.mxu1 %v8273_v55  ;;  %v2750_v63 = vpop.f32.mrf.mxu1  ;;  %v8345_v55 = vld [vmem:[%s11891_s2 + $0xba0] ss:$8 sps:$4 sm:$0xff]   ;;  %v8351_v51 = vld [vmem:[%s11891_s2 + $0xb90] ss:$8 sps:$4 sm:$0xff]   ;;  %v215_v58 = vpack.c.bf16 %v10171_v21, %v10171_v21  ;;  %v8366_v59 = vld [vmem:[%s11891_s2 + $0xc24] ss:$8 sps:$4 sm:$0xff]  }
 0x14a   :  { %3043 = vmatprep.subr.bf16.mxu1 %v8281_v50  ;;  %v8356_v50 = vld [vmem:[%s11891_s2 + $0xa84] ss:$8 sps:$4 sm:$0xff]   ;;  %v8354_v54 = vld [vmem:[%s11891_s2 + $0xa80] ss:$8 sps:$4 sm:$0xff]   ;;  %v8369_v21 = vld [vmem:[%s11891_s2 + $0xc14] ss:$8 sps:$4 sm:$0xff]  }
 0x14b   :  { %3003 = vmatpush1.bf16.msra.mxu0 %v8276_v17  ;;  %v8359_v17 = vld [vmem:[%s11891_s2 + $0xb84] ss:$8 sps:$4 sm:$0xff]  }
 0x14c   :  { %3004 = vmatprep.subr.bf16.mxu0 %v8284_v56  ;;  %v8357_v56 = vld [vmem:[%s11891_s2 + $0xb80] ss:$8 sps:$4 sm:$0xff]  }
 0x14d   :  { %3044 = vmatpush1.bf16.msra.mxu1 %v8279_v22  ;;  %v8360_v22 = vld [vmem:[%s11891_s2 + $0xc30] ss:$8 sps:$4 sm:$0xff]  }
 0x14e   :  { %3045 = vmatprep.subr.bf16.mxu1 %v8287_v60  ;;  %v217_v60 = vpack.c.bf16 %v10180_v25, %v10180_v25 }
 0x14f   :  { %3005 = vmatpush1.bf16.msra.mxu0 %v8282_v61  ;;  %v8364_v61 = vld [vmem:[%s11891_s2 + $0xc20] ss:$8 sps:$4 sm:$0xff]  }
 0x150   :  { %3006 = vmatprep.subr.bf16.mxu0 %v8290_v0 }
 0x151   :  { %3046 = vmatpush1.bf16.msra.mxu1 %v8285_v1  ;;  %v9049_v1 = vmov 0  }
 0x152   :  { %3047 = vmatprep.subr.bf16.mxu1 %v8293_v2 }
 0x153   :  { %3007 = vmatpush1.bf16.msra.mxu0 %v8288_v3 }
 0x154   :  { %3008 = vmatprep.subr.bf16.mxu0 %v8296_v4 }
 0x155   :  { %3048 = vmatpush1.bf16.msra.mxu1 %v8291_v5  ;;  %v8367_v5 = vld [vmem:[%s11891_s2 + $0xc10] ss:$8 sps:$4 sm:$0xff]  }
 0x156   :  { %3049 = vmatprep.subr.bf16.mxu1 %v8299_v36 }
 0x157   :  { %3009 = vmatpush1.bf16.msra.mxu0 %v8294_v6 }
 0x158   :  { %3010 = vmatprep.subr.bf16.mxu0 %v8302_v7 }
 0x159   :  { %3050 = vmatpush1.bf16.msra.mxu1 %v8297_v8 }
 0x15a   :  { %3051 = vmatprep.subr.bf16.mxu1 %v8305_v9 }
 0x15b   :  { %3011 = vmatpush1.bf16.msra.mxu0 %v8300_v10 }
 0x15c   :  { %3012 = vmatprep.subr.bf16.mxu0 %v8308_v40  ;;  %v8373_v40 = vld [vmem:[%s11893_s4 + $0x78] sm:$0xff]  }
 0x15d   :  { %3052 = vmatpush1.bf16.msra.mxu1 %v8303_v11  ;;  %v8375_v11 = vld [vmem:[%s11893_s4 + $0x38] sm:$0xff]  }
 0x15e   :  { %3053 = vmatprep.subr.bf16.mxu1 %v8311_v12  ;;  %v6874_v12 = vld.sshfl [vmem:[%s11889_s0 + $0x30] sm:$0x3 pattern:$0x76325410] }
 0x15f   :  { %3013 = vmatpush1.bf16.msra.mxu0 %v8306_v13  ;;  %v8377_v13 = vld [vmem:[%s11893_s4 + $0x70] sm:$0xff]  }
 0x160   :  { %3014 = vmatprep.subr.bf16.mxu0 %v8314_v14  ;;  %v8374_v14 = vld [vmem:[%s11895_s6 + $0x78] sm:$0xff]  }
 0x161   :  { %3054 = vmatpush1.bf16.msra.mxu1 %v8309_v15  ;;  %v8379_v15 = vld [vmem:[%s11893_s4 + $0x30] sm:$0xff]  }
 0x162   :  { %3055 = vmatprep.subr.bf16.mxu1 %v8317_v16  ;;  %v8376_v16 = vld [vmem:[%s11895_s6 + $0x38] sm:$0xff]  }
 0x163   :  { %3015 = vmatpush2.bf16.msra.mxu0 %v8312_v18  ;;  %v219_v18 = vpack.c.bf16 %v6874_v12, %v6874_v12 }
 0x164   :  { %3016 = vmatprep.subr.bf16.mxu0 %v8320_v19  ;;  %v8378_v19 = vld [vmem:[%s11895_s6 + $0x70] sm:$0xff]  }
 0x165   :  { %3056 = vmatpush2.bf16.msra.mxu1 %v8315_v20  ;;  %v8380_v20 = vld [vmem:[%s11895_s6 + $0x30] sm:$0xff]  }
 0x166   :  { %3057 = vmatprep.subr.bf16.mxu1 %v8323_v23 }
 0x167   :  { %3017 = vmatpush2.bf16.msra.mxu0 %v8318_v24 }
 0x168   :  { %3018 = vmatprep.subr.bf16.mxu0 %v8326_v26 }
 0x169   :  { %3058 = vmatpush2.bf16.msra.mxu1 %v8321_v27 }
 0x16a   :  { %3059 = vmatprep.subr.bf16.mxu1 %v8329_v28 }
 0x16b   :  { %3019 = vmatpush2.bf16.msra.mxu0 %v8324_v29 }
 0x16c   :  { %3020 = vmatprep.subr.bf16.mxu0 %v8332_v30 }
 0x16d   :  { %3060 = vmatpush2.bf16.msra.mxu1 %v8327_v31 }
 0x16e   :  { %3061 = vmatprep.subr.bf16.mxu1 %v8335_v32 }
 0x16f   :  { %3021 = vmatpush2.bf16.msra.mxu0 %v8330_v33 }
 0x170   :  { %3022 = vmatprep.subr.bf16.mxu0 %v8338_v35 }
 0x171   :  { %3062 = vmatpush2.bf16.msra.mxu1 %v8333_v37 }
 0x172   :  { %3063 = vmatprep.subr.bf16.mxu1 %v8341_v38 }
 0x173   :  { %3023 = vmatpush2.bf16.msra.mxu0 %v8336_v41 }
 0x174   :  { %3024 = vmatprep.subr.bf16.mxu0 %v8344_v53 }
 0x175   :  { %3064 = vmatpush2.bf16.msra.mxu1 %v8339_v42 }
 0x176   :  { %3065 = vmatprep.subr.bf16.mxu1 %v8347_v44 }
 0x177   :  { %3025 = vmatpush2.bf16.msra.mxu0 %v8342_v45 }
 0x178   :  { %3026 = vmatprep.subr.bf16.mxu0 %v8350_v46 }
 0x179   :  { %3066 = vmatpush2.bf16.msra.mxu1 %v8345_v55 }
 0x17a   :  { %3067 = vmatprep.subr.bf16.mxu1 %v8353_v47 }
 0x17b   :  { %3027 = vmatpush2.bf16.msra.mxu0 %v8348_v49 }
 0x17c   :  { %3028 = vmatprep.subr.bf16.mxu0 %v8356_v50 }
 0x17d   :  { %3068 = vmatpush2.bf16.msra.mxu1 %v8351_v51 }
 0x17e   :  { %3069 = vmatprep.subr.bf16.mxu1 %v8359_v17 }
 0x17f   :  { %3029 = vmatpush2.bf16.msra.mxu0 %v8354_v54 }
 0x180   :  { %3088 = vmatprep.subr.bf16.mxu0 %v8362_v34 }
 0x181   :  { %3070 = vmatpush2.bf16.msra.mxu1 %v8357_v56 }
 0x182   :  { %v2786_v63 = vpop.f32.mrf.mxu0  ;;  %3031 = vmatmul.mubr.bf16.vlgmr.msra.gmra.mxu0 %v215_v58  ;;  %7709 = vmatprep.subr.bf16.mxu1 %v8373_v40 }
 0x183   :  { %v2787_v0 = vadd.f32 %v2786_v63, %v10225_v52  ;;  %3089 = vmatpush1.bf16.msra.mxu0 %v8360_v22  ;;  %3112 = vmatprep.mubr.bf16.mxu0 %v9049_v1  ;;  %v8372_v52 = vld [vmem:[%s11891_s2 + $0xc04] ss:$8 sps:$4 sm:$0xff]  }
 0x184   :  { %v2788_v2 = vpop.f32.mrf.mxu0  ;;  %v2827_v3 = vpop.f32.mrf.mxu1  ;;  %3072 = vmatmul.mubr.bf16.vlgmr.msra.gmra.mxu1 %v217_v60  ;;  %3090 = vmatprep.subr.bf16.mxu0 %v8366_v59 }
 0x185   :  { %v2789_v25 = vadd.f32 %v2788_v2, %v10233_v39  ;;  %v2828_v4 = vadd.f32 %v2827_v3, %v2787_v0  ;;  %v8370_v39 = vld [vmem:[%s11891_s2 + $0xc00] ss:$8 sps:$4 sm:$0xff]   ;;  %7710 = vmatpush3.bf16.msra.mxu1 %v8375_v11 }
 0x186   :  { %v2790_v36 = vpop.f32.mrf.mxu0  ;;  %v2829_v6 = vpop.f32.mrf.mxu1  ;;  %7711 = vmatprep.subr.bf16.mxu1 %v8377_v13 }
 0x187   :  { %v2830_v7 = vadd.f32 %v2829_v6, %v2789_v25  ;;  %3091 = vmatpush1.bf16.msra.mxu0 %v8364_v61 }
 0x188   :  { %v2791_v8 = vpop.f32.mrf.mxu0  ;;  %3092 = vmatprep.subr.bf16.mxu0 %v8369_v21  ;;  %v2831_v9 = vpop.f32.mrf.mxu1 }
 0x189   :  { %7712 = vmatpush3.bf16.msra.mxu1 %v8379_v15 }
 0x18a   :  { %v2832_v10 = vpop.f32.mrf.mxu1 }
 0x18b   :  { %3093 = vmatpush1.bf16.msra.mxu0 %v8367_v5 }
 0x18c   :  { %3094 = vmatprep.subr.bf16.mxu0 %v8372_v52 }
 0x18f   :  { %3095 = vmatpush1.bf16.msra.mxu0 %v8370_v39 }
 0x190   :  { %7731 = vmatprep.subr.bf16.mxu0 %v8374_v14 }
 0x192   :  { %7267 = vmatmul.mubr.msk.bf16.vlgmr.msra.gmra.mxu0 %vm2584_vm0, %v219_v18 }
 0x193   :  { %7732 = vmatpush3.bf16.msra.mxu0 %v8376_v16 }
 0x194   :  { %7733 = vmatprep.subr.bf16.mxu0 %v8378_v19 }
 0x197   :  { %7734 = vmatpush3.bf16.msra.mxu0 %v8380_v20 }
 0x198   :  { %21 = vsyncpa [#allocation5], 0  ;;  %v8381_v24 = vld [vmem:[%s11893_s4 + $0x68] sm:$0xff]   ;;  %v8385_v38 = vld [vmem:[%s11893_s4 + $0x60] sm:$0xff]   ;;  %vm3519_vm1 = vcmask 1041408   ;;  %vm3475_vm2 = vcmask 156672  }
 0x199   :  { %v8382_v26 = vld [vmem:[%s11895_s6 + $0x68] sm:$0xff]   ;;  %7713 = vmatprep.subr.bf16.mxu1 %v8381_v24  ;;  %v8386_v41 = vld [vmem:[%s11895_s6 + $0x60] sm:$0xff]   ;;  %v8389_v55 = vld [vmem:[%s11893_s4 + $0x58] sm:$0xff]   ;;  %vm3515_vm3 = vcmask 162816   ;;  %s9051_s0 = smov [#allocation4]  }
 0x19a   :  { %v8383_v28 = vld [vmem:[%s11893_s4 + $0x28] sm:$0xff]   ;;  %7735 = vmatprep.subr.bf16.mxu0 %v8382_v26  ;;  %v8387_v42 = vld [vmem:[%s11893_s4 + $0x20] sm:$0xff]   ;;  %v8390_v47 = vld [vmem:[%s11895_s6 + $0x58] sm:$0xff]  }
 0x19b   :  { %v8384_v29 = vld [vmem:[%s11895_s6 + $0x28] sm:$0xff]   ;;  %7714 = vmatpush3.bf16.msra.mxu1 %v8383_v28  ;;  %v8388_v44 = vld [vmem:[%s11895_s6 + $0x20] sm:$0xff]   ;;  %v8391_v49 = vld [vmem:[%s11893_s4 + $0x18] sm:$0xff]  }
 0x19c   :  { %7736 = vmatpush3.bf16.msra.mxu0 %v8384_v29  ;;  %7715 = vmatprep.subr.bf16.mxu1 %v8385_v38  ;;  %v8392_v50 = vld [vmem:[%s11895_s6 + $0x18] sm:$0xff]   ;;  %v8393_v17 = vld [vmem:[%s11893_s4 + $0x50] sm:$0xff]   ;;  %v8397_v22 = vld [vmem:[%s11893_s4 + $0x48] sm:$0xff]  }
 0x19d   :  { %7737 = vmatprep.subr.bf16.mxu0 %v8386_v41  ;;  %v8394_v54 = vld [vmem:[%s11895_s6 + $0x50] sm:$0xff]   ;;  %v8398_v58 = vld [vmem:[%s11895_s6 + $0x48] sm:$0xff]   ;;  %v8401_v61 = vld [vmem:[%s11893_s4 + $0x40] sm:$0xff]  }
 0x19e   :  { %v8395_v34 = vld [vmem:[%s11893_s4 + $0x10] sm:$0xff]   ;;  %v8399_v59 = vld [vmem:[%s11893_s4 + $0x8] sm:$0xff]   ;;  %v8402_v63 = vld [vmem:[%s11895_s6 + $0x40] sm:$0xff]  }
 0x19f   :  { %7716 = vmatpush3.bf16.msra.mxu1 %v8387_v42  ;;  %v8396_v56 = vld [vmem:[%s11895_s6 + $0x10] sm:$0xff]   ;;  %v8400_v60 = vld [vmem:[%s11895_s6 + $0x8] sm:$0xff]   ;;  %v8403_v21 = vld [vmem:[%s11893_s4] sm:$0xff]  }
 0x1a0   :  { %7738 = vmatpush3.bf16.msra.mxu0 %v8388_v44  ;;  %7717 = vmatprep.subr.bf16.mxu1 %v8389_v55  ;;  %v8404_v0 = vld [vmem:[%s11895_s6] sm:$0xff]   ;;  %v8418_v55 = vld [vmem:[%s11899_s10 + $0x4b4] ss:$100 sps:$4 sm:$0xff]  }
 0x1a1   :  { %7739 = vmatprep.subr.bf16.mxu0 %v8390_v47  ;;  %v8407_v44 = vld [vmem:[%s11897_s8] ss:$8 sps:$4 sm:$0xff]   ;;  %v8416_v47 = vld [vmem:[%s11899_s10 + $0x4b0] ss:$100 sps:$4 sm:$0xff]  }
 0x1a3   :  { %7718 = vmatpush3.bf16.msra.mxu1 %v8391_v49  ;;  %v8424_v49 = vld [vmem:[%s11899_s10 + $0x3ec] ss:$100 sps:$4 sm:$0xff]  }
 0x1a4   :  { %7740 = vmatpush3.bf16.msra.mxu0 %v8392_v50  ;;  %7719 = vmatprep.subr.bf16.mxu1 %v8393_v17  ;;  %v8422_v50 = vld [vmem:[%s11899_s10 + $0x3e8] ss:$100 sps:$4 sm:$0xff]   ;;  %v8428_v17 = vld [vmem:[%s11899_s10 + $0x320] ss:$100 sps:$4 sm:$0xff]  }
 0x1a5   :  { %7741 = vmatprep.subr.bf16.mxu0 %v8394_v54  ;;  %v8436_v54 = vld [vmem:[%s11899_s10 + $0x25c] ss:$100 sps:$4 sm:$0xff]  }
 0x1a7   :  { %7720 = vmatpush3.bf16.msra.mxu1 %v8395_v34  ;;  %v8434_v34 = vld [vmem:[%s11899_s10 + $0x258] ss:$100 sps:$4 sm:$0xff]  }
 0x1a8   :  { %7742 = vmatpush3.bf16.msra.mxu0 %v8396_v56  ;;  %7721 = vmatprep.subr.bf16.mxu1 %v8397_v22  ;;  %v8442_v56 = vld [vmem:[%s11899_s10 + $0x194] ss:$100 sps:$4 sm:$0xff]  }
 0x1a9   :  { %7743 = vmatprep.subr.bf16.mxu0 %v8398_v58  ;;  %v8440_v22 = vld [vmem:[%s11899_s10 + $0x190] ss:$100 sps:$4 sm:$0xff]  }
 0x1aa   :  { %v8448_v58 = vld [vmem:[%s11899_s10 + $0xcc] ss:$100 sps:$4 sm:$0xff]  }
 0x1ab   :  { %7722 = vmatpush3.bf16.msra.mxu1 %v8399_v59  ;;  %v8446_v59 = vld [vmem:[%s11899_s10 + $0xc8] ss:$100 sps:$4 sm:$0xff]  }
 0x1ac   :  { %7744 = vmatpush3.bf16.msra.mxu0 %v8400_v60  ;;  %7723 = vmatprep.subr.bf16.mxu1 %v8401_v61  ;;  %v8454_v60 = vld [vmem:[%s11899_s10 + $0x4] ss:$100 sps:$4 sm:$0xff]  }
 0x1ad   :  { %7745 = vmatprep.subr.bf16.mxu0 %v8402_v63  ;;  %v8452_v61 = vld [vmem:[%s11899_s10] ss:$100 sps:$4 sm:$0xff]  }
 0x1ae   :  { %v8460_v63 = vld [vmem:[%s11899_s10 + $0xbbc] ss:$100 sps:$4 sm:$0xff]  }
 0x1af   :  { %7724 = vmatpush3.bf16.msra.mxu1 %v8403_v21  ;;  %v8458_v21 = vld [vmem:[%s11899_s10 + $0xbb8] ss:$100 sps:$4 sm:$0xff]  }
 0x1b0   :  { %7746 = vmatpush3.bf16.msra.mxu0 %v8404_v0  ;;  %v8466_v0 = vld [vmem:[%s11899_s10 + $0xaf4] ss:$100 sps:$4 sm:$0xff]  }
 0x1c2   :  { %v2868_v23 = vpop.f32.mrf.mxu0 }
 0x1c3   :  { %v2869_v27 = vadd.f32 %v2868_v23, %v2828_v4 }
 0x1c4   :  { %v2870_v30 = vpop.f32.mrf.mxu0  ;;  %v2909_v31 = vpop.f32.mrf.mxu1 }
 0x1c5   :  { %v2871_v32 = vadd.f32 %v2870_v30, %v2830_v7  ;;  %v2910_v33 = vadd.f32 %v2909_v31, %v2869_v27 }
 0x1c6   :  { %v2872_v35 = vpop.f32.mrf.mxu0  ;;  %v2911_v37 = vpop.f32.mrf.mxu1 }
 0x1c7   :  { %v2912_v53 = vadd.f32 %v2911_v37, %v2871_v32  ;;  %v3487_v37 = vld [vmem:[%s11897_s8 + $0x10] sm:$0x33] }
 0x1c8   :  { %v2873_v45 = vpop.f32.mrf.mxu0  ;;  %v2913_v46 = vpop.f32.mrf.mxu1  ;;  %v7305_v38 = vcombine.high %v3487_v37, %v3487_v37  ;;  %v7304_v41 = vcombine.low %v3487_v37, %v3487_v37  ;;  %v8425_v37 = vld [vmem:[%s11899_s10 + $0x3f0] ss:$100 sps:$4 sm:$0xff]  }
 0x1c9   :  { %v8412_v45 = vld [vmem:[%s11899_s10 + $0x57c] ss:$100 sps:$4 sm:$0xff]   ;;  %v8415_v46 = vld [vmem:[%s11899_s10 + $0x584] ss:$100 sps:$4 sm:$0xff]  }
 0x1ca   :  { %v2914_v51 = vpop.f32.mrf.mxu1  ;;  %7306 = vmatprep.subr.msk.bf16.mxu0 %vm3519_vm1, %v7305_v38  ;;  %v3521_v42 = vsel %vm3519_vm1, %v7304_v41, 0  ;;  %6136 = vmatprep.subr.bf16.mxu1 %v8412_v45  ;;  %v8433_v38 = vld [vmem:[%s11899_s10 + $0x32c] ss:$100 sps:$4 sm:$0xff]   ;;  %v8451_v45 = vld [vmem:[%s11899_s10 + $0xd4] ss:$100 sps:$4 sm:$0xff]  }
 0x1cb   :  { %v8430_v51 = vld [vmem:[%s11899_s10 + $0x324] ss:$100 sps:$4 sm:$0xff]  }
 0x1cc   :  { %v8431_v41 = vld [vmem:[%s11899_s10 + $0x328] ss:$100 sps:$4 sm:$0xff]  }
 0x202   :  { %v2950_v2 = vpop.f32.mrf.mxu0 }
 0x203   :  { %v2951_v3 = vadd.f32 %v2950_v2, %v2910_v33  ;;  %v8464_v2 = vld [vmem:[%s11899_s10 + $0xaf0] ss:$100 sps:$4 sm:$0xff]  }
 0x204   :  { %v2952_v25 = vpop.f32.mrf.mxu0  ;;  %v2991_v4 = vpop.f32.mrf.mxu1 }
 0x205   :  { %v2953_v5 = vadd.f32 %v2952_v25, %v2912_v53  ;;  %v2992_v36 = vadd.f32 %v2991_v4, %v2951_v3  ;;  %v8409_v53 = vld [vmem:[%s11897_s8 + $0x4] ss:$8 sps:$4 sm:$0xff]  }
 0x206   :  { %v2954_v6 = vpop.f32.mrf.mxu0  ;;  %v2993_v52 = vpop.f32.mrf.mxu1  ;;  %v8472_v3 = vld [vmem:[%s11899_s10 + $0xa2c] ss:$100 sps:$4 sm:$0xff]   ;;  %v8478_v4 = vld [vmem:[%s11899_s10 + $0x964] ss:$100 sps:$4 sm:$0xff]  }
 0x207   :  { %v2994_v7 = vadd.f32 %v2993_v52, %v2953_v5  ;;  %v8470_v25 = vld [vmem:[%s11899_s10 + $0xa28] ss:$100 sps:$4 sm:$0xff]   ;;  %v8476_v5 = vld [vmem:[%s11899_s10 + $0x960] ss:$100 sps:$4 sm:$0xff]   ;;  %v8482_v6 = vld [vmem:[%s11899_s10 + $0x898] ss:$100 sps:$4 sm:$0xff]  }
 0x208   :  { %v2955_v8 = vpop.f32.mrf.mxu0  ;;  %v2995_v9 = vpop.f32.mrf.mxu1  ;;  %v8490_v52 = vld [vmem:[%s11899_s10 + $0x7d4] ss:$100 sps:$4 sm:$0xff]  }
 0x20a   :  { %v2996_v39 = vpop.f32.mrf.mxu1 }
 0x20b   :  { %v7268_v39 = vld [vmem:[%s11894_s5] ss:$0 sm:$0xff] }
 0x242   :  { %v3032_v10 = vpop.f32.mrf.mxu0 }
 0x243   :  { %v3033_v18 = vadd.f32 %v3032_v10, %v2992_v36  ;;  %v8484_v36 = vld [vmem:[%s11899_s10 + $0x89c] ss:$100 sps:$4 sm:$0xff]  }
 0x244   :  { %v3034_v40 = vpop.f32.mrf.mxu0  ;;  %v3073_v11 = vpop.f32.mrf.mxu1 }
 0x245   :  { %v3035_v19 = vadd.f32 %v3034_v40, %v2994_v7  ;;  %v3074_v20 = vadd.f32 %v3073_v11, %v3033_v18  ;;  %v8488_v7 = vld [vmem:[%s11899_s10 + $0x7d0] ss:$100 sps:$4 sm:$0xff]   ;;  %v7285_v40 = vld [vmem:[%s11896_s7] ss:$0 sm:$0xff] }
 0x246   :  { %v3036_v12 = vpop.f32.mrf.mxu0  ;;  %v3075_v13 = vpop.f32.mrf.mxu1 }
 0x247   :  { %v3076_v24 = vadd.f32 %v3075_v13, %v3035_v19 }
 0x248   :  { %v3037_v14 = vpop.f32.mrf.mxu0  ;;  %v3077_v15 = vpop.f32.mrf.mxu1 }
 0x24a   :  { %v3078_v16 = vpop.f32.mrf.mxu1 }
 0x252   :  { %v3114_v23 = vpop.f32.mrf.mxu0 }
 0x253   :  { %v3115_v26 = vadd.f32 %v3114_v23, %v3074_v20 }
 0x254   :  { %v3116_v27 = vpop.f32.mrf.mxu0 }
 0x255   :  { %v3117_v28 = vadd.f32 %v3116_v27, %v3076_v24  ;;  %v3121_v29 = vmax.f32 %v3115_v26, 0.0  ;;  %v3478_v26 = vld [vmem:[%s11890_s1] sm:$0x3]  ;;  %s6860_s1 = sshll.u32 %s9051_s0, 4  ;;  %s6861_s1 = int_to_ptr.vmem [resolvable:$true] %s6860_s1 }
 0x256   :  { %v3118_v30 = vpop.f32.mrf.mxu0 }
 0x257   :  { %v3122_v31 = vmax.f32 %v3117_v28, 0.0  ;;  %v3123_v35 = vpack.c.bf16 %v3121_v29, %v3121_v29  ;;  %v8413_v30 = vld [vmem:[%s11899_s10 + $0x580] ss:$100 sps:$4 sm:$0xff]  }
 0x258   :  { %v3119_v32 = vpop.f32.mrf.mxu0 }
 0x259   :  { %v3124_v33 = vpack.c.bf16 %v3122_v31, %v3122_v31  ;;  %v8421_v32 = vld [vmem:[%s11899_s10 + $0x4bc] ss:$100 sps:$4 sm:$0xff]  }
 0x25b   :  { %3292 = vmatprep.mubr.bf16.mxu1 %v3124_v33  ;;  %3467 = vmatprep.mubr.bf16.mxu0 %v3124_v33  ;;  %v8419_v33 = vld [vmem:[%s11899_s10 + $0x4b8] ss:$100 sps:$4 sm:$0xff]  }
 0x25c   :  { %3293 = vmatmul.mubr.bf16.vlgmr.msra.gmra.mxu1 %v3123_v35  ;;  %3468 = vmatmul.mubr.bf16.vlgmr.msra.gmra.mxu0 %v3123_v35  ;;  %v8427_v35 = vld [vmem:[%s11899_s10 + $0x3f4] ss:$100 sps:$4 sm:$0xff]  }
 0x25d   :  { %3558 = vmatprep.mubr.bf16.mxu0 %v9049_v1  ;;  %3539 = vmatpush1.bf16.msra.mxu0 %v3521_v42  ;;  %v8410_v1 = vld [vmem:[%s11899_s10 + $0x578] ss:$100 sps:$4 sm:$0xff]   ;;  %v8437_v42 = vld [vmem:[%s11899_s10 + $0x260] ss:$100 sps:$4 sm:$0xff]  }
 0x25e   :  { %3540 = vmatprep.subr.bf16.mxu0 %v8409_v53  ;;  %6137 = vmatpush1.bf16.msra.mxu1 %v8410_v1  ;;  %v8439_v53 = vld [vmem:[%s11899_s10 + $0x264] ss:$100 sps:$4 sm:$0xff]   ;;  %v8443_v1 = vld [vmem:[%s11899_s10 + $0x198] ss:$100 sps:$4 sm:$0xff]  }
 0x25f   :  { %6138 = vmatprep.subr.bf16.mxu1 %v8418_v55  ;;  %v8457_v55 = vld [vmem:[%s11899_s10 + $0xc] ss:$100 sps:$4 sm:$0xff]  }
 0x261   :  { %3541 = vmatpush1.bf16.msra.mxu0 %v8407_v44  ;;  %v8445_v44 = vld [vmem:[%s11899_s10 + $0x19c] ss:$100 sps:$4 sm:$0xff]  }
 0x262   :  { %6177 = vmatprep.subr.bf16.mxu0 %v8415_v46  ;;  %6139 = vmatpush1.bf16.msra.mxu1 %v8416_v47  ;;  %v8449_v46 = vld [vmem:[%s11899_s10 + $0xd0] ss:$100 sps:$4 sm:$0xff]   ;;  %v8455_v47 = vld [vmem:[%s11899_s10 + $0x8] ss:$100 sps:$4 sm:$0xff]  }
 0x263   :  { %6140 = vmatprep.subr.bf16.mxu1 %v8424_v49  ;;  %v8463_v49 = vld [vmem:[%s11899_s10 + $0xbc4] ss:$100 sps:$4 sm:$0xff]  }
 0x266   :  { %6141 = vmatpush1.bf16.msra.mxu1 %v8422_v50  ;;  %v8461_v50 = vld [vmem:[%s11899_s10 + $0xbc0] ss:$100 sps:$4 sm:$0xff]  }
 0x267   :  { %6142 = vmatprep.subr.bf16.mxu1 %v8430_v51  ;;  %v8469_v51 = vld [vmem:[%s11899_s10 + $0xafc] ss:$100 sps:$4 sm:$0xff]  }
 0x26a   :  { %6143 = vmatpush1.bf16.msra.mxu1 %v8428_v17  ;;  %v8467_v17 = vld [vmem:[%s11899_s10 + $0xaf8] ss:$100 sps:$4 sm:$0xff]  }
 0x26b   :  { %6144 = vmatprep.subr.bf16.mxu1 %v8436_v54  ;;  %v8475_v54 = vld [vmem:[%s11899_s10 + $0xa34] ss:$100 sps:$4 sm:$0xff]  }
 0x26e   :  { %6145 = vmatpush1.bf16.msra.mxu1 %v8434_v34  ;;  %v8473_v34 = vld [vmem:[%s11899_s10 + $0xa30] ss:$100 sps:$4 sm:$0xff]  }
 0x26f   :  { %6146 = vmatprep.subr.bf16.mxu1 %v8442_v56  ;;  %v8481_v56 = vld [vmem:[%s11899_s10 + $0x96c] ss:$100 sps:$4 sm:$0xff]  }
 0x272   :  { %6147 = vmatpush1.bf16.msra.mxu1 %v8440_v22  ;;  %v8479_v22 = vld [vmem:[%s11899_s10 + $0x968] ss:$100 sps:$4 sm:$0xff]  }
 0x273   :  { %6148 = vmatprep.subr.bf16.mxu1 %v8448_v58  ;;  %v8487_v58 = vld [vmem:[%s11899_s10 + $0x8a4] ss:$100 sps:$4 sm:$0xff]  }
 0x276   :  { %6149 = vmatpush1.bf16.msra.mxu1 %v8446_v59  ;;  %v8485_v59 = vld [vmem:[%s11899_s10 + $0x8a0] ss:$100 sps:$4 sm:$0xff]  }
 0x277   :  { %6150 = vmatprep.subr.bf16.mxu1 %v8454_v60  ;;  %v8493_v60 = vld [vmem:[%s11899_s10 + $0x7dc] ss:$100 sps:$4 sm:$0xff]  }
 0x27a   :  { %6151 = vmatpush1.bf16.msra.mxu1 %v8452_v61  ;;  %v8491_v61 = vld [vmem:[%s11899_s10 + $0x7d8] ss:$100 sps:$4 sm:$0xff]  }
 0x27b   :  { %6152 = vmatprep.subr.bf16.mxu1 %v8460_v63  ;;  %v8496_v63 = vld [vmem:[%s11899_s10 + $0x70c] ss:$100 sps:$4 sm:$0xff]  }
 0x27e   :  { %6153 = vmatpush2.bf16.msra.mxu1 %v8458_v21  ;;  %v8499_v21 = vld [vmem:[%s11899_s10 + $0x714] ss:$100 sps:$4 sm:$0xff]  }
 0x27f   :  { %6154 = vmatprep.subr.bf16.mxu1 %v8466_v0  ;;  %v8494_v0 = vld [vmem:[%s11899_s10 + $0x708] ss:$100 sps:$4 sm:$0xff]  }
 0x282   :  { %6155 = vmatpush2.bf16.msra.mxu1 %v8464_v2  ;;  %v8497_v2 = vld [vmem:[%s11899_s10 + $0x710] ss:$100 sps:$4 sm:$0xff]  }
 0x283   :  { %6156 = vmatprep.subr.bf16.mxu1 %v8472_v3  ;;  %v8502_v3 = vld [vmem:[%s11899_s10 + $0x644] ss:$100 sps:$4 sm:$0xff]  }
 0x286   :  { %6157 = vmatpush2.bf16.msra.mxu1 %v8470_v25  ;;  %v8505_v25 = vld [vmem:[%s11899_s10 + $0x64c] ss:$100 sps:$4 sm:$0xff]  }
 0x287   :  { %6158 = vmatprep.subr.bf16.mxu1 %v8478_v4  ;;  %v8500_v4 = vld [vmem:[%s11899_s10 + $0x640] ss:$100 sps:$4 sm:$0xff]  }
 0x28a   :  { %6159 = vmatpush2.bf16.msra.mxu1 %v8476_v5  ;;  %v8503_v5 = vld [vmem:[%s11899_s10 + $0x648] ss:$100 sps:$4 sm:$0xff]  }
 0x28b   :  { %6160 = vmatprep.subr.bf16.mxu1 %v8484_v36  ;;  %v8508_v36 = vld [vmem:[%s11899_s10 + $0x58c] ss:$100 sps:$4 sm:$0xff]  }
 0x28e   :  { %6161 = vmatpush2.bf16.msra.mxu1 %v8482_v6  ;;  %v8511_v6 = vld [vmem:[%s11899_s10 + $0x594] ss:$100 sps:$4 sm:$0xff]  }
 0x28f   :  { %6162 = vmatprep.subr.bf16.mxu1 %v8490_v52  ;;  %v3488_v52 = vld [vmem:[%s11898_s9] sm:$0x3]  ;;  %s9050_s9 = smov [#allocation2]  }
 0x290   :  { %s6850_s22 = sshll.u32 %s9050_s9, 4  ;;  %s6851_s22 = int_to_ptr.vmem [resolvable:$true] %s6850_s22 }
 0x291   :  { %s9004_s23 = scalar_lea.vmem %s6851_s22, 32  ;;  %p9009_p1 = scmp.lt.s32.totalorder %s6851_s22, %s6851_s22 }
 0x292   :  { %6163 = vmatpush2.bf16.msra.mxu1 %v8488_v7  ;;  %v3493_v7 = vrot.slane %v3488_v52, %v9959_v57  ;;  %p9005_p0 = scmp.ne.s32.totalorder %s6851_s22, %s9004_s23  ;;  %p9010_p2 = scmp.lt.s32.totalorder %s9004_s23, %s9004_s23 }
 0x293   :  { %6164 = vmatprep.subr.bf16.mxu1 %v8496_v63  ;;  %v8563_v63 = vld [vmem:[%s11899_s10 + $0xb08] ss:$100 sps:$4 sm:$0xff]  }
 0x294   :  { %p9011_p3 = por %p9010_p2, %p9009_p1 }
 0x296   :  { %6165 = vmatpush2.bf16.msra.mxu1 %v8494_v0  ;;  %v8571_v0 = vld [vmem:[%s11899_s10 + $0xa44] ss:$100 sps:$4 sm:$0xff]   ;;  %p9012_p4 = pnand %p9011_p3, %p9005_p0 }
 0x297   :  { %6166 = vmatprep.subr.bf16.mxu1 %v8502_v3  ;;  %v8569_v3 = vld [vmem:[%s11899_s10 + $0xa40] ss:$100 sps:$4 sm:$0xff]  }
 0x29a   :  { %6167 = vmatpush2.bf16.msra.mxu1 %v8500_v4  ;;  %v8577_v4 = vld [vmem:[%s11899_s10 + $0x97c] ss:$100 sps:$4 sm:$0xff]  }
 0x29b   :  { %6218 = vmatprep.subr.bf16.mxu1 %v8508_v36  ;;  %v8575_v36 = vld [vmem:[%s11899_s10 + $0x978] ss:$100 sps:$4 sm:$0xff]  }
 0x31c   :  { %v7725_v8 = vpop.f32.mrf.mxu1  ;;  %v7747_v9 = vpop.f32.mrf.mxu0 }
 0x31e   :  { %v7726_v10 = vpop.f32.mrf.mxu1  ;;  %v7748_v11 = vpop.f32.mrf.mxu0 }
 0x31f   :  { %v7727_v12 = vadd.f32 %v7726_v10, %v7725_v8  ;;  %v7749_v13 = vadd.f32 %v7748_v11, %v7747_v9  ;;  %v3497_v8 = vrot.slane %v3488_v52, %v9973_v62  ;;  %v8583_v52 = vld [vmem:[%s11899_s10 + $0x8b4] ss:$100 sps:$4 sm:$0xff]  }
 0x320   :  { %v7728_v14 = vpop.f32.mrf.mxu1  ;;  %v7750_v15 = vpop.f32.mrf.mxu0 }
 0x321   :  { %v3295_v16 = vadd.f32 %v7727_v12, %v7268_v39  ;;  %v3470_v18 = vadd.f32 %v7749_v13, %v7285_v40 }
 0x322   :  { %v7729_v19 = vpop.f32.mrf.mxu1  ;;  %v7751_v20 = vpop.f32.mrf.mxu0 }
 0x323   :  { %v3479_v23 = vmul.f32 0.5, %v3470_v18  ;;  %3476 = vst.msk [vmem:[#allocation2] sm:$0x3] %vm3475_vm2, %v3295_v16  ;;  %3477 = vst.msk [vmem:[#allocation4] sm:$0x3] %vm3475_vm2, %v3470_v18 }
 0x324   :  { %v8509_v18 = vld [vmem:[%s11899_s10 + $0x590] ss:$100 sps:$4 sm:$0xff]   ;;  %v8514_v20 = vld [vmem:[%s11899_s10 + $0x4c4] ss:$100 sps:$4 sm:$0xff]  }
 0x325   :  { %v3480_v24 = vmul.f32 1.442695, %v3479_v23  ;;  %v8517_v23 = vld [vmem:[%s11899_s10 + $0x4cc] ss:$100 sps:$4 sm:$0xff]  }
 0x327   :  { %9002 = vpow2.f32 %v3480_v24  ;;  %v8512_v24 = vld [vmem:[%s11899_s10 + $0x4c0] ss:$100 sps:$4 sm:$0xff]  }
 0x334   :  { %v9003_v27 = vpop.eup %9002 }
 0x335   :  { %v3482_v28 = vmul.f32 %v9003_v27, %v3478_v26  ;;  %v8515_v26 = vld [vmem:[%s11899_s10 + $0x4c8] ss:$100 sps:$4 sm:$0xff]   ;;  %v8520_v27 = vld [vmem:[%s11899_s10 + $0x3fc] ss:$100 sps:$4 sm:$0xff]  }
 0x337   :  { %v3483_v29 = vadd.f32 %v3482_v28, %v3295_v16  ;;  %v8506_v16 = vld [vmem:[%s11899_s10 + $0x588] ss:$100 sps:$4 sm:$0xff]  }
 0x338   :  { %v8523_v28 = vld [vmem:[%s11899_s10 + $0x404] ss:$100 sps:$4 sm:$0xff]  }
 0x339   :  { %v3484_v31 = vpack.c.bf16 %v3483_v29, %v3483_v29  ;;  %v8518_v29 = vld [vmem:[%s11899_s10 + $0x3f8] ss:$100 sps:$4 sm:$0xff]  }
 0x33b   :  { %7307 = vmatmul.mubr.msk.bf16.vlgmr.msra.gmra.mxu0 %vm3515_vm3, %v3484_v31  ;;  %v8526_v31 = vld [vmem:[%s11899_s10 + $0x334] ss:$100 sps:$4 sm:$0xff]  }
 0x33c   :  { %6178 = vmatpush1.bf16.msra.mxu0 %v8413_v30  ;;  %v8521_v30 = vld [vmem:[%s11899_s10 + $0x400] ss:$100 sps:$4 sm:$0xff]  }
 0x33d   :  { %6179 = vmatprep.subr.bf16.mxu0 %v8421_v32  ;;  %v8529_v32 = vld [vmem:[%s11899_s10 + $0x33c] ss:$100 sps:$4 sm:$0xff]  }
 0x340   :  { %6180 = vmatpush1.bf16.msra.mxu0 %v8419_v33  ;;  %v8524_v33 = vld [vmem:[%s11899_s10 + $0x330] ss:$100 sps:$4 sm:$0xff]  }
 0x341   :  { %6181 = vmatprep.subr.bf16.mxu0 %v8427_v35  ;;  %v8527_v35 = vld [vmem:[%s11899_s10 + $0x338] ss:$100 sps:$4 sm:$0xff]  }
 0x344   :  { %6182 = vmatpush1.bf16.msra.mxu0 %v8425_v37  ;;  %v8532_v37 = vld [vmem:[%s11899_s10 + $0x26c] ss:$100 sps:$4 sm:$0xff]  }
 0x345   :  { %6183 = vmatprep.subr.bf16.mxu0 %v8433_v38  ;;  %v8535_v38 = vld [vmem:[%s11899_s10 + $0x274] ss:$100 sps:$4 sm:$0xff]  }
 0x348   :  { %6184 = vmatpush1.bf16.msra.mxu0 %v8431_v41  ;;  %v8530_v41 = vld [vmem:[%s11899_s10 + $0x268] ss:$100 sps:$4 sm:$0xff]  }
 0x349   :  { %6185 = vmatprep.subr.bf16.mxu0 %v8439_v53  ;;  %v8533_v53 = vld [vmem:[%s11899_s10 + $0x270] ss:$100 sps:$4 sm:$0xff]  }
 0x34c   :  { %6186 = vmatpush1.bf16.msra.mxu0 %v8437_v42  ;;  %v8538_v42 = vld [vmem:[%s11899_s10 + $0x1a4] ss:$100 sps:$4 sm:$0xff]  }
 0x34d   :  { %6187 = vmatprep.subr.bf16.mxu0 %v8445_v44  ;;  %v8541_v44 = vld [vmem:[%s11899_s10 + $0x1ac] ss:$100 sps:$4 sm:$0xff]  }
 0x350   :  { %6188 = vmatpush1.bf16.msra.mxu0 %v8443_v1  ;;  %v8536_v1 = vld [vmem:[%s11899_s10 + $0x1a0] ss:$100 sps:$4 sm:$0xff]  }
 0x351   :  { %6189 = vmatprep.subr.bf16.mxu0 %v8451_v45  ;;  %v8539_v45 = vld [vmem:[%s11899_s10 + $0x1a8] ss:$100 sps:$4 sm:$0xff]  }
 0x354   :  { %6190 = vmatpush1.bf16.msra.mxu0 %v8449_v46  ;;  %v8544_v46 = vld [vmem:[%s11899_s10 + $0xdc] ss:$100 sps:$4 sm:$0xff]  }
 0x355   :  { %6191 = vmatprep.subr.bf16.mxu0 %v8457_v55  ;;  %v8547_v55 = vld [vmem:[%s11899_s10 + $0xe4] ss:$100 sps:$4 sm:$0xff]  }
 0x358   :  { %6192 = vmatpush1.bf16.msra.mxu0 %v8455_v47  ;;  %v8542_v47 = vld [vmem:[%s11899_s10 + $0xd8] ss:$100 sps:$4 sm:$0xff]  }
 0x359   :  { %6193 = vmatprep.subr.bf16.mxu0 %v8463_v49  ;;  %v8545_v49 = vld [vmem:[%s11899_s10 + $0xe0] ss:$100 sps:$4 sm:$0xff]  }
 0x35c   :  { %6194 = vmatpush2.bf16.msra.mxu0 %v8461_v50  ;;  %v8550_v50 = vld [vmem:[%s11899_s10 + $0x14] ss:$100 sps:$4 sm:$0xff]  }
 0x35d   :  { %6195 = vmatprep.subr.bf16.mxu0 %v8469_v51  ;;  %v8553_v51 = vld [vmem:[%s11899_s10 + $0x1c] ss:$100 sps:$4 sm:$0xff]  }
 0x360   :  { %6196 = vmatpush2.bf16.msra.mxu0 %v8467_v17  ;;  %v8548_v17 = vld [vmem:[%s11899_s10 + $0x10] ss:$100 sps:$4 sm:$0xff]  }
 0x361   :  { %6197 = vmatprep.subr.bf16.mxu0 %v8475_v54  ;;  %v8551_v54 = vld [vmem:[%s11899_s10 + $0x18] ss:$100 sps:$4 sm:$0xff]  }
 0x364   :  { %6198 = vmatpush2.bf16.msra.mxu0 %v8473_v34  ;;  %v8556_v34 = vld [vmem:[%s11899_s10 + $0xbcc] ss:$100 sps:$4 sm:$0xff]  }
 0x365   :  { %6199 = vmatprep.subr.bf16.mxu0 %v8481_v56  ;;  %v8559_v56 = vld [vmem:[%s11899_s10 + $0xbd4] ss:$100 sps:$4 sm:$0xff]  }
 0x368   :  { %6200 = vmatpush2.bf16.msra.mxu0 %v8479_v22  ;;  %v8554_v22 = vld [vmem:[%s11899_s10 + $0xbc8] ss:$100 sps:$4 sm:$0xff]  }
 0x369   :  { %6201 = vmatprep.subr.bf16.mxu0 %v8487_v58  ;;  %v8557_v58 = vld [vmem:[%s11899_s10 + $0xbd0] ss:$100 sps:$4 sm:$0xff]  }
 0x36c   :  { %6202 = vmatpush2.bf16.msra.mxu0 %v8485_v59  ;;  %v8562_v59 = vld [vmem:[%s11899_s10 + $0xb04] ss:$100 sps:$4 sm:$0xff]  }
 0x36d   :  { %6203 = vmatprep.subr.bf16.mxu0 %v8493_v60  ;;  %v8565_v60 = vld [vmem:[%s11899_s10 + $0xb0c] ss:$100 sps:$4 sm:$0xff]  }
 0x370   :  { %6204 = vmatpush2.bf16.msra.mxu0 %v8491_v61  ;;  %v8560_v61 = vld [vmem:[%s11899_s10 + $0xb00] ss:$100 sps:$4 sm:$0xff]  }
 0x371   :  { %6205 = vmatprep.subr.bf16.mxu0 %v8499_v21  ;;  %v8568_v21 = vld [vmem:[%s11899_s10 + $0xa3c] ss:$100 sps:$4 sm:$0xff]  }
 0x374   :  { %6206 = vmatpush2.bf16.msra.mxu0 %v8497_v2  ;;  %v8566_v2 = vld [vmem:[%s11899_s10 + $0xa38] ss:$100 sps:$4 sm:$0xff]  }
 0x375   :  { %6207 = vmatprep.subr.bf16.mxu0 %v8505_v25  ;;  %v8574_v25 = vld [vmem:[%s11899_s10 + $0x974] ss:$100 sps:$4 sm:$0xff]  }
 0x378   :  { %6208 = vmatpush2.bf16.msra.mxu0 %v8503_v5  ;;  %v8572_v5 = vld [vmem:[%s11899_s10 + $0x970] ss:$100 sps:$4 sm:$0xff]  }
 0x379   :  { %6259 = vmatprep.subr.bf16.mxu0 %v8511_v6  ;;  %v8580_v6 = vld [vmem:[%s11899_s10 + $0x8ac] ss:$100 sps:$4 sm:$0xff]  }
 0x3fb   :  { %v3560_v9 = vpop.f32.mrf.mxu0 }
 0x3fc   :  { %v3561_v39 = vadd.f32 %v3560_v9, %v3493_v7  ;;  %v8578_v7 = vld [vmem:[%s11899_s10 + $0x8a8] ss:$100 sps:$4 sm:$0xff]  }
 0x3fd   :  { %v3562_v10 = vpop.f32.mrf.mxu0  ;;  %v8586_v9 = vld [vmem:[%s11899_s10 + $0x7e4] ss:$100 sps:$4 sm:$0xff]  }
 0x3fe   :  { %v3563_v40 = vadd.f32 %v3562_v10, %v3497_v8  ;;  %v3567_v11 = vmax.f32 %v3561_v39, 0.0  ;;  %v8581_v8 = vld [vmem:[%s11899_s10 + $0x8b0] ss:$100 sps:$4 sm:$0xff]   ;;  %v8584_v10 = vld [vmem:[%s11899_s10 + $0x7e0] ss:$100 sps:$4 sm:$0xff]  }
 0x3ff   :  { %v3564_v12 = vpop.f32.mrf.mxu0  ;;  %v8589_v39 = vld [vmem:[%s11899_s10 + $0x7ec] ss:$100 sps:$4 sm:$0xff]  }
 0x400   :  { %v3568_v13 = vmax.f32 %v3563_v40, 0.0  ;;  %v10751_v19 = vpack.c.bf16 %v3567_v11, %v3567_v11  ;;  %v8587_v40 = vld [vmem:[%s11899_s10 + $0x7e8] ss:$100 sps:$4 sm:$0xff]   ;;  %v8592_v11 = vld [vmem:[%s11899_s10 + $0x71c] ss:$100 sps:$4 sm:$0xff]  }
 0x401   :  { %v3565_v14 = vpop.f32.mrf.mxu0  ;;  %v8595_v12 = vld [vmem:[%s11899_s10 + $0x724] ss:$100 sps:$4 sm:$0xff]  }
 0x402   :  { %v10743_v15 = vpack.c.bf16 %v3568_v13, %v3568_v13  ;;  %v8590_v13 = vld [vmem:[%s11899_s10 + $0x718] ss:$100 sps:$4 sm:$0xff]   ;;  %v8593_v14 = vld [vmem:[%s11899_s10 + $0x720] ss:$100 sps:$4 sm:$0xff]  }
 0x404   :  { %6168 = vmatprep.mubr.bf16.mxu1 %v10743_v15  ;;  %6209 = vmatprep.mubr.bf16.mxu0 %v10743_v15 }
 0x405   :  { %6169 = vmatmul.mubr.bf16.vlgmr.msra.gmra.mxu1 %v10751_v19  ;;  %6210 = vmatmul.mubr.bf16.vlgmr.msra.gmra.mxu0 %v10751_v19 }
 0x406   :  { %6219 = vmatpush1.bf16.msra.mxu1 %v8506_v16  ;;  %6260 = vmatpush1.bf16.msra.mxu0 %v8509_v18  ;;  %v8598_v16 = vld [vmem:[%s11899_s10 + $0x654] ss:$100 sps:$4 sm:$0xff]   ;;  %v8601_v18 = vld [vmem:[%s11899_s10 + $0x65c] ss:$100 sps:$4 sm:$0xff]  }
 0x407   :  { %6250 = vmatprep.mubr.bf16.mxu1 %v10743_v15  ;;  %6291 = vmatprep.mubr.bf16.mxu0 %v10743_v15 }
 0x408   :  { %6220 = vmatprep.subr.bf16.mxu1 %v8514_v20  ;;  %6261 = vmatprep.subr.bf16.mxu0 %v8517_v23  ;;  %v8596_v20 = vld [vmem:[%s11899_s10 + $0x650] ss:$100 sps:$4 sm:$0xff]   ;;  %v8599_v23 = vld [vmem:[%s11899_s10 + $0x658] ss:$100 sps:$4 sm:$0xff]  }
 0x40a   :  { %6221 = vmatpush1.bf16.msra.mxu1 %v8512_v24  ;;  %6262 = vmatpush1.bf16.msra.mxu0 %v8515_v26  ;;  %v8604_v24 = vld [vmem:[%s11899_s10 + $0x59c] ss:$100 sps:$4 sm:$0xff]   ;;  %v8607_v26 = vld [vmem:[%s11899_s10 + $0x5a4] ss:$100 sps:$4 sm:$0xff]  }
 0x40b   :  { %6222 = vmatprep.subr.bf16.mxu1 %v8520_v27  ;;  %6263 = vmatprep.subr.bf16.mxu0 %v8523_v28  ;;  %v8602_v27 = vld [vmem:[%s11899_s10 + $0x598] ss:$100 sps:$4 sm:$0xff]   ;;  %v8605_v28 = vld [vmem:[%s11899_s10 + $0x5a0] ss:$100 sps:$4 sm:$0xff]  }
 0x40e   :  { %6223 = vmatpush1.bf16.msra.mxu1 %v8518_v29  ;;  %6264 = vmatpush1.bf16.msra.mxu0 %v8521_v30  ;;  %v8610_v29 = vld [vmem:[%s11899_s10 + $0x4d4] ss:$100 sps:$4 sm:$0xff]   ;;  %v8613_v30 = vld [vmem:[%s11899_s10 + $0x4dc] ss:$100 sps:$4 sm:$0xff]  }
 0x40f   :  { %6224 = vmatprep.subr.bf16.mxu1 %v8526_v31  ;;  %6265 = vmatprep.subr.bf16.mxu0 %v8529_v32  ;;  %v8608_v31 = vld [vmem:[%s11899_s10 + $0x4d0] ss:$100 sps:$4 sm:$0xff]   ;;  %v8611_v32 = vld [vmem:[%s11899_s10 + $0x4d8] ss:$100 sps:$4 sm:$0xff]  }
 0x412   :  { %6225 = vmatpush1.bf16.msra.mxu1 %v8524_v33  ;;  %6266 = vmatpush1.bf16.msra.mxu0 %v8527_v35  ;;  %v8616_v33 = vld [vmem:[%s11899_s10 + $0x40c] ss:$100 sps:$4 sm:$0xff]   ;;  %v8619_v35 = vld [vmem:[%s11899_s10 + $0x414] ss:$100 sps:$4 sm:$0xff]  }
 0x413   :  { %6226 = vmatprep.subr.bf16.mxu1 %v8532_v37  ;;  %6267 = vmatprep.subr.bf16.mxu0 %v8535_v38  ;;  %v8614_v37 = vld [vmem:[%s11899_s10 + $0x408] ss:$100 sps:$4 sm:$0xff]   ;;  %v8617_v38 = vld [vmem:[%s11899_s10 + $0x410] ss:$100 sps:$4 sm:$0xff]  }
 0x416   :  { %6227 = vmatpush1.bf16.msra.mxu1 %v8530_v41  ;;  %6268 = vmatpush1.bf16.msra.mxu0 %v8533_v53  ;;  %v8622_v41 = vld [vmem:[%s11899_s10 + $0x344] ss:$100 sps:$4 sm:$0xff]   ;;  %v8625_v53 = vld [vmem:[%s11899_s10 + $0x34c] ss:$100 sps:$4 sm:$0xff]  }
 0x417   :  { %6228 = vmatprep.subr.bf16.mxu1 %v8538_v42  ;;  %6269 = vmatprep.subr.bf16.mxu0 %v8541_v44  ;;  %v8620_v42 = vld [vmem:[%s11899_s10 + $0x340] ss:$100 sps:$4 sm:$0xff]   ;;  %v8623_v44 = vld [vmem:[%s11899_s10 + $0x348] ss:$100 sps:$4 sm:$0xff]  }
 0x41a   :  { %6229 = vmatpush1.bf16.msra.mxu1 %v8536_v1  ;;  %6270 = vmatpush1.bf16.msra.mxu0 %v8539_v45  ;;  %v8628_v1 = vld [vmem:[%s11899_s10 + $0x27c] ss:$100 sps:$4 sm:$0xff]   ;;  %v8631_v45 = vld [vmem:[%s11899_s10 + $0x284] ss:$100 sps:$4 sm:$0xff]  }
 0x41b   :  { %6230 = vmatprep.subr.bf16.mxu1 %v8544_v46  ;;  %6271 = vmatprep.subr.bf16.mxu0 %v8547_v55  ;;  %v8626_v46 = vld [vmem:[%s11899_s10 + $0x278] ss:$100 sps:$4 sm:$0xff]   ;;  %v8629_v55 = vld [vmem:[%s11899_s10 + $0x280] ss:$100 sps:$4 sm:$0xff]  }
 0x41e   :  { %6231 = vmatpush1.bf16.msra.mxu1 %v8542_v47  ;;  %6272 = vmatpush1.bf16.msra.mxu0 %v8545_v49  ;;  %v8634_v47 = vld [vmem:[%s11899_s10 + $0x1b4] ss:$100 sps:$4 sm:$0xff]   ;;  %v8637_v49 = vld [vmem:[%s11899_s10 + $0x1bc] ss:$100 sps:$4 sm:$0xff]  }
 0x41f   :  { %6232 = vmatprep.subr.bf16.mxu1 %v8550_v50  ;;  %6273 = vmatprep.subr.bf16.mxu0 %v8553_v51  ;;  %v8632_v50 = vld [vmem:[%s11899_s10 + $0x1b0] ss:$100 sps:$4 sm:$0xff]   ;;  %v8635_v51 = vld [vmem:[%s11899_s10 + $0x1b8] ss:$100 sps:$4 sm:$0xff]  }
 0x422   :  { %6233 = vmatpush1.bf16.msra.mxu1 %v8548_v17  ;;  %6274 = vmatpush1.bf16.msra.mxu0 %v8551_v54  ;;  %v8640_v17 = vld [vmem:[%s11899_s10 + $0xec] ss:$100 sps:$4 sm:$0xff]   ;;  %v8643_v54 = vld [vmem:[%s11899_s10 + $0xf4] ss:$100 sps:$4 sm:$0xff]  }
 0x423   :  { %6234 = vmatprep.subr.bf16.mxu1 %v8556_v34  ;;  %6275 = vmatprep.subr.bf16.mxu0 %v8559_v56  ;;  %v8638_v34 = vld [vmem:[%s11899_s10 + $0xe8] ss:$100 sps:$4 sm:$0xff]   ;;  %v8641_v56 = vld [vmem:[%s11899_s10 + $0xf0] ss:$100 sps:$4 sm:$0xff]  }
 0x426   :  { %6235 = vmatpush2.bf16.msra.mxu1 %v8554_v22  ;;  %6276 = vmatpush2.bf16.msra.mxu0 %v8557_v58  ;;  %v8646_v22 = vld [vmem:[%s11899_s10 + $0x24] ss:$100 sps:$4 sm:$0xff]   ;;  %v8649_v58 = vld [vmem:[%s11899_s10 + $0x2c] ss:$100 sps:$4 sm:$0xff]  }
 0x427   :  { %6236 = vmatprep.subr.bf16.mxu1 %v8562_v59  ;;  %6277 = vmatprep.subr.bf16.mxu0 %v8565_v60  ;;  %v8644_v59 = vld [vmem:[%s11899_s10 + $0x20] ss:$100 sps:$4 sm:$0xff]   ;;  %v8647_v60 = vld [vmem:[%s11899_s10 + $0x28] ss:$100 sps:$4 sm:$0xff]  }
 0x42a   :  { %6237 = vmatpush2.bf16.msra.mxu1 %v8560_v61  ;;  %6278 = vmatpush2.bf16.msra.mxu0 %v8563_v63  ;;  %v8652_v61 = vld [vmem:[%s11899_s10 + $0xbdc] ss:$100 sps:$4 sm:$0xff]   ;;  %v8655_v63 = vld [vmem:[%s11899_s10 + $0xbe4] ss:$100 sps:$4 sm:$0xff]  }
 0x42b   :  { %6238 = vmatprep.subr.bf16.mxu1 %v8568_v21  ;;  %6279 = vmatprep.subr.bf16.mxu0 %v8571_v0  ;;  %v8650_v21 = vld [vmem:[%s11899_s10 + $0xbd8] ss:$100 sps:$4 sm:$0xff]   ;;  %v8653_v0 = vld [vmem:[%s11899_s10 + $0xbe0] ss:$100 sps:$4 sm:$0xff]  }
 0x42e   :  { %6239 = vmatpush2.bf16.msra.mxu1 %v8566_v2  ;;  %6280 = vmatpush2.bf16.msra.mxu0 %v8569_v3  ;;  %v8658_v2 = vld [vmem:[%s11899_s10 + $0xb14] ss:$100 sps:$4 sm:$0xff]   ;;  %v8661_v3 = vld [vmem:[%s11899_s10 + $0xb1c] ss:$100 sps:$4 sm:$0xff]  }
 0x42f   :  { %6240 = vmatprep.subr.bf16.mxu1 %v8574_v25  ;;  %6281 = vmatprep.subr.bf16.mxu0 %v8577_v4  ;;  %v8656_v25 = vld [vmem:[%s11899_s10 + $0xb10] ss:$100 sps:$4 sm:$0xff]   ;;  %v8659_v4 = vld [vmem:[%s11899_s10 + $0xb18] ss:$100 sps:$4 sm:$0xff]  }
 0x432   :  { %6241 = vmatpush2.bf16.msra.mxu1 %v8572_v5  ;;  %6282 = vmatpush2.bf16.msra.mxu0 %v8575_v36  ;;  %v8664_v5 = vld [vmem:[%s11899_s10 + $0xa4c] ss:$100 sps:$4 sm:$0xff]   ;;  %v8667_v36 = vld [vmem:[%s11899_s10 + $0xa54] ss:$100 sps:$4 sm:$0xff]  }
 0x433   :  { %6242 = vmatprep.subr.bf16.mxu1 %v8580_v6  ;;  %6283 = vmatprep.subr.bf16.mxu0 %v8583_v52  ;;  %v8662_v6 = vld [vmem:[%s11899_s10 + $0xa48] ss:$100 sps:$4 sm:$0xff]   ;;  %v8665_v52 = vld [vmem:[%s11899_s10 + $0xa50] ss:$100 sps:$4 sm:$0xff]  }
 0x436   :  { %6243 = vmatpush2.bf16.msra.mxu1 %v8578_v7  ;;  %6284 = vmatpush2.bf16.msra.mxu0 %v8581_v8  ;;  %v8670_v7 = vld [vmem:[%s11899_s10 + $0x984] ss:$100 sps:$4 sm:$0xff]   ;;  %v8673_v8 = vld [vmem:[%s11899_s10 + $0x98c] ss:$100 sps:$4 sm:$0xff]  }
 0x437   :  { %6244 = vmatprep.subr.bf16.mxu1 %v8586_v9  ;;  %6285 = vmatprep.subr.bf16.mxu0 %v8589_v39  ;;  %v8668_v9 = vld [vmem:[%s11899_s10 + $0x980] ss:$100 sps:$4 sm:$0xff]   ;;  %v8671_v39 = vld [vmem:[%s11899_s10 + $0x988] ss:$100 sps:$4 sm:$0xff]  }
 0x43a   :  { %6245 = vmatpush2.bf16.msra.mxu1 %v8584_v10  ;;  %6286 = vmatpush2.bf16.msra.mxu0 %v8587_v40  ;;  %v8676_v10 = vld [vmem:[%s11899_s10 + $0x8bc] ss:$100 sps:$4 sm:$0xff]   ;;  %v8679_v40 = vld [vmem:[%s11899_s10 + $0x8c4] ss:$100 sps:$4 sm:$0xff]  }
 0x43b   :  { %6246 = vmatprep.subr.bf16.mxu1 %v8592_v11  ;;  %6287 = vmatprep.subr.bf16.mxu0 %v8595_v12  ;;  %v8674_v11 = vld [vmem:[%s11899_s10 + $0x8b8] ss:$100 sps:$4 sm:$0xff]   ;;  %v8677_v12 = vld [vmem:[%s11899_s10 + $0x8c0] ss:$100 sps:$4 sm:$0xff]  }
 0x43e   :  { %6247 = vmatpush2.bf16.msra.mxu1 %v8590_v13  ;;  %6288 = vmatpush2.bf16.msra.mxu0 %v8593_v14  ;;  %v8682_v13 = vld [vmem:[%s11899_s10 + $0x7f4] ss:$100 sps:$4 sm:$0xff]   ;;  %v8685_v14 = vld [vmem:[%s11899_s10 + $0x7fc] ss:$100 sps:$4 sm:$0xff]  }
 0x43f   :  { %6248 = vmatprep.subr.bf16.mxu1 %v8598_v16  ;;  %6289 = vmatprep.subr.bf16.mxu0 %v8601_v18  ;;  %v8680_v16 = vld [vmem:[%s11899_s10 + $0x7f0] ss:$100 sps:$4 sm:$0xff]   ;;  %v8683_v18 = vld [vmem:[%s11899_s10 + $0x7f8] ss:$100 sps:$4 sm:$0xff]  }
 0x442   :  { %6249 = vmatpush2.bf16.msra.mxu1 %v8596_v20  ;;  %6290 = vmatpush2.bf16.msra.mxu0 %v8599_v23  ;;  %v8688_v20 = vld [vmem:[%s11899_s10 + $0x72c] ss:$100 sps:$4 sm:$0xff]   ;;  %v8691_v23 = vld [vmem:[%s11899_s10 + $0x734] ss:$100 sps:$4 sm:$0xff]  }
 0x443   :  { %6300 = vmatprep.subr.bf16.mxu1 %v8604_v24  ;;  %6341 = vmatprep.subr.bf16.mxu0 %v8607_v26  ;;  %v8686_v24 = vld [vmem:[%s11899_s10 + $0x728] ss:$100 sps:$4 sm:$0xff]   ;;  %v8689_v26 = vld [vmem:[%s11899_s10 + $0x730] ss:$100 sps:$4 sm:$0xff]  }
 0x445   :  { %6251 = vmatmul.mubr.bf16.vlgmr.msra.gmra.mxu1 %v10751_v19  ;;  %6292 = vmatmul.mubr.bf16.vlgmr.msra.gmra.mxu0 %v10751_v19 }
 0x446   :  { %6301 = vmatpush1.bf16.msra.mxu1 %v8602_v27  ;;  %6332 = vmatprep.mubr.bf16.mxu1 %v10743_v15  ;;  %v8694_v27 = vld [vmem:[%s11899_s10 + $0x664] ss:$100 sps:$4 sm:$0xff]  }
 0x447   :  { %6342 = vmatpush1.bf16.msra.mxu0 %v8605_v28  ;;  %6373 = vmatprep.mubr.bf16.mxu0 %v10743_v15  ;;  %v8697_v28 = vld [vmem:[%s11899_s10 + $0x66c] ss:$100 sps:$4 sm:$0xff]  }
 0x448   :  { %6302 = vmatprep.subr.bf16.mxu1 %v8610_v29  ;;  %6343 = vmatprep.subr.bf16.mxu0 %v8613_v30  ;;  %v8692_v29 = vld [vmem:[%s11899_s10 + $0x660] ss:$100 sps:$4 sm:$0xff]   ;;  %v8695_v30 = vld [vmem:[%s11899_s10 + $0x668] ss:$100 sps:$4 sm:$0xff]  }
 0x44a   :  { %6303 = vmatpush1.bf16.msra.mxu1 %v8608_v31  ;;  %v8700_v31 = vld [vmem:[%s11899_s10 + $0x5ac] ss:$100 sps:$4 sm:$0xff]  }
 0x44b   :  { %6344 = vmatpush1.bf16.msra.mxu0 %v8611_v32  ;;  %6304 = vmatprep.subr.bf16.mxu1 %v8616_v33  ;;  %v8703_v32 = vld [vmem:[%s11899_s10 + $0x5b4] ss:$100 sps:$4 sm:$0xff]   ;;  %v8698_v33 = vld [vmem:[%s11899_s10 + $0x5a8] ss:$100 sps:$4 sm:$0xff]  }
 0x44c   :  { %6345 = vmatprep.subr.bf16.mxu0 %v8619_v35  ;;  %v8701_v35 = vld [vmem:[%s11899_s10 + $0x5b0] ss:$100 sps:$4 sm:$0xff]  }
 0x44e   :  { %6305 = vmatpush1.bf16.msra.mxu1 %v8614_v37  ;;  %v8706_v37 = vld [vmem:[%s11899_s10 + $0x4e4] ss:$100 sps:$4 sm:$0xff]  }
 0x44f   :  { %6346 = vmatpush1.bf16.msra.mxu0 %v8617_v38  ;;  %6306 = vmatprep.subr.bf16.mxu1 %v8622_v41  ;;  %v8709_v38 = vld [vmem:[%s11899_s10 + $0x4ec] ss:$100 sps:$4 sm:$0xff]   ;;  %v8704_v41 = vld [vmem:[%s11899_s10 + $0x4e0] ss:$100 sps:$4 sm:$0xff]  }
 0x450   :  { %6347 = vmatprep.subr.bf16.mxu0 %v8625_v53  ;;  %v8707_v53 = vld [vmem:[%s11899_s10 + $0x4e8] ss:$100 sps:$4 sm:$0xff]  }
 0x452   :  { %6307 = vmatpush1.bf16.msra.mxu1 %v8620_v42  ;;  %v8712_v42 = vld [vmem:[%s11899_s10 + $0x41c] ss:$100 sps:$4 sm:$0xff]  }
 0x453   :  { %6348 = vmatpush1.bf16.msra.mxu0 %v8623_v44  ;;  %6308 = vmatprep.subr.bf16.mxu1 %v8628_v1  ;;  %v8715_v44 = vld [vmem:[%s11899_s10 + $0x424] ss:$100 sps:$4 sm:$0xff]   ;;  %v8710_v1 = vld [vmem:[%s11899_s10 + $0x418] ss:$100 sps:$4 sm:$0xff]  }
 0x454   :  { %6349 = vmatprep.subr.bf16.mxu0 %v8631_v45  ;;  %v8713_v45 = vld [vmem:[%s11899_s10 + $0x420] ss:$100 sps:$4 sm:$0xff]  }
 0x456   :  { %6309 = vmatpush1.bf16.msra.mxu1 %v8626_v46  ;;  %v8718_v46 = vld [vmem:[%s11899_s10 + $0x354] ss:$100 sps:$4 sm:$0xff]  }
 0x457   :  { %6350 = vmatpush1.bf16.msra.mxu0 %v8629_v55  ;;  %6310 = vmatprep.subr.bf16.mxu1 %v8634_v47  ;;  %v8721_v55 = vld [vmem:[%s11899_s10 + $0x35c] ss:$100 sps:$4 sm:$0xff]   ;;  %v8716_v47 = vld [vmem:[%s11899_s10 + $0x350] ss:$100 sps:$4 sm:$0xff]  }
 0x458   :  { %6351 = vmatprep.subr.bf16.mxu0 %v8637_v49  ;;  %v8719_v49 = vld [vmem:[%s11899_s10 + $0x358] ss:$100 sps:$4 sm:$0xff]  }
 0x45a   :  { %6311 = vmatpush1.bf16.msra.mxu1 %v8632_v50  ;;  %v8724_v50 = vld [vmem:[%s11899_s10 + $0x28c] ss:$100 sps:$4 sm:$0xff]  }
 0x45b   :  { %6352 = vmatpush1.bf16.msra.mxu0 %v8635_v51  ;;  %6312 = vmatprep.subr.bf16.mxu1 %v8640_v17  ;;  %v8727_v51 = vld [vmem:[%s11899_s10 + $0x294] ss:$100 sps:$4 sm:$0xff]   ;;  %v8722_v17 = vld [vmem:[%s11899_s10 + $0x288] ss:$100 sps:$4 sm:$0xff]  }
 0x45c   :  { %6353 = vmatprep.subr.bf16.mxu0 %v8643_v54  ;;  %v8725_v54 = vld [vmem:[%s11899_s10 + $0x290] ss:$100 sps:$4 sm:$0xff]  }
 0x45e   :  { %6313 = vmatpush1.bf16.msra.mxu1 %v8638_v34  ;;  %v8730_v34 = vld [vmem:[%s11899_s10 + $0x1c4] ss:$100 sps:$4 sm:$0xff]  }
 0x45f   :  { %6354 = vmatpush1.bf16.msra.mxu0 %v8641_v56  ;;  %6314 = vmatprep.subr.bf16.mxu1 %v8646_v22  ;;  %v8733_v56 = vld [vmem:[%s11899_s10 + $0x1cc] ss:$100 sps:$4 sm:$0xff]   ;;  %v8728_v22 = vld [vmem:[%s11899_s10 + $0x1c0] ss:$100 sps:$4 sm:$0xff]  }
 0x460   :  { %6355 = vmatprep.subr.bf16.mxu0 %v8649_v58  ;;  %v8731_v58 = vld [vmem:[%s11899_s10 + $0x1c8] ss:$100 sps:$4 sm:$0xff]  }
 0x462   :  { %6315 = vmatpush1.bf16.msra.mxu1 %v8644_v59  ;;  %v8736_v59 = vld [vmem:[%s11899_s10 + $0xfc] ss:$100 sps:$4 sm:$0xff]  }
 0x463   :  { %6356 = vmatpush1.bf16.msra.mxu0 %v8647_v60  ;;  %6316 = vmatprep.subr.bf16.mxu1 %v8652_v61  ;;  %v8739_v60 = vld [vmem:[%s11899_s10 + $0x104] ss:$100 sps:$4 sm:$0xff]   ;;  %v8734_v61 = vld [vmem:[%s11899_s10 + $0xf8] ss:$100 sps:$4 sm:$0xff]  }
 0x464   :  { %6357 = vmatprep.subr.bf16.mxu0 %v8655_v63  ;;  %v8737_v63 = vld [vmem:[%s11899_s10 + $0x100] ss:$100 sps:$4 sm:$0xff]  }
 0x466   :  { %6317 = vmatpush2.bf16.msra.mxu1 %v8650_v21  ;;  %v8742_v21 = vld [vmem:[%s11899_s10 + $0x34] ss:$100 sps:$4 sm:$0xff]  }
 0x467   :  { %6358 = vmatpush2.bf16.msra.mxu0 %v8653_v0  ;;  %6318 = vmatprep.subr.bf16.mxu1 %v8658_v2  ;;  %v8745_v0 = vld [vmem:[%s11899_s10 + $0x3c] ss:$100 sps:$4 sm:$0xff]   ;;  %v8740_v2 = vld [vmem:[%s11899_s10 + $0x30] ss:$100 sps:$4 sm:$0xff]  }
 0x468   :  { %6359 = vmatprep.subr.bf16.mxu0 %v8661_v3  ;;  %v8743_v3 = vld [vmem:[%s11899_s10 + $0x38] ss:$100 sps:$4 sm:$0xff]  }
 0x46a   :  { %6319 = vmatpush2.bf16.msra.mxu1 %v8656_v25  ;;  %v8748_v25 = vld [vmem:[%s11899_s10 + $0xbec] ss:$100 sps:$4 sm:$0xff]  }
 0x46b   :  { %6360 = vmatpush2.bf16.msra.mxu0 %v8659_v4  ;;  %6320 = vmatprep.subr.bf16.mxu1 %v8664_v5  ;;  %v8751_v4 = vld [vmem:[%s11899_s10 + $0xbf4] ss:$100 sps:$4 sm:$0xff]   ;;  %v8746_v5 = vld [vmem:[%s11899_s10 + $0xbe8] ss:$100 sps:$4 sm:$0xff]  }
 0x46c   :  { %6361 = vmatprep.subr.bf16.mxu0 %v8667_v36  ;;  %v8749_v36 = vld [vmem:[%s11899_s10 + $0xbf0] ss:$100 sps:$4 sm:$0xff]  }
 0x46e   :  { %6321 = vmatpush2.bf16.msra.mxu1 %v8662_v6  ;;  %v8754_v6 = vld [vmem:[%s11899_s10 + $0xb24] ss:$100 sps:$4 sm:$0xff]  }
 0x46f   :  { %6362 = vmatpush2.bf16.msra.mxu0 %v8665_v52  ;;  %6322 = vmatprep.subr.bf16.mxu1 %v8670_v7  ;;  %v8757_v52 = vld [vmem:[%s11899_s10 + $0xb2c] ss:$100 sps:$4 sm:$0xff]   ;;  %v8752_v7 = vld [vmem:[%s11899_s10 + $0xb20] ss:$100 sps:$4 sm:$0xff]  }
 0x470   :  { %6363 = vmatprep.subr.bf16.mxu0 %v8673_v8  ;;  %v8755_v8 = vld [vmem:[%s11899_s10 + $0xb28] ss:$100 sps:$4 sm:$0xff]  }
 0x472   :  { %6323 = vmatpush2.bf16.msra.mxu1 %v8668_v9  ;;  %v8760_v9 = vld [vmem:[%s11899_s10 + $0xa5c] ss:$100 sps:$4 sm:$0xff]  }
 0x473   :  { %6364 = vmatpush2.bf16.msra.mxu0 %v8671_v39  ;;  %6324 = vmatprep.subr.bf16.mxu1 %v8676_v10  ;;  %v8763_v39 = vld [vmem:[%s11899_s10 + $0xa64] ss:$100 sps:$4 sm:$0xff]   ;;  %v8758_v10 = vld [vmem:[%s11899_s10 + $0xa58] ss:$100 sps:$4 sm:$0xff]  }
 0x474   :  { %6365 = vmatprep.subr.bf16.mxu0 %v8679_v40  ;;  %v8761_v40 = vld [vmem:[%s11899_s10 + $0xa60] ss:$100 sps:$4 sm:$0xff]  }
 0x476   :  { %6325 = vmatpush2.bf16.msra.mxu1 %v8674_v11  ;;  %v8766_v11 = vld [vmem:[%s11899_s10 + $0x994] ss:$100 sps:$4 sm:$0xff]  }
 0x477   :  { %6366 = vmatpush2.bf16.msra.mxu0 %v8677_v12  ;;  %6326 = vmatprep.subr.bf16.mxu1 %v8682_v13  ;;  %v8769_v12 = vld [vmem:[%s11899_s10 + $0x99c] ss:$100 sps:$4 sm:$0xff]   ;;  %v8764_v13 = vld [vmem:[%s11899_s10 + $0x990] ss:$100 sps:$4 sm:$0xff]  }
 0x478   :  { %6367 = vmatprep.subr.bf16.mxu0 %v8685_v14  ;;  %v8767_v14 = vld [vmem:[%s11899_s10 + $0x998] ss:$100 sps:$4 sm:$0xff]  }
 0x47a   :  { %6327 = vmatpush2.bf16.msra.mxu1 %v8680_v16  ;;  %v8772_v16 = vld [vmem:[%s11899_s10 + $0x8cc] ss:$100 sps:$4 sm:$0xff]  }
 0x47b   :  { %6368 = vmatpush2.bf16.msra.mxu0 %v8683_v18  ;;  %6328 = vmatprep.subr.bf16.mxu1 %v8688_v20  ;;  %v8775_v18 = vld [vmem:[%s11899_s10 + $0x8d4] ss:$100 sps:$4 sm:$0xff]   ;;  %v8770_v20 = vld [vmem:[%s11899_s10 + $0x8c8] ss:$100 sps:$4 sm:$0xff]  }
 0x47c   :  { %6369 = vmatprep.subr.bf16.mxu0 %v8691_v23  ;;  %v8773_v23 = vld [vmem:[%s11899_s10 + $0x8d0] ss:$100 sps:$4 sm:$0xff]  }
 0x47e   :  { %6329 = vmatpush2.bf16.msra.mxu1 %v8686_v24  ;;  %v8778_v24 = vld [vmem:[%s11899_s10 + $0x804] ss:$100 sps:$4 sm:$0xff]  }
 0x47f   :  { %6370 = vmatpush2.bf16.msra.mxu0 %v8689_v26  ;;  %6330 = vmatprep.subr.bf16.mxu1 %v8694_v27  ;;  %v8781_v26 = vld [vmem:[%s11899_s10 + $0x80c] ss:$100 sps:$4 sm:$0xff]   ;;  %v8776_v27 = vld [vmem:[%s11899_s10 + $0x800] ss:$100 sps:$4 sm:$0xff]  }
 0x480   :  { %6371 = vmatprep.subr.bf16.mxu0 %v8697_v28  ;;  %v8779_v28 = vld [vmem:[%s11899_s10 + $0x808] ss:$100 sps:$4 sm:$0xff]  }
 0x482   :  { %6331 = vmatpush2.bf16.msra.mxu1 %v8692_v29  ;;  %v8784_v29 = vld [vmem:[%s11899_s10 + $0x73c] ss:$100 sps:$4 sm:$0xff]  }
 0x483   :  { %6372 = vmatpush2.bf16.msra.mxu0 %v8695_v30  ;;  %6382 = vmatprep.subr.bf16.mxu1 %v8700_v31  ;;  %v8787_v30 = vld [vmem:[%s11899_s10 + $0x744] ss:$100 sps:$4 sm:$0xff]   ;;  %v8782_v31 = vld [vmem:[%s11899_s10 + $0x738] ss:$100 sps:$4 sm:$0xff]  }
 0x484   :  { %6423 = vmatprep.subr.bf16.mxu0 %v8703_v32  ;;  %v8785_v32 = vld [vmem:[%s11899_s10 + $0x740] ss:$100 sps:$4 sm:$0xff]  }
 0x485   :  { %6333 = vmatmul.mubr.bf16.vlgmr.msra.gmra.mxu1 %v10751_v19 }
 0x486   :  { %6374 = vmatmul.mubr.bf16.vlgmr.msra.gmra.mxu0 %v10751_v19  ;;  %6383 = vmatpush1.bf16.msra.mxu1 %v8698_v33  ;;  %v8790_v33 = vld [vmem:[%s11899_s10 + $0x674] ss:$100 sps:$4 sm:$0xff]  }
 0x487   :  { %6414 = vmatprep.mubr.bf16.mxu1 %v10743_v15  ;;  %6424 = vmatpush1.bf16.msra.mxu0 %v8701_v35  ;;  %v8793_v35 = vld [vmem:[%s11899_s10 + $0x67c] ss:$100 sps:$4 sm:$0xff]  }
 0x488   :  { %6455 = vmatprep.mubr.bf16.mxu0 %v10743_v15  ;;  %6384 = vmatprep.subr.bf16.mxu1 %v8706_v37  ;;  %v8788_v37 = vld [vmem:[%s11899_s10 + $0x670] ss:$100 sps:$4 sm:$0xff]  }
 0x489   :  { %6425 = vmatprep.subr.bf16.mxu0 %v8709_v38  ;;  %v11329_v38 = vsub.s32 2, %v9244_v43 }
 0x48a   :  { %6385 = vmatpush1.bf16.msra.mxu1 %v8704_v41  ;;  %v8791_v41 = vld [vmem:[%s11899_s10 + $0x678] ss:$100 sps:$4 sm:$0xff]  }
 0x48b   :  { %6426 = vmatpush1.bf16.msra.mxu0 %v8707_v53  ;;  %6386 = vmatprep.subr.bf16.mxu1 %v8712_v42  ;;  %v8796_v53 = vld [vmem:[%s11899_s10 + $0x5bc] ss:$100 sps:$4 sm:$0xff]  }
 0x48c   :  { %6427 = vmatprep.subr.bf16.mxu0 %v8715_v44  ;;  %v11340_v42 = vld [vmem:[%s11900_s11] sm:$0xff] }
 0x48d   :  { %v8799_v44 = vld [vmem:[%s11899_s10 + $0x5c4] ss:$100 sps:$4 sm:$0xff]  }
 0x48e   :  { %6387 = vmatpush1.bf16.msra.mxu1 %v8710_v1  ;;  %v11346_v1 = vsub.s32 3, %v9244_v43 }
 0x48f   :  { %6428 = vmatpush1.bf16.msra.mxu0 %v8713_v45  ;;  %6388 = vmatprep.subr.bf16.mxu1 %v8718_v46  ;;  %v8794_v45 = vld [vmem:[%s11899_s10 + $0x5b8] ss:$100 sps:$4 sm:$0xff]   ;;  %v3998_v46 = vrot.slane %v11340_v42, %v9959_v57 }
 0x490   :  { %6429 = vmatprep.subr.bf16.mxu0 %v8721_v55  ;;  %v4006_v55 = vrot.slane %v11340_v42, %v11329_v38 }
 0x492   :  { %6389 = vmatpush1.bf16.msra.mxu1 %v8716_v47  ;;  %v8797_v47 = vld [vmem:[%s11899_s10 + $0x5c0] ss:$100 sps:$4 sm:$0xff]  }
 0x493   :  { %6430 = vmatpush1.bf16.msra.mxu0 %v8719_v49  ;;  %6390 = vmatprep.subr.bf16.mxu1 %v8724_v50  ;;  %v4002_v49 = vrot.slane %v11340_v42, %v9973_v62  ;;  %v4010_v50 = vrot.slane %v11340_v42, %v11346_v1 }
 0x494   :  { %6431 = vmatprep.subr.bf16.mxu0 %v8727_v51  ;;  %v8802_v51 = vld [vmem:[%s11899_s10 + $0x4f4] ss:$100 sps:$4 sm:$0xff]  }
 0x496   :  { %6391 = vmatpush1.bf16.msra.mxu1 %v8722_v17 }
 0x497   :  { %6432 = vmatpush1.bf16.msra.mxu0 %v8725_v54  ;;  %6392 = vmatprep.subr.bf16.mxu1 %v8730_v34  ;;  %v8805_v34 = vld [vmem:[%s11899_s10 + $0x4fc] ss:$100 sps:$4 sm:$0xff]  }
 0x498   :  { %6433 = vmatprep.subr.bf16.mxu0 %v8733_v56 }
 0x49a   :  { %6393 = vmatpush1.bf16.msra.mxu1 %v8728_v22 }
 0x49b   :  { %6434 = vmatpush1.bf16.msra.mxu0 %v8731_v58  ;;  %6394 = vmatprep.subr.bf16.mxu1 %v8736_v59  ;;  %v8800_v58 = vld [vmem:[%s11899_s10 + $0x4f0] ss:$100 sps:$4 sm:$0xff]  }
 0x49c   :  { %6435 = vmatprep.subr.bf16.mxu0 %v8739_v60 }
 0x49e   :  { %6395 = vmatpush1.bf16.msra.mxu1 %v8734_v61  ;;  %v8803_v61 = vld [vmem:[%s11899_s10 + $0x4f8] ss:$100 sps:$4 sm:$0xff]  }
 0x49f   :  { %6436 = vmatpush1.bf16.msra.mxu0 %v8737_v63  ;;  %6396 = vmatprep.subr.bf16.mxu1 %v8742_v21  ;;  %v8808_v63 = vld [vmem:[%s11899_s10 + $0x42c] ss:$100 sps:$4 sm:$0xff]  }
 0x4a0   :  { %6437 = vmatprep.subr.bf16.mxu0 %v8745_v0 }
 0x4a2   :  { %6397 = vmatpush1.bf16.msra.mxu1 %v8740_v2  ;;  %v8811_v2 = vld [vmem:[%s11899_s10 + $0x434] ss:$100 sps:$4 sm:$0xff]  }
 0x4a3   :  { %6438 = vmatpush1.bf16.msra.mxu0 %v8743_v3  ;;  %6398 = vmatprep.subr.bf16.mxu1 %v8748_v25 }
 0x4a4   :  { %6439 = vmatprep.subr.bf16.mxu0 %v8751_v4 }
 0x4a6   :  { %6399 = vmatpush2.bf16.msra.mxu1 %v8746_v5 }
 0x4a7   :  { %6440 = vmatpush2.bf16.msra.mxu0 %v8749_v36  ;;  %6400 = vmatprep.subr.bf16.mxu1 %v8754_v6 }
 0x4a8   :  { %6441 = vmatprep.subr.bf16.mxu0 %v8757_v52  ;;  %v8806_v52 = vld [vmem:[%s11899_s10 + $0x428] ss:$100 sps:$4 sm:$0xff]  }
 0x4aa   :  { %6401 = vmatpush2.bf16.msra.mxu1 %v8752_v7 }
 0x4ab   :  { %6442 = vmatpush2.bf16.msra.mxu0 %v8755_v8  ;;  %6402 = vmatprep.subr.bf16.mxu1 %v8760_v9  ;;  %v8809_v9 = vld [vmem:[%s11899_s10 + $0x430] ss:$100 sps:$4 sm:$0xff]  }
 0x4ac   :  { %6443 = vmatprep.subr.bf16.mxu0 %v8763_v39  ;;  %v8814_v39 = vld [vmem:[%s11899_s10 + $0x364] ss:$100 sps:$4 sm:$0xff]  }
 0x4ae   :  { %6403 = vmatpush2.bf16.msra.mxu1 %v8758_v10 }
 0x4af   :  { %6444 = vmatpush2.bf16.msra.mxu0 %v8761_v40  ;;  %6404 = vmatprep.subr.bf16.mxu1 %v8766_v11  ;;  %v8817_v11 = vld [vmem:[%s11899_s10 + $0x36c] ss:$100 sps:$4 sm:$0xff]  }
 0x4b0   :  { %6445 = vmatprep.subr.bf16.mxu0 %v8769_v12 }
 0x4b2   :  { %6405 = vmatpush2.bf16.msra.mxu1 %v8764_v13 }
 0x4b3   :  { %6446 = vmatpush2.bf16.msra.mxu0 %v8767_v14  ;;  %6406 = vmatprep.subr.bf16.mxu1 %v8772_v16  ;;  %v8812_v14 = vld [vmem:[%s11899_s10 + $0x360] ss:$100 sps:$4 sm:$0xff]   ;;  %v8815_v16 = vld [vmem:[%s11899_s10 + $0x368] ss:$100 sps:$4 sm:$0xff]  }
 0x4b4   :  { %6447 = vmatprep.subr.bf16.mxu0 %v8775_v18  ;;  %v8820_v18 = vld [vmem:[%s11899_s10 + $0x29c] ss:$100 sps:$4 sm:$0xff]  }
 0x4b6   :  { %6407 = vmatpush2.bf16.msra.mxu1 %v8770_v20 }
 0x4b7   :  { %6448 = vmatpush2.bf16.msra.mxu0 %v8773_v23  ;;  %6408 = vmatprep.subr.bf16.mxu1 %v8778_v24  ;;  %v8823_v23 = vld [vmem:[%s11899_s10 + $0x2a4] ss:$100 sps:$4 sm:$0xff]   ;;  %v8818_v24 = vld [vmem:[%s11899_s10 + $0x298] ss:$100 sps:$4 sm:$0xff]  }
 0x4b8   :  { %6449 = vmatprep.subr.bf16.mxu0 %v8781_v26  ;;  %v8821_v26 = vld [vmem:[%s11899_s10 + $0x2a0] ss:$100 sps:$4 sm:$0xff]  }
 0x4ba   :  { %6409 = vmatpush2.bf16.msra.mxu1 %v8776_v27  ;;  %v8826_v27 = vld [vmem:[%s11899_s10 + $0x1d4] ss:$100 sps:$4 sm:$0xff]  }
 0x4bb   :  { %6450 = vmatpush2.bf16.msra.mxu0 %v8779_v28  ;;  %6410 = vmatprep.subr.bf16.mxu1 %v8784_v29  ;;  %v8829_v28 = vld [vmem:[%s11899_s10 + $0x1dc] ss:$100 sps:$4 sm:$0xff]   ;;  %v8824_v29 = vld [vmem:[%s11899_s10 + $0x1d0] ss:$100 sps:$4 sm:$0xff]  }
 0x4bc   :  { %6451 = vmatprep.subr.bf16.mxu0 %v8787_v30  ;;  %v8827_v30 = vld [vmem:[%s11899_s10 + $0x1d8] ss:$100 sps:$4 sm:$0xff]  }
 0x4be   :  { %6411 = vmatpush2.bf16.msra.mxu1 %v8782_v31  ;;  %v8832_v31 = vld [vmem:[%s11899_s10 + $0x10c] ss:$100 sps:$4 sm:$0xff]  }
 0x4bf   :  { %6452 = vmatpush2.bf16.msra.mxu0 %v8785_v32  ;;  %6412 = vmatprep.subr.bf16.mxu1 %v8790_v33  ;;  %v8835_v32 = vld [vmem:[%s11899_s10 + $0x114] ss:$100 sps:$4 sm:$0xff]   ;;  %v8830_v33 = vld [vmem:[%s11899_s10 + $0x108] ss:$100 sps:$4 sm:$0xff]  }
 0x4c0   :  { %6453 = vmatprep.subr.bf16.mxu0 %v8793_v35  ;;  %v8833_v35 = vld [vmem:[%s11899_s10 + $0x110] ss:$100 sps:$4 sm:$0xff]  }
 0x4c2   :  { %6413 = vmatpush2.bf16.msra.mxu1 %v8788_v37  ;;  %v8838_v37 = vld [vmem:[%s11899_s10 + $0x44] ss:$100 sps:$4 sm:$0xff]  }
 0x4c3   :  { %6454 = vmatpush2.bf16.msra.mxu0 %v8791_v41  ;;  %6464 = vmatprep.subr.bf16.mxu1 %v8796_v53  ;;  %v8841_v41 = vld [vmem:[%s11899_s10 + $0x4c] ss:$100 sps:$4 sm:$0xff]   ;;  %v8836_v53 = vld [vmem:[%s11899_s10 + $0x40] ss:$100 sps:$4 sm:$0xff]  }
 0x4c4   :  { %6505 = vmatprep.subr.bf16.mxu0 %v8799_v44  ;;  %v8839_v44 = vld [vmem:[%s11899_s10 + $0x48] ss:$100 sps:$4 sm:$0xff]  }
 0x4c5   :  { %6415 = vmatmul.mubr.bf16.vlgmr.msra.gmra.mxu1 %v10751_v19  ;;  %v6170_v17 = vpop.f32.mrf.mxu1  ;;  %v6211_v54 = vpop.f32.mrf.mxu0 }
 0x4c6   :  { %6456 = vmatmul.mubr.bf16.vlgmr.msra.gmra.mxu0 %v10751_v19  ;;  %v6171_v56 = vadd.f32 %v6170_v17, %v3998_v46  ;;  %v6212_v22 = vadd.f32 %v6211_v54, %v4006_v55  ;;  %6465 = vmatpush1.bf16.msra.mxu1 %v8794_v45  ;;  %v8844_v45 = vld [vmem:[%s11899_s10 + $0xbfc] ss:$100 sps:$4 sm:$0xff]   ;;  %v8847_v46 = vld [vmem:[%s11899_s10 + $0xc04] ss:$100 sps:$4 sm:$0xff]   ;;  %v8856_v54 = vld [vmem:[%s11899_s10 + $0xa6c] ss:$100 sps:$4 sm:$0xff]  }
 0x4c7   :  { %6496 = vmatprep.mubr.bf16.mxu1 %v10743_v15  ;;  %6506 = vmatpush1.bf16.msra.mxu0 %v8797_v47  ;;  %v6172_v59 = vpop.f32.mrf.mxu1  ;;  %v6213_v60 = vpop.f32.mrf.mxu0  ;;  %v8842_v55 = vld [vmem:[%s11899_s10 + $0xbf8] ss:$100 sps:$4 sm:$0xff]   ;;  %v8845_v47 = vld [vmem:[%s11899_s10 + $0xc00] ss:$100 sps:$4 sm:$0xff]  }
 0x4c8   :  { %6537 = vmatprep.mubr.bf16.mxu0 %v10743_v15  ;;  %v6173_v21 = vadd.f32 %v6172_v59, %v4002_v49  ;;  %v6214_v0 = vadd.f32 %v6213_v60, %v4010_v50  ;;  %6466 = vmatprep.subr.bf16.mxu1 %v8802_v51  ;;  %v6668_v4 = vmax.f32 %v6171_v56, 0.0  ;;  %v6670_v5 = vmax.f32 %v6212_v22, 0.0  ;;  %v8850_v49 = vld [vmem:[%s11899_s10 + $0xb34] ss:$100 sps:$4 sm:$0xff]   ;;  %v8853_v50 = vld [vmem:[%s11899_s10 + $0xb3c] ss:$100 sps:$4 sm:$0xff]  }
 0x4c9   :  { %6507 = vmatprep.subr.bf16.mxu0 %v8805_v34  ;;  %v6174_v3 = vpop.f32.mrf.mxu1  ;;  %v6215_v25 = vpop.f32.mrf.mxu0  ;;  %v8848_v51 = vld [vmem:[%s11899_s10 + $0xb30] ss:$100 sps:$4 sm:$0xff]   ;;  %v8851_v17 = vld [vmem:[%s11899_s10 + $0xb38] ss:$100 sps:$4 sm:$0xff]   ;;  %v8854_v56 = vld [vmem:[%s11899_s10 + $0xa68] ss:$100 sps:$4 sm:$0xff]  }
 0x4ca   :  { %v6669_v36 = vmax.f32 %v6173_v21, 0.0  ;;  %v6671_v6 = vmax.f32 %v6214_v0, 0.0  ;;  %6467 = vmatpush1.bf16.msra.mxu1 %v8800_v58  ;;  %v8859_v34 = vld [vmem:[%s11899_s10 + $0xa74] ss:$100 sps:$4 sm:$0xff]   ;;  %v8862_v58 = vld [vmem:[%s11899_s10 + $0x9a4] ss:$100 sps:$4 sm:$0xff]  }
 0x4cb   :  { %6508 = vmatpush1.bf16.msra.mxu0 %v8803_v61  ;;  %v6175_v7 = vpop.f32.mrf.mxu1  ;;  %v6216_v8 = vpop.f32.mrf.mxu0  ;;  %6468 = vmatprep.subr.bf16.mxu1 %v8808_v63  ;;  %v8857_v22 = vld [vmem:[%s11899_s10 + $0xa70] ss:$100 sps:$4 sm:$0xff]   ;;  %v8860_v60 = vld [vmem:[%s11899_s10 + $0x9a0] ss:$100 sps:$4 sm:$0xff]   ;;  %v8863_v61 = vld [vmem:[%s11899_s10 + $0x9a8] ss:$100 sps:$4 sm:$0xff]  }
 0x4cc   :  { %v6718_v10 = vcombine.low %v6668_v4, %v6669_v36  ;;  %v6719_v40 = vcombine.low %v6670_v5, %v6671_v6  ;;  %6509 = vmatprep.subr.bf16.mxu0 %v8811_v2  ;;  %v8865_v59 = vld [vmem:[%s11899_s10 + $0x9ac] ss:$100 sps:$4 sm:$0xff]   ;;  %v8868_v63 = vld [vmem:[%s11899_s10 + $0x8dc] ss:$100 sps:$4 sm:$0xff]   ;;  %v8871_v21 = vld [vmem:[%s11899_s10 + $0x8e4] ss:$100 sps:$4 sm:$0xff]  }
 0x4cd   :  { %v8866_v0 = vld [vmem:[%s11899_s10 + $0x8d8] ss:$100 sps:$4 sm:$0xff]   ;;  %v8869_v2 = vld [vmem:[%s11899_s10 + $0x8e0] ss:$100 sps:$4 sm:$0xff]   ;;  %v8872_v4 = vld [vmem:[%s11899_s10 + $0x810] ss:$100 sps:$4 sm:$0xff]  }
 0x4ce   :  { %v6726_v12 = vrot.slane %v6718_v10, %v9259_v48  ;;  %v6733_v13 = vrot.slane %v6719_v40, %v9259_v48  ;;  %6469 = vmatpush1.bf16.msra.mxu1 %v8806_v52  ;;  %v8874_v3 = vld [vmem:[%s11899_s10 + $0x814] ss:$100 sps:$4 sm:$0xff]   ;;  %v8877_v25 = vld [vmem:[%s11899_s10 + $0x81c] ss:$100 sps:$4 sm:$0xff]   ;;  %v8880_v36 = vld [vmem:[%s11899_s10 + $0x74c] ss:$100 sps:$4 sm:$0xff]  }
 0x4cf   :  { %6510 = vmatpush1.bf16.msra.mxu0 %v8809_v9  ;;  %6470 = vmatprep.subr.bf16.mxu1 %v8814_v39  ;;  %v8875_v5 = vld [vmem:[%s11899_s10 + $0x818] ss:$100 sps:$4 sm:$0xff]   ;;  %v8878_v52 = vld [vmem:[%s11899_s10 + $0x748] ss:$100 sps:$4 sm:$0xff]   ;;  %v8881_v7 = vld [vmem:[%s11899_s10 + $0x750] ss:$100 sps:$4 sm:$0xff]  }
 0x4d0   :  { %v6734_v20 = vcombine.low %v6726_v12, %v6733_v13  ;;  %6511 = vmatprep.subr.bf16.mxu0 %v8817_v11  ;;  %v8883_v6 = vld [vmem:[%s11899_s10 + $0x754] ss:$100 sps:$4 sm:$0xff]   ;;  %v8886_v8 = vld [vmem:[%s11899_s10 + $0x684] ss:$100 sps:$4 sm:$0xff]   ;;  %v8889_v9 = vld [vmem:[%s11899_s10 + $0x68c] ss:$100 sps:$4 sm:$0xff]  }
 0x4d1   :  { %v8884_v39 = vld [vmem:[%s11899_s10 + $0x680] ss:$100 sps:$4 sm:$0xff]   ;;  %v11549_v10 = vsub.s32 4, %v9244_v43  ;;  %v11552_v40 = vsub.s32 6, %v9244_v43  ;;  %v8887_v11 = vld [vmem:[%s11899_s10 + $0x688] ss:$100 sps:$4 sm:$0xff]  }
 0x4d2   :  { %6834 = vst [vmem:[%s11901_s12] sm:$0xff] %v6734_v20  ;;  %6471 = vmatpush1.bf16.msra.mxu1 %v8812_v14  ;;  %v8892_v12 = vld [vmem:[%s11899_s10 + $0x5cc] ss:$100 sps:$4 sm:$0xff]   ;;  %v8895_v13 = vld [vmem:[%s11899_s10 + $0x5d4] ss:$100 sps:$4 sm:$0xff]   ;;  %v11564_v14 = vsub.s32 5, %v9244_v43 }
 0x4d3   :  { %6512 = vmatpush1.bf16.msra.mxu0 %v8815_v16  ;;  %6472 = vmatprep.subr.bf16.mxu1 %v8820_v18  ;;  %v11567_v16 = vsub.s32 7, %v9244_v43  ;;  %v4014_v18 = vrot.slane %v11340_v42, %v11549_v10  ;;  %v4022_v20 = vrot.slane %v11340_v42, %v11552_v40 }
 0x4d4   :  { %6513 = vmatprep.subr.bf16.mxu0 %v8823_v23  ;;  %v8890_v23 = vld [vmem:[%s11899_s10 + $0x5c8] ss:$100 sps:$4 sm:$0xff]   ;;  %v4018_v43 = vrot.slane %v11340_v42, %v11564_v14 }
 0x4d6   :  { %6473 = vmatpush1.bf16.msra.mxu1 %v8818_v24  ;;  %v8893_v24 = vld [vmem:[%s11899_s10 + $0x5d0] ss:$100 sps:$4 sm:$0xff]  }
 0x4d7   :  { %6514 = vmatpush1.bf16.msra.mxu0 %v8821_v26  ;;  %6474 = vmatprep.subr.bf16.mxu1 %v8826_v27  ;;  %v4026_v26 = vrot.slane %v11340_v42, %v11567_v16  ;;  %v8898_v27 = vld [vmem:[%s11899_s10 + $0x504] ss:$100 sps:$4 sm:$0xff]  }
 0x4d8   :  { %6515 = vmatprep.subr.bf16.mxu0 %v8829_v28  ;;  %v8896_v42 = vld [vmem:[%s11899_s10 + $0x500] ss:$100 sps:$4 sm:$0xff]  }
 0x4da   :  { %6475 = vmatpush1.bf16.msra.mxu1 %v8824_v29 }
 0x4db   :  { %6516 = vmatpush1.bf16.msra.mxu0 %v8827_v30  ;;  %6476 = vmatprep.subr.bf16.mxu1 %v8832_v31  ;;  %v8901_v30 = vld [vmem:[%s11899_s10 + $0x50c] ss:$100 sps:$4 sm:$0xff]  }
 0x4dc   :  { %6517 = vmatprep.subr.bf16.mxu0 %v8835_v32 }
 0x4de   :  { %6477 = vmatpush1.bf16.msra.mxu1 %v8830_v33 }
 0x4df   :  { %6518 = vmatpush1.bf16.msra.mxu0 %v8833_v35  ;;  %6478 = vmatprep.subr.bf16.mxu1 %v8838_v37  ;;  %v8899_v37 = vld [vmem:[%s11899_s10 + $0x508] ss:$100 sps:$4 sm:$0xff]  }
 0x4e0   :  { %6519 = vmatprep.subr.bf16.mxu0 %v8841_v41  ;;  %v8904_v41 = vld [vmem:[%s11899_s10 + $0x43c] ss:$100 sps:$4 sm:$0xff]  }
 0x4e2   :  { %6479 = vmatpush1.bf16.msra.mxu1 %v8836_v53 }
 0x4e3   :  { %6520 = vmatpush1.bf16.msra.mxu0 %v8839_v44  ;;  %6480 = vmatprep.subr.bf16.mxu1 %v8844_v45  ;;  %v8907_v45 = vld [vmem:[%s11899_s10 + $0x444] ss:$100 sps:$4 sm:$0xff]  }
 0x4e4   :  { %6521 = vmatprep.subr.bf16.mxu0 %v8847_v46 }
 0x4e6   :  { %6481 = vmatpush2.bf16.msra.mxu1 %v8842_v55 }
 0x4e7   :  { %6522 = vmatpush2.bf16.msra.mxu0 %v8845_v47  ;;  %6482 = vmatprep.subr.bf16.mxu1 %v8850_v49 }
 0x4e8   :  { %6523 = vmatprep.subr.bf16.mxu0 %v8853_v50 }
 0x4ea   :  { %6483 = vmatpush2.bf16.msra.mxu1 %v8848_v51 }
 0x4eb   :  { %6524 = vmatpush2.bf16.msra.mxu0 %v8851_v17  ;;  %6484 = vmatprep.subr.bf16.mxu1 %v8856_v54  ;;  %v8902_v17 = vld [vmem:[%s11899_s10 + $0x438] ss:$100 sps:$4 sm:$0xff]  }
 0x4ec   :  { %6525 = vmatprep.subr.bf16.mxu0 %v8859_v34 }
 0x4ee   :  { %6485 = vmatpush2.bf16.msra.mxu1 %v8854_v56  ;;  %v8905_v56 = vld [vmem:[%s11899_s10 + $0x440] ss:$100 sps:$4 sm:$0xff]  }
 0x4ef   :  { %6526 = vmatpush2.bf16.msra.mxu0 %v8857_v22  ;;  %6486 = vmatprep.subr.bf16.mxu1 %v8862_v58  ;;  %v8910_v22 = vld [vmem:[%s11899_s10 + $0x374] ss:$100 sps:$4 sm:$0xff]  }
 0x4f0   :  { %6527 = vmatprep.subr.bf16.mxu0 %v8865_v59 }
 0x4f2   :  { %6487 = vmatpush2.bf16.msra.mxu1 %v8860_v60  ;;  %v8913_v60 = vld [vmem:[%s11899_s10 + $0x37c] ss:$100 sps:$4 sm:$0xff]  }
 0x4f3   :  { %6528 = vmatpush2.bf16.msra.mxu0 %v8863_v61  ;;  %6488 = vmatprep.subr.bf16.mxu1 %v8868_v63 }
 0x4f4   :  { %6529 = vmatprep.subr.bf16.mxu0 %v8871_v21  ;;  %v8908_v21 = vld [vmem:[%s11899_s10 + $0x370] ss:$100 sps:$4 sm:$0xff]  }
 0x4f6   :  { %6489 = vmatpush2.bf16.msra.mxu1 %v8866_v0  ;;  %v8911_v0 = vld [vmem:[%s11899_s10 + $0x378] ss:$100 sps:$4 sm:$0xff]  }
 0x4f7   :  { %6530 = vmatpush2.bf16.msra.mxu0 %v8869_v2  ;;  %6490 = vmatprep.subr.bf16.mxu1 %v8874_v3  ;;  %v8916_v2 = vld [vmem:[%s11899_s10 + $0x2ac] ss:$100 sps:$4 sm:$0xff]  }
 0x4f8   :  { %6531 = vmatprep.subr.bf16.mxu0 %v8877_v25  ;;  %v8919_v25 = vld [vmem:[%s11899_s10 + $0x2b4] ss:$100 sps:$4 sm:$0xff]  }
 0x4fa   :  { %6491 = vmatpush2.bf16.msra.mxu1 %v8872_v4  ;;  %v8914_v4 = vld [vmem:[%s11899_s10 + $0x2a8] ss:$100 sps:$4 sm:$0xff]  }
 0x4fb   :  { %6532 = vmatpush2.bf16.msra.mxu0 %v8875_v5  ;;  %6492 = vmatprep.subr.bf16.mxu1 %v8880_v36  ;;  %v8917_v5 = vld [vmem:[%s11899_s10 + $0x2b0] ss:$100 sps:$4 sm:$0xff]   ;;  %v8922_v36 = vld [vmem:[%s11899_s10 + $0x1e4] ss:$100 sps:$4 sm:$0xff]  }
 0x4fc   :  { %6533 = vmatprep.subr.bf16.mxu0 %v8883_v6  ;;  %v8925_v6 = vld [vmem:[%s11899_s10 + $0x1ec] ss:$100 sps:$4 sm:$0xff]  }
 0x4fe   :  { %6493 = vmatpush2.bf16.msra.mxu1 %v8878_v52  ;;  %v8920_v52 = vld [vmem:[%s11899_s10 + $0x1e0] ss:$100 sps:$4 sm:$0xff]  }
 0x4ff   :  { %6534 = vmatpush2.bf16.msra.mxu0 %v8881_v7  ;;  %6494 = vmatprep.subr.bf16.mxu1 %v8886_v8  ;;  %v8923_v7 = vld [vmem:[%s11899_s10 + $0x1e8] ss:$100 sps:$4 sm:$0xff]   ;;  %v8928_v8 = vld [vmem:[%s11899_s10 + $0x11c] ss:$100 sps:$4 sm:$0xff]  }
 0x500   :  { %6535 = vmatprep.subr.bf16.mxu0 %v8889_v9  ;;  %v8931_v9 = vld [vmem:[%s11899_s10 + $0x124] ss:$100 sps:$4 sm:$0xff]  }
 0x502   :  { %6495 = vmatpush2.bf16.msra.mxu1 %v8884_v39  ;;  %v8926_v39 = vld [vmem:[%s11899_s10 + $0x118] ss:$100 sps:$4 sm:$0xff]  }
 0x503   :  { %6536 = vmatpush2.bf16.msra.mxu0 %v8887_v11  ;;  %6546 = vmatprep.subr.bf16.mxu1 %v8892_v12  ;;  %v8929_v11 = vld [vmem:[%s11899_s10 + $0x120] ss:$100 sps:$4 sm:$0xff]   ;;  %v8934_v12 = vld [vmem:[%s11899_s10 + $0x54] ss:$100 sps:$4 sm:$0xff]  }
 0x504   :  { %6587 = vmatprep.subr.bf16.mxu0 %v8895_v13  ;;  %v8937_v13 = vld [vmem:[%s11899_s10 + $0x5c] ss:$100 sps:$4 sm:$0xff]  }
 0x505   :  { %v6252_v28 = vpop.f32.mrf.mxu1  ;;  %v6293_v29 = vpop.f32.mrf.mxu0  ;;  %6497 = vmatmul.mubr.bf16.vlgmr.msra.gmra.mxu1 %v10751_v19 }
 0x506   :  { %v6253_v31 = vadd.f32 %v6252_v28, %v4014_v18  ;;  %v6294_v32 = vadd.f32 %v6293_v29, %v4022_v20  ;;  %6538 = vmatmul.mubr.bf16.vlgmr.msra.gmra.mxu0 %v10751_v19  ;;  %6547 = vmatpush1.bf16.msra.mxu1 %v8890_v23  ;;  %v8932_v18 = vld [vmem:[%s11899_s10 + $0x50] ss:$100 sps:$4 sm:$0xff]   ;;  %v8935_v20 = vld [vmem:[%s11899_s10 + $0x58] ss:$100 sps:$4 sm:$0xff]   ;;  %v8944_v29 = vld [vmem:[%s11899_s10 + $0xb40] ss:$100 sps:$4 sm:$0xff]  }
 0x507   :  { %6578 = vmatprep.mubr.bf16.mxu1 %v10743_v15  ;;  %6588 = vmatpush1.bf16.msra.mxu0 %v8893_v24  ;;  %v6254_v33 = vpop.f32.mrf.mxu1  ;;  %v6295_v35 = vpop.f32.mrf.mxu0  ;;  %v8940_v23 = vld [vmem:[%s11899_s10 + $0xc0c] ss:$100 sps:$4 sm:$0xff]   ;;  %v8943_v24 = vld [vmem:[%s11899_s10 + $0xc14] ss:$100 sps:$4 sm:$0xff]  }
 0x508   :  { %6619 = vmatprep.mubr.bf16.mxu0 %v10743_v15  ;;  %v6255_v53 = vadd.f32 %v6254_v33, %v4018_v43  ;;  %v6296_v44 = vadd.f32 %v6295_v35, %v4026_v26  ;;  %6548 = vmatprep.subr.bf16.mxu1 %v8898_v27  ;;  %v6672_v47 = vmax.f32 %v6253_v31, 0.0  ;;  %v6674_v49 = vmax.f32 %v6294_v32, 0.0  ;;  %v8938_v43 = vld [vmem:[%s11899_s10 + $0xc08] ss:$100 sps:$4 sm:$0xff]   ;;  %v8941_v26 = vld [vmem:[%s11899_s10 + $0xc10] ss:$100 sps:$4 sm:$0xff]  }
 0x509   :  { %v6256_v46 = vpop.f32.mrf.mxu1  ;;  %v6297_v55 = vpop.f32.mrf.mxu0  ;;  %6589 = vmatprep.subr.bf16.mxu0 %v8901_v30  ;;  %v8946_v27 = vld [vmem:[%s11899_s10 + $0xb44] ss:$100 sps:$4 sm:$0xff]   ;;  %v8949_v28 = vld [vmem:[%s11899_s10 + $0xb4c] ss:$100 sps:$4 sm:$0xff]   ;;  %v8952_v31 = vld [vmem:[%s11899_s10 + $0xa7c] ss:$100 sps:$4 sm:$0xff]  }
 0x50a   :  { %v6673_v50 = vmax.f32 %v6255_v53, 0.0  ;;  %v6675_v51 = vmax.f32 %v6296_v44, 0.0  ;;  %6549 = vmatpush1.bf16.msra.mxu1 %v8896_v42  ;;  %v8947_v30 = vld [vmem:[%s11899_s10 + $0xb48] ss:$100 sps:$4 sm:$0xff]   ;;  %v8950_v42 = vld [vmem:[%s11899_s10 + $0xa78] ss:$100 sps:$4 sm:$0xff]  }
 0x50b   :  { %6590 = vmatpush1.bf16.msra.mxu0 %v8899_v37  ;;  %v6257_v54 = vpop.f32.mrf.mxu1  ;;  %v6298_v34 = vpop.f32.mrf.mxu0  ;;  %6550 = vmatprep.subr.bf16.mxu1 %v8904_v41  ;;  %v8955_v32 = vld [vmem:[%s11899_s10 + $0xa84] ss:$100 sps:$4 sm:$0xff]   ;;  %v8958_v35 = vld [vmem:[%s11899_s10 + $0x9b4] ss:$100 sps:$4 sm:$0xff]   ;;  %v8961_v37 = vld [vmem:[%s11899_s10 + $0x9bc] ss:$100 sps:$4 sm:$0xff]  }
 0x50c   :  { %v6735_v58 = vcombine.low %v6672_v47, %v6673_v50  ;;  %v6736_v59 = vcombine.low %v6674_v49, %v6675_v51  ;;  %6591 = vmatprep.subr.bf16.mxu0 %v8907_v45  ;;  %v8953_v33 = vld [vmem:[%s11899_s10 + $0xa80] ss:$100 sps:$4 sm:$0xff]   ;;  %v8956_v41 = vld [vmem:[%s11899_s10 + $0x9b0] ss:$100 sps:$4 sm:$0xff]   ;;  %v8959_v53 = vld [vmem:[%s11899_s10 + $0x9b8] ss:$100 sps:$4 sm:$0xff]  }
 0x50d   :  { %v8964_v44 = vld [vmem:[%s11899_s10 + $0x8ec] ss:$100 sps:$4 sm:$0xff]   ;;  %v8967_v45 = vld [vmem:[%s11899_s10 + $0x8f4] ss:$100 sps:$4 sm:$0xff]   ;;  %v8970_v47 = vld [vmem:[%s11899_s10 + $0x824] ss:$100 sps:$4 sm:$0xff]  }
 0x50e   :  { %v6743_v61 = vrot.slane %v6735_v58, %v9259_v48  ;;  %v6750_v63 = vrot.slane %v6736_v59, %v9259_v48  ;;  %6551 = vmatpush1.bf16.msra.mxu1 %v8902_v17  ;;  %v8962_v46 = vld [vmem:[%s11899_s10 + $0x8e8] ss:$100 sps:$4 sm:$0xff]   ;;  %v8965_v55 = vld [vmem:[%s11899_s10 + $0x8f0] ss:$100 sps:$4 sm:$0xff]   ;;  %v8968_v50 = vld [vmem:[%s11899_s10 + $0x820] ss:$100 sps:$4 sm:$0xff]  }
 0x50f   :  { %6592 = vmatpush1.bf16.msra.mxu0 %v8905_v56  ;;  %6552 = vmatprep.subr.bf16.mxu1 %v8910_v22  ;;  %v8973_v49 = vld [vmem:[%s11899_s10 + $0x82c] ss:$100 sps:$4 sm:$0xff]   ;;  %v8976_v17 = vld [vmem:[%s11899_s10 + $0x75c] ss:$100 sps:$4 sm:$0xff]   ;;  %v8979_v54 = vld [vmem:[%s11899_s10 + $0x764] ss:$100 sps:$4 sm:$0xff]  }
 0x510   :  { %v6751_v3 = vcombine.low %v6743_v61, %v6750_v63  ;;  %6593 = vmatprep.subr.bf16.mxu0 %v8913_v60  ;;  %v8971_v51 = vld [vmem:[%s11899_s10 + $0x828] ss:$100 sps:$4 sm:$0xff]   ;;  %v8974_v34 = vld [vmem:[%s11899_s10 + $0x758] ss:$100 sps:$4 sm:$0xff]   ;;  %v8977_v56 = vld [vmem:[%s11899_s10 + $0x760] ss:$100 sps:$4 sm:$0xff]  }
 0x511   :  { %v8982_v22 = vld [vmem:[%s11899_s10 + $0x694] ss:$100 sps:$4 sm:$0xff]   ;;  %v8985_v58 = vld [vmem:[%s11899_s10 + $0x69c] ss:$100 sps:$4 sm:$0xff]   ;;  %v11775_v61 = vld [vmem:[%s11900_s11 + $0x8] sm:$0xff] }
 0x512   :  { %6835 = vst [vmem:[%s11901_s12 + $0x8] sm:$0xff] %v6751_v3  ;;  %6553 = vmatpush1.bf16.msra.mxu1 %v8908_v21  ;;  %v8980_v59 = vld [vmem:[%s11899_s10 + $0x690] ss:$100 sps:$4 sm:$0xff]   ;;  %v8983_v60 = vld [vmem:[%s11899_s10 + $0x698] ss:$100 sps:$4 sm:$0xff]   ;;  %v4030_v21 = vrot.slane %v11775_v61, %v9959_v57 }
 0x513   :  { %6594 = vmatpush1.bf16.msra.mxu0 %v8911_v0  ;;  %6554 = vmatprep.subr.bf16.mxu1 %v8916_v2  ;;  %v8986_v63 = vld [vmem:[%s11899_s10 + $0xc18] ss:$100 sps:$4 sm:$0xff]   ;;  %v4038_v2 = vrot.slane %v11775_v61, %v11329_v38  ;;  %v8988_v3 = vld [vmem:[%s11899_s10 + $0xb50] ss:$100 sps:$4 sm:$0xff]  }
 0x514   :  { %6595 = vmatprep.subr.bf16.mxu0 %v8919_v25  ;;  %v8987_v0 = vld [vmem:[%s11899_s10 + $0x5d8] ss:$100 sps:$4 sm:$0xff]   ;;  %v4034_v25 = vrot.slane %v11775_v61, %v9973_v62 }
 0x516   :  { %6555 = vmatpush1.bf16.msra.mxu1 %v8914_v4 }
 0x517   :  { %6596 = vmatpush1.bf16.msra.mxu0 %v8917_v5  ;;  %6556 = vmatprep.subr.bf16.mxu1 %v8922_v36  ;;  %v4042_v5 = vrot.slane %v11775_v61, %v11346_v1 }
 0x518   :  { %6597 = vmatprep.subr.bf16.mxu0 %v8925_v6 }
 0x51a   :  { %6557 = vmatpush1.bf16.msra.mxu1 %v8920_v52  ;;  %v8989_v52 = vld [vmem:[%s11899_s10 + $0x510] ss:$100 sps:$4 sm:$0xff]  }
 0x51b   :  { %6598 = vmatpush1.bf16.msra.mxu0 %v8923_v7  ;;  %6558 = vmatprep.subr.bf16.mxu1 %v8928_v8 }
 0x51c   :  { %6599 = vmatprep.subr.bf16.mxu0 %v8931_v9  ;;  %v8990_v9 = vld [vmem:[%s11899_s10 + $0xa88] ss:$100 sps:$4 sm:$0xff]  }
 0x51e   :  { %6559 = vmatpush1.bf16.msra.mxu1 %v8926_v39 }
 0x51f   :  { %6600 = vmatpush1.bf16.msra.mxu0 %v8929_v11  ;;  %6560 = vmatprep.subr.bf16.mxu1 %v8934_v12 }
 0x520   :  { %6601 = vmatprep.subr.bf16.mxu0 %v8937_v13 }
 0x522   :  { %6561 = vmatpush1.bf16.msra.mxu1 %v8932_v18 }
 0x523   :  { %6602 = vmatpush1.bf16.msra.mxu0 %v8935_v20  ;;  %6562 = vmatprep.subr.bf16.mxu1 %v8940_v23 }
 0x524   :  { %6603 = vmatprep.subr.bf16.mxu0 %v8943_v24  ;;  %v8991_v24 = vld [vmem:[%s11899_s10 + $0x448] ss:$100 sps:$4 sm:$0xff]  }
 0x526   :  { %6563 = vmatpush2.bf16.msra.mxu1 %v8938_v43 }
 0x527   :  { %6604 = vmatpush2.bf16.msra.mxu0 %v8941_v26  ;;  %6564 = vmatprep.subr.bf16.mxu1 %v8946_v27  ;;  %v8992_v27 = vld [vmem:[%s11899_s10 + $0x9c0] ss:$100 sps:$4 sm:$0xff]  }
 0x528   :  { %6605 = vmatprep.subr.bf16.mxu0 %v8949_v28 }
 0x52a   :  { %6565 = vmatpush2.bf16.msra.mxu1 %v8944_v29 }
 0x52b   :  { %6606 = vmatpush2.bf16.msra.mxu0 %v8947_v30  ;;  %6566 = vmatprep.subr.bf16.mxu1 %v8952_v31 }
 0x52c   :  { %6607 = vmatprep.subr.bf16.mxu0 %v8955_v32  ;;  %v8993_v32 = vld [vmem:[%s11899_s10 + $0x380] ss:$100 sps:$4 sm:$0xff]  }
 0x52e   :  { %6567 = vmatpush2.bf16.msra.mxu1 %v8950_v42 }
 0x52f   :  { %6608 = vmatpush2.bf16.msra.mxu0 %v8953_v33  ;;  %6568 = vmatprep.subr.bf16.mxu1 %v8958_v35  ;;  %v8994_v33 = vld [vmem:[%s11899_s10 + $0x8f8] ss:$100 sps:$4 sm:$0xff]  }
 0x530   :  { %6609 = vmatprep.subr.bf16.mxu0 %v8961_v37  ;;  %v8995_v37 = vld [vmem:[%s11899_s10 + $0x2b8] ss:$100 sps:$4 sm:$0xff]  }
 0x532   :  { %6569 = vmatpush2.bf16.msra.mxu1 %v8956_v41  ;;  %v8996_v41 = vld [vmem:[%s11899_s10 + $0x830] ss:$100 sps:$4 sm:$0xff]  }
 0x533   :  { %6610 = vmatpush2.bf16.msra.mxu0 %v8959_v53  ;;  %6570 = vmatprep.subr.bf16.mxu1 %v8964_v44  ;;  %v8997_v53 = vld [vmem:[%s11899_s10 + $0x1f0] ss:$100 sps:$4 sm:$0xff]   ;;  %v8998_v44 = vld [vmem:[%s11899_s10 + $0x768] ss:$100 sps:$4 sm:$0xff]  }
 0x534   :  { %6611 = vmatprep.subr.bf16.mxu0 %v8967_v45  ;;  %v8999_v45 = vld [vmem:[%s11899_s10 + $0x128] ss:$100 sps:$4 sm:$0xff]  }
 0x536   :  { %6571 = vmatpush2.bf16.msra.mxu1 %v8962_v46  ;;  %v9000_v46 = vld [vmem:[%s11899_s10 + $0x6a0] ss:$100 sps:$4 sm:$0xff]  }
 0x537   :  { %6612 = vmatpush2.bf16.msra.mxu0 %v8965_v55  ;;  %6572 = vmatprep.subr.bf16.mxu1 %v8970_v47  ;;  %v9001_v55 = vld [vmem:[%s11899_s10 + $0x60] ss:$100 sps:$4 sm:$0xff]   ;;  %v4046_v47 = vrot.slane %v11775_v61, %v11549_v10 }
 0x538   :  { %6613 = vmatprep.subr.bf16.mxu0 %v8973_v49  ;;  %v4054_v49 = vrot.slane %v11775_v61, %v11552_v40 }
 0x53a   :  { %6573 = vmatpush2.bf16.msra.mxu1 %v8968_v50  ;;  %v4050_v50 = vrot.slane %v11775_v61, %v11564_v14 }
 0x53b   :  { %6614 = vmatpush2.bf16.msra.mxu0 %v8971_v51  ;;  %6574 = vmatprep.subr.bf16.mxu1 %v8976_v17  ;;  %v4058_v17 = vrot.slane %v11775_v61, %v11567_v16 }
 0x53c   :  { %6615 = vmatprep.subr.bf16.mxu0 %v8979_v54 }
 0x53e   :  { %6575 = vmatpush2.bf16.msra.mxu1 %v8974_v34 }
 0x53f   :  { %6616 = vmatpush2.bf16.msra.mxu0 %v8977_v56  ;;  %6576 = vmatprep.subr.bf16.mxu1 %v8982_v22 }
 0x540   :  { %6617 = vmatprep.subr.bf16.mxu0 %v8985_v58 }
 0x542   :  { %6577 = vmatpush2.bf16.msra.mxu1 %v8980_v59 }
 0x543   :  { %6618 = vmatpush2.bf16.msra.mxu0 %v8983_v60  ;;  %7753 = vmatprep.subr.bf16.mxu1 %v8986_v63 }
 0x545   :  { %v6334_v4 = vpop.f32.mrf.mxu1  ;;  %6579 = vmatmul.mubr.bf16.vlgmr.msra.gmra.mxu1 %v10751_v19 }
 0x546   :  { %v6335_v36 = vadd.f32 %v6334_v4, %v4030_v21  ;;  %v6375_v6 = vpop.f32.mrf.mxu0  ;;  %6620 = vmatmul.mubr.bf16.vlgmr.msra.gmra.mxu0 %v10751_v19  ;;  %7754 = vmatpush3.bf16.msra.mxu1 %v8987_v0 }
 0x547   :  { %v6376_v7 = vadd.f32 %v6375_v6, %v4038_v2  ;;  %6660 = vmatprep.mubr.bf16.mxu1 %v10743_v15  ;;  %v6336_v8 = vpop.f32.mrf.mxu1  ;;  %7755 = vmatprep.subr.bf16.mxu1 %v8988_v3 }
 0x548   :  { %v6337_v39 = vadd.f32 %v6336_v8, %v4034_v25  ;;  %v6377_v11 = vpop.f32.mrf.mxu0  ;;  %v6676_v18 = vmax.f32 %v6335_v36, 0.0 }
 0x549   :  { %v6378_v12 = vadd.f32 %v6377_v11, %v4042_v5  ;;  %v6338_v13 = vpop.f32.mrf.mxu1  ;;  %v6678_v43 = vmax.f32 %v6376_v7, 0.0 }
 0x54a   :  { %v6677_v20 = vmax.f32 %v6337_v39, 0.0  ;;  %v6379_v23 = vpop.f32.mrf.mxu0  ;;  %7756 = vmatpush3.bf16.msra.mxu1 %v8989_v52 }
 0x54b   :  { %v6679_v15 = vmax.f32 %v6378_v12, 0.0  ;;  %v6339_v26 = vpop.f32.mrf.mxu1  ;;  %7757 = vmatprep.subr.bf16.mxu1 %v8990_v9 }
 0x54c   :  { %v6752_v28 = vcombine.low %v6676_v18, %v6677_v20  ;;  %v6380_v29 = vpop.f32.mrf.mxu0 }
 0x54d   :  { %v6753_v30 = vcombine.low %v6678_v43, %v6679_v15 }
 0x54e   :  { %v6760_v31 = vrot.slane %v6752_v28, %v9259_v48  ;;  %7758 = vmatpush3.bf16.msra.mxu1 %v8991_v24 }
 0x54f   :  { %v6767_v42 = vrot.slane %v6753_v30, %v9259_v48  ;;  %7759 = vmatprep.subr.bf16.mxu1 %v8992_v27 }
 0x551   :  { %v6768_v35 = vcombine.low %v6760_v31, %v6767_v42 }
 0x552   :  { %7760 = vmatpush3.bf16.msra.mxu1 %v8993_v32 }
 0x553   :  { %6836 = vst [vmem:[%s11901_s12 + $0x10] sm:$0xff] %v6768_v35  ;;  %7761 = vmatprep.subr.bf16.mxu1 %v8994_v33 }
 0x556   :  { %7762 = vmatpush3.bf16.msra.mxu1 %v8995_v37 }
 0x557   :  { %7763 = vmatprep.subr.bf16.mxu1 %v8996_v41 }
 0x55a   :  { %7764 = vmatpush3.bf16.msra.mxu1 %v8997_v53 }
 0x55b   :  { %7765 = vmatprep.subr.bf16.mxu1 %v8998_v44 }
 0x55e   :  { %7766 = vmatpush3.bf16.msra.mxu1 %v8999_v45 }
 0x55f   :  { %7767 = vmatprep.subr.bf16.mxu1 %v9000_v46 }
 0x562   :  { %7768 = vmatpush3.bf16.msra.mxu1 %v9001_v55 }
 0x565   :  { %6661 = vmatmul.mubr.bf16.vlgmr.msra.gmra.mxu1 %v10751_v19 }
 0x585   :  { %v6416_v51 = vpop.f32.mrf.mxu1 }
 0x586   :  { %v6417_v54 = vadd.f32 %v6416_v51, %v4046_v47  ;;  %v6457_v34 = vpop.f32.mrf.mxu0 }
 0x587   :  { %v6458_v56 = vadd.f32 %v6457_v34, %v4054_v49  ;;  %v6418_v22 = vpop.f32.mrf.mxu1 }
 0x588   :  { %v6419_v58 = vadd.f32 %v6418_v22, %v4050_v50  ;;  %v6459_v59 = vpop.f32.mrf.mxu0  ;;  %v6680_v63 = vmax.f32 %v6417_v54, 0.0 }
 0x589   :  { %v6460_v19 = vadd.f32 %v6459_v59, %v4058_v17  ;;  %v6420_v60 = vpop.f32.mrf.mxu1  ;;  %v6682_v2 = vmax.f32 %v6458_v56, 0.0 }
 0x58a   :  { %v6681_v21 = vmax.f32 %v6419_v58, 0.0  ;;  %v6461_v0 = vpop.f32.mrf.mxu0 }
 0x58b   :  { %v6683_v3 = vmax.f32 %v6460_v19, 0.0  ;;  %v6421_v25 = vpop.f32.mrf.mxu1 }
 0x58c   :  { %v6769_v4 = vcombine.low %v6680_v63, %v6681_v21  ;;  %v6462_v5 = vpop.f32.mrf.mxu0 }
 0x58d   :  { %v6770_v36 = vcombine.low %v6682_v2, %v6683_v3 }
 0x58e   :  { %v6777_v6 = vrot.slane %v6769_v4, %v9259_v48 }
 0x58f   :  { %v6784_v61 = vrot.slane %v6770_v36, %v9259_v48 }
 0x591   :  { %v6785_v52 = vcombine.low %v6777_v6, %v6784_v61 }
 0x593   :  { %6837 = vst [vmem:[%s11901_s12 + $0x18] sm:$0xff] %v6785_v52 }
 0x594   :  { %9015 = shalt.err (!%p9012_p4)
}
 0x595   :  { %6853 = dma.vmem_to_hbm [thread:$0]  %s6851_s22, 32, %s11902_s13, [#allocation3]  }
 0x596   :  { %s9024_s26 = scalar_lea.vmem %s6861_s1, 32  ;;  %p9029_p6 = scmp.lt.s32.totalorder %s6861_s1, %s6861_s1 }
 0x597   :  { %p9025_p5 = scmp.ne.s32.totalorder %s6861_s1, %s9024_s26  ;;  %p9030_p7 = scmp.lt.s32.totalorder %s9024_s26, %s9024_s26 }
 0x599   :  { %p9031_p8 = por %p9030_p7, %p9029_p6 }
 0x59b   :  { %p9032_p9 = pnand %p9031_p8, %p9025_p5 }
 0x59d   :  { %9035 = shalt.err (!%p9032_p9)
}
 0x59e   :  { %6863 = dma.vmem_to_hbm [thread:$0]  %s6861_s1, 32, %s11903_s14, [#allocation5]   ;;  %v3989_v7 = vld [vmem:[%s11900_s11 + $0x10] sm:$0xff]  ;;  %v7308_v21 = vld [vmem:[%s11900_s11 + $0x18] ss:$0 sm:$0xff]  ;;  %vm6840_vm4 = vcmask 517120  }
 0x59f   :  { %v4062_v8 = vrot.slane %v3989_v7, %v9959_v57  ;;  %v4070_v9 = vrot.slane %v3989_v7, %v11329_v38  ;;  %v4066_v39 = vrot.slane %v3989_v7, %v9973_v62  ;;  %v4074_v12 = vrot.slane %v3989_v7, %v11346_v1 }
 0x5a0   :  { %v4078_v35 = vrot.slane %v3989_v7, %v11549_v10  ;;  %v4086_v37 = vrot.slane %v3989_v7, %v11552_v40  ;;  %v4082_v41 = vrot.slane %v3989_v7, %v11564_v14  ;;  %v4090_v44 = vrot.slane %v3989_v7, %v11567_v16 }
 0x5c5   :  { %v6498_v11 = vpop.f32.mrf.mxu1 }
 0x5c6   :  { %v6499_v13 = vadd.f32 %v6498_v11, %v4062_v8  ;;  %v6539_v18 = vpop.f32.mrf.mxu0 }
 0x5c7   :  { %v6540_v20 = vadd.f32 %v6539_v18, %v4070_v9  ;;  %v6500_v23 = vpop.f32.mrf.mxu1 }
 0x5c8   :  { %v6501_v24 = vadd.f32 %v6500_v23, %v4066_v39  ;;  %v6541_v43 = vpop.f32.mrf.mxu0  ;;  %v6684_v27 = vmax.f32 %v6499_v13, 0.0 }
 0x5c9   :  { %v6542_v15 = vadd.f32 %v6541_v43, %v4074_v12  ;;  %v6502_v26 = vpop.f32.mrf.mxu1  ;;  %v6686_v30 = vmax.f32 %v6540_v20, 0.0 }
 0x5ca   :  { %v6685_v28 = vmax.f32 %v6501_v24, 0.0  ;;  %v6543_v29 = vpop.f32.mrf.mxu0 }
 0x5cb   :  { %v6687_v57 = vmax.f32 %v6542_v15, 0.0  ;;  %v6503_v31 = vpop.f32.mrf.mxu1 }
 0x5cc   :  { %v6786_v38 = vcombine.low %v6684_v27, %v6685_v28  ;;  %v6544_v32 = vpop.f32.mrf.mxu0 }
 0x5cd   :  { %v6787_v62 = vcombine.low %v6686_v30, %v6687_v57 }
 0x5ce   :  { %v6794_v42 = vrot.slane %v6786_v38, %v9259_v48 }
 0x5cf   :  { %v6801_v1 = vrot.slane %v6787_v62, %v9259_v48 }
 0x5d1   :  { %v6802_v33 = vcombine.low %v6794_v42, %v6801_v1 }
 0x5d3   :  { %6838 = vst [vmem:[%s11901_s12 + $0x20] sm:$0xff] %v6802_v33 }
 0x605   :  { %v6580_v53 = vpop.f32.mrf.mxu1 }
 0x606   :  { %v6581_v45 = vadd.f32 %v6580_v53, %v4078_v35  ;;  %v6621_v46 = vpop.f32.mrf.mxu0 }
 0x607   :  { %v6622_v55 = vadd.f32 %v6621_v46, %v4086_v37  ;;  %v6582_v47 = vpop.f32.mrf.mxu1 }
 0x608   :  { %v6583_v49 = vadd.f32 %v6582_v47, %v4082_v41  ;;  %v6623_v50 = vpop.f32.mrf.mxu0  ;;  %v6688_v54 = vmax.f32 %v6581_v45, 0.0 }
 0x609   :  { %v6624_v51 = vadd.f32 %v6623_v50, %v4090_v44  ;;  %v6584_v17 = vpop.f32.mrf.mxu1  ;;  %v6690_v22 = vmax.f32 %v6622_v55, 0.0 }
 0x60a   :  { %v6689_v34 = vmax.f32 %v6583_v49, 0.0  ;;  %v6625_v56 = vpop.f32.mrf.mxu0 }
 0x60b   :  { %v6691_v10 = vmax.f32 %v6624_v51, 0.0  ;;  %v6585_v58 = vpop.f32.mrf.mxu1 }
 0x60c   :  { %v6803_v40 = vcombine.low %v6688_v54, %v6689_v34  ;;  %v6626_v59 = vpop.f32.mrf.mxu0 }
 0x60d   :  { %v6804_v14 = vcombine.low %v6690_v22, %v6691_v10 }
 0x60e   :  { %v6811_v19 = vrot.slane %v6803_v40, %v9259_v48 }
 0x60f   :  { %v6818_v16 = vrot.slane %v6804_v14, %v9259_v48 }
 0x611   :  { %v6819_v60 = vcombine.low %v6811_v19, %v6818_v16 }
 0x613   :  { %6839 = vst [vmem:[%s11901_s12 + $0x28] sm:$0xff] %v6819_v60 }
 0x625   :  { %v7769_v63 = vpop.f32.mrf.mxu1 }
 0x627   :  { %v7770_v0 = vpop.f32.mrf.mxu1 }
 0x628   :  { %v7771_v2 = vadd.f32 %v7770_v0, %v7769_v63 }
 0x629   :  { %v7772_v3 = vpop.f32.mrf.mxu1 }
 0x62a   :  { %v6663_v25 = vadd.f32 %v7771_v2, %v7308_v21 }
 0x62b   :  { %v7773_v4 = vpop.f32.mrf.mxu1 }
 0x62c   :  { %v6692_v5 = vmax.f32 %v6663_v25, 0.0 }
 0x62e   :  { %v6826_v36 = vrot.slane %v6692_v5, %v9259_v48 }
 0x630   :  { %6841 = vst.msk [vmem:[%s11901_s12 + $0x30] sm:$0x3] %vm6840_vm4, %v6826_v36 }
 0x631   :  { %9044 = dma.done.wait [#allocation3], 32  }
 0x632   :  { %9045 = vsyncadd [#allocation3], 4294967264 }
 0x633   :  { %9046 = dma.done.wait [#allocation5], 32  }
 0x634   :  { %9047 = vsyncadd [#allocation5], 4294967264 }
 0x635   :  { %6872 = vsyncpa [#allocation3], 1 }
 0x636   :  { %6873 = vsyncpa [#allocation5], 1 }

</bundles_post_ra>
